<compile_context>
chip_gen: v7x
topology: tpu7x:2x2x1
jax: 0.10.0
libtpu: 0.0.40
codegen_flags: <defaults>
</compile_context>

<pallas_src>
import jax
import jax.numpy as jnp
from jax import lax
from jax.experimental import pallas as pl
from jax.experimental.pallas import tpu as pltpu


_C1, _C2 = 32, 64          # real conv output channels (PyTorch: 3 -> 32 -> 64)
_CP = 128                  # channel lanes after zero-padding (full-lane stores)
_HID = 128                 # fc1 hidden width


def _round_up(x, m):
    return ((x + m - 1) // m) * m


# ----------------------------------------------------------------------------
# XLA-side layout plumbing: zero-pad + im2col in pool-group row order.
# ----------------------------------------------------------------------------
def _im2col_pool_order(x, k_pad):
    """x: (N, D, H, W, Cin) -> (N, D*H*W, k_pad) bf16 patch matrix.

    Rows are ordered (do, ho, wo, dd, hh, ww) so that each 2x2x2 pool group is
    8 consecutive rows; columns are ordered (kd, kh, kw, cin) and zero-padded
    from 27*Cin to k_pad (a multiple of 128) to keep the kernel's matmul lhs,
    its DMA rows and the weight K dimension fully lane/granule dense.
    """
    N, D, H, W, Cin = x.shape
    assert k_pad >= 27 * Cin
    xp = jnp.pad(x, ((0, 0), (1, 1), (1, 1), (1, 1), (0, 0)))
    taps = []
    for kd in range(3):
        for kh in range(3):
            for kw in range(3):
                taps.append(xp[:, kd:kd + D, kh:kh + H, kw:kw + W, :])
    cols = jnp.concatenate(taps, axis=-1)                    # (N, D, H, W, 27*Cin)
    Do, Ho, Wo = D // 2, H // 2, W // 2
    cols = cols.reshape(N, Do, 2, Ho, 2, Wo, 2, 27 * Cin)
    cols = cols.transpose(0, 1, 3, 5, 2, 4, 6, 7)            # (N,Do,Ho,Wo,dd,hh,ww,K)
    cols = cols.reshape(N, Do * Ho * Wo * 8, 27 * Cin)
    cols = jnp.pad(cols, ((0, 0), (0, 0), (0, k_pad - 27 * Cin)))
    return cols.astype(jnp.bfloat16)


# ----------------------------------------------------------------------------
# Fused (im2col-)matmul + bias + ReLU + 2x2x2 max-pool kernel.
# ----------------------------------------------------------------------------
def _conv_matmul_relu_pool_kernel(col_ref, w_ref, b_ref, o_ref):
    # col_ref: (M, Kp)    bf16 im2col rows; each pool group = 8 contiguous rows
    # w_ref  : (Kp, Cp)   bf16 (zero rows beyond 27*Cin, zero cols beyond Cout)
    # b_ref  : (1, Cp)    f32
    # o_ref  : (M//8, Cp) bf16 pooled activation, rows in (do, ho, wo) order
    acc = jnp.dot(col_ref[...], w_ref[...],
                  preferred_element_type=jnp.float32)        # one deep-K MXU matmul
    y = jnp.maximum(acc + b_ref[...], 0.0)                   # bias + ReLU (f32)
    mo, cp = o_ref.shape
    y = jnp.max(y.reshape(mo, 8, cp), axis=1)                # sublane max over the
    o_ref[...] = y.astype(o_ref.dtype)                       # contiguous pool group


def conv3d_relu_pool(x, w2d, b):
    """Conv3d(3x3x3, stride 1, pad 1) + bias + ReLU + MaxPool3d(2,2,2), NDHWC.

    x: (N, D, H, W, Cin); w2d: (Kp, 128) bf16 rows in (kd, kh, kw, cin) order;
    b: (1, 128) f32.  Returns (N, D//2, H//2, W//2, 128) bf16 where only the
    first Cout lanes carry real channels (caller slices them back).
    """
    N, D, H, W, _ = x.shape
    assert D % 2 == 0 and H % 2 == 0 and W % 2 == 0, "pool needs even D/H/W"
    Kp, Cp = w2d.shape
    M = D * H * W
    Mo = M // 8
    cols = _im2col_pool_order(x, Kp)                         # (N, M, Kp) bf16
    out = pl.pallas_call(
        _conv_matmul_relu_pool_kernel,
        out_shape=jax.ShapeDtypeStruct((N, Mo, Cp), jnp.bfloat16),
        grid=(N,),
        in_specs=[
            pl.BlockSpec((None, M, Kp), lambda n: (n, 0, 0)),
            pl.BlockSpec((Kp, Cp), lambda n: (0, 0)),
            pl.BlockSpec((1, Cp), lambda n: (0, 0)),
        ],
        out_specs=pl.BlockSpec((None, Mo, Cp), lambda n: (n, 0, 0)),
        compiler_params=pltpu.CompilerParams(
            dimension_semantics=("parallel",),
            vmem_limit_bytes=32 * 1024 * 1024),
    )(cols, w2d, b)
    return out.reshape(N, D // 2, H // 2, W // 2, Cp)


# ----------------------------------------------------------------------------
# fc1 + ReLU + fc2 (batch padded to the row tile, classes padded to 128 lanes)
# ----------------------------------------------------------------------------
def _mlp_kernel(x_ref, w1_ref, b1_ref, w2_ref, b2_ref, o_ref):
    h = jnp.dot(x_ref[...], w1_ref[...],
                preferred_element_type=jnp.float32) + b1_ref[...]
    h = jnp.maximum(h, 0.0).astype(jnp.bfloat16)
    o_ref[...] = (jnp.dot(h, w2_ref[...], preferred_element_type=jnp.float32)
                  + b2_ref[...]).astype(o_ref.dtype)


def mlp_head(x_flat, w1, b1, w2, b2, num_classes):
    N, F = x_flat.shape
    Hd = w1.shape[-1]
    Cp = w2.shape[-1]
    tm = min(128, _round_up(N, 16))          # one large row tile, not 8-row steps
    mb = _round_up(N, tm)
    xp = jnp.pad(x_flat, ((0, mb - N), (0, 0)))
    out = pl.pallas_call(
        _mlp_kernel,
        out_shape=jax.ShapeDtypeStruct((mb, Cp), jnp.float32),
        grid=(mb // tm,),
        in_specs=[
            pl.BlockSpec((tm, F), lambda i: (i, 0)),
            pl.BlockSpec((F, Hd), lambda i: (0, 0)),
            pl.BlockSpec((1, Hd), lambda i: (0, 0)),
            pl.BlockSpec((Hd, Cp), lambda i: (0, 0)),
            pl.BlockSpec((1, Cp), lambda i: (0, 0)),
        ],
        out_specs=pl.BlockSpec((tm, Cp), lambda i: (i, 0)),
        compiler_params=pltpu.CompilerParams(
            dimension_semantics=("parallel",),
            vmem_limit_bytes=32 * 1024 * 1024),
    )(xp, w1, b1, w2, b2)
    return out[:N, :num_classes]


# ----------------------------------------------------------------------------
# Full forward pass (equivalent to PigAction3DCNN.forward)
# ----------------------------------------------------------------------------
def pig_action_3dcnn_forward(x_ncdhw, params, num_classes=2):
    x = jnp.transpose(x_ncdhw, (0, 2, 3, 4, 1))              # NCDHW -> NDHWC
    # Slice back to the real channel counts so padded lanes never enter the
    # next conv's K dimension.
    a1 = conv3d_relu_pool(x, params["w_conv1"], params["b_conv1"])[..., :_C1]
    a2 = conv3d_relu_pool(a1, params["w_conv2"], params["b_conv2"])[..., :_C2]
    N = a2.shape[0]
    # Flatten in NDHWC (d,h,w,c) order; w_fc1 rows are laid out in the same
    # order (== PyTorch's NCDHW view(N,-1) with a row-permuted fc1 weight).
    x_flat = a2.reshape(N, -1)
    return mlp_head(x_flat, params["w_fc1"], params["b_fc1"],
                    params["w_fc2"], params["b_fc2"], num_classes)


# ----------------------------------------------------------------------------
# Parameters (kernel layout + dense f32 reference layout)
# ----------------------------------------------------------------------------
def init_params(key, in_ch=3, d=8, h=16, w=16, num_classes=2):
    """Deterministic synthetic parameters.

    Returns (params, ref): `params` in kernel layout (padded, bf16 matmul
    operands), `ref` as dense f32 weights for the pure-XLA reference.
    Importing real PyTorch weights:
      conv (Cout,Cin,3,3,3): w.transpose(2,3,4,1,0).reshape(27*Cin, Cout), then
        zero-pad rows to the 128 granule and cols to 128 (no flip; Conv3d is
        cross-correlation).
      fc1 (128, C*D*H*W): reshape(128, C, D, H, W).transpose(2,3,4,1,0)
        .reshape(D*H*W*C, 128) so rows follow the NDHWC flatten order.
    """
    c1, c2, hid, cp = _C1, _C2, _HID, _CP
    flat = (d // 4) * (h // 4) * (w // 4) * c2
    k1, k2 = 27 * in_ch, 27 * c1
    k1p, k2p = _round_up(k1, 128), _round_up(k2, 128)
    ks = jax.random.split(key, 8)
    w1 = jax.random.normal(ks[0], (3, 3, 3, in_ch, c1), jnp.float32) * 0.05
    b1 = jax.random.normal(ks[1], (c1,), jnp.float32) * 0.05
    w2 = jax.random.normal(ks[2], (3, 3, 3, c1, c2), jnp.float32) * 0.05
    b2 = jax.random.normal(ks[3], (c2,), jnp.float32) * 0.05
    wf1 = jax.random.normal(ks[4], (flat, hid), jnp.float32) * 0.02
    bf1 = jax.random.normal(ks[5], (hid,), jnp.float32) * 0.02
    wf2 = jax.random.normal(ks[6], (hid, num_classes), jnp.float32) * 0.05
    bf2 = jax.random.normal(ks[7], (num_classes,), jnp.float32) * 0.05

    def pad2(a, rows, cols):
        return jnp.pad(a, ((0, rows - a.shape[0]), (0, cols - a.shape[1])))

    params = {
        "w_conv1": pad2(w1.reshape(k1, c1), k1p, cp).astype(jnp.bfloat16),
        "b_conv1": jnp.pad(b1, (0, cp - c1)).reshape(1, cp),
        "w_conv2": pad2(w2.reshape(k2, c2), k2p, cp).astype(jnp.bfloat16),
        "b_conv2": jnp.pad(b2, (0, cp - c2)).reshape(1, cp),
        "w_fc1": wf1.astype(jnp.bfloat16),
        "b_fc1": bf1.reshape(1, hid),
        "w_fc2": pad2(wf2, hid, cp).astype(jnp.bfloat16),
        "b_fc2": jnp.pad(bf2, (0, cp - num_classes)).reshape(1, cp),
    }
    ref = {"w1": w1, "b1": b1, "w2": w2, "b2": b2,
           "wf1": wf1, "bf1": bf1, "wf2": wf2, "bf2": bf2}
    return params, ref


# ----------------------------------------------------------------------------
# Pure-XLA f32 reference (same semantics as the PyTorch module)
# ----------------------------------------------------------------------------
def reference_forward(x_ncdhw, ref):
    x = jnp.transpose(x_ncdhw, (0, 2, 3, 4, 1)).astype(jnp.float32)

    def conv_relu_pool_ref(x, w, b):
        y = lax.conv_general_dilated(
            x, w, window_strides=(1, 1, 1), padding=((1, 1), (1, 1), (1, 1)),
            dimension_numbers=("NDHWC", "DHWIO", "NDHWC"))
        y = jnp.maximum(y + b, 0.0)
        return lax.reduce_window(y, -jnp.inf, lax.max,
                                 (1, 2, 2, 2, 1), (1, 2, 2, 2, 1), "VALID")

    x = conv_relu_pool_ref(x, ref["w1"], ref["b1"])
    x = conv_relu_pool_ref(x, ref["w2"], ref["b2"])
    xf = x.reshape(x.shape[0], -1)                           # NDHWC flatten order
    hid = jnp.maximum(xf @ ref["wf1"] + ref["bf1"], 0.0)
    return hid @ ref["wf2"] + ref["bf2"]


if __name__ == "__main__":
    key = jax.random.PRNGKey(0)
    kx, kp = jax.random.split(key)

    N, C, D, H, W = 2, 3, 8, 16, 16                          # NCDHW, PyTorch-style
    x = jax.random.normal(kx, (N, C, D, H, W), jnp.float32)
    params, ref = init_params(kp, in_ch=C, d=D, h=H, w=W, num_classes=2)

    fwd = jax.jit(pig_action_3dcnn_forward)
    logits = jax.block_until_ready(fwd(x, params))
    assert logits.shape == (N, 2), logits.shape

    # Parity check vs. a pure-XLA f32 reference (tolerance covers bf16 matmul
    # operands in the Pallas path).
    expect = reference_forward(x, ref)
    max_err = float(jnp.max(jnp.abs(logits - expect)))
    assert max_err < 1e-1, f"max |logits - reference| = {max_err}"

    print("KERNEL_OK")
</pallas_src>

<mosaic_0001>
module attributes {stable_mosaic.version = 11 : i64} {
  func.func @_conv_matmul_relu_pool_kernel(%arg0: i32, %arg1: memref<1x2048x128xbf16, #tpu.memory_space<vmem>>, %arg2: memref<128x128xbf16, #tpu.memory_space<vmem>>, %arg3: memref<1x128xf32, #tpu.memory_space<vmem>>, %arg4: memref<1x256x128xbf16, #tpu.memory_space<vmem>>) attributes {dimension_semantics = [#tpu.dimension_semantics<parallel>], iteration_bounds = array<i64: 2>, scalar_prefetch = 0 : i64, scratch_operands = 0 : i64, tpu.core_type = #tpu.core_type<tc>, window_params = [{transform_indices = @transform_0, window_bounds = array<i64: 1, 2048, 128>}, {pipeline_mode = #tpu.pipeline_mode<synchronous>, transform_indices = @transform_1, window_bounds = array<i64: 128, 128>}, {pipeline_mode = #tpu.pipeline_mode<synchronous>, transform_indices = @transform_2, window_bounds = array<i64: 1, 128>}, {transform_indices = @transform_3, window_bounds = array<i64: 1, 256, 128>}]} {
    %c0 = arith.constant 0 : index
    %c0_0 = arith.constant 0 : index
    %c0_1 = arith.constant 0 : index
    %0 = vector.load %arg1[%c0, %c0_0, %c0_1] : memref<1x2048x128xbf16, #tpu.memory_space<vmem>>, vector<1x2048x128xbf16>
    %1 = vector.shape_cast %0 : vector<1x2048x128xbf16> to vector<2048x128xbf16>
    %c0_2 = arith.constant 0 : index
    %c0_3 = arith.constant 0 : index
    %2 = vector.load %arg2[%c0_2, %c0_3] : memref<128x128xbf16, #tpu.memory_space<vmem>>, vector<128x128xbf16>
    %cst = arith.constant dense<0.000000e+00> : vector<2048x128xf32>
    %3 = tpu.matmul %1, %2, %cst {dimension_numbers = #tpu.dot_dimension_numbers<[1], [0], [0], [1], [0, 0, 1, 1], [], []>} : vector<2048x128xbf16>, vector<128x128xbf16>, vector<2048x128xf32> -> vector<2048x128xf32>
    %c0_4 = arith.constant 0 : index
    %c0_5 = arith.constant 0 : index
    %4 = vector.load %arg3[%c0_4, %c0_5] : memref<1x128xf32, #tpu.memory_space<vmem>>, vector<1x128xf32>
    %5 = vector.broadcast %4 : vector<1x128xf32> to vector<2048x128xf32>
    %6 = arith.addf %3, %5 : vector<2048x128xf32>
    %cst_6 = arith.constant 0.000000e+00 : f32
    %7 = vector.broadcast %cst_6 : f32 to vector<2048x128xf32>
    %8 = arith.maximumf %6, %7 : vector<2048x128xf32>
    %9 = vector.shape_cast %8 : vector<2048x128xf32> to vector<256x8x128xf32>
    %cst_7 = arith.constant dense<0xFF800000> : vector<256x128xf32>
    %10 = vector.multi_reduction <maximumf>, %9, %cst_7 [1] : vector<256x8x128xf32> to vector<256x128xf32>
    %11 = arith.truncf %10 : vector<256x128xf32> to vector<256x128xbf16>
    %c0_8 = arith.constant 0 : index
    %c0_9 = arith.constant 0 : index
    %c0_10 = arith.constant 0 : index
    %12 = vector.load %arg4[%c0_8, %c0_9, %c0_10] : memref<1x256x128xbf16, #tpu.memory_space<vmem>>, vector<1x256x128xbf16>
    %13 = vector.shape_cast %12 : vector<1x256x128xbf16> to vector<256x128xbf16>
    %14 = vector.shape_cast %11 : vector<256x128xbf16> to vector<1x256x128xbf16>
    tpu.vector_store %arg4[%c0_8, %c0_9, %c0_10], %14 {strides = array<i32>} : memref<1x256x128xbf16, #tpu.memory_space<vmem>>, vector<1x256x128xbf16>,
    return
  }
  func.func @transform_0(%arg0: i32) -> (i32, i32, i32) {
    %c0_i32 = arith.constant 0 : i32
    %c0_i32_0 = arith.constant 0 : i32
    %c0_i32_1 = arith.constant 0 : i32
    return %arg0, %c0_i32, %c0_i32_0 : i32, i32, i32
  }
  func.func @transform_1(%arg0: i32) -> (i32, i32) {
    %c0_i32 = arith.constant 0 : i32
    %c0_i32_0 = arith.constant 0 : i32
    %c0_i32_1 = arith.constant 0 : i32
    return %c0_i32, %c0_i32_0 : i32, i32
  }
  func.func @transform_2(%arg0: i32) -> (i32, i32) {
    %c0_i32 = arith.constant 0 : i32
    %c0_i32_0 = arith.constant 0 : i32
    %c0_i32_1 = arith.constant 0 : i32
    return %c0_i32, %c0_i32_0 : i32, i32
  }
  func.func @transform_3(%arg0: i32) -> (i32, i32, i32) {
    %c0_i32 = arith.constant 0 : i32
    %c0_i32_0 = arith.constant 0 : i32
    %c0_i32_1 = arith.constant 0 : i32
    return %arg0, %c0_i32, %c0_i32_0 : i32, i32, i32
  }
}

module attributes {stable_mosaic.version = 11 : i64} {
  func.func @_conv_matmul_relu_pool_kernel(%arg0: i32, %arg1: memref<1x256x896xbf16, #tpu.memory_space<vmem>>, %arg2: memref<896x128xbf16, #tpu.memory_space<vmem>>, %arg3: memref<1x128xf32, #tpu.memory_space<vmem>>, %arg4: memref<1x32x128xbf16, #tpu.memory_space<vmem>>) attributes {dimension_semantics = [#tpu.dimension_semantics<parallel>], iteration_bounds = array<i64: 2>, scalar_prefetch = 0 : i64, scratch_operands = 0 : i64, tpu.core_type = #tpu.core_type<tc>, window_params = [{transform_indices = @transform_0, window_bounds = array<i64: 1, 256, 896>}, {pipeline_mode = #tpu.pipeline_mode<synchronous>, transform_indices = @transform_1, window_bounds = array<i64: 896, 128>}, {pipeline_mode = #tpu.pipeline_mode<synchronous>, transform_indices = @transform_2, window_bounds = array<i64: 1, 128>}, {transform_indices = @transform_3, window_bounds = array<i64: 1, 32, 128>}]} {
    %c0 = arith.constant 0 : index
    %c0_0 = arith.constant 0 : index
    %c0_1 = arith.constant 0 : index
    %0 = vector.load %arg1[%c0, %c0_0, %c0_1] : memref<1x256x896xbf16, #tpu.memory_space<vmem>>, vector<1x256x896xbf16>
    %1 = vector.shape_cast %0 : vector<1x256x896xbf16> to vector<256x896xbf16>
    %c0_2 = arith.constant 0 : index
    %c0_3 = arith.constant 0 : index
    %2 = vector.load %arg2[%c0_2, %c0_3] : memref<896x128xbf16, #tpu.memory_space<vmem>>, vector<896x128xbf16>
    %cst = arith.constant dense<0.000000e+00> : vector<256x128xf32>
    %3 = tpu.matmul %1, %2, %cst {dimension_numbers = #tpu.dot_dimension_numbers<[1], [0], [0], [1], [0, 0, 1, 1], [], []>} : vector<256x896xbf16>, vector<896x128xbf16>, vector<256x128xf32> -> vector<256x128xf32>
    %c0_4 = arith.constant 0 : index
    %c0_5 = arith.constant 0 : index
    %4 = vector.load %arg3[%c0_4, %c0_5] : memref<1x128xf32, #tpu.memory_space<vmem>>, vector<1x128xf32>
    %5 = vector.broadcast %4 : vector<1x128xf32> to vector<256x128xf32>
    %6 = arith.addf %3, %5 : vector<256x128xf32>
    %cst_6 = arith.constant 0.000000e+00 : f32
    %7 = vector.broadcast %cst_6 : f32 to vector<256x128xf32>
    %8 = arith.maximumf %6, %7 : vector<256x128xf32>
    %9 = vector.shape_cast %8 : vector<256x128xf32> to vector<32x8x128xf32>
    %cst_7 = arith.constant dense<0xFF800000> : vector<32x128xf32>
    %10 = vector.multi_reduction <maximumf>, %9, %cst_7 [1] : vector<32x8x128xf32> to vector<32x128xf32>
    %11 = arith.truncf %10 : vector<32x128xf32> to vector<32x128xbf16>
    %c0_8 = arith.constant 0 : index
    %c0_9 = arith.constant 0 : index
    %c0_10 = arith.constant 0 : index
    %12 = vector.load %arg4[%c0_8, %c0_9, %c0_10] : memref<1x32x128xbf16, #tpu.memory_space<vmem>>, vector<1x32x128xbf16>
    %13 = vector.shape_cast %12 : vector<1x32x128xbf16> to vector<32x128xbf16>
    %14 = vector.shape_cast %11 : vector<32x128xbf16> to vector<1x32x128xbf16>
    tpu.vector_store %arg4[%c0_8, %c0_9, %c0_10], %14 {strides = array<i32>} : memref<1x32x128xbf16, #tpu.memory_space<vmem>>, vector<1x32x128xbf16>,
    return
  }
  func.func @transform_0(%arg0: i32) -> (i32, i32, i32) {
    %c0_i32 = arith.constant 0 : i32
    %c0_i32_0 = arith.constant 0 : i32
    %c0_i32_1 = arith.constant 0 : i32
    return %arg0, %c0_i32, %c0_i32_0 : i32, i32, i32
  }
  func.func @transform_1(%arg0: i32) -> (i32, i32) {
    %c0_i32 = arith.constant 0 : i32
    %c0_i32_0 = arith.constant 0 : i32
    %c0_i32_1 = arith.constant 0 : i32
    return %c0_i32, %c0_i32_0 : i32, i32
  }
  func.func @transform_2(%arg0: i32) -> (i32, i32) {
    %c0_i32 = arith.constant 0 : i32
    %c0_i32_0 = arith.constant 0 : i32
    %c0_i32_1 = arith.constant 0 : i32
    return %c0_i32, %c0_i32_0 : i32, i32
  }
  func.func @transform_3(%arg0: i32) -> (i32, i32, i32) {
    %c0_i32 = arith.constant 0 : i32
    %c0_i32_0 = arith.constant 0 : i32
    %c0_i32_1 = arith.constant 0 : i32
    return %arg0, %c0_i32, %c0_i32_0 : i32, i32, i32
  }
}

module attributes {stable_mosaic.version = 11 : i64} {
  func.func @_mlp_kernel(%arg0: i32, %arg1: memref<16x2048xbf16, #tpu.memory_space<vmem>>, %arg2: memref<2048x128xbf16, #tpu.memory_space<vmem>>, %arg3: memref<1x128xf32, #tpu.memory_space<vmem>>, %arg4: memref<128x128xbf16, #tpu.memory_space<vmem>>, %arg5: memref<1x128xf32, #tpu.memory_space<vmem>>, %arg6: memref<16x128xf32, #tpu.memory_space<vmem>>) attributes {dimension_semantics = [#tpu.dimension_semantics<parallel>], iteration_bounds = array<i64: 1>, scalar_prefetch = 0 : i64, scratch_operands = 0 : i64, tpu.core_type = #tpu.core_type<tc>, window_params = [{transform_indices = @transform_0, window_bounds = array<i64: 16, 2048>}, {pipeline_mode = #tpu.pipeline_mode<synchronous>, transform_indices = @transform_1, window_bounds = array<i64: 2048, 128>}, {pipeline_mode = #tpu.pipeline_mode<synchronous>, transform_indices = @transform_2, window_bounds = array<i64: 1, 128>}, {pipeline_mode = #tpu.pipeline_mode<synchronous>, transform_indices = @transform_3, window_bounds = array<i64: 128, 128>}, {pipeline_mode = #tpu.pipeline_mode<synchronous>, transform_indices = @transform_4, window_bounds = array<i64: 1, 128>}, {transform_indices = @transform_5, window_bounds = array<i64: 16, 128>}]} {
    %c0 = arith.constant 0 : index
    %c0_0 = arith.constant 0 : index
    %0 = vector.load %arg1[%c0, %c0_0] : memref<16x2048xbf16, #tpu.memory_space<vmem>>, vector<16x2048xbf16>
    %c0_1 = arith.constant 0 : index
    %c0_2 = arith.constant 0 : index
    %1 = vector.load %arg2[%c0_1, %c0_2] : memref<2048x128xbf16, #tpu.memory_space<vmem>>, vector<2048x128xbf16>
    %cst = arith.constant dense<0.000000e+00> : vector<16x128xf32>
    %2 = tpu.matmul %0, %1, %cst {dimension_numbers = #tpu.dot_dimension_numbers<[1], [0], [0], [1], [0, 0, 1, 1], [], []>} : vector<16x2048xbf16>, vector<2048x128xbf16>, vector<16x128xf32> -> vector<16x128xf32>
    %c0_3 = arith.constant 0 : index
    %c0_4 = arith.constant 0 : index
    %3 = vector.load %arg3[%c0_3, %c0_4] : memref<1x128xf32, #tpu.memory_space<vmem>>, vector<1x128xf32>
    %4 = vector.broadcast %3 : vector<1x128xf32> to vector<16x128xf32>
    %5 = arith.addf %2, %4 : vector<16x128xf32>
    %cst_5 = arith.constant 0.000000e+00 : f32
    %6 = vector.broadcast %cst_5 : f32 to vector<16x128xf32>
    %7 = arith.maximumf %5, %6 : vector<16x128xf32>
    %8 = arith.truncf %7 : vector<16x128xf32> to vector<16x128xbf16>
    %c0_6 = arith.constant 0 : index
    %c0_7 = arith.constant 0 : index
    %9 = vector.load %arg4[%c0_6, %c0_7] : memref<128x128xbf16, #tpu.memory_space<vmem>>, vector<128x128xbf16>
    %cst_8 = arith.constant dense<0.000000e+00> : vector<16x128xf32>
    %10 = tpu.matmul %8, %9, %cst_8 {dimension_numbers = #tpu.dot_dimension_numbers<[1], [0], [0], [1], [0, 0, 1, 1], [], []>} : vector<16x128xbf16>, vector<128x128xbf16>, vector<16x128xf32> -> vector<16x128xf32>
    %c0_9 = arith.constant 0 : index
    %c0_10 = arith.constant 0 : index
    %11 = vector.load %arg5[%c0_9, %c0_10] : memref<1x128xf32, #tpu.memory_space<vmem>>, vector<1x128xf32>
    %12 = vector.broadcast %11 : vector<1x128xf32> to vector<16x128xf32>
    %13 = arith.addf %10, %12 : vector<16x128xf32>
    %c0_11 = arith.constant 0 : index
    %c0_12 = arith.constant 0 : index
    %14 = vector.load %arg6[%c0_11, %c0_12] : memref<16x128xf32, #tpu.memory_space<vmem>>, vector<16x128xf32>
    tpu.vector_store %arg6[%c0_11, %c0_12], %13 {strides = array<i32>} : memref<16x128xf32, #tpu.memory_space<vmem>>, vector<16x128xf32>,
    return
  }
  func.func @transform_0(%arg0: i32) -> (i32, i32) {
    %c0_i32 = arith.constant 0 : i32
    %c0_i32_0 = arith.constant 0 : i32
    return %arg0, %c0_i32 : i32, i32
  }
  func.func @transform_1(%arg0: i32) -> (i32, i32) {
    %c0_i32 = arith.constant 0 : i32
    %c0_i32_0 = arith.constant 0 : i32
    %c0_i32_1 = arith.constant 0 : i32
    return %c0_i32, %c0_i32_0 : i32, i32
  }
  func.func @transform_2(%arg0: i32) -> (i32, i32) {
    %c0_i32 = arith.constant 0 : i32
    %c0_i32_0 = arith.constant 0 : i32
    %c0_i32_1 = arith.constant 0 : i32
    return %c0_i32, %c0_i32_0 : i32, i32
  }
  func.func @transform_3(%arg0: i32) -> (i32, i32) {
    %c0_i32 = arith.constant 0 : i32
    %c0_i32_0 = arith.constant 0 : i32
    %c0_i32_1 = arith.constant 0 : i32
    return %c0_i32, %c0_i32_0 : i32, i32
  }
  func.func @transform_4(%arg0: i32) -> (i32, i32) {
    %c0_i32 = arith.constant 0 : i32
    %c0_i32_0 = arith.constant 0 : i32
    %c0_i32_1 = arith.constant 0 : i32
    return %c0_i32, %c0_i32_0 : i32, i32
  }
  func.func @transform_5(%arg0: i32) -> (i32, i32) {
    %c0_i32 = arith.constant 0 : i32
    %c0_i32_0 = arith.constant 0 : i32
    return %arg0, %c0_i32 : i32, i32
  }
}

</mosaic_0001>

<bundles_post_ra>
// kernel: pig_action_3dcnn_forward.3
= control target key start
LH: loop header
LB: loop body
LE: loop exit
PB: predicated region body
PF: predicated region fallthrough
CT: control target
= control target key end

     0   :  { %s7041_s12 = smov 0   ;;  %s9258_s0 = inlined_call_operand.vmem [shape: bf16[2,2048,128], index: 0, kind: input, shape index: {}]   ;;  %s9259_s1 = inlined_call_operand.vmem [shape: bf16[128,128], index: 1, kind: input, shape index: {}]   ;;  %s9260_s2 = inlined_call_operand.vmem [shape: f32[1,128], index: 2, kind: input, shape index: {}]   ;;  %s9261_s3 = inlined_call_operand.vmem [shape: bf16[2,256,128], index: 3, kind: output, shape index: {}]  }
   0x1 LB: > { %s5778_s13 = sadd.s32 4294967295, %s7019_s12   ;;  %p5782_p0 = scmp.ge.s32.totalorder %s7019_s12, 1  ;;  %s7019_s12 = sphi %s7041_s12, %s13_s12  }
   0x2   : > { %p137_p1 = scmp.lt.s32.totalorder %s7019_s12, 3 }
   0x4   : > { %p138_p2 = pnand %p5782_p0, %p137_p1 }
   0x6   : > { %141 = sbr.rel (%p138_p2) target bundleno = 976 (0x3d0), region = 32 }
   0xd   : > { %v6872_v0 = vld [vmem:[%s9259_s1] sm:$0xff]   ;;  %p161_p3 = scmp.lt.s32.totalorder %s5778_s13, 1  ;;  %v6873_v1 = vld [vmem:[%s9259_s1 + $0x8] sm:$0xff]   ;;  %v6874_v2 = vld [vmem:[%s9259_s1 + $0x10] sm:$0xff]   ;;  %vm5396_vm0 = vcmask 1041409   ;;  %vm5398_vm1 = vcmask 1042434  }
   0xe   : > { %6576 = vmatprep.subr.bf16.mxu0 %v6872_v0  ;;  %6848 = vmatprep.subr.bf16.mxu1 %v6872_v0  ;;  %v6875_v3 = vld [vmem:[%s9259_s1 + $0x18] sm:$0xff]   ;;  %v6876_v6 = vld [vmem:[%s9259_s1 + $0x20] sm:$0xff]   ;;  %v6877_v7 = vld [vmem:[%s9259_s1 + $0x28] sm:$0xff]   ;;  %vm5400_vm2 = vcmask 1043459   ;;  %vm5402_vm3 = vcmask 1044484   ;;  %vm5404_vm4 = vcmask 1045509  }
   0xf   : > { %s9537_s13 = smov (!%p161_p3, %s5778_s13), 1  ;;  %6577 = vmatpush3.bf16.msra.mxu0 %v6872_v0  ;;  %6856 = vmatpush3.bf16.msra.mxu1 %v6872_v0  ;;  %v6878_v8 = vld [vmem:[%s9259_s1 + $0x30] sm:$0xff]   ;;  %v6879_v9 = vld [vmem:[%s9259_s1 + $0x38] sm:$0xff]   ;;  %vm5406_vm5 = vcmask 1046534   ;;  %vm5408_vm6 = vcmask 1047559  }
  0x10   : > { %6578 = vmatprep.subr.bf16.mxu0 %v6873_v1  ;;  %6849 = vmatprep.subr.bf16.mxu1 %v6873_v1  ;;  %s6182_s20 = sshll.u32 %s9537_s13, 10  ;;  %s6183_s9 = sshll.u32 %s9537_s13, 7 }
  0x11   : > { %s7064_s23 = scalar_lea.vmem %s9258_s0, %s6182_s20  ;;  %s7360_s13 = scalar_lea.vmem %s9261_s3, %s6183_s9 }
  0x12   : > { %v6880_v4 = vld [vmem:[%s7064_s23] sm:$0xff]   ;;  %v6882_v10 = vld [vmem:[%s7064_s23 + $0x8] sm:$0xff]   ;;  %v6884_v12 = vld [vmem:[%s7064_s23 + $0x10] sm:$0xff]  }
  0x13   : > { %6579 = vmatpush3.bf16.msra.mxu0 %v6873_v1  ;;  %6857 = vmatpush3.bf16.msra.mxu1 %v6873_v1  ;;  %v6881_v5 = vld [vmem:[%s7064_s23 + $0x200] sm:$0xff]   ;;  %v6883_v11 = vld [vmem:[%s7064_s23 + $0x208] sm:$0xff]   ;;  %v6885_v13 = vld [vmem:[%s7064_s23 + $0x210] sm:$0xff]  }
  0x14   : > { %6580 = vmatprep.subr.bf16.mxu0 %v6874_v2  ;;  %6850 = vmatprep.subr.bf16.mxu1 %v6874_v2  ;;  %v6886_v14 = vld [vmem:[%s7064_s23 + $0x18] sm:$0xff]   ;;  %v6888_v16 = vld [vmem:[%s7064_s23 + $0x20] sm:$0xff]   ;;  %v6890_v18 = vld [vmem:[%s7064_s23 + $0x28] sm:$0xff]  }
  0x15   : > { %6592 = vmatprep.mubr.bf16.mxu0 %v6880_v4  ;;  %6720 = vmatprep.mubr.bf16.mxu1 %v6881_v5  ;;  %v6887_v15 = vld [vmem:[%s7064_s23 + $0x218] sm:$0xff]   ;;  %v6889_v17 = vld [vmem:[%s7064_s23 + $0x220] sm:$0xff]   ;;  %v6891_v19 = vld [vmem:[%s7064_s23 + $0x228] sm:$0xff]  }
  0x16   : > { %v6892_v20 = vld [vmem:[%s7064_s23 + $0x30] sm:$0xff]   ;;  %v6894_v22 = vld [vmem:[%s7064_s23 + $0x38] sm:$0xff]   ;;  %v6896_v24 = vld [vmem:[%s7064_s23 + $0x40] sm:$0xff]  }
  0x17   : > { %6581 = vmatpush3.bf16.msra.mxu0 %v6874_v2  ;;  %6858 = vmatpush3.bf16.msra.mxu1 %v6874_v2  ;;  %v6893_v21 = vld [vmem:[%s7064_s23 + $0x230] sm:$0xff]   ;;  %v6895_v23 = vld [vmem:[%s7064_s23 + $0x238] sm:$0xff]   ;;  %v6897_v25 = vld [vmem:[%s7064_s23 + $0x240] sm:$0xff]  }
  0x18   : > { %6582 = vmatprep.subr.bf16.mxu0 %v6875_v3  ;;  %6851 = vmatprep.subr.bf16.mxu1 %v6875_v3  ;;  %v6898_v26 = vld [vmem:[%s7064_s23 + $0x48] sm:$0xff]   ;;  %v6900_v28 = vld [vmem:[%s7064_s23 + $0x50] sm:$0xff]   ;;  %v6902_v30 = vld [vmem:[%s7064_s23 + $0x58] sm:$0xff]  }
  0x19   : > { %v6899_v27 = vld [vmem:[%s7064_s23 + $0x248] sm:$0xff]   ;;  %v6901_v29 = vld [vmem:[%s7064_s23 + $0x250] sm:$0xff]   ;;  %v6903_v31 = vld [vmem:[%s7064_s23 + $0x258] sm:$0xff]  }
  0x1a   : > { %v6904_v32 = vld [vmem:[%s7064_s23 + $0x60] sm:$0xff]   ;;  %v6906_v34 = vld [vmem:[%s7064_s23 + $0x68] sm:$0xff]   ;;  %v6908_v36 = vld [vmem:[%s7064_s23 + $0x70] sm:$0xff]  }
  0x1b   : > { %6583 = vmatpush3.bf16.msra.mxu0 %v6875_v3  ;;  %6859 = vmatpush3.bf16.msra.mxu1 %v6875_v3  ;;  %v6905_v33 = vld [vmem:[%s7064_s23 + $0x260] sm:$0xff]   ;;  %v6907_v35 = vld [vmem:[%s7064_s23 + $0x268] sm:$0xff]   ;;  %v6909_v37 = vld [vmem:[%s7064_s23 + $0x270] sm:$0xff]  }
  0x1c   : > { %6584 = vmatprep.subr.bf16.mxu0 %v6876_v6  ;;  %6852 = vmatprep.subr.bf16.mxu1 %v6876_v6  ;;  %v6910_v38 = vld [vmem:[%s7064_s23 + $0x78] sm:$0xff]   ;;  %v6912_v40 = vld [vmem:[%s7064_s23 + $0x80] sm:$0xff]   ;;  %v6914_v42 = vld [vmem:[%s7064_s23 + $0x88] sm:$0xff]  }
  0x1d   : > { %v6911_v39 = vld [vmem:[%s7064_s23 + $0x278] sm:$0xff]   ;;  %v6913_v41 = vld [vmem:[%s7064_s23 + $0x280] sm:$0xff]   ;;  %v6915_v43 = vld [vmem:[%s7064_s23 + $0x288] sm:$0xff]  }
  0x1e   : > { %v6916_v44 = vld [vmem:[%s7064_s23 + $0x90] sm:$0xff]   ;;  %v6918_v46 = vld [vmem:[%s7064_s23 + $0x98] sm:$0xff]   ;;  %v6920_v48 = vld [vmem:[%s7064_s23 + $0xa0] sm:$0xff]  }
  0x1f   : > { %6585 = vmatpush3.bf16.msra.mxu0 %v6876_v6  ;;  %6860 = vmatpush3.bf16.msra.mxu1 %v6876_v6  ;;  %v6917_v45 = vld [vmem:[%s7064_s23 + $0x290] sm:$0xff]   ;;  %v6919_v47 = vld [vmem:[%s7064_s23 + $0x298] sm:$0xff]   ;;  %v6921_v49 = vld [vmem:[%s7064_s23 + $0x2a0] sm:$0xff]  }
  0x20   : > { %6586 = vmatprep.subr.bf16.mxu0 %v6877_v7  ;;  %6853 = vmatprep.subr.bf16.mxu1 %v6877_v7  ;;  %v6922_v50 = vld [vmem:[%s7064_s23 + $0xa8] sm:$0xff]   ;;  %v6924_v52 = vld [vmem:[%s7064_s23 + $0xb0] sm:$0xff]   ;;  %v6926_v54 = vld [vmem:[%s7064_s23 + $0xb8] sm:$0xff]  }
  0x21   : > { %v6923_v51 = vld [vmem:[%s7064_s23 + $0x2a8] sm:$0xff]   ;;  %v6925_v53 = vld [vmem:[%s7064_s23 + $0x2b0] sm:$0xff]   ;;  %v6927_v55 = vld [vmem:[%s7064_s23 + $0x2b8] sm:$0xff]  }
  0x22   : > { %v6928_v56 = vld [vmem:[%s7064_s23 + $0xc0] sm:$0xff]   ;;  %v6930_v58 = vld [vmem:[%s7064_s23 + $0xc8] sm:$0xff]   ;;  %v6932_v60 = vld [vmem:[%s7064_s23 + $0xd0] sm:$0xff]  }
  0x23   : > { %6587 = vmatpush3.bf16.msra.mxu0 %v6877_v7  ;;  %6861 = vmatpush3.bf16.msra.mxu1 %v6877_v7  ;;  %v6929_v57 = vld [vmem:[%s7064_s23 + $0x2c0] sm:$0xff]   ;;  %v6931_v59 = vld [vmem:[%s7064_s23 + $0x2c8] sm:$0xff]   ;;  %v6933_v61 = vld [vmem:[%s7064_s23 + $0x2d0] sm:$0xff]  }
  0x24   : > { %6588 = vmatprep.subr.bf16.mxu0 %v6878_v8  ;;  %6854 = vmatprep.subr.bf16.mxu1 %v6878_v8  ;;  %v6934_v62 = vld [vmem:[%s7064_s23 + $0xd8] sm:$0xff]   ;;  %v6936_v0 = vld [vmem:[%s7064_s23 + $0xe0] sm:$0xff]   ;;  %v6938_v2 = vld [vmem:[%s7064_s23 + $0xe8] sm:$0xff]  }
  0x25   : > { %v6935_v63 = vld [vmem:[%s7064_s23 + $0x2d8] sm:$0xff]   ;;  %v6937_v1 = vld [vmem:[%s7064_s23 + $0x2e0] sm:$0xff]   ;;  %v6939_v3 = vld [vmem:[%s7064_s23 + $0x2e8] sm:$0xff]  }
  0x26   : > { %v6940_v4 = vld [vmem:[%s7064_s23 + $0xf0] sm:$0xff]   ;;  %v6942_v6 = vld [vmem:[%s7064_s23 + $0xf8] sm:$0xff]  }
  0x27   : > { %6589 = vmatpush3.bf16.msra.mxu0 %v6878_v8  ;;  %6862 = vmatpush3.bf16.msra.mxu1 %v6878_v8  ;;  %v6941_v5 = vld [vmem:[%s7064_s23 + $0x2f0] sm:$0xff]   ;;  %v6943_v7 = vld [vmem:[%s7064_s23 + $0x2f8] sm:$0xff]   ;;  %v6944_v8 = vld [vmem:[%s7064_s23 + $0x100] sm:$0xff]  }
  0x28   : > { %6590 = vmatprep.subr.bf16.mxu0 %v6879_v9  ;;  %6855 = vmatprep.subr.bf16.mxu1 %v6879_v9 }
  0x2b   : > { %6591 = vmatpush3.bf16.msra.mxu0 %v6879_v9  ;;  %6863 = vmatpush3.bf16.msra.mxu1 %v6879_v9  ;;  %v6945_v9 = vld [vmem:[%s7064_s23 + $0x300] sm:$0xff]  }
  0x2e   : > { %6593 = vmatmul.mubr.bf16.vlgmr.msra.gmra.mrb[0].mxu0 %v6882_v10  ;;  %6721 = vmatmul.mubr.bf16.vlgmr.msra.gmra.mrb[0].mxu1 %v6883_v11  ;;  %v6946_v10 = vld [vmem:[%s7064_s23 + $0x108] sm:$0xff]  }
  0x2f   : > { %6596 = vmatprep.mubr.bf16.mxu0 %v6884_v12  ;;  %6724 = vmatprep.mubr.bf16.mxu1 %v6885_v13  ;;  %v6947_v11 = vld [vmem:[%s7064_s23 + $0x308] sm:$0xff]   ;;  %v6948_v12 = vld [vmem:[%s7064_s23 + $0x110] sm:$0xff]  }
  0x30   : > { %v6949_v13 = vld [vmem:[%s7064_s23 + $0x310] sm:$0xff]  }
  0x36   : > { %6597 = vmatmul.mubr.bf16.gmra.mrb[4].mxu0 %v6886_v14  ;;  %6725 = vmatmul.mubr.bf16.gmra.mrb[4].mxu1 %v6887_v15  ;;  %v6950_v14 = vld [vmem:[%s7064_s23 + $0x118] sm:$0xff]  }
  0x37   : > { %6600 = vmatprep.mubr.bf16.mxu0 %v6888_v16  ;;  %6728 = vmatprep.mubr.bf16.mxu1 %v6889_v17  ;;  %v6951_v15 = vld [vmem:[%s7064_s23 + $0x318] sm:$0xff]   ;;  %v6952_v16 = vld [vmem:[%s7064_s23 + $0x120] sm:$0xff]  }
  0x38   : > { %v6953_v17 = vld [vmem:[%s7064_s23 + $0x320] sm:$0xff]  }
  0x3e   : > { %6601 = vmatmul.mubr.bf16.gmra.mrb[8].mxu0 %v6890_v18  ;;  %6729 = vmatmul.mubr.bf16.gmra.mrb[8].mxu1 %v6891_v19  ;;  %v6954_v18 = vld [vmem:[%s7064_s23 + $0x128] sm:$0xff]  }
  0x3f   : > { %6604 = vmatprep.mubr.bf16.mxu0 %v6892_v20  ;;  %6732 = vmatprep.mubr.bf16.mxu1 %v6893_v21  ;;  %v6955_v19 = vld [vmem:[%s7064_s23 + $0x328] sm:$0xff]   ;;  %v6956_v20 = vld [vmem:[%s7064_s23 + $0x130] sm:$0xff]  }
  0x40   : > { %v6957_v21 = vld [vmem:[%s7064_s23 + $0x330] sm:$0xff]  }
  0x46   : > { %6605 = vmatmul.mubr.bf16.gmra.mrb[12].mxu0 %v6894_v22  ;;  %6733 = vmatmul.mubr.bf16.gmra.mrb[12].mxu1 %v6895_v23  ;;  %v6958_v22 = vld [vmem:[%s7064_s23 + $0x138] sm:$0xff]  }
  0x47   : > { %6608 = vmatprep.mubr.bf16.mxu0 %v6896_v24  ;;  %6736 = vmatprep.mubr.bf16.mxu1 %v6897_v25  ;;  %v6959_v23 = vld [vmem:[%s7064_s23 + $0x338] sm:$0xff]   ;;  %v6960_v24 = vld [vmem:[%s7064_s23 + $0x140] sm:$0xff]  }
  0x48   : > { %v6961_v25 = vld [vmem:[%s7064_s23 + $0x340] sm:$0xff]  }
  0x4e   : > { %6609 = vmatmul.mubr.bf16.gmra.mrb[16].mxu0 %v6898_v26  ;;  %6737 = vmatmul.mubr.bf16.gmra.mrb[16].mxu1 %v6899_v27  ;;  %v6962_v26 = vld [vmem:[%s7064_s23 + $0x148] sm:$0xff]  }
  0x4f   : > { %6612 = vmatprep.mubr.bf16.mxu0 %v6900_v28  ;;  %6740 = vmatprep.mubr.bf16.mxu1 %v6901_v29  ;;  %v6963_v27 = vld [vmem:[%s7064_s23 + $0x348] sm:$0xff]   ;;  %v6964_v28 = vld [vmem:[%s7064_s23 + $0x150] sm:$0xff]  }
  0x50   : > { %v6965_v29 = vld [vmem:[%s7064_s23 + $0x350] sm:$0xff]  }
  0x56   : > { %6613 = vmatmul.mubr.bf16.gmra.mrb[20].mxu0 %v6902_v30  ;;  %6741 = vmatmul.mubr.bf16.gmra.mrb[20].mxu1 %v6903_v31  ;;  %v6966_v30 = vld [vmem:[%s7064_s23 + $0x158] sm:$0xff]  }
  0x57   : > { %6616 = vmatprep.mubr.bf16.mxu0 %v6904_v32  ;;  %6744 = vmatprep.mubr.bf16.mxu1 %v6905_v33  ;;  %v6967_v31 = vld [vmem:[%s7064_s23 + $0x358] sm:$0xff]   ;;  %v6968_v32 = vld [vmem:[%s7064_s23 + $0x160] sm:$0xff]  }
  0x58   : > { %v6969_v33 = vld [vmem:[%s7064_s23 + $0x360] sm:$0xff]  }
  0x5e   : > { %6617 = vmatmul.mubr.bf16.gmra.mrb[24].mxu0 %v6906_v34  ;;  %6745 = vmatmul.mubr.bf16.gmra.mrb[24].mxu1 %v6907_v35  ;;  %v6970_v34 = vld [vmem:[%s7064_s23 + $0x168] sm:$0xff]  }
  0x5f   : > { %6620 = vmatprep.mubr.bf16.mxu0 %v6908_v36  ;;  %6748 = vmatprep.mubr.bf16.mxu1 %v6909_v37  ;;  %v6971_v35 = vld [vmem:[%s7064_s23 + $0x368] sm:$0xff]   ;;  %v6972_v36 = vld [vmem:[%s7064_s23 + $0x170] sm:$0xff]  }
  0x60   : > { %v6973_v37 = vld [vmem:[%s7064_s23 + $0x370] sm:$0xff]  }
  0x66   : > { %6621 = vmatmul.mubr.bf16.gmra.mrb[28].mxu0 %v6910_v38  ;;  %6749 = vmatmul.mubr.bf16.gmra.mrb[28].mxu1 %v6911_v39  ;;  %v6974_v38 = vld [vmem:[%s7064_s23 + $0x178] sm:$0xff]  }
  0x67   : > { %6624 = vmatprep.mubr.bf16.mxu0 %v6912_v40  ;;  %6752 = vmatprep.mubr.bf16.mxu1 %v6913_v41  ;;  %v6975_v39 = vld [vmem:[%s7064_s23 + $0x378] sm:$0xff]   ;;  %v6976_v40 = vld [vmem:[%s7064_s23 + $0x180] sm:$0xff]  }
  0x68   : > { %v6977_v41 = vld [vmem:[%s7064_s23 + $0x380] sm:$0xff]  }
  0x6e   : > { %6625 = vmatmul.mubr.bf16.gmra.mrb[32].mxu0 %v6914_v42  ;;  %6753 = vmatmul.mubr.bf16.gmra.mrb[32].mxu1 %v6915_v43  ;;  %v6978_v42 = vld [vmem:[%s7064_s23 + $0x188] sm:$0xff]  }
  0x6f   : > { %6628 = vmatprep.mubr.bf16.mxu0 %v6916_v44  ;;  %6756 = vmatprep.mubr.bf16.mxu1 %v6917_v45  ;;  %v6979_v43 = vld [vmem:[%s7064_s23 + $0x388] sm:$0xff]   ;;  %v6980_v44 = vld [vmem:[%s7064_s23 + $0x190] sm:$0xff]  }
  0x70   : > { %v6981_v45 = vld [vmem:[%s7064_s23 + $0x390] sm:$0xff]  }
  0x76   : > { %6629 = vmatmul.mubr.bf16.gmra.mrb[36].mxu0 %v6918_v46  ;;  %6757 = vmatmul.mubr.bf16.gmra.mrb[36].mxu1 %v6919_v47  ;;  %v6982_v46 = vld [vmem:[%s7064_s23 + $0x198] sm:$0xff]  }
  0x77   : > { %6632 = vmatprep.mubr.bf16.mxu0 %v6920_v48  ;;  %6760 = vmatprep.mubr.bf16.mxu1 %v6921_v49  ;;  %v6983_v47 = vld [vmem:[%s7064_s23 + $0x398] sm:$0xff]   ;;  %v6984_v48 = vld [vmem:[%s7064_s23 + $0x1a0] sm:$0xff]  }
  0x78   : > { %v6985_v49 = vld [vmem:[%s7064_s23 + $0x3a0] sm:$0xff]  }
  0x7e   : > { %6633 = vmatmul.mubr.bf16.gmra.mrb[40].mxu0 %v6922_v50  ;;  %6761 = vmatmul.mubr.bf16.gmra.mrb[40].mxu1 %v6923_v51  ;;  %v6986_v50 = vld [vmem:[%s7064_s23 + $0x1a8] sm:$0xff]  }
  0x7f   : > { %6636 = vmatprep.mubr.bf16.mxu0 %v6924_v52  ;;  %6764 = vmatprep.mubr.bf16.mxu1 %v6925_v53  ;;  %v6987_v51 = vld [vmem:[%s7064_s23 + $0x3a8] sm:$0xff]   ;;  %v6988_v52 = vld [vmem:[%s7064_s23 + $0x1b0] sm:$0xff]  }
  0x80   : > { %v6989_v53 = vld [vmem:[%s7064_s23 + $0x3b0] sm:$0xff]  }
  0x86   : > { %6637 = vmatmul.mubr.bf16.gmra.mrb[44].mxu0 %v6926_v54  ;;  %6765 = vmatmul.mubr.bf16.gmra.mrb[44].mxu1 %v6927_v55  ;;  %v7194_v54 = vld [vmem:[%s9260_s2] ss:$0 sm:$0xff] }
  0x87   : > { %6640 = vmatprep.mubr.bf16.mxu0 %v6928_v56  ;;  %6768 = vmatprep.mubr.bf16.mxu1 %v6929_v57 }
  0x8e   : > { %6641 = vmatmul.mubr.bf16.gmra.mrb[48].mxu0 %v6930_v58  ;;  %6769 = vmatmul.mubr.bf16.gmra.mrb[48].mxu1 %v6931_v59 }
  0x8f   : > { %6644 = vmatprep.mubr.bf16.mxu0 %v6932_v60  ;;  %6772 = vmatprep.mubr.bf16.mxu1 %v6933_v61  ;;  %v6990_v61 = vld [vmem:[%s7064_s23 + $0x1b8] sm:$0xff]  }
  0x96   : > { %6645 = vmatmul.mubr.bf16.gmra.mrb[52].mxu0 %v6934_v62  ;;  %6773 = vmatmul.mubr.bf16.gmra.mrb[52].mxu1 %v6935_v63  ;;  %v6991_v62 = vld [vmem:[%s7064_s23 + $0x3b8] sm:$0xff]  }
  0x97   : > { %6648 = vmatprep.mubr.bf16.mxu0 %v6936_v0  ;;  %6776 = vmatprep.mubr.bf16.mxu1 %v6937_v1 }
  0x9e   : > { %6649 = vmatmul.mubr.bf16.gmra.mrb[56].mxu0 %v6938_v2  ;;  %6777 = vmatmul.mubr.bf16.gmra.mrb[56].mxu1 %v6939_v3  ;;  %v6992_v3 = vld [vmem:[%s7064_s23 + $0x1c0] sm:$0xff]  }
  0x9f   : > { %6652 = vmatprep.mubr.bf16.mxu0 %v6940_v4  ;;  %6780 = vmatprep.mubr.bf16.mxu1 %v6941_v5  ;;  %v6993_v4 = vld [vmem:[%s7064_s23 + $0x3c0] sm:$0xff]  }
  0xa6   : > { %6653 = vmatmul.mubr.bf16.gmra.mrb[60].mxu0 %v6942_v6  ;;  %6781 = vmatmul.mubr.bf16.gmra.mrb[60].mxu1 %v6943_v7 }
  0xa7   : > { %6656 = vmatprep.mubr.bf16.mxu0 %v6944_v8  ;;  %6784 = vmatprep.mubr.bf16.mxu1 %v6945_v9 }
  0xae   : > { %6657 = vmatmul.mubr.bf16.gmra.mrb[64].mxu0 %v6946_v10  ;;  %6785 = vmatmul.mubr.bf16.gmra.mrb[64].mxu1 %v6947_v11 }
  0xaf   : > { %6660 = vmatprep.mubr.bf16.mxu0 %v6948_v12  ;;  %6788 = vmatprep.mubr.bf16.mxu1 %v6949_v13 }
  0xb6   : > { %6661 = vmatmul.mubr.bf16.gmra.mrb[68].mxu0 %v6950_v14  ;;  %6789 = vmatmul.mubr.bf16.gmra.mrb[68].mxu1 %v6951_v15 }
  0xb7   : > { %6664 = vmatprep.mubr.bf16.mxu0 %v6952_v16  ;;  %6792 = vmatprep.mubr.bf16.mxu1 %v6953_v17 }
  0xbe   : > { %6665 = vmatmul.mubr.bf16.gmra.mrb[72].mxu0 %v6954_v18  ;;  %6793 = vmatmul.mubr.bf16.gmra.mrb[72].mxu1 %v6955_v19 }
  0xbf   : > { %6668 = vmatprep.mubr.bf16.mxu0 %v6956_v20  ;;  %6796 = vmatprep.mubr.bf16.mxu1 %v6957_v21 }
  0xc6   : > { %6669 = vmatmul.mubr.bf16.gmra.mrb[76].mxu0 %v6958_v22  ;;  %6797 = vmatmul.mubr.bf16.gmra.mrb[76].mxu1 %v6959_v23 }
  0xc7   : > { %6672 = vmatprep.mubr.bf16.mxu0 %v6960_v24  ;;  %6800 = vmatprep.mubr.bf16.mxu1 %v6961_v25 }
  0xce   : > { %6673 = vmatmul.mubr.bf16.gmra.mrb[80].mxu0 %v6962_v26  ;;  %6801 = vmatmul.mubr.bf16.gmra.mrb[80].mxu1 %v6963_v27 }
  0xcf   : > { %6676 = vmatprep.mubr.bf16.mxu0 %v6964_v28  ;;  %6804 = vmatprep.mubr.bf16.mxu1 %v6965_v29 }
  0xd6   : > { %6677 = vmatmul.mubr.bf16.gmra.mrb[84].mxu0 %v6966_v30  ;;  %6805 = vmatmul.mubr.bf16.gmra.mrb[84].mxu1 %v6967_v31 }
  0xd7   : > { %6680 = vmatprep.mubr.bf16.mxu0 %v6968_v32  ;;  %6808 = vmatprep.mubr.bf16.mxu1 %v6969_v33 }
  0xde   : > { %6681 = vmatmul.mubr.bf16.gmra.mrb[88].mxu0 %v6970_v34  ;;  %6809 = vmatmul.mubr.bf16.gmra.mrb[88].mxu1 %v6971_v35 }
  0xdf   : > { %6684 = vmatprep.mubr.bf16.mxu0 %v6972_v36  ;;  %6812 = vmatprep.mubr.bf16.mxu1 %v6973_v37 }
  0xe6   : > { %6685 = vmatmul.mubr.bf16.gmra.mrb[92].mxu0 %v6974_v38  ;;  %6813 = vmatmul.mubr.bf16.gmra.mrb[92].mxu1 %v6975_v39  ;;  %v6994_v39 = vld [vmem:[%s7064_s23 + $0x1c8] sm:$0xff]  }
  0xe7   : > { %6688 = vmatprep.mubr.bf16.mxu0 %v6976_v40  ;;  %6816 = vmatprep.mubr.bf16.mxu1 %v6977_v41  ;;  %v6995_v40 = vld [vmem:[%s7064_s23 + $0x3c8] sm:$0xff]  }
  0xee   : > { %6689 = vmatmul.mubr.bf16.gmra.mrb[96].mxu0 %v6978_v42  ;;  %6817 = vmatmul.mubr.bf16.gmra.mrb[96].mxu1 %v6979_v43 }
  0xef   : > { %6692 = vmatprep.mubr.bf16.mxu0 %v6980_v44  ;;  %6820 = vmatprep.mubr.bf16.mxu1 %v6981_v45 }
  0xf6   : > { %6693 = vmatmul.mubr.bf16.gmra.mrb[100].mxu0 %v6982_v46  ;;  %6821 = vmatmul.mubr.bf16.gmra.mrb[100].mxu1 %v6983_v47  ;;  %v6996_v47 = vld [vmem:[%s7064_s23 + $0x1d0] sm:$0xff]  }
  0xf7   : > { %6696 = vmatprep.mubr.bf16.mxu0 %v6984_v48  ;;  %6824 = vmatprep.mubr.bf16.mxu1 %v6985_v49  ;;  %v6997_v48 = vld [vmem:[%s7064_s23 + $0x3d0] sm:$0xff]  }
  0xfe   : > { %6697 = vmatmul.mubr.bf16.gmra.mrb[104].mxu0 %v6986_v50  ;;  %6825 = vmatmul.mubr.bf16.gmra.mrb[104].mxu1 %v6987_v51 }
  0xff   : > { %6700 = vmatprep.mubr.bf16.mxu0 %v6988_v52  ;;  %6828 = vmatprep.mubr.bf16.mxu1 %v6989_v53 }
 0x101   : > { %v6594_v55 = vpop.f32.mrb[0].mxu0  ;;  %v6722_v56 = vpop.f32.mrb[0].mxu1 }
 0x102   : > { %v1310_v57 = vadd.f32 %v6594_v55, %v7194_v54  ;;  %v1822_v58 = vadd.f32 %v6722_v56, %v7194_v54  ;;  %v1301_v59 = vpop.f32.mrb[1].mxu0  ;;  %v1813_v60 = vpop.f32.mrb[1].mxu1 }
 0x103   : > { %v1302_v63 = vadd.f32 %v7194_v54, %v1301_v59  ;;  %v1814_v0 = vadd.f32 %v7194_v54, %v1813_v60  ;;  %v6595_v1 = vpop.f32.mrb[2].mxu0  ;;  %v6723_v2 = vpop.f32.mrb[2].mxu1 }
 0x104   : > { %v2326_v5 = vmax.f32 %v1310_v57, 0.0  ;;  %v2454_v6 = vmax.f32 %v1822_v58, 0.0  ;;  %v1313_v7 = vadd.f32 %v6595_v1, %v7194_v54  ;;  %v1825_v8 = vadd.f32 %v6723_v2, %v7194_v54  ;;  %v1304_v9 = vpop.f32.mrb[3].mxu0  ;;  %v1816_v10 = vpop.f32.mrb[3].mxu1 }
 0x105   : > { %v2324_v11 = vmax.f32 %v1302_v63, 0.0  ;;  %v2452_v12 = vmax.f32 %v1814_v0, 0.0  ;;  %v1305_v13 = vadd.f32 %v7194_v54, %v1304_v9  ;;  %v1817_v14 = vadd.f32 %v7194_v54, %v1816_v10 }
 0x106   : > { %v2592_v15 = vrot.slane %v2326_v5, 4  ;;  %v3360_v16 = vrot.slane %v2454_v6, 4  ;;  %v2327_v17 = vmax.f32 %v1313_v7, 0.0  ;;  %v2455_v18 = vmax.f32 %v1825_v8, 0.0  ;;  %6701 = vmatmul.mubr.bf16.gmra.mrb[108].mxu0 %v6990_v61  ;;  %6829 = vmatmul.mubr.bf16.gmra.mrb[108].mxu1 %v6991_v62 }
 0x107   : > { %v2580_v19 = vrot.slane %v2324_v11, 4  ;;  %v3348_v20 = vrot.slane %v2452_v12, 4  ;;  %v2325_v21 = vmax.f32 %v1305_v13, 0.0  ;;  %v2453_v22 = vmax.f32 %v1817_v14, 0.0  ;;  %6704 = vmatprep.mubr.bf16.mxu0 %v6992_v3  ;;  %6832 = vmatprep.mubr.bf16.mxu1 %v6993_v4 }
 0x108   : > { %v2593_v23 = vmax.f32 %v2326_v5, %v2592_v15  ;;  %v3361_v24 = vmax.f32 %v2454_v6, %v3360_v16  ;;  %v2598_v25 = vrot.slane %v2327_v17, 4  ;;  %v3366_v26 = vrot.slane %v2455_v18, 4 }
 0x109   : > { %v2581_v27 = vmax.f32 %v2324_v11, %v2580_v19  ;;  %v3349_v28 = vmax.f32 %v2452_v12, %v3348_v20  ;;  %v2586_v29 = vrot.slane %v2325_v21, 4  ;;  %v3354_v30 = vrot.slane %v2453_v22, 4  ;;  %v7208_v31 = vpop.f32.mrb[4].mxu0  ;;  %v7210_v32 = vpop.f32.mrb[4].mxu1  ;;  %v6998_v20 = vld [vmem:[%s7064_s23 + $0x1d8] sm:$0xff]  }
 0x10a   : > { %v2594_v33 = vrot.slane %v2593_v23, 2  ;;  %v3362_v34 = vrot.slane %v3361_v24, 2  ;;  %v2599_v35 = vmax.f32 %v2327_v17, %v2598_v25  ;;  %v3367_v36 = vmax.f32 %v2455_v18, %v3366_v26  ;;  %v7212_v37 = vpop.f32.mrb[5].mxu0  ;;  %v7214_v38 = vpop.f32.mrb[5].mxu1 }
 0x10b   : > { %v2582_v41 = vrot.slane %v2581_v27, 2  ;;  %v3350_v42 = vrot.slane %v3349_v28, 2  ;;  %v2587_v43 = vmax.f32 %v2325_v21, %v2586_v29  ;;  %v3355_v44 = vmax.f32 %v2453_v22, %v3354_v30  ;;  %v7218_v45 = vpop.f32.mrb[6].mxu0  ;;  %v7220_v46 = vpop.f32.mrb[6].mxu1  ;;  %v6999_v21 = vld [vmem:[%s7064_s23 + $0x3d8] sm:$0xff]   ;;  %v7001_v29 = vld [vmem:[%s7064_s23 + $0x3e0] sm:$0xff]  }
 0x10c   : > { %v2595_v49 = vmax.f32 %v2593_v23, %v2594_v33  ;;  %v3363_v50 = vmax.f32 %v3361_v24, %v3362_v34  ;;  %v2600_v51 = vrot.slane %v2599_v35, 2  ;;  %v3368_v52 = vrot.slane %v3367_v36, 2  ;;  %v7224_v53 = vpop.f32.mrb[7].mxu0  ;;  %v7226_v55 = vpop.f32.mrb[7].mxu1 }
 0x10d   : > { %v2583_v56 = vmax.f32 %v2581_v27, %v2582_v41  ;;  %v3351_v57 = vmax.f32 %v3349_v28, %v3350_v42  ;;  %v2588_v58 = vrot.slane %v2587_v43, 2  ;;  %v3356_v59 = vrot.slane %v3355_v44, 2  ;;  %v7000_v28 = vld [vmem:[%s7064_s23 + $0x1e0] sm:$0xff]  }
 0x10e   : > { %v2596_v60 = vrot.slane %v2595_v49, 1  ;;  %v3364_v61 = vrot.slane %v3363_v50, 1  ;;  %v2601_v62 = vmax.f32 %v2599_v35, %v2600_v51  ;;  %v3369_v63 = vmax.f32 %v3367_v36, %v3368_v52  ;;  %6705 = vmatmul.mubr.bf16.gmra.mrb[112].mxu0 %v6994_v39  ;;  %6833 = vmatmul.mubr.bf16.gmra.mrb[112].mxu1 %v6995_v40 }
 0x10f   : > { %v2584_v0 = vrot.slane %v2583_v56, 1  ;;  %v3352_v1 = vrot.slane %v3351_v57, 1  ;;  %v2589_v2 = vmax.f32 %v2587_v43, %v2588_v58  ;;  %v3357_v3 = vmax.f32 %v3355_v44, %v3356_v59  ;;  %6708 = vmatprep.mubr.bf16.mxu0 %v6996_v47  ;;  %6836 = vmatprep.mubr.bf16.mxu1 %v6997_v48 }
 0x110   : > { %v2597_v4 = vmax.f32 %v2595_v49, %v2596_v60  ;;  %v3365_v5 = vmax.f32 %v3363_v50, %v3364_v61  ;;  %v2602_v6 = vrot.slane %v2601_v62, 1  ;;  %v3370_v7 = vrot.slane %v3369_v63, 1 }
 0x111   : > { %v2585_v8 = vmax.f32 %v2583_v56, %v2584_v0  ;;  %v3353_v9 = vmax.f32 %v3351_v57, %v3352_v1  ;;  %v2590_v10 = vrot.slane %v2589_v2, 1  ;;  %v3358_v11 = vrot.slane %v3357_v3, 1  ;;  %v7228_v12 = vpop.f32.mrb[8].mxu0  ;;  %v7230_v13 = vpop.f32.mrb[8].mxu1 }
 0x112   : > { %v6186_v14 = vpack.c.bf16 %v2597_v4, %v2597_v4  ;;  %v6314_v15 = vpack.c.bf16 %v3365_v5, %v3365_v5  ;;  %v2603_v16 = vmax.f32 %v2601_v62, %v2602_v6  ;;  %v3371_v17 = vmax.f32 %v3369_v63, %v3370_v7  ;;  %v7232_v18 = vpop.f32.mrb[9].mxu0  ;;  %v7234_v19 = vpop.f32.mrb[9].mxu1  ;;  %v7003_v4 = vld [vmem:[%s7064_s23 + $0x3e8] sm:$0xff]  }
 0x113   : > { %v6184_v22 = vpack.c.bf16 %v2585_v8, %v2585_v8  ;;  %v6312_v23 = vpack.c.bf16 %v3353_v9, %v3353_v9  ;;  %v2591_v24 = vmax.f32 %v2589_v2, %v2590_v10  ;;  %v3359_v25 = vmax.f32 %v3357_v3, %v3358_v11  ;;  %v7238_v26 = vpop.f32.mrb[10].mxu0  ;;  %v7240_v27 = vpop.f32.mrb[10].mxu1  ;;  %v7002_v3 = vld [vmem:[%s7064_s23 + $0x1e8] sm:$0xff]   ;;  %v7004_v11 = vld [vmem:[%s7064_s23 + $0x1f0] sm:$0xff]  }
 0x114   : > { %v5142_v30 = vunpack.c.l.b16 %v6186_v14  ;;  %v5270_v33 = vunpack.c.l.b16 %v6314_v15  ;;  %v6187_v34 = vpack.c.bf16 %v2603_v16, %v2603_v16  ;;  %v6315_v35 = vpack.c.bf16 %v3371_v17, %v3371_v17  ;;  %v7244_v36 = vpop.f32.mrb[11].mxu0  ;;  %v7246_v39 = vpop.f32.mrb[11].mxu1  ;;  %v7005_v14 = vld [vmem:[%s7064_s23 + $0x3f0] sm:$0xff]  }
 0x115   : > { %v5140_v40 = vunpack.c.l.b16 %v6184_v22  ;;  %v5268_v41 = vunpack.c.l.b16 %v6312_v23  ;;  %v6185_v42 = vpack.c.bf16 %v2591_v24, %v2591_v24  ;;  %v6313_v43 = vpack.c.bf16 %v3359_v25, %v3359_v25 }
 0x116   : > { %v5143_v44 = vunpack.c.l.b16 %v6187_v34  ;;  %v5271_v47 = vunpack.c.l.b16 %v6315_v35  ;;  %v1326_v48 = vadd.f32 %v7208_v31, %v7194_v54  ;;  %v1838_v49 = vadd.f32 %v7210_v32, %v7194_v54  ;;  %6709 = vmatmul.mubr.bf16.gmra.mrb[116].mxu0 %v6998_v20  ;;  %6837 = vmatmul.mubr.bf16.gmra.mrb[116].mxu1 %v6999_v21 }
 0x117   : > { %v5141_v50 = vunpack.c.l.b16 %v6185_v42  ;;  %v5269_v51 = vunpack.c.l.b16 %v6313_v43  ;;  %v1318_v52 = vadd.f32 %v7194_v54, %v7212_v37  ;;  %v1830_v56 = vadd.f32 %v7194_v54, %v7214_v38  ;;  %6712 = vmatprep.mubr.bf16.mxu0 %v7000_v28  ;;  %6840 = vmatprep.mubr.bf16.mxu1 %v7001_v29 }
 0x118   : > { %v2330_v57 = vmax.f32 %v1326_v48, 0.0  ;;  %v2458_v58 = vmax.f32 %v1838_v49, 0.0  ;;  %v1329_v31 = vadd.f32 %v7218_v45, %v7194_v54  ;;  %v1841_v32 = vadd.f32 %v7220_v46, %v7194_v54 }
 0x119   : > { %v5397_v59 = vsel %vm5396_vm0, %v5141_v50, %v5140_v40  ;;  %v5515_v60 = vsel %vm5396_vm0, %v5269_v51, %v5268_v41  ;;  %v2328_v37 = vmax.f32 %v1318_v52, 0.0  ;;  %v2456_v61 = vmax.f32 %v1830_v56, 0.0  ;;  %v7262_v62 = vpop.f32.mrb[12].mxu0  ;;  %v7264_v38 = vpop.f32.mrb[12].mxu1  ;;  %v7006_v56 = vld [vmem:[%s7064_s23 + $0x1f8] sm:$0xff]  }
 0x11a   : > { %v5399_v63 = vsel %vm5398_vm1, %v5142_v30, %v5397_v59  ;;  %v5516_v0 = vsel %vm5398_vm1, %v5270_v33, %v5515_v60  ;;  %v2616_v45 = vrot.slane %v2330_v57, 4  ;;  %v3384_v1 = vrot.slane %v2458_v58, 4  ;;  %v7268_v2 = vpop.f32.mrb[13].mxu0  ;;  %v7270_v46 = vpop.f32.mrb[13].mxu1 }
 0x11b   : > { %v2604_v5 = vrot.slane %v2328_v37, 4  ;;  %v7275_v6 = vsel %vm5400_vm2, %v5143_v44, %v5399_v63  ;;  %v3372_v7 = vrot.slane %v2456_v61, 4  ;;  %v7278_v8 = vsel %vm5400_vm2, %v5271_v47, %v5516_v0  ;;  %v7280_v9 = vpop.f32.mrb[14].mxu0  ;;  %v7282_v10 = vpop.f32.mrb[14].mxu1 }
 0x11c   : > { %v2617_v15 = vmax.f32 %v2330_v57, %v2616_v45  ;;  %v3385_v16 = vmax.f32 %v2458_v58, %v3384_v1  ;;  %v2331_v17 = vmax.f32 %v1329_v31, 0.0  ;;  %v2459_v20 = vmax.f32 %v1841_v32, 0.0  ;;  %v7286_v21 = vpop.f32.mrb[15].mxu0  ;;  %v7288_v22 = vpop.f32.mrb[15].mxu1  ;;  %v7007_v57 = vld [vmem:[%s7064_s23 + $0x3f8] sm:$0xff]  }
 0x11d   : > { %v2605_v23 = vmax.f32 %v2328_v37, %v2604_v5  ;;  %v3373_v24 = vmax.f32 %v2456_v61, %v3372_v7  ;;  %v1321_v25 = vadd.f32 %v7194_v54, %v7224_v53  ;;  %v1833_v28 = vadd.f32 %v7194_v54, %v7226_v55 }
 0x11e   : > { %v2618_v29 = vrot.slane %v2617_v15, 2  ;;  %v3386_v30 = vrot.slane %v3385_v16, 2  ;;  %v2622_v33 = vrot.slane %v2331_v17, 4  ;;  %v3390_v34 = vrot.slane %v2459_v20, 4  ;;  %6713 = vmatmul.mubr.bf16.gmra.mrb[120].mxu0 %v7002_v3  ;;  %6841 = vmatmul.mubr.bf16.gmra.mrb[120].mxu1 %v7003_v4 }
 0x11f   : > { %v2606_v35 = vrot.slane %v2605_v23, 2  ;;  %v3374_v40 = vrot.slane %v3373_v24, 2  ;;  %v2329_v41 = vmax.f32 %v1321_v25, 0.0  ;;  %v2457_v42 = vmax.f32 %v1833_v28, 0.0  ;;  %6716 = vmatprep.mubr.bf16.mxu0 %v7004_v11  ;;  %6844 = vmatprep.mubr.bf16.mxu1 %v7005_v14 }
 0x120   : > { %v2619_v43 = vmax.f32 %v2617_v15, %v2618_v29  ;;  %v3387_v44 = vmax.f32 %v3385_v16, %v3386_v30  ;;  %v2623_v53 = vmax.f32 %v2331_v17, %v2622_v33  ;;  %v3391_v47 = vmax.f32 %v2459_v20, %v3390_v34 }
 0x121   : > { %v2607_v55 = vmax.f32 %v2605_v23, %v2606_v35  ;;  %v3375_v48 = vmax.f32 %v3373_v24, %v3374_v40  ;;  %v2610_v49 = vrot.slane %v2329_v41, 4  ;;  %v3378_v50 = vrot.slane %v2457_v42, 4  ;;  %v7294_v51 = vpop.f32.mrb[16].mxu0  ;;  %v7296_v52 = vpop.f32.mrb[16].mxu1 }
 0x122   : > { %v2620_v58 = vrot.slane %v2619_v43, 1  ;;  %v3388_v31 = vrot.slane %v3387_v44, 1  ;;  %v2624_v32 = vrot.slane %v2623_v53, 2  ;;  %v3392_v59 = vrot.slane %v3391_v47, 2  ;;  %v7300_v60 = vpop.f32.mrb[17].mxu0  ;;  %v7302_v37 = vpop.f32.mrb[17].mxu1 }
 0x123   : > { %v2608_v61 = vrot.slane %v2607_v55, 1  ;;  %v3376_v63 = vrot.slane %v3375_v48, 1  ;;  %v2611_v0 = vmax.f32 %v2329_v41, %v2610_v49  ;;  %v3379_v45 = vmax.f32 %v2457_v42, %v3378_v50  ;;  %v7304_v1 = vpop.f32.mrb[18].mxu0  ;;  %v7306_v3 = vpop.f32.mrb[18].mxu1 }
 0x124   : > { %v2621_v4 = vmax.f32 %v2619_v43, %v2620_v58  ;;  %v3389_v5 = vmax.f32 %v3387_v44, %v3388_v31  ;;  %v2625_v7 = vmax.f32 %v2623_v53, %v2624_v32  ;;  %v3393_v11 = vmax.f32 %v3391_v47, %v3392_v59  ;;  %v7308_v14 = vpop.f32.mrb[19].mxu0  ;;  %v7310_v15 = vpop.f32.mrb[19].mxu1 }
 0x125   : > { %v2609_v16 = vmax.f32 %v2607_v55, %v2608_v61  ;;  %v3377_v17 = vmax.f32 %v3375_v48, %v3376_v63  ;;  %v2612_v20 = vrot.slane %v2611_v0, 2  ;;  %v3380_v23 = vrot.slane %v3379_v45, 2 }
 0x126   : > { %v6190_v24 = vpack.c.bf16 %v2621_v4, %v2621_v4  ;;  %v6318_v25 = vpack.c.bf16 %v3389_v5, %v3389_v5  ;;  %v2626_v28 = vrot.slane %v2625_v7, 1  ;;  %v3394_v29 = vrot.slane %v3393_v11, 1  ;;  %6717 = vmatmul.mubr.bf16.gmra.mrb[124].mxu0 %v7006_v56  ;;  %6845 = vmatmul.mubr.bf16.gmra.mrb[124].mxu1 %v7007_v57 }
 0x127   : > { %v6188_v30 = vpack.c.bf16 %v2609_v16, %v2609_v16  ;;  %v6316_v33 = vpack.c.bf16 %v3377_v17, %v3377_v17  ;;  %v2613_v34 = vmax.f32 %v2611_v0, %v2612_v20  ;;  %v3381_v35 = vmax.f32 %v3379_v45, %v3380_v23 }
 0x128   : > { %v5146_v40 = vunpack.c.l.b16 %v6190_v24  ;;  %v5274_v41 = vunpack.c.l.b16 %v6318_v25  ;;  %v2627_v42 = vmax.f32 %v2625_v7, %v2626_v28  ;;  %v3395_v43 = vmax.f32 %v3393_v11, %v3394_v29 }
 0x129   : > { %v5144_v44 = vunpack.c.l.b16 %v6188_v30  ;;  %v5272_v53 = vunpack.c.l.b16 %v6316_v33  ;;  %v2614_v47 = vrot.slane %v2613_v34, 1  ;;  %v3382_v55 = vrot.slane %v3381_v35, 1  ;;  %v7312_v48 = vpop.f32.mrb[20].mxu0  ;;  %v7314_v49 = vpop.f32.mrb[20].mxu1 }
 0x12a   : > { %v6191_v50 = vpack.c.bf16 %v2627_v42, %v2627_v42  ;;  %v6319_v56 = vpack.c.bf16 %v3395_v43, %v3395_v43  ;;  %v1342_v57 = vadd.f32 %v7228_v12, %v7194_v54  ;;  %v1854_v58 = vadd.f32 %v7230_v13, %v7194_v54  ;;  %v7320_v31 = vpop.f32.mrb[21].mxu0  ;;  %v7322_v32 = vpop.f32.mrb[21].mxu1 }
 0x12b   : > { %v5403_v59 = vsel %vm5402_vm3, %v5144_v44, %v7275_v6  ;;  %v5518_v61 = vsel %vm5402_vm3, %v5272_v53, %v7278_v8  ;;  %v2615_v63 = vmax.f32 %v2613_v34, %v2614_v47  ;;  %v3383_v0 = vmax.f32 %v3381_v35, %v3382_v55  ;;  %v7328_v45 = vpop.f32.mrb[22].mxu0  ;;  %v7330_v4 = vpop.f32.mrb[22].mxu1 }
 0x12c   : > { %v5147_v12 = vunpack.c.l.b16 %v6191_v50  ;;  %v5275_v5 = vunpack.c.l.b16 %v6319_v56  ;;  %v2334_v7 = vmax.f32 %v1342_v57, 0.0  ;;  %v2462_v13 = vmax.f32 %v1854_v58, 0.0  ;;  %v7332_v11 = vpop.f32.mrb[23].mxu0  ;;  %v7334_v16 = vpop.f32.mrb[23].mxu1 }
 0x12d   : > { %v6189_v17 = vpack.c.bf16 %v2615_v63, %v2615_v63  ;;  %v6317_v6 = vpack.c.bf16 %v3383_v0, %v3383_v0  ;;  %v1334_v8 = vadd.f32 %v7194_v54, %v7232_v18  ;;  %v1846_v20 = vadd.f32 %v7194_v54, %v7234_v19 }
 0x12e   : > { %v2640_v23 = vrot.slane %v2334_v7, 4  ;;  %v3408_v24 = vrot.slane %v2462_v13, 4  ;;  %v1345_v25 = vadd.f32 %v7238_v26, %v7194_v54  ;;  %v1857_v28 = vadd.f32 %v7240_v27, %v7194_v54 }
 0x12f   : > { %v5145_v29 = vunpack.c.l.b16 %v6189_v17  ;;  %v5273_v30 = vunpack.c.l.b16 %v6317_v6  ;;  %v2332_v33 = vmax.f32 %v1334_v8, 0.0  ;;  %v2460_v34 = vmax.f32 %v1846_v20, 0.0 }
 0x130   : > { %v2641_v35 = vmax.f32 %v2334_v7, %v2640_v23  ;;  %v3409_v42 = vmax.f32 %v2462_v13, %v3408_v24  ;;  %v2335_v43 = vmax.f32 %v1345_v25, 0.0  ;;  %v2463_v18 = vmax.f32 %v1857_v28, 0.0 }
 0x131   : > { %v5405_v44 = vsel %vm5404_vm4, %v5145_v29, %v5403_v59  ;;  %v5519_v19 = vsel %vm5404_vm4, %v5273_v30, %v5518_v61  ;;  %v2628_v53 = vrot.slane %v2332_v33, 4  ;;  %v3396_v47 = vrot.slane %v2460_v34, 4  ;;  %v7347_v55 = vpop.f32.mrb[24].mxu0  ;;  %v7349_v26 = vpop.f32.mrb[24].mxu1 }
 0x132   : > { %v5407_v27 = vsel %vm5406_vm5, %v5146_v40, %v5405_v44  ;;  %v5520_v50 = vsel %vm5406_vm5, %v5274_v41, %v5519_v19  ;;  %v2642_v56 = vrot.slane %v2641_v35, 2  ;;  %v3410_v57 = vrot.slane %v3409_v42, 2  ;;  %v7353_v58 = vpop.f32.mrb[25].mxu0  ;;  %v7355_v63 = vpop.f32.mrb[25].mxu1 }
 0x133   : > { %v5409_v59 = vsel %vm5408_vm6, %v5147_v12, %v5407_v27  ;;  %v5521_v61 = vsel %vm5408_vm6, %v5275_v5, %v5520_v50  ;;  %v2629_v40 = vmax.f32 %v2332_v33, %v2628_v53  ;;  %v3397_v0 = vmax.f32 %v2460_v34, %v3396_v47  ;;  %v7364_v41 = vpop.f32.mrb[26].mxu0  ;;  %v7366_v7 = vpop.f32.mrb[26].mxu1 }
 0x134   : > { %v5627_v13 = vpack.c.b16 %v5409_v59, %v5409_v59  ;;  %v5643_v17 = vpack.c.b16 %v5521_v61, %v5521_v61  ;;  %v2643_v6 = vmax.f32 %v2641_v35, %v2642_v56  ;;  %v3411_v8 = vmax.f32 %v3409_v42, %v3410_v57  ;;  %v7368_v20 = vpop.f32.mrb[27].mxu0  ;;  %v7370_v23 = vpop.f32.mrb[27].mxu1 }
 0x135   : > { %9262 = vst [vmem:[#allocation2_spill] sm:$0xff] %v7370_v23  ;;  %v2630_v24 = vrot.slane %v2629_v40, 2  ;;  %v3398_v12 = vrot.slane %v3397_v0, 2  ;;  %v2646_v25 = vrot.slane %v2335_v43, 4  ;;  %v3414_v28 = vrot.slane %v2463_v18, 4 }
 0x136   : > { %5691 = vst [vmem:[%s7360_s13] sm:$0xf] %v5627_v13  ;;  %5707 = vst [vmem:[%s7360_s13 + $0x40] sm:$0xf] %v5643_v17  ;;  %v2644_v5 = vrot.slane %v2643_v6, 1  ;;  %v3412_v29 = vrot.slane %v3411_v8, 1  ;;  %v1337_v30 = vadd.f32 %v7194_v54, %v7244_v36  ;;  %v1849_v33 = vadd.f32 %v7194_v54, %v7246_v39 }
 0x137   : > { %v2631_v34 = vmax.f32 %v2629_v40, %v2630_v24  ;;  %v3399_v35 = vmax.f32 %v3397_v0, %v3398_v12  ;;  %v2647_v42 = vmax.f32 %v2335_v43, %v2646_v25  ;;  %v3415_v44 = vmax.f32 %v2463_v18, %v3414_v28 }
 0x138   : > { %v2645_v19 = vmax.f32 %v2643_v6, %v2644_v5  ;;  %v3413_v53 = vmax.f32 %v3411_v8, %v3412_v29  ;;  %v2333_v47 = vmax.f32 %v1337_v30, 0.0  ;;  %v2461_v27 = vmax.f32 %v1849_v33, 0.0 }
 0x139   : > { %v2632_v50 = vrot.slane %v2631_v34, 1  ;;  %v3400_v56 = vrot.slane %v3399_v35, 1  ;;  %v2648_v57 = vrot.slane %v2647_v42, 2  ;;  %v3416_v59 = vrot.slane %v3415_v44, 2  ;;  %v7378_v61 = vpop.f32.mrb[28].mxu0  ;;  %v7380_v13 = vpop.f32.mrb[28].mxu1 }
 0x13a   : > { %v6194_v36 = vpack.c.bf16 %v2645_v19, %v2645_v19  ;;  %v6322_v17 = vpack.c.bf16 %v3413_v53, %v3413_v53  ;;  %v2634_v23 = vrot.slane %v2333_v47, 4  ;;  %v3402_v39 = vrot.slane %v2461_v27, 4  ;;  %v7382_v40 = vpop.f32.mrb[29].mxu0  ;;  %v7384_v43 = vpop.f32.mrb[29].mxu1 }
 0x13b   : > { %9263 = vst [vmem:[#allocation3_spill] sm:$0xff] %v7384_v43  ;;  %v2633_v18 = vmax.f32 %v2631_v34, %v2632_v50  ;;  %v3401_v0 = vmax.f32 %v3399_v35, %v3400_v56  ;;  %v2649_v6 = vmax.f32 %v2647_v42, %v2648_v57  ;;  %v3417_v8 = vmax.f32 %v3415_v44, %v3416_v59  ;;  %v7386_v24 = vpop.f32.mrb[30].mxu0  ;;  %v7388_v12 = vpop.f32.mrb[30].mxu1 }
 0x13c   : > { %9264 = vst [vmem:[#allocation4_spill] sm:$0xff] %v7386_v24  ;;  %9265 = vst [vmem:[#allocation5_spill] sm:$0xff] %v7388_v12  ;;  %v7390_v25 = vunpack.c.l.b16 %v6194_v36  ;;  %v7392_v28 = vunpack.c.l.b16 %v6322_v17  ;;  %v2635_v5 = vmax.f32 %v2333_v47, %v2634_v23  ;;  %v3403_v29 = vmax.f32 %v2461_v27, %v3402_v39  ;;  %v7394_v30 = vpop.f32.mrb[31].mxu0  ;;  %v7396_v33 = vpop.f32.mrb[31].mxu1 }
 0x13d   : > { %9266 = vst [vmem:[#allocation6_spill] sm:$0xff] %v7394_v30  ;;  %9267 = vst [vmem:[#allocation7_spill] sm:$0xff] %v7396_v33  ;;  %v6192_v19 = vpack.c.bf16 %v2633_v18, %v2633_v18  ;;  %v6320_v53 = vpack.c.bf16 %v3401_v0, %v3401_v0  ;;  %v2650_v34 = vrot.slane %v2649_v6, 1  ;;  %v3418_v35 = vrot.slane %v3417_v8, 1 }
 0x13e   : > { %v2636_v42 = vrot.slane %v2635_v5, 2  ;;  %v3404_v44 = vrot.slane %v3403_v29, 2  ;;  %v1358_v50 = vadd.f32 %v7262_v62, %v7194_v54  ;;  %v1870_v56 = vadd.f32 %v7264_v38, %v7194_v54 }
 0x13f   : > { %v5148_v57 = vunpack.c.l.b16 %v6192_v19  ;;  %v5276_v59 = vunpack.c.l.b16 %v6320_v53  ;;  %v2651_v23 = vmax.f32 %v2649_v6, %v2650_v34  ;;  %v3419_v47 = vmax.f32 %v3417_v8, %v3418_v35 }
 0x140   : > { %v2637_v27 = vmax.f32 %v2635_v5, %v2636_v42  ;;  %v3405_v36 = vmax.f32 %v3403_v29, %v3404_v44  ;;  %v2338_v17 = vmax.f32 %v1358_v50, 0.0  ;;  %v2466_v39 = vmax.f32 %v1870_v56, 0.0 }
 0x141   : > { %v6195_v18 = vpack.c.bf16 %v2651_v23, %v2651_v23  ;;  %v6323_v0 = vpack.c.bf16 %v3419_v47, %v3419_v47  ;;  %v1350_v33 = vadd.f32 %v7194_v54, %v7268_v2  ;;  %v1862_v30 = vadd.f32 %v7194_v54, %v7270_v46  ;;  %v7406_v62 = vpop.f32.mrb[32].mxu0  ;;  %v7408_v12 = vpop.f32.mrb[32].mxu1 }
 0x142   : > { %9268 = vst [vmem:[#allocation8_spill] sm:$0xff] %v7406_v62  ;;  %9269 = vst [vmem:[#allocation9_spill] sm:$0xff] %v7408_v12  ;;  %v2638_v38 = vrot.slane %v2637_v27, 1  ;;  %v3406_v19 = vrot.slane %v3405_v36, 1  ;;  %v2664_v6 = vrot.slane %v2338_v17, 4  ;;  %v3432_v8 = vrot.slane %v2466_v39, 4 }
 0x143   : > { %v7410_v5 = vpop.f32.mrb[33].mxu0  ;;  %v7412_v29 = vpop.f32.mrb[33].mxu1  ;;  %v5151_v53 = vunpack.c.l.b16 %v6195_v18  ;;  %v5279_v34 = vunpack.c.l.b16 %v6323_v0  ;;  %v2336_v35 = vmax.f32 %v1350_v33, 0.0  ;;  %v2464_v42 = vmax.f32 %v1862_v30, 0.0 }
 0x144   : > { %9270 = vst [vmem:[#allocation10_spill] sm:$0xff] %v7410_v5  ;;  %9271 = vst [vmem:[#allocation11_spill] sm:$0xff] %v7412_v29  ;;  %v7414_v2 = vpop.f32.mrb[34].mxu0  ;;  %v7416_v44 = vpop.f32.mrb[34].mxu1  ;;  %v2639_v46 = vmax.f32 %v2637_v27, %v2638_v38  ;;  %v3407_v50 = vmax.f32 %v3405_v36, %v3406_v19  ;;  %v2665_v56 = vmax.f32 %v2338_v17, %v2664_v6 }
 0x145   : > { %9272 = vst [vmem:[#allocation12_spill] sm:$0xff] %v7414_v2  ;;  %9273 = vst [vmem:[#allocation13_spill] sm:$0xff] %v7416_v44  ;;  %v3433_v23 = vmax.f32 %v2466_v39, %v3432_v8  ;;  %v7418_v47 = vpop.f32.mrb[35].mxu0  ;;  %v7420_v12 = vpop.f32.mrb[35].mxu1  ;;  %v2652_v62 = vrot.slane %v2336_v35, 4  ;;  %v3420_v5 = vrot.slane %v2464_v42, 4  ;;  %v1361_v18 = vadd.f32 %v7280_v9, %v7194_v54 }
 0x146   : > { %9274 = vst [vmem:[#allocation14_spill] sm:$0xff] %v7418_v47  ;;  %9275 = vst [vmem:[#allocation15_spill] sm:$0xff] %v7420_v12  ;;  %v1873_v30 = vadd.f32 %v7282_v10, %v7194_v54  ;;  %v6193_v33 = vpack.c.bf16 %v2639_v46, %v2639_v46  ;;  %v6321_v0 = vpack.c.bf16 %v3407_v50, %v3407_v50  ;;  %v2666_v2 = vrot.slane %v2665_v56, 2 }
 0x147   : > { %v3434_v44 = vrot.slane %v3433_v23, 2  ;;  %v2653_v27 = vmax.f32 %v2336_v35, %v2652_v62  ;;  %v3421_v36 = vmax.f32 %v2464_v42, %v3420_v5  ;;  %v2339_v17 = vmax.f32 %v1361_v18, 0.0 }
 0x148   : > { %v2467_v39 = vmax.f32 %v1873_v30, 0.0  ;;  %v5149_v38 = vunpack.c.l.b16 %v6193_v33  ;;  %v5277_v19 = vunpack.c.l.b16 %v6321_v0  ;;  %v2667_v6 = vmax.f32 %v2665_v56, %v2666_v2 }
 0x149   : > { %v3435_v8 = vmax.f32 %v3433_v23, %v3434_v44  ;;  %v2654_v12 = vrot.slane %v2653_v27, 2  ;;  %v3422_v47 = vrot.slane %v3421_v36, 2  ;;  %v2670_v29 = vrot.slane %v2339_v17, 4  ;;  %v7426_v9 = vpop.f32.mrb[36].mxu0  ;;  %v7428_v43 = vpop.f32.mrb[36].mxu1 }
 0x14a   : > { %v3438_v24 = vrot.slane %v2467_v39, 4  ;;  %v5410_v10 = vsel %vm5396_vm0, %v5149_v38, %v5148_v57  ;;  %v5522_v46 = vsel %vm5396_vm0, %v5277_v19, %v5276_v59  ;;  %v2668_v62 = vrot.slane %v2667_v6, 1  ;;  %v7432_v35 = vpop.f32.mrb[37].mxu0  ;;  %v7434_v42 = vpop.f32.mrb[37].mxu1 }
 0x14b   : > { %v3436_v5 = vrot.slane %v3435_v8, 1  ;;  %9276 = vst [vmem:[#allocation16_spill] sm:$0xff] %v7434_v42  ;;  %v5411_v2 = vsel %vm5398_vm1, %v7390_v25, %v5410_v10  ;;  %v5523_v44 = vsel %vm5398_vm1, %v7392_v28, %v5522_v46  ;;  %v2655_v50 = vmax.f32 %v2653_v27, %v2654_v12  ;;  %v7440_v23 = vpop.f32.mrb[38].mxu0  ;;  %v7442_v18 = vpop.f32.mrb[38].mxu1 }
 0x14c   : > { %v3423_v56 = vmax.f32 %v3421_v36, %v3422_v47  ;;  %v2669_v57 = vmax.f32 %v2667_v6, %v2668_v62  ;;  %v5412_v30 = vsel %vm5400_vm2, %v5151_v53, %v5411_v2  ;;  %v5524_v33 = vsel %vm5400_vm2, %v5279_v34, %v5523_v44  ;;  %v7446_v0 = vpop.f32.mrb[39].mxu0 }
 0x14d   : > { %v3437_v59 = vmax.f32 %v3435_v8, %v3436_v5  ;;  %v2656_v38 = vrot.slane %v2655_v50, 1  ;;  %v2671_v25 = vmax.f32 %v2339_v17, %v2670_v29  ;;  %v3439_v10 = vmax.f32 %v2467_v39, %v3438_v24 }
 0x14e   : > { %v3424_v19 = vrot.slane %v3423_v56, 1  ;;  %v6198_v42 = vpack.c.bf16 %v2669_v57, %v2669_v57  ;;  %v1353_v12 = vadd.f32 %v7194_v54, %v7286_v21  ;;  %v1865_v47 = vadd.f32 %v7194_v54, %v7288_v22 }
 0x14f   : > { %v6326_v28 = vpack.c.bf16 %v3437_v59, %v3437_v59  ;;  %v2657_v27 = vmax.f32 %v2655_v50, %v2656_v38  ;;  %v2672_v6 = vrot.slane %v2671_v25, 2  ;;  %v3440_v53 = vrot.slane %v3439_v10, 2 }
 0x150   : > { %v3425_v36 = vmax.f32 %v3423_v56, %v3424_v19  ;;  %v7452_v8 = vunpack.c.l.b16 %v6198_v42  ;;  %v2337_v46 = vmax.f32 %v1353_v12, 0.0  ;;  %v2465_v62 = vmax.f32 %v1865_v47, 0.0  ;;  %v7462_v47 = vpop.f32.mrb[39].mxu1 }
 0x151   : > { %v7454_v34 = vunpack.c.l.b16 %v6326_v28  ;;  %v6196_v29 = vpack.c.bf16 %v2657_v27, %v2657_v27  ;;  %v2673_v17 = vmax.f32 %v2671_v25, %v2672_v6  ;;  %v3441_v39 = vmax.f32 %v3439_v10, %v3440_v53 }
 0x152   : > { %v6324_v24 = vpack.c.bf16 %v3425_v36, %v3425_v36  ;;  %v2658_v5 = vrot.slane %v2337_v46, 4  ;;  %v3426_v2 = vrot.slane %v2465_v62, 4  ;;  %v1374_v21 = vadd.f32 %v7294_v51, %v7194_v54 }
 0x153   : > { %v1886_v22 = vadd.f32 %v7296_v52, %v7194_v54  ;;  %v5152_v44 = vunpack.c.l.b16 %v6196_v29  ;;  %v2674_v42 = vrot.slane %v2673_v17, 1  ;;  %v3442_v56 = vrot.slane %v3441_v39, 1 }
 0x154   : > { %v5280_v50 = vunpack.c.l.b16 %v6324_v24  ;;  %v2659_v57 = vmax.f32 %v2337_v46, %v2658_v5  ;;  %v3427_v59 = vmax.f32 %v2465_v62, %v3426_v2  ;;  %v2342_v38 = vmax.f32 %v1374_v21, 0.0 }
 0x155   : > { %v2470_v19 = vmax.f32 %v1886_v22, 0.0  ;;  %v5413_v28 = vsel %vm5402_vm3, %v5152_v44, %v5412_v30  ;;  %v2675_v10 = vmax.f32 %v2673_v17, %v2674_v42  ;;  %v3443_v12 = vmax.f32 %v3441_v39, %v3442_v56  ;;  %v7468_v42 = vpop.f32.mrb[40].mxu0  ;;  %v7470_v56 = vpop.f32.mrb[40].mxu1 }
 0x156   : > { %v5525_v25 = vsel %vm5402_vm3, %v5280_v50, %v5524_v33  ;;  %v2660_v51 = vrot.slane %v2659_v57, 2  ;;  %v3428_v27 = vrot.slane %v3427_v59, 2  ;;  %v2688_v36 = vrot.slane %v2342_v38, 4  ;;  %9277 = vst [vmem:[#allocation17_spill] sm:$0xff] %v7468_v42  ;;  %9278 = vst [vmem:[#allocation18_spill] sm:$0xff] %v7470_v56 }
 0x157   : > { %v3456_v52 = vrot.slane %v2470_v19, 4  ;;  %v6199_v6 = vpack.c.bf16 %v2675_v10, %v2675_v10  ;;  %v6327_v53 = vpack.c.bf16 %v3443_v12, %v3443_v12  ;;  %v1366_v46 = vadd.f32 %v7194_v54, %v7300_v60 }
 0x158   : > { %v1878_v62 = vadd.f32 %v7194_v54, %v7302_v37  ;;  %v2661_v29 = vmax.f32 %v2659_v57, %v2660_v51  ;;  %v3429_v30 = vmax.f32 %v3427_v59, %v3428_v27  ;;  %v2689_v24 = vmax.f32 %v2342_v38, %v2688_v36  ;;  %v7476_v59 = vpop.f32.mrb[41].mxu0  ;;  %v7478_v38 = vpop.f32.mrb[41].mxu1 }
 0x159   : > { %v3457_v33 = vmax.f32 %v2470_v19, %v3456_v52  ;;  %v5155_v17 = vunpack.c.l.b16 %v6199_v6  ;;  %v5283_v39 = vunpack.c.l.b16 %v6327_v53  ;;  %v2340_v5 = vmax.f32 %v1366_v46, 0.0  ;;  %9279 = vst [vmem:[#allocation19_spill] sm:$0xff] %v7476_v59  ;;  %9280 = vst [vmem:[#allocation20_spill] sm:$0xff] %v7478_v38  ;;  %v7480_v36 = vpop.f32.mrb[42].mxu0  ;;  %v7482_v52 = vpop.f32.mrb[42].mxu1 }
 0x15a   : > { %v2468_v2 = vmax.f32 %v1878_v62, 0.0  ;;  %v2662_v21 = vrot.slane %v2661_v29, 1  ;;  %v3430_v22 = vrot.slane %v3429_v30, 1  ;;  %v2690_v44 = vrot.slane %v2689_v24, 2 }
 0x15b   : > { %v3458_v50 = vrot.slane %v3457_v33, 2  ;;  %v2676_v60 = vrot.slane %v2340_v5, 4  ;;  %v1377_v37 = vadd.f32 %v7304_v1, %v7194_v54  ;;  %v1889_v57 = vadd.f32 %v7306_v3, %v7194_v54  ;;  %v7484_v1 = vpop.f32.mrb[43].mxu0 }
 0x15c   : > { %v3444_v10 = vrot.slane %v2468_v2, 4  ;;  %v2663_v19 = vmax.f32 %v2661_v29, %v2662_v21  ;;  %v3431_v12 = vmax.f32 %v3429_v30, %v3430_v22  ;;  %v2691_v51 = vmax.f32 %v2689_v24, %v2690_v44 }
 0x15d   : > { %v3459_v27 = vmax.f32 %v3457_v33, %v3458_v50  ;;  %v2677_v6 = vmax.f32 %v2340_v5, %v2676_v60  ;;  %v2343_v46 = vmax.f32 %v1377_v37, 0.0  ;;  %v2471_v62 = vmax.f32 %v1889_v57, 0.0 }
 0x15e   : > { %v3445_v53 = vmax.f32 %v2468_v2, %v3444_v10  ;;  %v6197_v56 = vpack.c.bf16 %v2663_v19, %v2663_v19  ;;  %v6325_v54 = vpack.c.bf16 %v3431_v12, %v3431_v12  ;;  %v2692_v3 = vrot.slane %v2691_v51, 1 }
 0x15f   : > { %v3460_v59 = vrot.slane %v3459_v27, 1  ;;  %v2678_v42 = vrot.slane %v2677_v6, 2  ;;  %v2694_v29 = vrot.slane %v2343_v46, 4  ;;  %v3462_v30 = vrot.slane %v2471_v62, 4 }
 0x160   : > { %v3446_v38 = vrot.slane %v3445_v53, 2  ;;  %v5153_v24 = vunpack.c.l.b16 %v6197_v56  ;;  %v5281_v33 = vunpack.c.l.b16 %v6325_v54  ;;  %v2693_v21 = vmax.f32 %v2691_v51, %v2692_v3 }
 0x161   : > { %v3461_v22 = vmax.f32 %v3459_v27, %v3460_v59  ;;  %v2679_v44 = vmax.f32 %v2677_v6, %v2678_v42  ;;  %v2695_v5 = vmax.f32 %v2343_v46, %v2694_v29  ;;  %v3463_v2 = vmax.f32 %v2471_v62, %v3462_v30 }
 0x162   : > { %v3447_v50 = vmax.f32 %v3445_v53, %v3446_v38  ;;  %v5414_v60 = vsel %vm5404_vm4, %v5153_v24, %v5413_v28  ;;  %v5526_v10 = vsel %vm5404_vm4, %v5281_v33, %v5525_v25  ;;  %v6202_v37 = vpack.c.bf16 %v2693_v21, %v2693_v21 }
 0x163   : > { %v6330_v57 = vpack.c.bf16 %v3461_v22, %v3461_v22  ;;  %v5415_v19 = vsel %vm5406_vm5, %v7452_v8, %v5414_v60  ;;  %v5527_v56 = vsel %vm5406_vm5, %v7454_v34, %v5526_v10  ;;  %v2680_v12 = vrot.slane %v2679_v44, 1  ;;  %v7497_v8 = vld [vmem:[%s9260_s2] ss:$0 sm:$0xff] }
 0x164   : > { %v3448_v59 = vrot.slane %v3447_v50, 1  ;;  %v5416_v42 = vsel %vm5408_vm6, %v5155_v17, %v5415_v19  ;;  %v5528_v38 = vsel %vm5408_vm6, %v5283_v39, %v5527_v56  ;;  %v2696_v6 = vrot.slane %v2695_v5, 2 }
 0x165   : > { %v5628_v51 = vpack.c.b16 %v5416_v42, %v5416_v42  ;;  %v5644_v28 = vpack.c.b16 %v5528_v38, %v5528_v38  ;;  %v2681_v27 = vmax.f32 %v2679_v44, %v2680_v12  ;;  %v3464_v53 = vrot.slane %v3463_v2, 2  ;;  %v7517_v38 = vpop.f32.mrb[43].mxu1 }
 0x166   : > { %v3449_v25 = vmax.f32 %v3447_v50, %v3448_v59  ;;  %v1369_v34 = vadd.f32 %v7497_v8, %v7308_v14  ;;  %v1881_v46 = vadd.f32 %v7497_v8, %v7310_v15  ;;  %v7505_v17 = vunpack.c.l.b16 %v6202_v37 }
 0x167   : > { %5692 = vst [vmem:[%s7360_s13 + $0x4] sm:$0xf] %v5628_v51  ;;  %5708 = vst [vmem:[%s7360_s13 + $0x44] sm:$0xf] %v5644_v28  ;;  %v7507_v39 = vunpack.c.l.b16 %v6330_v57  ;;  %v1390_v62 = vadd.f32 %v7497_v8, %v7312_v48  ;;  %v1902_v54 = vadd.f32 %v7497_v8, %v7314_v49  ;;  %v2697_v3 = vmax.f32 %v2695_v5, %v2696_v6 }
 0x168   : > { %v3465_v29 = vmax.f32 %v3463_v2, %v3464_v53  ;;  %v2341_v30 = vmax.f32 %v1369_v34, 0.0  ;;  %v2469_v24 = vmax.f32 %v1881_v46, 0.0  ;;  %v6200_v14 = vpack.c.bf16 %v2681_v27, %v2681_v27 }
 0x169   : > { %v6328_v33 = vpack.c.bf16 %v3449_v25, %v3449_v25  ;;  %v2346_v21 = vmax.f32 %v1390_v62, 0.0  ;;  %v2474_v15 = vmax.f32 %v1902_v54, 0.0  ;;  %v2698_v22 = vrot.slane %v2697_v3, 1 }
 0x16a   : > { %v3466_v44 = vrot.slane %v3465_v29, 1  ;;  %v2682_v50 = vrot.slane %v2341_v30, 4  ;;  %v3450_v60 = vrot.slane %v2469_v24, 4  ;;  %v1382_v48 = vadd.f32 %v7497_v8, %v7320_v31 }
 0x16b   : > { %v2712_v10 = vrot.slane %v2346_v21, 4  ;;  %v3480_v37 = vrot.slane %v2474_v15, 4  ;;  %v1894_v49 = vadd.f32 %v7497_v8, %v7322_v32  ;;  %v2699_v5 = vmax.f32 %v2697_v3, %v2698_v22  ;;  %v7523_v22 = vpop.f32.mrb[44].mxu0 }
 0x16c   : > { %v3467_v2 = vmax.f32 %v3465_v29, %v3466_v44  ;;  %v2683_v57 = vmax.f32 %v2341_v30, %v2682_v50  ;;  %v3451_v19 = vmax.f32 %v2469_v24, %v3450_v60  ;;  %v2344_v59 = vmax.f32 %v1382_v48, 0.0  ;;  %v7525_v44 = vpop.f32.mrb[44].mxu1  ;;  %v7527_v48 = vpop.f32.mrb[45].mxu0 }
 0x16d   : > { %v2713_v56 = vmax.f32 %v2346_v21, %v2712_v10  ;;  %v3481_v12 = vmax.f32 %v2474_v15, %v3480_v37  ;;  %v2472_v42 = vmax.f32 %v1894_v49, 0.0  ;;  %v5156_v51 = vunpack.c.l.b16 %v6200_v14  ;;  %v7529_v49 = vpop.f32.mrb[45].mxu1 }
 0x16e   : > { %v5284_v28 = vunpack.c.l.b16 %v6328_v33  ;;  %v2684_v27 = vrot.slane %v2683_v57, 2  ;;  %v3452_v25 = vrot.slane %v3451_v19, 2  ;;  %v2700_v31 = vrot.slane %v2344_v59, 4  ;;  %9281 = vst [vmem:[#allocation21_spill] sm:$0xff] %v7529_v49 }
 0x16f   : > { %v2714_v6 = vrot.slane %v2713_v56, 2  ;;  %v3482_v53 = vrot.slane %v3481_v12, 2  ;;  %v3468_v34 = vrot.slane %v2472_v42, 4  ;;  %v6203_v46 = vpack.c.bf16 %v2699_v5, %v2699_v5 }
 0x170   : > { %v6331_v32 = vpack.c.bf16 %v3467_v2, %v3467_v2  ;;  %v2685_v62 = vmax.f32 %v2683_v57, %v2684_v27  ;;  %v3453_v54 = vmax.f32 %v3451_v19, %v3452_v25  ;;  %v2701_v30 = vmax.f32 %v2344_v59, %v2700_v31 }
 0x171   : > { %v2715_v3 = vmax.f32 %v2713_v56, %v2714_v6  ;;  %v3483_v29 = vmax.f32 %v3481_v12, %v3482_v53  ;;  %v3469_v24 = vmax.f32 %v2472_v42, %v3468_v34  ;;  %v1393_v14 = vadd.f32 %v7497_v8, %v7328_v45  ;;  %v7531_v45 = vpop.f32.mrb[46].mxu0  ;;  %v7533_v56 = vpop.f32.mrb[46].mxu1 }
 0x172   : > { %v2686_v21 = vrot.slane %v2685_v62, 1  ;;  %v3454_v15 = vrot.slane %v3453_v54, 1  ;;  %v1905_v33 = vadd.f32 %v7497_v8, %v7330_v4  ;;  %v2702_v10 = vrot.slane %v2701_v30, 2  ;;  %9282 = vst [vmem:[#allocation22_spill] sm:$0xff] %v7531_v45  ;;  %9283 = vst [vmem:[#allocation23_spill] sm:$0xff] %v7533_v56  ;;  %v7535_v27 = vpop.f32.mrb[47].mxu0 }
 0x173   : > { %v2716_v50 = vrot.slane %v2715_v3, 1  ;;  %v3484_v60 = vrot.slane %v3483_v29, 1  ;;  %v3470_v37 = vrot.slane %v3469_v24, 2  ;;  %v2347_v57 = vmax.f32 %v1393_v14, 0.0 }
 0x174   : > { %v2687_v5 = vmax.f32 %v2685_v62, %v2686_v21  ;;  %v3455_v2 = vmax.f32 %v3453_v54, %v3454_v15  ;;  %v2475_v19 = vmax.f32 %v1905_v33, 0.0  ;;  %v2703_v59 = vmax.f32 %v2701_v30, %v2702_v10 }
 0x175   : > { %v2717_v4 = vmax.f32 %v2715_v3, %v2716_v50  ;;  %v3485_v12 = vmax.f32 %v3483_v29, %v3484_v60  ;;  %v3471_v42 = vmax.f32 %v3469_v24, %v3470_v37  ;;  %v2718_v53 = vrot.slane %v2347_v57, 4 }
 0x176   : > { %v6201_v25 = vpack.c.bf16 %v2687_v5, %v2687_v5  ;;  %v6329_v6 = vpack.c.bf16 %v3455_v2, %v3455_v2  ;;  %v3486_v31 = vrot.slane %v2475_v19, 4  ;;  %v5159_v34 = vunpack.c.l.b16 %v6203_v46 }
 0x177   : > { %v5287_v49 = vunpack.c.l.b16 %v6331_v32  ;;  %v2704_v62 = vrot.slane %v2703_v59, 1  ;;  %v3472_v54 = vrot.slane %v3471_v42, 1  ;;  %v2719_v14 = vmax.f32 %v2347_v57, %v2718_v53 }
 0x178   : > { %v5157_v21 = vunpack.c.l.b16 %v6201_v25  ;;  %v5285_v15 = vunpack.c.l.b16 %v6329_v6  ;;  %v3487_v33 = vmax.f32 %v2475_v19, %v3486_v31  ;;  %v6206_v45 = vpack.c.bf16 %v2717_v4, %v2717_v4 }
 0x179   : > { %v6334_v56 = vpack.c.bf16 %v3485_v12, %v3485_v12  ;;  %v2705_v3 = vmax.f32 %v2703_v59, %v2704_v62  ;;  %v3473_v29 = vmax.f32 %v3471_v42, %v3472_v54  ;;  %v2720_v50 = vrot.slane %v2719_v14, 2 }
 0x17a   : > { %v5417_v30 = vsel %vm5396_vm0, %v5157_v21, %v5156_v51  ;;  %v5529_v24 = vsel %vm5396_vm0, %v5285_v15, %v5284_v28  ;;  %v3488_v60 = vrot.slane %v3487_v33, 2  ;;  %v1385_v28 = vadd.f32 %v7497_v8, %v7332_v11  ;;  %v7567_v21 = vpop.f32.mrb[47].mxu1 }
 0x17b   : > { %v5418_v46 = vsel %vm5398_vm1, %v7505_v17, %v5417_v30  ;;  %v5530_v32 = vsel %vm5398_vm1, %v7507_v39, %v5529_v24  ;;  %v6204_v10 = vpack.c.bf16 %v2705_v3, %v2705_v3  ;;  %v6332_v37 = vpack.c.bf16 %v3473_v29, %v3473_v29 }
 0x17c   : > { %v5419_v5 = vsel %vm5400_vm2, %v5159_v34, %v5418_v46  ;;  %v5531_v2 = vsel %vm5400_vm2, %v5287_v49, %v5530_v32  ;;  %v2721_v57 = vmax.f32 %v2719_v14, %v2720_v50  ;;  %v3489_v19 = vmax.f32 %v3487_v33, %v3488_v60 }
 0x17d   : > { %v5160_v4 = vunpack.c.l.b16 %v6204_v10  ;;  %v5288_v51 = vunpack.c.l.b16 %v6332_v37  ;;  %v1897_v12 = vadd.f32 %v7497_v8, %v7334_v16  ;;  %v1406_v39 = vadd.f32 %v7497_v8, %v7347_v55 }
 0x17e   : > { %v2722_v17 = vrot.slane %v2721_v57, 1  ;;  %v3490_v59 = vrot.slane %v3489_v19, 1  ;;  %v1918_v42 = vadd.f32 %v7497_v8, %v7349_v26  ;;  %v2345_v6 = vmax.f32 %v1385_v28, 0.0 }
 0x17f   : > { %v7554_v49 = vsel %vm5402_vm3, %v5160_v4, %v5419_v5  ;;  %v7557_v25 = vsel %vm5402_vm3, %v5288_v51, %v5531_v2  ;;  %v2473_v53 = vmax.f32 %v1897_v12, 0.0  ;;  %v2350_v16 = vmax.f32 %v1406_v39, 0.0  ;;  %v7583_v4 = vpop.f32.mrb[48].mxu1 }
 0x180   : > { %v7559_v11 = vmax.f32 %v2721_v57, %v2722_v17  ;;  %v7561_v31 = vmax.f32 %v3489_v19, %v3490_v59  ;;  %v2478_v34 = vmax.f32 %v1918_v42, 0.0  ;;  %v2706_v62 = vrot.slane %v2345_v6, 4  ;;  %v7581_v19 = vpop.f32.mrb[48].mxu0  ;;  %9284 = vst [vmem:[#allocation24_spill] sm:$0xff] %v7583_v4  ;;  %v7587_v39 = vpop.f32.mrb[49].mxu1 }
 0x181   : > { %v3474_v54 = vrot.slane %v2473_v53, 4  ;;  %v1398_v55 = vadd.f32 %v7497_v8, %v7353_v58  ;;  %v1910_v26 = vadd.f32 %v7497_v8, %v7355_v63  ;;  %v7569_v15 = vunpack.c.l.b16 %v6206_v45  ;;  %v7585_v59 = vpop.f32.mrb[49].mxu0  ;;  %9286 = vst [vmem:[#allocation26_spill] sm:$0xff] %v7587_v39 }
 0x182   : > { %v7571_v14 = vunpack.c.l.b16 %v6334_v56  ;;  %v2736_v33 = vrot.slane %v2350_v16, 4  ;;  %v3504_v3 = vrot.slane %v2478_v34, 4  ;;  %v2707_v29 = vmax.f32 %v2345_v6, %v2706_v62  ;;  %9285 = vst [vmem:[#allocation25_spill] sm:$0xff] %v7585_v59 }
 0x183   : > { %v3475_v30 = vmax.f32 %v2473_v53, %v3474_v54  ;;  %v2348_v24 = vmax.f32 %v1398_v55, 0.0  ;;  %v2476_v50 = vmax.f32 %v1910_v26, 0.0  ;;  %v6207_v60 = vpack.c.bf16 %v7559_v11, %v7559_v11 }
 0x184   : > { %v6335_v58 = vpack.c.bf16 %v7561_v31, %v7561_v31  ;;  %v2737_v46 = vmax.f32 %v2350_v16, %v2736_v33  ;;  %v3505_v63 = vmax.f32 %v2478_v34, %v3504_v3  ;;  %v2708_v32 = vrot.slane %v2707_v29, 2  ;;  %v7591_v31 = vpop.f32.mrb[50].mxu1 }
 0x185   : > { %v3476_v10 = vrot.slane %v3475_v30, 2  ;;  %v2724_v45 = vrot.slane %v2348_v24, 4  ;;  %v3492_v37 = vrot.slane %v2476_v50, 4  ;;  %v1409_v2 = vadd.f32 %v7497_v8, %v7364_v41  ;;  %v7589_v41 = vpop.f32.mrb[50].mxu0  ;;  %9288 = vst [vmem:[#allocation28_spill] sm:$0xff] %v7591_v31 }
 0x186   : > { %v2738_v56 = vrot.slane %v2737_v46, 2  ;;  %v3506_v5 = vrot.slane %v3505_v63, 2  ;;  %v1921_v57 = vadd.f32 %v7497_v8, %v7366_v7  ;;  %v2709_v51 = vmax.f32 %v2707_v29, %v2708_v32  ;;  %9287 = vst [vmem:[#allocation27_spill] sm:$0xff] %v7589_v41  ;;  %v7593_v54 = vpop.f32.mrb[51].mxu0 }
 0x187   : > { %v3477_v28 = vmax.f32 %v3475_v30, %v3476_v10  ;;  %v2725_v12 = vmax.f32 %v2348_v24, %v2724_v45  ;;  %v3493_v17 = vmax.f32 %v2476_v50, %v3492_v37  ;;  %v2351_v53 = vmax.f32 %v1409_v2, 0.0  ;;  %9289 = vst [vmem:[#allocation29_spill] sm:$0xff] %v7593_v54 }
 0x188   : > { %v2739_v42 = vmax.f32 %v2737_v46, %v2738_v56  ;;  %v3507_v6 = vmax.f32 %v3505_v63, %v3506_v5  ;;  %v2479_v11 = vmax.f32 %v1921_v57, 0.0  ;;  %v2710_v7 = vrot.slane %v2709_v51, 1 }
 0x189   : > { %v3478_v16 = vrot.slane %v3477_v28, 1  ;;  %v2726_v34 = vrot.slane %v2725_v12, 2  ;;  %v3494_v62 = vrot.slane %v3493_v17, 2  ;;  %v2742_v33 = vrot.slane %v2351_v53, 4 }
 0x18a   : > { %v2740_v55 = vrot.slane %v2739_v42, 1  ;;  %v3508_v26 = vrot.slane %v3507_v6, 1  ;;  %v3510_v3 = vrot.slane %v2479_v11, 4  ;;  %v2711_v29 = vmax.f32 %v2709_v51, %v2710_v7 }
 0x18b   : > { %v3479_v30 = vmax.f32 %v3477_v28, %v3478_v16  ;;  %v2727_v24 = vmax.f32 %v2725_v12, %v2726_v34  ;;  %v3495_v50 = vmax.f32 %v3493_v17, %v3494_v62  ;;  %v2743_v32 = vmax.f32 %v2351_v53, %v2742_v33 }
 0x18c   : > { %v2741_v46 = vmax.f32 %v2739_v42, %v2740_v55  ;;  %v3509_v63 = vmax.f32 %v3507_v6, %v3508_v26  ;;  %v3511_v10 = vmax.f32 %v2479_v11, %v3510_v3  ;;  %v6205_v45 = vpack.c.bf16 %v2711_v29, %v2711_v29  ;;  %v9291_v29 = vld [vmem:[#allocation3_spill] sm:$0xff] }
 0x18d   : > { %v6333_v37 = vpack.c.bf16 %v3479_v30, %v3479_v30  ;;  %v2728_v56 = vrot.slane %v2727_v24, 1  ;;  %v3496_v5 = vrot.slane %v3495_v50, 1  ;;  %v2744_v31 = vrot.slane %v2743_v32, 2 }
 0x18e   : > { %v6210_v2 = vpack.c.bf16 %v2741_v46, %v2741_v46  ;;  %v6338_v57 = vpack.c.bf16 %v3509_v63, %v3509_v63  ;;  %v3512_v54 = vrot.slane %v3511_v10, 2  ;;  %v5161_v41 = vunpack.c.l.b16 %v6205_v45 }
 0x18f   : > { %v5289_v39 = vunpack.c.l.b16 %v6333_v37  ;;  %v2729_v59 = vmax.f32 %v2727_v24, %v2728_v56  ;;  %v3497_v4 = vmax.f32 %v3495_v50, %v3496_v5  ;;  %v5163_v51 = vunpack.c.l.b16 %v6207_v60 }
 0x190   : > { %v5291_v28 = vunpack.c.l.b16 %v6335_v58  ;;  %v2745_v12 = vmax.f32 %v2743_v32, %v2744_v31  ;;  %v3513_v17 = vmax.f32 %v3511_v10, %v3512_v54  ;;  %v5421_v42 = vsel %vm5404_vm4, %v5161_v41, %v7554_v49 }
 0x191   : > { %v5533_v6 = vsel %vm5404_vm4, %v5289_v39, %v7557_v25  ;;  %v6208_v53 = vpack.c.bf16 %v2729_v59, %v2729_v59  ;;  %v6336_v11 = vpack.c.bf16 %v3497_v4, %v3497_v4  ;;  %v5422_v7 = vsel %vm5406_vm5, %v7569_v15, %v5421_v42  ;;  %v9290_v39 = vld [vmem:[#allocation2_spill] sm:$0xff] }
 0x192   : > { %v5534_v16 = vsel %vm5406_vm5, %v7571_v14, %v5533_v6  ;;  %v2746_v60 = vrot.slane %v2745_v12, 1  ;;  %v3514_v58 = vrot.slane %v3513_v17, 1  ;;  %v5423_v31 = vsel %vm5408_vm6, %v5163_v51, %v5422_v7 }
 0x193   : > { %v5535_v34 = vsel %vm5408_vm6, %v5291_v28, %v5534_v16  ;;  %v7605_v49 = vunpack.c.l.b16 %v6210_v2  ;;  %v7607_v41 = vunpack.c.l.b16 %v6338_v57  ;;  %v5629_v25 = vpack.c.b16 %v5423_v31, %v5423_v31  ;;  %v9292_v57 = vld [vmem:[#allocation4_spill] sm:$0xff]  ;;  %v9293_v28 = vld [vmem:[#allocation5_spill] sm:$0xff] }
 0x194   : > { %v5645_v4 = vpack.c.b16 %v5535_v34, %v5535_v34  ;;  %v7609_v59 = vmax.f32 %v2745_v12, %v2746_v60  ;;  %v7611_v15 = vmax.f32 %v3513_v17, %v3514_v58  ;;  %v1401_v14 = vadd.f32 %v7497_v8, %v7368_v20 }
 0x195   : > { %v1913_v62 = vadd.f32 %v7497_v8, %v9290_v39  ;;  %v1422_v54 = vadd.f32 %v7497_v8, %v7378_v61  ;;  %v1934_v55 = vadd.f32 %v7497_v8, %v7380_v13  ;;  %5693 = vst [vmem:[%s7360_s13 + $0x8] sm:$0xf] %v5629_v25  ;;  %v7623_v26 = vunpack.c.l.b16 %v6208_v53 }
 0x196   : > { %5709 = vst [vmem:[%s7360_s13 + $0x48] sm:$0xf] %v5645_v4  ;;  %v7625_v33 = vunpack.c.l.b16 %v6336_v11  ;;  %v1414_v3 = vadd.f32 %v7497_v8, %v7382_v40  ;;  %v1926_v20 = vadd.f32 %v7497_v8, %v9291_v29  ;;  %v2349_v30 = vmax.f32 %v1401_v14, 0.0  ;;  %v7635_v40 = vpop.f32.mrb[51].mxu1 }
 0x197   : > { %v2477_v24 = vmax.f32 %v1913_v62, 0.0  ;;  %v2354_v50 = vmax.f32 %v1422_v54, 0.0  ;;  %v2482_v46 = vmax.f32 %v1934_v55, 0.0  ;;  %v1425_v51 = vadd.f32 %v7497_v8, %v9292_v57  ;;  %v7641_v54 = vpop.f32.mrb[52].mxu0  ;;  %v7643_v55 = vpop.f32.mrb[52].mxu1 }
 0x198   : > { %v2352_v63 = vmax.f32 %v1414_v3, 0.0  ;;  %v2480_v32 = vmax.f32 %v1926_v20, 0.0  ;;  %v2730_v10 = vrot.slane %v2349_v30, 4  ;;  %v1937_v12 = vadd.f32 %v7497_v8, %v9293_v28 }
 0x199   : > { %v3498_v45 = vrot.slane %v2477_v24, 4  ;;  %v2760_v37 = vrot.slane %v2354_v50, 4  ;;  %v3528_v56 = vrot.slane %v2482_v46, 4  ;;  %v2355_v16 = vmax.f32 %v1425_v51, 0.0 }
 0x19a   : > { %v2748_v5 = vrot.slane %v2352_v63, 4  ;;  %v3516_v2 = vrot.slane %v2480_v32, 4  ;;  %v2731_v17 = vmax.f32 %v2349_v30, %v2730_v10  ;;  %v2483_v60 = vmax.f32 %v1937_v12, 0.0 }
 0x19b   : > { %v3499_v42 = vmax.f32 %v2477_v24, %v3498_v45  ;;  %v2761_v6 = vmax.f32 %v2354_v50, %v2760_v37  ;;  %v3529_v53 = vmax.f32 %v2482_v46, %v3528_v56  ;;  %v2766_v39 = vrot.slane %v2355_v16, 4  ;;  %v7645_v24 = vpop.f32.mrb[53].mxu0  ;;  %v7647_v50 = vpop.f32.mrb[53].mxu1 }
 0x19c   : > { %v2749_v11 = vmax.f32 %v2352_v63, %v2748_v5  ;;  %v3517_v7 = vmax.f32 %v2480_v32, %v3516_v2  ;;  %v2732_v58 = vrot.slane %v2731_v17, 2  ;;  %v3534_v62 = vrot.slane %v2483_v60, 4  ;;  %9294 = vst [vmem:[#allocation2_spill] sm:$0xff] %v7647_v50  ;;  %v7649_v45 = vpop.f32.mrb[54].mxu0  ;;  %v7651_v37 = vpop.f32.mrb[54].mxu1 }
 0x19d   : > { %v3500_v31 = vrot.slane %v3499_v42, 2  ;;  %v2762_v34 = vrot.slane %v2761_v6, 2  ;;  %v3530_v25 = vrot.slane %v3529_v53, 2  ;;  %v2767_v32 = vmax.f32 %v2355_v16, %v2766_v39  ;;  %9295 = vst [vmem:[#allocation3_spill] sm:$0xff] %v7649_v45  ;;  %9296 = vst [vmem:[#allocation4_spill] sm:$0xff] %v7651_v37  ;;  %v7653_v51 = vpop.f32.mrb[55].mxu0 }
 0x19e   : > { %v2750_v4 = vrot.slane %v2749_v11, 2  ;;  %v3518_v14 = vrot.slane %v3517_v7, 2  ;;  %v2733_v3 = vmax.f32 %v2731_v17, %v2732_v58  ;;  %v3535_v10 = vmax.f32 %v2483_v60, %v3534_v62  ;;  %9297 = vst [vmem:[#allocation5_spill] sm:$0xff] %v7653_v51 }
 0x19f   : > { %v3501_v29 = vmax.f32 %v3499_v42, %v3500_v31  ;;  %v2763_v20 = vmax.f32 %v2761_v6, %v2762_v34  ;;  %v3531_v30 = vmax.f32 %v3529_v53, %v3530_v25  ;;  %v2768_v17 = vrot.slane %v2767_v32, 2 }
 0x1a0   : > { %v2751_v46 = vmax.f32 %v2749_v11, %v2750_v4  ;;  %v3519_v63 = vmax.f32 %v3517_v7, %v3518_v14  ;;  %v2734_v56 = vrot.slane %v2733_v3, 1  ;;  %v3536_v42 = vrot.slane %v3535_v10, 2 }
 0x1a1   : > { %v3502_v5 = vrot.slane %v3501_v29, 1  ;;  %v2764_v2 = vrot.slane %v2763_v20, 1  ;;  %v3532_v57 = vrot.slane %v3531_v30, 1  ;;  %v2769_v58 = vmax.f32 %v2767_v32, %v2768_v17 }
 0x1a2   : > { %v2752_v28 = vrot.slane %v2751_v46, 1  ;;  %v3520_v12 = vrot.slane %v3519_v63, 1  ;;  %v2735_v6 = vmax.f32 %v2733_v3, %v2734_v56  ;;  %v3537_v31 = vmax.f32 %v3535_v10, %v3536_v42 }
 0x1a3   : > { %v3503_v53 = vmax.f32 %v3501_v29, %v3502_v5  ;;  %v2765_v11 = vmax.f32 %v2763_v20, %v2764_v2  ;;  %v3533_v7 = vmax.f32 %v3531_v30, %v3532_v57  ;;  %v2770_v13 = vrot.slane %v2769_v58, 1  ;;  %v9301_v57 = vld [vmem:[#allocation7_spill] sm:$0xff] }
 0x1a4   : > { %v2753_v16 = vmax.f32 %v2751_v46, %v2752_v28  ;;  %v3521_v60 = vmax.f32 %v3519_v63, %v3520_v12  ;;  %v6209_v34 = vpack.c.bf16 %v2735_v6, %v2735_v6  ;;  %v3538_v61 = vrot.slane %v3537_v31, 1 }
 0x1a5   : > { %v6337_v25 = vpack.c.bf16 %v3503_v53, %v3503_v53  ;;  %v6214_v4 = vpack.c.bf16 %v2765_v11, %v2765_v11  ;;  %v6342_v14 = vpack.c.bf16 %v3533_v7, %v3533_v7  ;;  %v9298_v51 = vpack.c.bf16 %v7609_v59, %v7609_v59  ;;  %v9300_v59 = vld [vmem:[#allocation6_spill] sm:$0xff]  ;;  %v9302_v7 = vld [vmem:[#allocation8_spill] sm:$0xff] }
 0x1a6   : > { %v6212_v39 = vpack.c.bf16 %v2753_v16, %v2753_v16  ;;  %v6340_v62 = vpack.c.bf16 %v3521_v60, %v3521_v60  ;;  %v9299_v3 = vpack.c.bf16 %v7611_v15, %v7611_v15  ;;  %v5165_v20 = vunpack.c.l.b16 %v6209_v34  ;;  %v9303_v16 = vld [vmem:[#allocation9_spill] sm:$0xff] }
 0x1a7   : > { %v5167_v37 = vunpack.c.l.b16 %v9298_v51  ;;  %v5293_v30 = vunpack.c.l.b16 %v6337_v25  ;;  %v7661_v32 = vmax.f32 %v2769_v58, %v2770_v13  ;;  %v7663_v10 = vmax.f32 %v3537_v31, %v3538_v61  ;;  %v7697_v58 = vpop.f32.mrb[55].mxu1  ;;  %v9305_v31 = vld [vmem:[#allocation10_spill] sm:$0xff]  ;;  %v9306_v25 = vld [vmem:[#allocation11_spill] sm:$0xff] }
 0x1a8   : > { %v5295_v29 = vunpack.c.l.b16 %v9299_v3  ;;  %v5168_v46 = vunpack.c.l.b16 %v6212_v39  ;;  %v5296_v63 = vunpack.c.l.b16 %v6340_v62  ;;  %v5424_v56 = vsel %vm5396_vm0, %v5165_v20, %v7623_v26  ;;  %9304 = vst [vmem:[#allocation6_spill] sm:$0xff] %v7697_v58  ;;  %v9308_v62 = vld [vmem:[#allocation13_spill] sm:$0xff] }
 0x1a9   : > { %v5536_v5 = vsel %vm5396_vm0, %v5293_v30, %v7625_v33  ;;  %v1417_v2 = vadd.f32 %v7497_v8, %v9300_v59  ;;  %v1929_v15 = vadd.f32 %v7497_v8, %v9301_v57  ;;  %v5425_v51 = vsel %vm5398_vm1, %v7605_v49, %v5424_v56 }
 0x1aa   : > { %v5537_v13 = vsel %vm5398_vm1, %v7607_v41, %v5536_v5  ;;  %v7677_v61 = vunpack.c.l.b16 %v6214_v4  ;;  %v7679_v28 = vunpack.c.l.b16 %v6342_v14  ;;  %v5426_v26 = vsel %vm5400_vm2, %v5167_v37, %v5425_v51  ;;  %v9307_v14 = vld [vmem:[#allocation12_spill] sm:$0xff] }
 0x1ab   : > { %v5538_v33 = vsel %vm5400_vm2, %v5295_v29, %v5537_v13  ;;  %v2353_v12 = vmax.f32 %v1417_v2, 0.0  ;;  %v2481_v17 = vmax.f32 %v1929_v15, 0.0  ;;  %v7684_v42 = vsel %vm5402_vm3, %v5168_v46, %v5426_v26 }
 0x1ac   : > { %v7687_v6 = vsel %vm5402_vm3, %v5296_v63, %v5538_v33  ;;  %v1438_v37 = vadd.f32 %v7497_v8, %v9302_v7  ;;  %v1950_v60 = vadd.f32 %v7497_v8, %v9303_v16  ;;  %v1430_v34 = vadd.f32 %v7497_v8, %v9305_v31  ;;  %v7707_v16 = vpop.f32.mrb[56].mxu0  ;;  %v7709_v31 = vpop.f32.mrb[56].mxu1 }
 0x1ad   : > { %v2754_v53 = vrot.slane %v2353_v12, 4  ;;  %v3522_v11 = vrot.slane %v2481_v17, 4  ;;  %v1942_v4 = vadd.f32 %v7497_v8, %v9306_v25  ;;  %v1441_v39 = vadd.f32 %v7497_v8, %v9307_v14  ;;  %9309 = vst [vmem:[#allocation7_spill] sm:$0xff] %v7707_v16  ;;  %9310 = vst [vmem:[#allocation8_spill] sm:$0xff] %v7709_v31 }
 0x1ae   : > { %v1953_v3 = vadd.f32 %v7497_v8, %v9308_v62  ;;  %v2358_v30 = vmax.f32 %v1438_v37, 0.0  ;;  %v2486_v46 = vmax.f32 %v1950_v60, 0.0  ;;  %v2356_v63 = vmax.f32 %v1430_v34, 0.0  ;;  %v7711_v37 = vpop.f32.mrb[57].mxu0  ;;  %v7713_v60 = vpop.f32.mrb[57].mxu1 }
 0x1af   : > { %v2755_v29 = vmax.f32 %v2353_v12, %v2754_v53  ;;  %v3523_v20 = vmax.f32 %v2481_v17, %v3522_v11  ;;  %v2484_v56 = vmax.f32 %v1942_v4, 0.0  ;;  %v2359_v5 = vmax.f32 %v1441_v39, 0.0  ;;  %9311 = vst [vmem:[#allocation9_spill] sm:$0xff] %v7711_v37  ;;  %9312 = vst [vmem:[#allocation10_spill] sm:$0xff] %v7713_v60  ;;  %v7715_v39 = vpop.f32.mrb[58].mxu0  ;;  %v7717_v62 = vpop.f32.mrb[58].mxu1 }
 0x1b0   : > { %v2487_v59 = vmax.f32 %v1953_v3, 0.0  ;;  %v2784_v15 = vrot.slane %v2358_v30, 4  ;;  %v3552_v51 = vrot.slane %v2486_v46, 4  ;;  %v2772_v13 = vrot.slane %v2356_v63, 4  ;;  %9313 = vst [vmem:[#allocation11_spill] sm:$0xff] %v7715_v39  ;;  %9314 = vst [vmem:[#allocation12_spill] sm:$0xff] %v7717_v62 }
 0x1b1   : > { %v2756_v2 = vrot.slane %v2755_v29, 2  ;;  %v3524_v57 = vrot.slane %v3523_v20, 2  ;;  %v3540_v26 = vrot.slane %v2484_v56, 4  ;;  %v2790_v33 = vrot.slane %v2359_v5, 4 }
 0x1b2   : > { %v3558_v7 = vrot.slane %v2487_v59, 4  ;;  %v2785_v53 = vmax.f32 %v2358_v30, %v2784_v15  ;;  %v3553_v11 = vmax.f32 %v2486_v46, %v3552_v51  ;;  %v2773_v34 = vmax.f32 %v2356_v63, %v2772_v13 }
 0x1b3   : > { %v2757_v12 = vmax.f32 %v2755_v29, %v2756_v2  ;;  %v3525_v17 = vmax.f32 %v3523_v20, %v3524_v57  ;;  %v3541_v25 = vmax.f32 %v2484_v56, %v3540_v26  ;;  %v2791_v4 = vmax.f32 %v2359_v5, %v2790_v33  ;;  %v7719_v29 = vpop.f32.mrb[59].mxu0 }
 0x1b4   : > { %v3559_v14 = vmax.f32 %v2487_v59, %v3558_v7  ;;  %v2786_v49 = vrot.slane %v2785_v53, 2  ;;  %v3554_v31 = vrot.slane %v3553_v11, 2  ;;  %9315 = vst [vmem:[#allocation13_spill] sm:$0xff] %v7719_v29  ;;  %v2774_v20 = vrot.slane %v2773_v34, 2 }
 0x1b5   : > { %v2758_v3 = vrot.slane %v2757_v12, 1  ;;  %v3526_v41 = vrot.slane %v3525_v17, 1  ;;  %v3542_v30 = vrot.slane %v3541_v25, 2  ;;  %v2792_v46 = vrot.slane %v2791_v4, 2 }
 0x1b6   : > { %v3560_v2 = vrot.slane %v3559_v14, 2  ;;  %v2787_v63 = vmax.f32 %v2785_v53, %v2786_v49  ;;  %v3555_v56 = vmax.f32 %v3553_v11, %v3554_v31  ;;  %v2775_v5 = vmax.f32 %v2773_v34, %v2774_v20 }
 0x1b7   : > { %v2759_v57 = vmax.f32 %v2757_v12, %v2758_v3  ;;  %v3527_v15 = vmax.f32 %v3525_v17, %v3526_v41  ;;  %v3543_v59 = vmax.f32 %v3541_v25, %v3542_v30  ;;  %v2793_v51 = vmax.f32 %v2791_v4, %v2792_v46  ;;  %v9319_v3 = vld [vmem:[#allocation15_spill] sm:$0xff]  ;;  %v9320_v46 = vld [vmem:[#allocation16_spill] sm:$0xff] }
 0x1b8   : > { %v3561_v13 = vmax.f32 %v3559_v14, %v3560_v2  ;;  %v2788_v7 = vrot.slane %v2787_v63, 1  ;;  %v3556_v62 = vrot.slane %v3555_v56, 1  ;;  %v2776_v39 = vrot.slane %v2775_v5, 1 }
 0x1b9   : > { %v6213_v26 = vpack.c.bf16 %v2759_v57, %v2759_v57  ;;  %v6341_v33 = vpack.c.bf16 %v3527_v15, %v3527_v15  ;;  %v3544_v60 = vrot.slane %v3543_v59, 1  ;;  %v2794_v37 = vrot.slane %v2793_v51, 1 }
 0x1ba   : > { %v3562_v29 = vrot.slane %v3561_v13, 1  ;;  %v2789_v45 = vmax.f32 %v2787_v63, %v2788_v7  ;;  %v3557_v50 = vmax.f32 %v3555_v56, %v3556_v62  ;;  %v9316_v49 = vpack.c.bf16 %v7661_v32, %v7661_v32 }
 0x1bb   : > { %v5169_v16 = vunpack.c.l.b16 %v6213_v26  ;;  %v5297_v58 = vunpack.c.l.b16 %v6341_v33  ;;  %v9317_v31 = vpack.c.bf16 %v7663_v10, %v7663_v10  ;;  %v7727_v17 = vmax.f32 %v2775_v5, %v2776_v39  ;;  %v7775_v33 = vpop.f32.mrb[59].mxu1 }
 0x1bc   : > { %v5171_v41 = vunpack.c.l.b16 %v9316_v49  ;;  %v7729_v53 = vmax.f32 %v3543_v59, %v3544_v60  ;;  %v6218_v25 = vpack.c.bf16 %v2789_v45, %v2789_v45  ;;  %v6346_v4 = vpack.c.bf16 %v3557_v50, %v3557_v50 }
 0x1bd   : > { %v5299_v12 = vunpack.c.l.b16 %v9317_v31  ;;  %v5428_v11 = vsel %vm5404_vm4, %v5169_v16, %v7684_v42  ;;  %v5540_v34 = vsel %vm5404_vm4, %v5297_v58, %v7687_v6  ;;  %v7741_v39 = vmax.f32 %v2793_v51, %v2794_v37 }
 0x1be   : > { %v5429_v32 = vsel %vm5406_vm5, %v7677_v61, %v5428_v11  ;;  %v5541_v10 = vsel %vm5406_vm5, %v7679_v28, %v5540_v34  ;;  %v7743_v42 = vmax.f32 %v3561_v13, %v3562_v29  ;;  %v6216_v50 = vpack.c.bf16 %v7727_v17, %v7727_v17  ;;  %v9318_v28 = vld [vmem:[#allocation14_spill] sm:$0xff] }
 0x1bf   : > { %v5430_v14 = vsel %vm5408_vm6, %v5171_v41, %v5429_v32  ;;  %v5542_v60 = vsel %vm5408_vm6, %v5299_v12, %v5541_v10  ;;  %v6344_v45 = vpack.c.bf16 %v7729_v53, %v7729_v53  ;;  %v7749_v61 = vunpack.c.l.b16 %v6218_v25 }
 0x1c0   : > { %v5630_v16 = vpack.c.b16 %v5430_v14, %v5430_v14  ;;  %v5646_v6 = vpack.c.b16 %v5542_v60, %v5542_v60  ;;  %v7751_v58 = vunpack.c.l.b16 %v6346_v4  ;;  %v1433_v62 = vadd.f32 %v7497_v8, %v9318_v28 }
 0x1c1   : > { %v1945_v37 = vadd.f32 %v7497_v8, %v9319_v3  ;;  %v1454_v29 = vadd.f32 %v7497_v8, %v7426_v9  ;;  %v1966_v20 = vadd.f32 %v7497_v8, %v7428_v43  ;;  %v1446_v30 = vadd.f32 %v7497_v8, %v7432_v35 }
 0x1c2   : > { %5694 = vst [vmem:[%s7360_s13 + $0xc] sm:$0xf] %v5630_v16  ;;  %5710 = vst [vmem:[%s7360_s13 + $0x4c] sm:$0xf] %v5646_v6  ;;  %v1958_v2 = vadd.f32 %v7497_v8, %v9320_v46  ;;  %v6219_v57 = vpack.c.bf16 %v7741_v39, %v7741_v39  ;;  %v6347_v15 = vpack.c.bf16 %v7743_v42, %v7743_v42  ;;  %v2357_v63 = vmax.f32 %v1433_v62, 0.0 }
 0x1c3   : > { %v2485_v56 = vmax.f32 %v1945_v37, 0.0  ;;  %v2362_v5 = vmax.f32 %v1454_v29, 0.0  ;;  %v2490_v59 = vmax.f32 %v1966_v20, 0.0  ;;  %v2360_v9 = vmax.f32 %v1446_v30, 0.0  ;;  %v7777_v37 = vpop.f32.mrb[60].mxu0  ;;  %v7779_v29 = vpop.f32.mrb[60].mxu1 }
 0x1c4   : > { %v2488_v51 = vmax.f32 %v1958_v2, 0.0  ;;  %v2778_v13 = vrot.slane %v2357_v63, 4  ;;  %v1457_v35 = vadd.f32 %v7497_v8, %v7440_v23  ;;  %v1969_v26 = vadd.f32 %v7497_v8, %v7442_v18 }
 0x1c5   : > { %v3546_v43 = vrot.slane %v2485_v56, 4  ;;  %v2808_v7 = vrot.slane %v2362_v5, 4  ;;  %v3576_v49 = vrot.slane %v2490_v59, 4  ;;  %v2796_v41 = vrot.slane %v2360_v9, 4 }
 0x1c6   : > { %v3564_v31 = vrot.slane %v2488_v51, 4  ;;  %v2779_v12 = vmax.f32 %v2357_v63, %v2778_v13  ;;  %v2363_v34 = vmax.f32 %v1457_v35, 0.0  ;;  %v2491_v25 = vmax.f32 %v1969_v26, 0.0  ;;  %v7781_v63 = vpop.f32.mrb[61].mxu0 }
 0x1c7   : > { %v3547_v11 = vmax.f32 %v2485_v56, %v3546_v43  ;;  %v2809_v4 = vmax.f32 %v2362_v5, %v2808_v7  ;;  %v3577_v32 = vmax.f32 %v2490_v59, %v3576_v49  ;;  %v2797_v10 = vmax.f32 %v2360_v9, %v2796_v41  ;;  %v7783_v56 = vpop.f32.mrb[61].mxu1  ;;  %v7785_v13 = vpop.f32.mrb[62].mxu0 }
 0x1c8   : > { %v3565_v14 = vmax.f32 %v2488_v51, %v3564_v31  ;;  %v2780_v60 = vrot.slane %v2779_v12, 2  ;;  %v2814_v23 = vrot.slane %v2363_v34, 4  ;;  %v3582_v6 = vrot.slane %v2491_v25, 4  ;;  %v7787_v43 = vpop.f32.mrb[62].mxu1  ;;  %v7789_v41 = vpop.f32.mrb[63].mxu0 }
 0x1c9   : > { %v3548_v16 = vrot.slane %v3547_v11, 2  ;;  %v2810_v28 = vrot.slane %v2809_v4, 2  ;;  %v3578_v18 = vrot.slane %v3577_v32, 2  ;;  %v2798_v62 = vrot.slane %v2797_v10, 2 }
 0x1ca   : > { %v3566_v3 = vrot.slane %v3565_v14, 2  ;;  %v2781_v20 = vmax.f32 %v2779_v12, %v2780_v60  ;;  %v2815_v46 = vmax.f32 %v2363_v34, %v2814_v23  ;;  %v3583_v2 = vmax.f32 %v2491_v25, %v3582_v6 }
 0x1cb   : > { %v3549_v30 = vmax.f32 %v3547_v11, %v3548_v16  ;;  %v2811_v5 = vmax.f32 %v2809_v4, %v2810_v28  ;;  %v3579_v59 = vmax.f32 %v3577_v32, %v3578_v18  ;;  %v2799_v9 = vmax.f32 %v2797_v10, %v2798_v62 }
 0x1cc   : > { %v3567_v51 = vmax.f32 %v3565_v14, %v3566_v3  ;;  %v2782_v35 = vrot.slane %v2781_v20, 1  ;;  %v2816_v7 = vrot.slane %v2815_v46, 2  ;;  %v3584_v49 = vrot.slane %v3583_v2, 2 }
 0x1cd   : > { %v3550_v26 = vrot.slane %v3549_v30, 1  ;;  %v2812_v31 = vrot.slane %v2811_v5, 1  ;;  %v3580_v12 = vrot.slane %v3579_v59, 1  ;;  %v2800_v11 = vrot.slane %v2799_v9, 1 }
 0x1ce   : > { %v3568_v34 = vrot.slane %v3567_v51, 1  ;;  %v2783_v25 = vmax.f32 %v2781_v20, %v2782_v35  ;;  %v2817_v4 = vmax.f32 %v2815_v46, %v2816_v7  ;;  %v3585_v32 = vmax.f32 %v3583_v2, %v3584_v49 }
 0x1cf   : > { %v3551_v60 = vmax.f32 %v3549_v30, %v3550_v26  ;;  %v7791_v10 = vmax.f32 %v2811_v5, %v2812_v31  ;;  %v7793_v14 = vmax.f32 %v3579_v59, %v3580_v12  ;;  %v2801_v16 = vmax.f32 %v2799_v9, %v2800_v11 }
 0x1d0   : > { %v3569_v23 = vmax.f32 %v3567_v51, %v3568_v34  ;;  %v6217_v6 = vpack.c.bf16 %v2783_v25, %v2783_v25  ;;  %v2818_v18 = vrot.slane %v2817_v4, 1  ;;  %v3586_v62 = vrot.slane %v3585_v32, 1  ;;  %v9321_v25 = vld [vmem:[#allocation17_spill] sm:$0xff] }
 0x1d1   : > { %v6345_v28 = vpack.c.bf16 %v3551_v60, %v3551_v60  ;;  %v5172_v3 = vunpack.c.l.b16 %v6216_v50  ;;  %v5300_v20 = vunpack.c.l.b16 %v6344_v45  ;;  %v6220_v30 = vpack.c.bf16 %v2801_v16, %v2801_v16  ;;  %v9322_v60 = vld [vmem:[#allocation18_spill] sm:$0xff] }
 0x1d2   : > { %v6348_v46 = vpack.c.bf16 %v3569_v23, %v3569_v23  ;;  %v5173_v2 = vunpack.c.l.b16 %v6217_v6  ;;  %v7801_v59 = vmax.f32 %v2817_v4, %v2818_v18  ;;  %v7803_v9 = vmax.f32 %v3585_v32, %v3586_v62  ;;  %v9323_v32 = vld [vmem:[#allocation19_spill] sm:$0xff]  ;;  %v9324_v23 = vld [vmem:[#allocation20_spill] sm:$0xff] }
 0x1d3   : > { %v5301_v5 = vunpack.c.l.b16 %v6345_v28  ;;  %v5175_v51 = vunpack.c.l.b16 %v6219_v57  ;;  %v5303_v17 = vunpack.c.l.b16 %v6347_v15  ;;  %v5176_v50 = vunpack.c.l.b16 %v6220_v30  ;;  %v7845_v28 = vpop.f32.mrb[63].mxu1 }
 0x1d4   : > { %v5304_v35 = vunpack.c.l.b16 %v6348_v46  ;;  %v5431_v53 = vsel %vm5396_vm0, %v5173_v2, %v5172_v3  ;;  %v1449_v42 = vadd.f32 %v7497_v8, %v7446_v0  ;;  %v1961_v15 = vadd.f32 %v7497_v8, %v7462_v47 }
 0x1d5   : > { %v5543_v45 = vsel %vm5396_vm0, %v5301_v5, %v5300_v20  ;;  %v5432_v39 = vsel %vm5398_vm1, %v7749_v61, %v5431_v53  ;;  %v1470_v47 = vadd.f32 %v7497_v8, %v9321_v25  ;;  %v1982_v4 = vadd.f32 %v7497_v8, %v9322_v60  ;;  %v7853_v25 = vpop.f32.mrb[64].mxu1 }
 0x1d6   : > { %v5544_v57 = vsel %vm5398_vm1, %v7751_v58, %v5543_v45  ;;  %v5433_v49 = vsel %vm5400_vm2, %v5175_v51, %v5432_v39  ;;  %v2361_v0 = vmax.f32 %v1449_v42, 0.0  ;;  %v2489_v34 = vmax.f32 %v1961_v15, 0.0 }
 0x1d7   : > { %v5545_v31 = vsel %vm5400_vm2, %v5303_v17, %v5544_v57  ;;  %v7832_v61 = vsel %vm5402_vm3, %v5176_v50, %v5433_v49  ;;  %v1462_v16 = vadd.f32 %v7497_v8, %v9323_v32  ;;  %v1974_v6 = vadd.f32 %v7497_v8, %v9324_v23 }
 0x1d8   : > { %v7835_v58 = vsel %vm5402_vm3, %v5304_v35, %v5545_v31  ;;  %v2802_v18 = vrot.slane %v2361_v0, 4  ;;  %v3570_v62 = vrot.slane %v2489_v34, 4  ;;  %v1473_v3 = vadd.f32 %v7497_v8, %v7480_v36  ;;  %v7851_v36 = vpop.f32.mrb[64].mxu0 }
 0x1d9   : > { %v1985_v20 = vadd.f32 %v7497_v8, %v7482_v52  ;;  %v2366_v30 = vmax.f32 %v1470_v47, 0.0  ;;  %v2494_v46 = vmax.f32 %v1982_v4, 0.0  ;;  %v2364_v2 = vmax.f32 %v1462_v16, 0.0 }
 0x1da   : > { %v2492_v5 = vmax.f32 %v1974_v6, 0.0  ;;  %v2803_v51 = vmax.f32 %v2361_v0, %v2802_v18  ;;  %v3571_v17 = vmax.f32 %v2489_v34, %v3570_v62  ;;  %v2367_v50 = vmax.f32 %v1473_v3, 0.0  ;;  %v7855_v0 = vpop.f32.mrb[65].mxu0  ;;  %v7857_v34 = vpop.f32.mrb[65].mxu1 }
 0x1db   : > { %v2495_v35 = vmax.f32 %v1985_v20, 0.0  ;;  %v2832_v53 = vrot.slane %v2366_v30, 4  ;;  %v3600_v45 = vrot.slane %v2494_v46, 4  ;;  %v2820_v39 = vrot.slane %v2364_v2, 4  ;;  %9325 = vst [vmem:[#allocation14_spill] sm:$0xff] %v7855_v0  ;;  %9326 = vst [vmem:[#allocation15_spill] sm:$0xff] %v7857_v34 }
 0x1dc   : > { %v3588_v57 = vrot.slane %v2492_v5, 4  ;;  %v2804_v42 = vrot.slane %v2803_v51, 2  ;;  %v3572_v15 = vrot.slane %v3571_v17, 2  ;;  %v2838_v49 = vrot.slane %v2367_v50, 4  ;;  %v7859_v6 = vpop.f32.mrb[66].mxu0  ;;  %v7861_v18 = vpop.f32.mrb[66].mxu1 }
 0x1dd   : > { %v3606_v31 = vrot.slane %v2495_v35, 4  ;;  %v2833_v52 = vmax.f32 %v2366_v30, %v2832_v53  ;;  %v3601_v8 = vmax.f32 %v2494_v46, %v3600_v45  ;;  %v2821_v47 = vmax.f32 %v2364_v2, %v2820_v39  ;;  %9327 = vst [vmem:[#allocation16_spill] sm:$0xff] %v7859_v6  ;;  %9328 = vst [vmem:[#allocation17_spill] sm:$0xff] %v7861_v18  ;;  %v7863_v30 = vpop.f32.mrb[67].mxu0 }
 0x1de   : > { %v3589_v60 = vmax.f32 %v2492_v5, %v3588_v57  ;;  %v2805_v4 = vmax.f32 %v2803_v51, %v2804_v42  ;;  %v3573_v32 = vmax.f32 %v3571_v17, %v3572_v15  ;;  %v2839_v16 = vmax.f32 %v2367_v50, %v2838_v49  ;;  %9329 = vst [vmem:[#allocation18_spill] sm:$0xff] %v7863_v30 }
 0x1df   : > { %v3607_v23 = vmax.f32 %v2495_v35, %v3606_v31  ;;  %v2834_v62 = vrot.slane %v2833_v52, 2  ;;  %v3602_v3 = vrot.slane %v3601_v8, 2  ;;  %v2822_v20 = vrot.slane %v2821_v47, 2 }
 0x1e0   : > { %v3590_v11 = vrot.slane %v3589_v60, 2  ;;  %v2806_v46 = vrot.slane %v2805_v4, 1  ;;  %v3574_v2 = vrot.slane %v3573_v32, 1  ;;  %v2840_v5 = vrot.slane %v2839_v16, 2 }
 0x1e1   : > { %v3608_v53 = vrot.slane %v3607_v23, 2  ;;  %v2835_v45 = vmax.f32 %v2833_v52, %v2834_v62  ;;  %v3603_v39 = vmax.f32 %v3601_v8, %v3602_v3  ;;  %v2823_v51 = vmax.f32 %v2821_v47, %v2822_v20 }
 0x1e2   : > { %v3591_v17 = vmax.f32 %v3589_v60, %v3590_v11  ;;  %v2807_v50 = vmax.f32 %v2805_v4, %v2806_v46  ;;  %v3575_v35 = vmax.f32 %v3573_v32, %v3574_v2  ;;  %v2841_v57 = vmax.f32 %v2839_v16, %v2840_v5 }
 0x1e3   : > { %v3609_v42 = vmax.f32 %v3607_v23, %v3608_v53  ;;  %v2836_v15 = vrot.slane %v2835_v45, 1  ;;  %v3604_v49 = vrot.slane %v3603_v39, 1  ;;  %v2824_v31 = vrot.slane %v2823_v51, 1 }
 0x1e4   : > { %v3592_v12 = vrot.slane %v3591_v17, 1  ;;  %v6221_v7 = vpack.c.bf16 %v2807_v50, %v2807_v50  ;;  %v6349_v26 = vpack.c.bf16 %v3575_v35, %v3575_v35  ;;  %v2842_v18 = vrot.slane %v2841_v57, 1 }
 0x1e5   : > { %v3610_v30 = vrot.slane %v3609_v42, 1  ;;  %v2837_v6 = vmax.f32 %v2835_v45, %v2836_v15  ;;  %v3605_v34 = vmax.f32 %v3603_v39, %v3604_v49  ;;  %v7865_v0 = vmax.f32 %v2823_v51, %v2824_v31  ;;  %v7908_v45 = vld [vmem:[%s9260_s2] ss:$0 sm:$0xff]  ;;  %v9336_v49 = vld [vmem:[#allocation23_spill] sm:$0xff] }
 0x1e6   : > { %v7867_v52 = vmax.f32 %v3591_v17, %v3592_v12  ;;  %v5177_v8 = vunpack.c.l.b16 %v6221_v7  ;;  %v5305_v11 = vunpack.c.l.b16 %v6349_v26  ;;  %v7869_v47 = vmax.f32 %v2841_v57, %v2842_v18  ;;  %v9334_v57 = vld [vmem:[#allocation21_spill] sm:$0xff]  ;;  %v9335_v15 = vld [vmem:[#allocation22_spill] sm:$0xff] }
 0x1e7   : > { %v7871_v60 = vmax.f32 %v3609_v42, %v3610_v30  ;;  %v9330_v4 = vpack.c.bf16 %v7791_v10, %v7791_v10  ;;  %v9331_v16 = vpack.c.bf16 %v7793_v14, %v7793_v14  ;;  %v6226_v62 = vpack.c.bf16 %v2837_v6, %v2837_v6 }
 0x1e8   : > { %v6354_v3 = vpack.c.bf16 %v3605_v34, %v3605_v34  ;;  %v9332_v12 = vpack.c.bf16 %v7801_v59, %v7801_v59  ;;  %v9333_v26 = vpack.c.bf16 %v7803_v9, %v7803_v9  ;;  %v5435_v18 = vsel %vm5404_vm4, %v5177_v8, %v7832_v61 }
 0x1e9   : > { %v5178_v32 = vunpack.c.l.b16 %v9330_v4  ;;  %v5306_v23 = vunpack.c.l.b16 %v9331_v16  ;;  %v5547_v10 = vsel %vm5404_vm4, %v5305_v11, %v7835_v58  ;;  %v6224_v34 = vpack.c.bf16 %v7865_v0, %v7865_v0 }
 0x1ea   : > { %v5179_v20 = vunpack.c.l.b16 %v9332_v12  ;;  %v5307_v7 = vunpack.c.l.b16 %v9333_v26  ;;  %v7901_v5 = vunpack.c.l.b16 %v6226_v62  ;;  %v7903_v53 = vunpack.c.l.b16 %v6354_v3 }
 0x1eb   : > { %v5436_v30 = vsel %vm5406_vm5, %v5178_v32, %v5435_v18  ;;  %v5548_v14 = vsel %vm5406_vm5, %v5306_v23, %v5547_v10  ;;  %v1465_v39 = vadd.f32 %v7908_v45, %v7484_v1  ;;  %v1977_v51 = vadd.f32 %v7908_v45, %v7517_v38  ;;  %v7928_v23 = vpop.f32.mrb[67].mxu1 }
 0x1ec   : > { %v5437_v9 = vsel %vm5408_vm6, %v5179_v20, %v5436_v30  ;;  %v5549_v6 = vsel %vm5408_vm6, %v5307_v7, %v5548_v14  ;;  %v1486_v17 = vadd.f32 %v7908_v45, %v7523_v22  ;;  %v1998_v50 = vadd.f32 %v7908_v45, %v7525_v44 }
 0x1ed   : > { %v5631_v46 = vpack.c.b16 %v5437_v9, %v5437_v9  ;;  %v5647_v2 = vpack.c.b16 %v5549_v6, %v5549_v6  ;;  %v1478_v35 = vadd.f32 %v7908_v45, %v7527_v48  ;;  %v1990_v42 = vadd.f32 %v7908_v45, %v9334_v57  ;;  %v7930_v57 = vpop.f32.mrb[68].mxu0 }
 0x1ee   : > { %v1489_v1 = vadd.f32 %v7908_v45, %v9335_v15  ;;  %v2001_v38 = vadd.f32 %v7908_v45, %v9336_v49  ;;  %v2365_v31 = vmax.f32 %v1465_v39, 0.0  ;;  %v2493_v8 = vmax.f32 %v1977_v51, 0.0 }
 0x1ef   : > { %5695 = vst [vmem:[%s7360_s13 + $0x10] sm:$0xf] %v5631_v46  ;;  %5711 = vst [vmem:[%s7360_s13 + $0x50] sm:$0xf] %v5647_v2  ;;  %v2370_v22 = vmax.f32 %v1486_v17, 0.0  ;;  %v2498_v11 = vmax.f32 %v1998_v50, 0.0 }
 0x1f0   : > { %v2368_v4 = vmax.f32 %v1478_v35, 0.0  ;;  %v2496_v44 = vmax.f32 %v1990_v42, 0.0  ;;  %v2371_v32 = vmax.f32 %v1489_v1, 0.0  ;;  %v2499_v16 = vmax.f32 %v2001_v38, 0.0  ;;  %v7932_v42 = vpop.f32.mrb[68].mxu1 }
 0x1f1   : > { %v2826_v48 = vrot.slane %v2365_v31, 4  ;;  %v3594_v62 = vrot.slane %v2493_v8, 4  ;;  %v2856_v3 = vrot.slane %v2370_v22, 4  ;;  %v3624_v12 = vrot.slane %v2498_v11, 4 }
 0x1f2   : > { %v2844_v20 = vrot.slane %v2368_v4, 4  ;;  %v3612_v26 = vrot.slane %v2496_v44, 4  ;;  %v2862_v7 = vrot.slane %v2371_v32, 4  ;;  %v3630_v18 = vrot.slane %v2499_v16, 4 }
 0x1f3   : > { %v2827_v10 = vmax.f32 %v2365_v31, %v2826_v48  ;;  %v3595_v30 = vmax.f32 %v2493_v8, %v3594_v62  ;;  %v2857_v14 = vmax.f32 %v2370_v22, %v2856_v3  ;;  %v3625_v9 = vmax.f32 %v2498_v11, %v3624_v12  ;;  %v7934_v31 = vpop.f32.mrb[69].mxu0  ;;  %v7936_v8 = vpop.f32.mrb[69].mxu1 }
 0x1f4   : > { %v2845_v6 = vmax.f32 %v2368_v4, %v2844_v20  ;;  %v3613_v46 = vmax.f32 %v2496_v44, %v3612_v26  ;;  %v2863_v2 = vmax.f32 %v2371_v32, %v2862_v7  ;;  %v3631_v39 = vmax.f32 %v2499_v16, %v3630_v18  ;;  %v7938_v32 = vpop.f32.mrb[70].mxu0  ;;  %v7940_v16 = vpop.f32.mrb[70].mxu1 }
 0x1f5   : > { %v2828_v51 = vrot.slane %v2827_v10, 2  ;;  %v3596_v17 = vrot.slane %v3595_v30, 2  ;;  %v2858_v50 = vrot.slane %v2857_v14, 2  ;;  %v3626_v35 = vrot.slane %v3625_v9, 2  ;;  %v7942_v20 = vpop.f32.mrb[71].mxu0 }
 0x1f6   : > { %v2846_v15 = vrot.slane %v2845_v6, 2  ;;  %v3614_v1 = vrot.slane %v3613_v46, 2  ;;  %v2864_v49 = vrot.slane %v2863_v2, 2  ;;  %v3632_v38 = vrot.slane %v3631_v39, 2  ;;  %9337 = vst [vmem:[#allocation19_spill] sm:$0xff] %v7942_v20 }
 0x1f7   : > { %v2829_v22 = vmax.f32 %v2827_v10, %v2828_v51  ;;  %v3597_v11 = vmax.f32 %v3595_v30, %v3596_v17  ;;  %v2859_v4 = vmax.f32 %v2857_v14, %v2858_v50  ;;  %v3627_v44 = vmax.f32 %v3625_v9, %v3626_v35 }
 0x1f8   : > { %v2847_v48 = vmax.f32 %v2845_v6, %v2846_v15  ;;  %v3615_v62 = vmax.f32 %v3613_v46, %v3614_v1  ;;  %v2865_v3 = vmax.f32 %v2863_v2, %v2864_v49  ;;  %v3633_v12 = vmax.f32 %v3631_v39, %v3632_v38 }
 0x1f9   : > { %v2830_v26 = vrot.slane %v2829_v22, 1  ;;  %v3598_v7 = vrot.slane %v3597_v11, 1  ;;  %v2860_v18 = vrot.slane %v2859_v4, 1  ;;  %v3628_v58 = vrot.slane %v3627_v44, 1 }
 0x1fa   : > { %v2848_v61 = vrot.slane %v2847_v48, 1  ;;  %v3616_v59 = vrot.slane %v3615_v62, 1  ;;  %v2866_v10 = vrot.slane %v2865_v3, 1  ;;  %v3634_v30 = vrot.slane %v3633_v12, 1 }
 0x1fb   : > { %v2831_v14 = vmax.f32 %v2829_v22, %v2830_v26  ;;  %v3599_v9 = vmax.f32 %v3597_v11, %v3598_v7  ;;  %v7944_v51 = vmax.f32 %v2859_v4, %v2860_v18  ;;  %v7946_v17 = vmax.f32 %v3627_v44, %v3628_v58 }
 0x1fc   : > { %v2849_v6 = vmax.f32 %v2847_v48, %v2848_v61  ;;  %v3617_v46 = vmax.f32 %v3615_v62, %v3616_v59  ;;  %v7948_v2 = vmax.f32 %v2865_v3, %v2866_v10  ;;  %v7950_v39 = vmax.f32 %v3633_v12, %v3634_v30  ;;  %v9341_v30 = vld [vmem:[#allocation24_spill] sm:$0xff] }
 0x1fd   : > { %v5180_v50 = vunpack.c.l.b16 %v6224_v34  ;;  %v9338_v35 = vpack.c.bf16 %v7867_v52, %v7867_v52  ;;  %v6225_v1 = vpack.c.bf16 %v2831_v14, %v2831_v14  ;;  %v6353_v49 = vpack.c.bf16 %v3599_v9, %v3599_v9 }
 0x1fe   : > { %v9339_v58 = vpack.c.bf16 %v7869_v47, %v7869_v47  ;;  %v9340_v59 = vpack.c.bf16 %v7871_v60, %v7871_v60  ;;  %v6228_v22 = vpack.c.bf16 %v2849_v6, %v2849_v6  ;;  %v6356_v11 = vpack.c.bf16 %v3617_v46, %v3617_v46 }
 0x1ff   : > { %v5308_v15 = vunpack.c.l.b16 %v9338_v35  ;;  %v5181_v4 = vunpack.c.l.b16 %v6225_v1  ;;  %v5309_v44 = vunpack.c.l.b16 %v6353_v49  ;;  %v1481_v12 = vadd.f32 %v7908_v45, %v7535_v27  ;;  %v7994_v35 = vpop.f32.mrb[71].mxu1  ;;  %v9343_v1 = vld [vmem:[#allocation25_spill] sm:$0xff] }
 0x200   : > { %v5183_v38 = vunpack.c.l.b16 %v9339_v58  ;;  %v5311_v61 = vunpack.c.l.b16 %v9340_v59  ;;  %v5184_v34 = vunpack.c.l.b16 %v6228_v22  ;;  %v5312_v48 = vunpack.c.l.b16 %v6356_v11  ;;  %9342 = vst [vmem:[#allocation20_spill] sm:$0xff] %v7994_v35  ;;  %v9344_v58 = vld [vmem:[#allocation26_spill] sm:$0xff]  ;;  %v9345_v22 = vld [vmem:[#allocation27_spill] sm:$0xff] }
 0x201   : > { %v5438_v60 = vsel %vm5396_vm0, %v5181_v4, %v5180_v50  ;;  %v5550_v3 = vsel %vm5396_vm0, %v5309_v44, %v5308_v15  ;;  %v1993_v26 = vadd.f32 %v7908_v45, %v7567_v21  ;;  %v1502_v10 = vadd.f32 %v7908_v45, %v7581_v19  ;;  %v9346_v4 = vld [vmem:[#allocation28_spill] sm:$0xff] }
 0x202   : > { %v5439_v7 = vsel %vm5398_vm1, %v7901_v5, %v5438_v60  ;;  %v5551_v18 = vsel %vm5398_vm1, %v7903_v53, %v5550_v3  ;;  %v2014_v14 = vadd.f32 %v7908_v45, %v9341_v30  ;;  %v2369_v27 = vmax.f32 %v1481_v12, 0.0 }
 0x203   : > { %v5440_v9 = vsel %vm5400_vm2, %v5183_v38, %v5439_v7  ;;  %v5552_v6 = vsel %vm5400_vm2, %v5311_v61, %v5551_v18  ;;  %v2497_v46 = vmax.f32 %v1993_v26, 0.0  ;;  %v2374_v50 = vmax.f32 %v1502_v10, 0.0 }
 0x204   : > { %v7989_v21 = vsel %vm5402_vm3, %v5184_v34, %v5440_v9  ;;  %v7992_v5 = vsel %vm5402_vm3, %v5312_v48, %v5552_v6  ;;  %v2502_v53 = vmax.f32 %v2014_v14, 0.0  ;;  %v2850_v19 = vrot.slane %v2369_v27, 4  ;;  %v8004_v6 = vpop.f32.mrb[72].mxu0 }
 0x205   : > { %v3618_v15 = vrot.slane %v2497_v46, 4  ;;  %v1494_v49 = vadd.f32 %v7908_v45, %v9343_v1  ;;  %v2006_v38 = vadd.f32 %v7908_v45, %v9344_v58  ;;  %v2880_v59 = vrot.slane %v2374_v50, 4  ;;  %9347 = vst [vmem:[#allocation21_spill] sm:$0xff] %v8004_v6  ;;  %v8006_v1 = vpop.f32.mrb[72].mxu1 }
 0x206   : > { %v3648_v61 = vrot.slane %v2502_v53, 4  ;;  %v1505_v11 = vadd.f32 %v7908_v45, %v9345_v22  ;;  %v2017_v44 = vadd.f32 %v7908_v45, %v9346_v4  ;;  %v2851_v34 = vmax.f32 %v2369_v27, %v2850_v19  ;;  %9348 = vst [vmem:[#allocation22_spill] sm:$0xff] %v8006_v1  ;;  %v8008_v27 = vpop.f32.mrb[73].mxu0 }
 0x207   : > { %v3619_v48 = vmax.f32 %v2497_v46, %v3618_v15  ;;  %v2372_v60 = vmax.f32 %v1494_v49, 0.0  ;;  %v2500_v3 = vmax.f32 %v2006_v38, 0.0  ;;  %v2881_v12 = vmax.f32 %v2374_v50, %v2880_v59  ;;  %9349 = vst [vmem:[#allocation23_spill] sm:$0xff] %v8008_v27  ;;  %v8010_v46 = vpop.f32.mrb[73].mxu1  ;;  %v8012_v49 = vpop.f32.mrb[74].mxu0 }
 0x208   : > { %v3649_v26 = vmax.f32 %v2502_v53, %v3648_v61  ;;  %v2375_v7 = vmax.f32 %v1505_v11, 0.0  ;;  %v2503_v18 = vmax.f32 %v2017_v44, 0.0  ;;  %v2852_v10 = vrot.slane %v2851_v34, 2  ;;  %9350 = vst [vmem:[#allocation24_spill] sm:$0xff] %v8010_v46  ;;  %9351 = vst [vmem:[#allocation25_spill] sm:$0xff] %v8012_v49  ;;  %v8014_v38 = vpop.f32.mrb[74].mxu1 }
 0x209   : > { %v3620_v30 = vrot.slane %v3619_v48, 2  ;;  %v2868_v14 = vrot.slane %v2372_v60, 4  ;;  %v3636_v9 = vrot.slane %v2500_v3, 4  ;;  %v2882_v58 = vrot.slane %v2881_v12, 2  ;;  %9352 = vst [vmem:[#allocation26_spill] sm:$0xff] %v8014_v38  ;;  %v8016_v47 = vpop.f32.mrb[75].mxu0 }
 0x20a   : > { %v3650_v22 = vrot.slane %v3649_v26, 2  ;;  %v2886_v62 = vrot.slane %v2375_v7, 4  ;;  %v3654_v4 = vrot.slane %v2503_v18, 4  ;;  %v2853_v50 = vmax.f32 %v2851_v34, %v2852_v10  ;;  %9353 = vst [vmem:[#allocation27_spill] sm:$0xff] %v8016_v47 }
 0x20b   : > { %v3621_v53 = vmax.f32 %v3619_v48, %v3620_v30  ;;  %v2869_v19 = vmax.f32 %v2372_v60, %v2868_v14  ;;  %v3637_v15 = vmax.f32 %v2500_v3, %v3636_v9  ;;  %v2883_v59 = vmax.f32 %v2881_v12, %v2882_v58 }
 0x20c   : > { %v3651_v61 = vmax.f32 %v3649_v26, %v3650_v22  ;;  %v2887_v11 = vmax.f32 %v2375_v7, %v2886_v62  ;;  %v3655_v44 = vmax.f32 %v2503_v18, %v3654_v4  ;;  %v2854_v52 = vrot.slane %v2853_v50, 1 }
 0x20d   : > { %v3622_v0 = vrot.slane %v3621_v53, 1  ;;  %v2870_v1 = vrot.slane %v2869_v19, 2  ;;  %v3638_v27 = vrot.slane %v3637_v15, 2  ;;  %v2884_v6 = vrot.slane %v2883_v59, 1 }
 0x20e   : > { %v3652_v46 = vrot.slane %v3651_v61, 1  ;;  %v2888_v34 = vrot.slane %v2887_v11, 2  ;;  %v3656_v48 = vrot.slane %v3655_v44, 2  ;;  %v2855_v60 = vmax.f32 %v2853_v50, %v2854_v52 }
 0x20f   : > { %v3623_v3 = vmax.f32 %v3621_v53, %v3622_v0  ;;  %v2871_v10 = vmax.f32 %v2869_v19, %v2870_v1  ;;  %v3639_v30 = vmax.f32 %v3637_v15, %v3638_v27  ;;  %v2885_v14 = vmax.f32 %v2883_v59, %v2884_v6 }
 0x210   : > { %v3653_v9 = vmax.f32 %v3651_v61, %v3652_v46  ;;  %v2889_v12 = vmax.f32 %v2887_v11, %v2888_v34  ;;  %v3657_v26 = vmax.f32 %v3655_v44, %v3656_v48  ;;  %v6229_v62 = vpack.c.bf16 %v2855_v60, %v2855_v60  ;;  %v9358_v48 = vld [vmem:[#allocation29_spill] sm:$0xff] }
 0x211   : > { %v6357_v7 = vpack.c.bf16 %v3623_v3, %v3623_v3  ;;  %v2872_v18 = vrot.slane %v2871_v10, 1  ;;  %v3640_v58 = vrot.slane %v3639_v30, 1  ;;  %v6234_v22 = vpack.c.bf16 %v2885_v14, %v2885_v14 }
 0x212   : > { %v6362_v4 = vpack.c.bf16 %v3653_v9, %v3653_v9  ;;  %v2890_v47 = vrot.slane %v2889_v12, 1  ;;  %v3658_v38 = vrot.slane %v3657_v26, 1  ;;  %v5185_v49 = vunpack.c.l.b16 %v6229_v62  ;;  %v9359_v9 = vld [vmem:[#allocation2_spill] sm:$0xff] }
 0x213   : > { %v5313_v35 = vunpack.c.l.b16 %v6357_v7  ;;  %v8018_v20 = vmax.f32 %v2871_v10, %v2872_v18  ;;  %v8020_v52 = vmax.f32 %v3639_v30, %v3640_v58  ;;  %v9354_v0 = vpack.c.bf16 %v7944_v51, %v7944_v51  ;;  %v9361_v7 = vld [vmem:[#allocation4_spill] sm:$0xff] }
 0x214   : > { %v9355_v1 = vpack.c.bf16 %v7946_v17, %v7946_v17  ;;  %v8028_v46 = vmax.f32 %v2889_v12, %v2890_v47  ;;  %v8030_v50 = vmax.f32 %v3657_v26, %v3658_v38  ;;  %v9356_v53 = vpack.c.bf16 %v7948_v2, %v7948_v2  ;;  %v9360_v26 = vld [vmem:[#allocation3_spill] sm:$0xff] }
 0x215   : > { %v5186_v6 = vunpack.c.l.b16 %v9354_v0  ;;  %v9357_v15 = vpack.c.bf16 %v7950_v39, %v7950_v39  ;;  %v5442_v51 = vsel %vm5404_vm4, %v5185_v49, %v7989_v21  ;;  %v5554_v61 = vsel %vm5404_vm4, %v5313_v35, %v7992_v5 }
 0x216   : > { %v5314_v27 = vunpack.c.l.b16 %v9355_v1  ;;  %v5187_v19 = vunpack.c.l.b16 %v9356_v53  ;;  %v8044_v38 = vunpack.c.l.b16 %v6234_v22  ;;  %v8046_v2 = vunpack.c.l.b16 %v6362_v4  ;;  %v8076_v1 = vpop.f32.mrb[75].mxu1 }
 0x217   : > { %v5315_v59 = vunpack.c.l.b16 %v9357_v15  ;;  %v5443_v17 = vsel %vm5406_vm5, %v5186_v6, %v5442_v51  ;;  %v6232_v21 = vpack.c.bf16 %v8018_v20, %v8018_v20  ;;  %v1497_v60 = vadd.f32 %v7908_v45, %v9358_v48 }
 0x218   : > { %v5555_v47 = vsel %vm5406_vm5, %v5314_v27, %v5554_v61  ;;  %v5444_v11 = vsel %vm5408_vm6, %v5187_v19, %v5443_v17  ;;  %v2009_v3 = vadd.f32 %v7908_v45, %v7635_v40  ;;  %v1518_v10 = vadd.f32 %v7908_v45, %v7641_v54 }
 0x219   : > { %v5556_v39 = vsel %vm5408_vm6, %v5315_v59, %v5555_v47  ;;  %v5632_v35 = vpack.c.b16 %v5444_v11, %v5444_v11  ;;  %v2030_v30 = vadd.f32 %v7908_v45, %v7643_v55  ;;  %v1510_v14 = vadd.f32 %v7908_v45, %v7645_v24 }
 0x21a   : > { %v5648_v49 = vpack.c.b16 %v5556_v39, %v5556_v39  ;;  %v2022_v12 = vadd.f32 %v7908_v45, %v9359_v9  ;;  %v1521_v62 = vadd.f32 %v7908_v45, %v9360_v26  ;;  %v2033_v40 = vadd.f32 %v7908_v45, %v9361_v7  ;;  %v8078_v9 = vpop.f32.mrb[76].mxu0 }
 0x21b   : > { %5696 = vst [vmem:[%s7360_s13 + $0x14] sm:$0xf] %v5632_v35  ;;  %v2373_v18 = vmax.f32 %v1497_v60, 0.0  ;;  %v2501_v58 = vmax.f32 %v2009_v3, 0.0  ;;  %v2378_v54 = vmax.f32 %v1518_v10, 0.0  ;;  %v2506_v22 = vmax.f32 %v2030_v30, 0.0 }
 0x21c   : > { %5712 = vst [vmem:[%s7360_s13 + $0x54] sm:$0xf] %v5648_v49  ;;  %v2376_v4 = vmax.f32 %v1510_v14, 0.0  ;;  %v2504_v55 = vmax.f32 %v2022_v12, 0.0  ;;  %v2379_v0 = vmax.f32 %v1521_v62, 0.0  ;;  %v2507_v6 = vmax.f32 %v2033_v40, 0.0 }
 0x21d   : > { %v2874_v24 = vrot.slane %v2373_v18, 4  ;;  %v3642_v27 = vrot.slane %v2501_v58, 4  ;;  %v2904_v53 = vrot.slane %v2378_v54, 4  ;;  %v3672_v19 = vrot.slane %v2506_v22, 4  ;;  %v8080_v12 = vpop.f32.mrb[76].mxu1 }
 0x21e   : > { %v2892_v15 = vrot.slane %v2376_v4, 4  ;;  %v3660_v59 = vrot.slane %v2504_v55, 4  ;;  %v2910_v51 = vrot.slane %v2379_v0, 4  ;;  %v3678_v61 = vrot.slane %v2507_v6, 4 }
 0x21f   : > { %v2875_v17 = vmax.f32 %v2373_v18, %v2874_v24  ;;  %v3643_v47 = vmax.f32 %v2501_v58, %v3642_v27  ;;  %v2905_v11 = vmax.f32 %v2378_v54, %v2904_v53  ;;  %v3673_v39 = vmax.f32 %v2506_v22, %v3672_v19  ;;  %v8082_v18 = vpop.f32.mrb[77].mxu0  ;;  %v8084_v58 = vpop.f32.mrb[77].mxu1 }
 0x220   : > { %v2893_v35 = vmax.f32 %v2376_v4, %v2892_v15  ;;  %v3661_v49 = vmax.f32 %v2504_v55, %v3660_v59  ;;  %v2911_v48 = vmax.f32 %v2379_v0, %v2910_v51  ;;  %v3679_v60 = vmax.f32 %v2507_v6, %v3678_v61  ;;  %9362 = vst [vmem:[#allocation28_spill] sm:$0xff] %v8084_v58  ;;  %v8086_v0 = vpop.f32.mrb[78].mxu0  ;;  %v8088_v6 = vpop.f32.mrb[78].mxu1 }
 0x221   : > { %v2876_v3 = vrot.slane %v2875_v17, 2  ;;  %v3644_v10 = vrot.slane %v3643_v47, 2  ;;  %v2906_v30 = vrot.slane %v2905_v11, 2  ;;  %v3674_v14 = vrot.slane %v3673_v39, 2  ;;  %9363 = vst [vmem:[#allocation29_spill] sm:$0xff] %v8086_v0  ;;  %9364 = vst [vmem:[#allocation2_spill] sm:$0xff] %v8088_v6 }
 0x222   : > { %v2894_v26 = vrot.slane %v2893_v35, 2  ;;  %v3662_v62 = vrot.slane %v3661_v49, 2  ;;  %v2912_v7 = vrot.slane %v2911_v48, 2  ;;  %v3680_v40 = vrot.slane %v3679_v60, 2  ;;  %v8090_v15 = vpop.f32.mrb[79].mxu0 }
 0x223   : > { %v2877_v54 = vmax.f32 %v2875_v17, %v2876_v3  ;;  %v3645_v22 = vmax.f32 %v3643_v47, %v3644_v10  ;;  %v2907_v4 = vmax.f32 %v2905_v11, %v2906_v30  ;;  %v3675_v55 = vmax.f32 %v3673_v39, %v3674_v14  ;;  %9365 = vst [vmem:[#allocation3_spill] sm:$0xff] %v8090_v15 }
 0x224   : > { %v2895_v24 = vmax.f32 %v2893_v35, %v2894_v26  ;;  %v3663_v27 = vmax.f32 %v3661_v49, %v3662_v62  ;;  %v2913_v53 = vmax.f32 %v2911_v48, %v2912_v7  ;;  %v3681_v19 = vmax.f32 %v3679_v60, %v3680_v40 }
 0x225   : > { %v2878_v59 = vrot.slane %v2877_v54, 1  ;;  %v3646_v51 = vrot.slane %v3645_v22, 1  ;;  %v2908_v61 = vrot.slane %v2907_v4, 1  ;;  %v3676_v34 = vrot.slane %v3675_v55, 1 }
 0x226   : > { %v2896_v44 = vrot.slane %v2895_v24, 1  ;;  %v3664_v5 = vrot.slane %v3663_v27, 1  ;;  %v2914_v17 = vrot.slane %v2913_v53, 1  ;;  %v3682_v47 = vrot.slane %v3681_v19, 1 }
 0x227   : > { %v2879_v11 = vmax.f32 %v2877_v54, %v2878_v59  ;;  %v3647_v39 = vmax.f32 %v3645_v22, %v3646_v51  ;;  %v8092_v3 = vmax.f32 %v2907_v4, %v2908_v61  ;;  %v8094_v10 = vmax.f32 %v3675_v55, %v3676_v34  ;;  %v9370_v51 = vld [vmem:[#allocation6_spill] sm:$0xff] }
 0x228   : > { %v2897_v35 = vmax.f32 %v2895_v24, %v2896_v44  ;;  %v3665_v49 = vmax.f32 %v3663_v27, %v3664_v5  ;;  %v8096_v48 = vmax.f32 %v2913_v53, %v2914_v17  ;;  %v8098_v60 = vmax.f32 %v3681_v19, %v3682_v47  ;;  %v9369_v19 = vld [vmem:[#allocation5_spill] sm:$0xff]  ;;  %v8152_v27 = vpop.f32.mrb[80].mxu0 }
 0x229   : > { %v5188_v30 = vunpack.c.l.b16 %v6232_v21  ;;  %v9366_v14 = vpack.c.bf16 %v8020_v52, %v8020_v52  ;;  %v6233_v62 = vpack.c.bf16 %v2879_v11, %v2879_v11  ;;  %v6361_v7 = vpack.c.bf16 %v3647_v39, %v3647_v39  ;;  %v9371_v11 = vld [vmem:[#allocation7_spill] sm:$0xff]  ;;  %9378 = vst [vmem:[#allocation5_spill] sm:$0xff] %v8152_v27 }
 0x22a   : > { %v9367_v34 = vpack.c.bf16 %v8028_v46, %v8028_v46  ;;  %v9368_v5 = vpack.c.bf16 %v8030_v50, %v8030_v50  ;;  %v6236_v54 = vpack.c.bf16 %v2897_v35, %v2897_v35  ;;  %v6364_v22 = vpack.c.bf16 %v3665_v49, %v3665_v49  ;;  %v9372_v35 = vld [vmem:[#allocation8_spill] sm:$0xff] }
 0x22b   : > { %v5316_v26 = vunpack.c.l.b16 %v9366_v14  ;;  %v5189_v4 = vunpack.c.l.b16 %v6233_v62  ;;  %v5317_v55 = vunpack.c.l.b16 %v6361_v7  ;;  %v1513_v59 = vadd.f32 %v7908_v45, %v9369_v19  ;;  %v9376_v19 = vld [vmem:[#allocation11_spill] sm:$0xff] }
 0x22c   : > { %v5191_v40 = vunpack.c.l.b16 %v9367_v34  ;;  %v5319_v44 = vunpack.c.l.b16 %v9368_v5  ;;  %v5192_v21 = vunpack.c.l.b16 %v6236_v54  ;;  %v5320_v24 = vunpack.c.l.b16 %v6364_v22  ;;  %v8142_v5 = vpop.f32.mrb[79].mxu1 }
 0x22d   : > { %v5445_v50 = vsel %vm5396_vm0, %v5189_v4, %v5188_v30  ;;  %v5557_v53 = vsel %vm5396_vm0, %v5317_v55, %v5316_v26  ;;  %v2025_v61 = vadd.f32 %v7908_v45, %v9370_v51  ;;  %v1534_v39 = vadd.f32 %v7908_v45, %v9371_v11  ;;  %9373 = vst [vmem:[#allocation4_spill] sm:$0xff] %v8142_v5  ;;  %v9374_v4 = vld [vmem:[#allocation9_spill] sm:$0xff]  ;;  %v8154_v46 = vpop.f32.mrb[80].mxu1 }
 0x22e   : > { %v5446_v17 = vsel %vm5398_vm1, %v8044_v38, %v5445_v50  ;;  %v5558_v47 = vsel %vm5398_vm1, %v8046_v2, %v5557_v53  ;;  %v2046_v49 = vadd.f32 %v7908_v45, %v9372_v35  ;;  %v2377_v26 = vmax.f32 %v1513_v59, 0.0  ;;  %v9377_v59 = vld [vmem:[#allocation12_spill] sm:$0xff]  ;;  %9379 = vst [vmem:[#allocation6_spill] sm:$0xff] %v8154_v46 }
 0x22f   : > { %v5447_v30 = vsel %vm5400_vm2, %v5191_v40, %v5446_v17  ;;  %v5559_v14 = vsel %vm5400_vm2, %v5319_v44, %v5558_v47  ;;  %v2505_v62 = vmax.f32 %v2025_v61, 0.0  ;;  %v2382_v34 = vmax.f32 %v1534_v39, 0.0  ;;  %v9375_v40 = vld [vmem:[#allocation10_spill] sm:$0xff] }
 0x230   : > { %v8137_v7 = vsel %vm5402_vm3, %v5192_v21, %v5447_v30  ;;  %v8140_v38 = vsel %vm5402_vm3, %v5320_v24, %v5559_v14  ;;  %v2510_v2 = vmax.f32 %v2046_v49, 0.0  ;;  %v2898_v54 = vrot.slane %v2377_v26, 4 }
 0x231   : > { %v3666_v22 = vrot.slane %v2505_v62, 4  ;;  %v1526_v55 = vadd.f32 %v7908_v45, %v9374_v4  ;;  %v2038_v44 = vadd.f32 %v7908_v45, %v9375_v40  ;;  %v2928_v50 = vrot.slane %v2382_v34, 4 }
 0x232   : > { %v3696_v53 = vrot.slane %v2510_v2, 4  ;;  %v1537_v21 = vadd.f32 %v7908_v45, %v9376_v19  ;;  %v2049_v24 = vadd.f32 %v7908_v45, %v9377_v59  ;;  %v2899_v51 = vmax.f32 %v2377_v26, %v2898_v54  ;;  %v8156_v26 = vpop.f32.mrb[81].mxu0 }
 0x233   : > { %v3667_v61 = vmax.f32 %v2505_v62, %v3666_v22  ;;  %v2380_v17 = vmax.f32 %v1526_v55, 0.0  ;;  %v2508_v47 = vmax.f32 %v2038_v44, 0.0  ;;  %v2929_v11 = vmax.f32 %v2382_v34, %v2928_v50  ;;  %9380 = vst [vmem:[#allocation7_spill] sm:$0xff] %v8156_v26  ;;  %v8158_v62 = vpop.f32.mrb[81].mxu1  ;;  %v8160_v55 = vpop.f32.mrb[82].mxu0 }
 0x234   : > { %v3697_v39 = vmax.f32 %v2510_v2, %v3696_v53  ;;  %v2383_v35 = vmax.f32 %v1537_v21, 0.0  ;;  %v2511_v49 = vmax.f32 %v2049_v24, 0.0  ;;  %v2900_v30 = vrot.slane %v2899_v51, 2  ;;  %9381 = vst [vmem:[#allocation8_spill] sm:$0xff] %v8158_v62  ;;  %9382 = vst [vmem:[#allocation9_spill] sm:$0xff] %v8160_v55  ;;  %v8162_v44 = vpop.f32.mrb[82].mxu1 }
 0x235   : > { %v3668_v14 = vrot.slane %v3667_v61, 2  ;;  %v2916_v4 = vrot.slane %v2380_v17, 4  ;;  %v3684_v40 = vrot.slane %v2508_v47, 4  ;;  %v2930_v19 = vrot.slane %v2929_v11, 2  ;;  %9383 = vst [vmem:[#allocation10_spill] sm:$0xff] %v8162_v44  ;;  %v8164_v46 = vpop.f32.mrb[83].mxu0 }
 0x236   : > { %v3698_v52 = vrot.slane %v3697_v39, 2  ;;  %v2934_v20 = vrot.slane %v2383_v35, 4  ;;  %v3702_v59 = vrot.slane %v2511_v49, 4  ;;  %v2901_v34 = vmax.f32 %v2899_v51, %v2900_v30  ;;  %9384 = vst [vmem:[#allocation11_spill] sm:$0xff] %v8164_v46 }
 0x237   : > { %v3669_v2 = vmax.f32 %v3667_v61, %v3668_v14  ;;  %v2917_v54 = vmax.f32 %v2380_v17, %v2916_v4  ;;  %v3685_v22 = vmax.f32 %v2508_v47, %v3684_v40  ;;  %v2931_v50 = vmax.f32 %v2929_v11, %v2930_v19 }
 0x238   : > { %v3699_v53 = vmax.f32 %v3697_v39, %v3698_v52  ;;  %v2935_v21 = vmax.f32 %v2383_v35, %v2934_v20  ;;  %v3703_v24 = vmax.f32 %v2511_v49, %v3702_v59  ;;  %v2902_v27 = vrot.slane %v2901_v34, 1 }
 0x239   : > { %v3670_v5 = vrot.slane %v3669_v2, 1  ;;  %v2918_v15 = vrot.slane %v2917_v54, 2  ;;  %v3686_v26 = vrot.slane %v3685_v22, 2  ;;  %v2932_v6 = vrot.slane %v2931_v50, 1 }
 0x23a   : > { %v3700_v62 = vrot.slane %v3699_v53, 1  ;;  %v2936_v51 = vrot.slane %v2935_v21, 2  ;;  %v3704_v61 = vrot.slane %v3703_v24, 2  ;;  %v2903_v17 = vmax.f32 %v2901_v34, %v2902_v27 }
 0x23b   : > { %v3671_v47 = vmax.f32 %v3669_v2, %v3670_v5  ;;  %v2919_v30 = vmax.f32 %v2917_v54, %v2918_v15  ;;  %v3687_v14 = vmax.f32 %v3685_v22, %v3686_v26  ;;  %v2933_v4 = vmax.f32 %v2931_v50, %v2932_v6 }
 0x23c   : > { %v3701_v40 = vmax.f32 %v3699_v53, %v3700_v62  ;;  %v2937_v11 = vmax.f32 %v2935_v21, %v2936_v51  ;;  %v3705_v52 = vmax.f32 %v3703_v24, %v3704_v61  ;;  %v6237_v20 = vpack.c.bf16 %v2903_v17, %v2903_v17  ;;  %v9389_v61 = vld [vmem:[#allocation13_spill] sm:$0xff] }
 0x23d   : > { %v6365_v39 = vpack.c.bf16 %v3671_v47, %v3671_v47  ;;  %v2920_v35 = vrot.slane %v2919_v30, 1  ;;  %v3688_v49 = vrot.slane %v3687_v14, 1  ;;  %v6242_v19 = vpack.c.bf16 %v2933_v4, %v2933_v4 }
 0x23e   : > { %v6370_v59 = vpack.c.bf16 %v3701_v40, %v3701_v40  ;;  %v2938_v46 = vrot.slane %v2937_v11, 1  ;;  %v3706_v44 = vrot.slane %v3705_v52, 1  ;;  %v5193_v55 = vunpack.c.l.b16 %v6237_v20 }
 0x23f   : > { %v5321_v0 = vunpack.c.l.b16 %v6365_v39  ;;  %v8166_v58 = vmax.f32 %v2919_v30, %v2920_v35  ;;  %v8168_v27 = vmax.f32 %v3687_v14, %v3688_v49  ;;  %v9385_v6 = vpack.c.bf16 %v8092_v3, %v8092_v3 }
 0x240   : > { %v9386_v5 = vpack.c.bf16 %v8094_v10, %v8094_v10  ;;  %v8176_v62 = vmax.f32 %v2937_v11, %v2938_v46  ;;  %v8178_v34 = vmax.f32 %v3705_v52, %v3706_v44  ;;  %v9387_v2 = vpack.c.bf16 %v8096_v48, %v8096_v48 }
 0x241   : > { %v5194_v15 = vunpack.c.l.b16 %v9385_v6  ;;  %v9388_v22 = vpack.c.bf16 %v8098_v60, %v8098_v60  ;;  %v5449_v3 = vsel %vm5404_vm4, %v5193_v55, %v8137_v7  ;;  %v5561_v53 = vsel %vm5404_vm4, %v5321_v0, %v8140_v38 }
 0x242   : > { %v5322_v26 = vunpack.c.l.b16 %v9386_v5  ;;  %v5195_v54 = vunpack.c.l.b16 %v9387_v2  ;;  %v8192_v44 = vunpack.c.l.b16 %v6242_v19  ;;  %v8194_v48 = vunpack.c.l.b16 %v6370_v59  ;;  %v8224_v59 = vpop.f32.mrb[83].mxu1 }
 0x243   : > { %v5323_v50 = vunpack.c.l.b16 %v9388_v22  ;;  %v5450_v10 = vsel %vm5406_vm5, %v5194_v15, %v5449_v3  ;;  %v6240_v7 = vpack.c.bf16 %v8166_v58, %v8166_v58  ;;  %v6368_v0 = vpack.c.bf16 %v8168_v27, %v8168_v27 }
 0x244   : > { %v5562_v46 = vsel %vm5406_vm5, %v5322_v26, %v5561_v53  ;;  %v5451_v21 = vsel %vm5408_vm6, %v5195_v54, %v5450_v10  ;;  %v6243_v24 = vpack.c.bf16 %v8176_v62, %v8176_v62  ;;  %v6371_v51 = vpack.c.bf16 %v8178_v34, %v8178_v34 }
 0x245   : > { %v5563_v60 = vsel %vm5408_vm6, %v5323_v50, %v5562_v46  ;;  %v5633_v38 = vpack.c.b16 %v5451_v21, %v5451_v21  ;;  %v1529_v17 = vadd.f32 %v7908_v45, %v9389_v61  ;;  %v2041_v47 = vadd.f32 %v7908_v45, %v7775_v33  ;;  %v8226_v61 = vpop.f32.mrb[84].mxu0 }
 0x246   : > { %v5649_v55 = vpack.c.b16 %v5563_v60, %v5563_v60  ;;  %v1550_v30 = vadd.f32 %v7908_v45, %v7777_v37  ;;  %v2062_v14 = vadd.f32 %v7908_v45, %v7779_v29  ;;  %v1542_v4 = vadd.f32 %v7908_v45, %v7781_v63 }
 0x247   : > { %5697 = vst [vmem:[%s7360_s13 + $0x18] sm:$0xf] %v5633_v38  ;;  %v2054_v40 = vadd.f32 %v7908_v45, %v7783_v56  ;;  %v1553_v11 = vadd.f32 %v7908_v45, %v7785_v13  ;;  %v2065_v33 = vadd.f32 %v7908_v45, %v7787_v43  ;;  %v2381_v52 = vmax.f32 %v1529_v17, 0.0  ;;  %v8228_v17 = vpop.f32.mrb[84].mxu1 }
 0x248   : > { %5713 = vst [vmem:[%s7360_s13 + $0x58] sm:$0xf] %v5649_v55  ;;  %v2509_v20 = vmax.f32 %v2041_v47, 0.0  ;;  %v2386_v37 = vmax.f32 %v1550_v30, 0.0  ;;  %v2514_v39 = vmax.f32 %v2062_v14, 0.0  ;;  %v2384_v35 = vmax.f32 %v1542_v4, 0.0 }
 0x249   : > { %v2512_v29 = vmax.f32 %v2054_v40, 0.0  ;;  %v2387_v49 = vmax.f32 %v1553_v11, 0.0  ;;  %v2515_v19 = vmax.f32 %v2065_v33, 0.0  ;;  %v2922_v63 = vrot.slane %v2381_v52, 4  ;;  %v8230_v40 = vpop.f32.mrb[85].mxu0  ;;  %v8232_v11 = vpop.f32.mrb[85].mxu1 }
 0x24a   : > { %v3690_v6 = vrot.slane %v2509_v20, 4  ;;  %v2952_v15 = vrot.slane %v2386_v37, 4  ;;  %v3720_v56 = vrot.slane %v2514_v39, 4  ;;  %v2940_v5 = vrot.slane %v2384_v35, 4 }
 0x24b   : > { %v3708_v26 = vrot.slane %v2512_v29, 4  ;;  %v2958_v13 = vrot.slane %v2387_v49, 4  ;;  %v3726_v2 = vrot.slane %v2515_v19, 4  ;;  %v2923_v54 = vmax.f32 %v2381_v52, %v2922_v63 }
 0x24c   : > { %v3691_v43 = vmax.f32 %v2509_v20, %v3690_v6  ;;  %v2953_v22 = vmax.f32 %v2386_v37, %v2952_v15  ;;  %v3721_v50 = vmax.f32 %v2514_v39, %v3720_v56  ;;  %v2941_v3 = vmax.f32 %v2384_v35, %v2940_v5  ;;  %v8234_v39 = vpop.f32.mrb[86].mxu0  ;;  %v8236_v35 = vpop.f32.mrb[86].mxu1 }
 0x24d   : > { %v3709_v53 = vmax.f32 %v2512_v29, %v3708_v26  ;;  %v2959_v10 = vmax.f32 %v2387_v49, %v2958_v13  ;;  %v3727_v46 = vmax.f32 %v2515_v19, %v3726_v2  ;;  %v2924_v21 = vrot.slane %v2923_v54, 2  ;;  %v8238_v6 = vpop.f32.mrb[87].mxu0 }
 0x24e   : > { %v3692_v60 = vrot.slane %v3691_v43, 2  ;;  %v2954_v38 = vrot.slane %v2953_v22, 2  ;;  %v3722_v55 = vrot.slane %v3721_v50, 2  ;;  %v2942_v47 = vrot.slane %v2941_v3, 2 }
 0x24f   : > { %v3710_v30 = vrot.slane %v3709_v53, 2  ;;  %v2960_v14 = vrot.slane %v2959_v10, 2  ;;  %v3728_v4 = vrot.slane %v3727_v46, 2  ;;  %v2925_v33 = vmax.f32 %v2923_v54, %v2924_v21 }
 0x250   : > { %v3693_v52 = vmax.f32 %v3691_v43, %v3692_v60  ;;  %v2955_v20 = vmax.f32 %v2953_v22, %v2954_v38  ;;  %v3723_v37 = vmax.f32 %v3721_v50, %v3722_v55  ;;  %v2943_v29 = vmax.f32 %v2941_v3, %v2942_v47 }
 0x251   : > { %v3711_v49 = vmax.f32 %v3709_v53, %v3710_v30  ;;  %v2961_v19 = vmax.f32 %v2959_v10, %v2960_v14  ;;  %v3729_v63 = vmax.f32 %v3727_v46, %v3728_v4  ;;  %v2926_v15 = vrot.slane %v2925_v33, 1 }
 0x252   : > { %v3694_v56 = vrot.slane %v3693_v52, 1  ;;  %v2956_v5 = vrot.slane %v2955_v20, 1  ;;  %v3724_v26 = vrot.slane %v3723_v37, 1  ;;  %v2944_v13 = vrot.slane %v2943_v29, 1 }
 0x253   : > { %v3712_v2 = vrot.slane %v3711_v49, 1  ;;  %v2962_v54 = vrot.slane %v2961_v19, 1  ;;  %v3730_v43 = vrot.slane %v3729_v63, 1  ;;  %v2927_v22 = vmax.f32 %v2925_v33, %v2926_v15 }
 0x254   : > { %v3695_v50 = vmax.f32 %v3693_v52, %v3694_v56  ;;  %v8240_v21 = vmax.f32 %v2955_v20, %v2956_v5  ;;  %v8242_v60 = vmax.f32 %v3723_v37, %v3724_v26  ;;  %v2945_v3 = vmax.f32 %v2943_v29, %v2944_v13 }
 0x255   : > { %v3713_v53 = vmax.f32 %v3711_v49, %v3712_v2  ;;  %v8244_v10 = vmax.f32 %v2961_v19, %v2962_v54  ;;  %v8246_v46 = vmax.f32 %v3729_v63, %v3730_v43  ;;  %v5196_v38 = vunpack.c.l.b16 %v6240_v7  ;;  %v8290_v54 = vpop.f32.mrb[87].mxu1 }
 0x256   : > { %v5324_v55 = vunpack.c.l.b16 %v6368_v0  ;;  %v6241_v47 = vpack.c.bf16 %v2927_v22, %v2927_v22  ;;  %v6369_v30 = vpack.c.bf16 %v3695_v50, %v3695_v50  ;;  %v5199_v14 = vunpack.c.l.b16 %v6243_v24  ;;  %v9390_v22 = vld [vmem:[#allocation14_spill] sm:$0xff]  ;;  %v9391_v50 = vld [vmem:[#allocation15_spill] sm:$0xff] }
 0x257   : > { %v5327_v4 = vunpack.c.l.b16 %v6371_v51  ;;  %v6244_v33 = vpack.c.bf16 %v2945_v3, %v2945_v3  ;;  %v6372_v52 = vpack.c.bf16 %v3713_v53, %v3713_v53  ;;  %v1545_v29 = vadd.f32 %v7908_v45, %v7789_v41 }
 0x258   : > { %v5197_v20 = vunpack.c.l.b16 %v6241_v47  ;;  %v5325_v37 = vunpack.c.l.b16 %v6369_v30  ;;  %v2057_v49 = vadd.f32 %v7908_v45, %v7845_v28  ;;  %v1566_v15 = vadd.f32 %v7908_v45, %v7851_v36  ;;  %v9393_v30 = vld [vmem:[#allocation17_spill] sm:$0xff] }
 0x259   : > { %v5200_v7 = vunpack.c.l.b16 %v6244_v33  ;;  %v5328_v0 = vunpack.c.l.b16 %v6372_v52  ;;  %v2078_v56 = vadd.f32 %v7908_v45, %v7853_v25  ;;  %v2385_v41 = vmax.f32 %v1545_v29, 0.0 }
 0x25a   : > { %v5452_v34 = vsel %vm5396_vm0, %v5197_v20, %v5196_v38  ;;  %v5564_v51 = vsel %vm5396_vm0, %v5325_v37, %v5324_v55  ;;  %v2513_v13 = vmax.f32 %v2057_v49, 0.0  ;;  %v2390_v2 = vmax.f32 %v1566_v15, 0.0  ;;  %v9392_v55 = vld [vmem:[#allocation16_spill] sm:$0xff]  ;;  %v8302_v15 = vpop.f32.mrb[88].mxu1 }
 0x25b   : > { %v5453_v19 = vsel %vm5398_vm1, %v8192_v44, %v5452_v34  ;;  %v5565_v63 = vsel %vm5398_vm1, %v8194_v48, %v5564_v51  ;;  %v2518_v48 = vmax.f32 %v2078_v56, 0.0  ;;  %v2946_v36 = vrot.slane %v2385_v41, 4 }
 0x25c   : > { %v5454_v5 = vsel %vm5400_vm2, %v5199_v14, %v5453_v19  ;;  %v5566_v26 = vsel %vm5400_vm2, %v5327_v4, %v5565_v63  ;;  %v3714_v43 = vrot.slane %v2513_v13, 4  ;;  %v1558_v25 = vadd.f32 %v7908_v45, %v9390_v22  ;;  %v8300_v63 = vpop.f32.mrb[88].mxu0 }
 0x25d   : > { %v8285_v28 = vsel %vm5402_vm3, %v5200_v7, %v5454_v5  ;;  %v8288_v44 = vsel %vm5402_vm3, %v5328_v0, %v5566_v26  ;;  %v2070_v3 = vadd.f32 %v7908_v45, %v9391_v50  ;;  %v2976_v53 = vrot.slane %v2390_v2, 4 }
 0x25e   : > { %v3744_v38 = vrot.slane %v2518_v48, 4  ;;  %v1569_v47 = vadd.f32 %v7908_v45, %v9392_v55  ;;  %v2081_v14 = vadd.f32 %v7908_v45, %v9393_v30  ;;  %v2947_v4 = vmax.f32 %v2385_v41, %v2946_v36  ;;  %v8304_v41 = vpop.f32.mrb[89].mxu0 }
 0x25f   : > { %v3715_v33 = vmax.f32 %v2513_v13, %v3714_v43  ;;  %v2388_v52 = vmax.f32 %v1558_v25, 0.0  ;;  %v2516_v20 = vmax.f32 %v2070_v3, 0.0  ;;  %v2977_v37 = vmax.f32 %v2390_v2, %v2976_v53  ;;  %v8306_v13 = vpop.f32.mrb[89].mxu1  ;;  %v8308_v22 = vpop.f32.mrb[90].mxu0 }
 0x260   : > { %v3745_v7 = vmax.f32 %v2518_v48, %v3744_v38  ;;  %v2391_v0 = vmax.f32 %v1569_v47, 0.0  ;;  %v2519_v34 = vmax.f32 %v2081_v14, 0.0  ;;  %v2948_v51 = vrot.slane %v2947_v4, 2  ;;  %9394 = vst [vmem:[#allocation12_spill] sm:$0xff] %v8306_v13  ;;  %9395 = vst [vmem:[#allocation13_spill] sm:$0xff] %v8308_v22  ;;  %v8310_v25 = vpop.f32.mrb[90].mxu1 }
 0x261   : > { %v3716_v29 = vrot.slane %v3715_v33, 2  ;;  %v2964_v49 = vrot.slane %v2388_v52, 4  ;;  %v3732_v19 = vrot.slane %v2516_v20, 4  ;;  %v2978_v56 = vrot.slane %v2977_v37, 2  ;;  %9396 = vst [vmem:[#allocation14_spill] sm:$0xff] %v8310_v25  ;;  %v8312_v55 = vpop.f32.mrb[91].mxu0 }
 0x262   : > { %v3746_v5 = vrot.slane %v3745_v7, 2  ;;  %v2982_v26 = vrot.slane %v2391_v0, 4  ;;  %v3750_v45 = vrot.slane %v2519_v34, 4  ;;  %v2949_v2 = vmax.f32 %v2947_v4, %v2948_v51  ;;  %9397 = vst [vmem:[#allocation15_spill] sm:$0xff] %v8312_v55 }
 0x263   : > { %v3717_v48 = vmax.f32 %v3715_v33, %v3716_v29  ;;  %v2965_v36 = vmax.f32 %v2388_v52, %v2964_v49  ;;  %v3733_v43 = vmax.f32 %v2516_v20, %v3732_v19  ;;  %v2979_v50 = vmax.f32 %v2977_v37, %v2978_v56 }
 0x264   : > { %v3747_v3 = vmax.f32 %v3745_v7, %v3746_v5  ;;  %v2983_v53 = vmax.f32 %v2391_v0, %v2982_v26  ;;  %v3751_v38 = vmax.f32 %v2519_v34, %v3750_v45  ;;  %v2950_v47 = vrot.slane %v2949_v2, 1 }
 0x265   : > { %v3718_v30 = vrot.slane %v3717_v48, 1  ;;  %v2966_v14 = vrot.slane %v2965_v36, 2  ;;  %v3734_v24 = vrot.slane %v3733_v43, 2  ;;  %v2980_v62 = vrot.slane %v2979_v50, 1 }
 0x266   : > { %v3748_v27 = vrot.slane %v3747_v3, 1  ;;  %v2984_v4 = vrot.slane %v2983_v53, 2  ;;  %v3752_v33 = vrot.slane %v3751_v38, 2  ;;  %v2951_v52 = vmax.f32 %v2949_v2, %v2950_v47 }
 0x267   : > { %v3719_v20 = vmax.f32 %v3717_v48, %v3718_v30  ;;  %v2967_v51 = vmax.f32 %v2965_v36, %v2966_v14  ;;  %v3735_v29 = vmax.f32 %v3733_v43, %v3734_v24  ;;  %v2981_v49 = vmax.f32 %v2979_v50, %v2980_v62 }
 0x268   : > { %v3749_v19 = vmax.f32 %v3747_v3, %v3748_v27  ;;  %v2985_v37 = vmax.f32 %v2983_v53, %v2984_v4  ;;  %v3753_v7 = vmax.f32 %v3751_v38, %v3752_v33  ;;  %v6245_v0 = vpack.c.bf16 %v2951_v52, %v2951_v52  ;;  %v8357_v33 = vld [vmem:[%s9260_s2] ss:$0 sm:$0xff] }
 0x269   : > { %v6373_v34 = vpack.c.bf16 %v3719_v20, %v3719_v20  ;;  %v2968_v56 = vrot.slane %v2967_v51, 1  ;;  %v3736_v5 = vrot.slane %v3735_v29, 1  ;;  %v6250_v26 = vpack.c.bf16 %v2981_v49, %v2981_v49  ;;  %v9402_v52 = vld [vmem:[#allocation18_spill] sm:$0xff] }
 0x26a   : > { %v6378_v45 = vpack.c.bf16 %v3749_v19, %v3749_v19  ;;  %v2986_v58 = vrot.slane %v2985_v37, 1  ;;  %v3754_v55 = vrot.slane %v3753_v7, 1  ;;  %v5201_v25 = vunpack.c.l.b16 %v6245_v0 }
 0x26b   : > { %v5329_v22 = vunpack.c.l.b16 %v6373_v34  ;;  %v8314_v13 = vmax.f32 %v2967_v51, %v2968_v56  ;;  %v8316_v2 = vmax.f32 %v3735_v29, %v3736_v5  ;;  %v9398_v62 = vpack.c.bf16 %v8240_v21, %v8240_v21 }
 0x26c   : > { %v9399_v24 = vpack.c.bf16 %v8242_v60, %v8242_v60  ;;  %v8324_v36 = vmax.f32 %v2985_v37, %v2986_v58  ;;  %v8326_v43 = vmax.f32 %v3753_v7, %v3754_v55  ;;  %v9400_v50 = vpack.c.bf16 %v8244_v10, %v8244_v10 }
 0x26d   : > { %v5202_v27 = vunpack.c.l.b16 %v9398_v62  ;;  %v9401_v53 = vpack.c.bf16 %v8246_v46, %v8246_v46  ;;  %v5456_v21 = vsel %vm5404_vm4, %v5201_v25, %v8285_v28  ;;  %v5568_v47 = vsel %vm5404_vm4, %v5329_v22, %v8288_v44  ;;  %v8377_v62 = vpop.f32.mrb[91].mxu1 }
 0x26e   : > { %v5330_v48 = vunpack.c.l.b16 %v9399_v24  ;;  %v5203_v3 = vunpack.c.l.b16 %v9400_v50  ;;  %v8340_v55 = vunpack.c.l.b16 %v6250_v26  ;;  %v8342_v10 = vunpack.c.l.b16 %v6378_v45 }
 0x26f   : > { %v5331_v38 = vunpack.c.l.b16 %v9401_v53  ;;  %v5457_v60 = vsel %vm5406_vm5, %v5202_v27, %v5456_v21  ;;  %v6248_v28 = vpack.c.bf16 %v8314_v13, %v8314_v13  ;;  %v6376_v44 = vpack.c.bf16 %v8316_v2, %v8316_v2 }
 0x270   : > { %v5569_v58 = vsel %vm5406_vm5, %v5330_v48, %v5568_v47  ;;  %v5458_v30 = vsel %vm5408_vm6, %v5203_v3, %v5457_v60  ;;  %v6251_v14 = vpack.c.bf16 %v8324_v36, %v8324_v36  ;;  %v1561_v20 = vadd.f32 %v8357_v33, %v9402_v52 }
 0x271   : > { %v5570_v46 = vsel %vm5408_vm6, %v5331_v38, %v5569_v58  ;;  %v5634_v22 = vpack.c.b16 %v5458_v30, %v5458_v30  ;;  %v2073_v51 = vadd.f32 %v8357_v33, %v7928_v23  ;;  %v1582_v29 = vadd.f32 %v8357_v33, %v7930_v57 }
 0x272   : > { %v5650_v25 = vpack.c.b16 %v5570_v46, %v5570_v46  ;;  %v2094_v49 = vadd.f32 %v8357_v33, %v7932_v42  ;;  %v1574_v19 = vadd.f32 %v8357_v33, %v7934_v31  ;;  %v2086_v37 = vadd.f32 %v8357_v33, %v7936_v8 }
 0x273   : > { %5698 = vst [vmem:[%s7360_s13 + $0x1c] sm:$0xf] %v5634_v22  ;;  %v1585_v7 = vadd.f32 %v8357_v33, %v7938_v32  ;;  %v2097_v23 = vadd.f32 %v8357_v33, %v7940_v16  ;;  %v2389_v0 = vmax.f32 %v1561_v20, 0.0  ;;  %v2517_v34 = vmax.f32 %v2073_v51, 0.0  ;;  %v8379_v20 = vpop.f32.mrb[92].mxu0  ;;  %v8381_v51 = vpop.f32.mrb[92].mxu1 }
 0x274   : > { %5714 = vst [vmem:[%s7360_s13 + $0x5c] sm:$0xf] %v5650_v25  ;;  %v2394_v57 = vmax.f32 %v1582_v29, 0.0  ;;  %v2522_v56 = vmax.f32 %v2094_v49, 0.0  ;;  %v2392_v5 = vmax.f32 %v1574_v19, 0.0  ;;  %v2520_v42 = vmax.f32 %v2086_v37, 0.0 }
 0x275   : > { %v2395_v26 = vmax.f32 %v1585_v7, 0.0  ;;  %v2523_v45 = vmax.f32 %v2097_v23, 0.0  ;;  %v2970_v31 = vrot.slane %v2389_v0, 4  ;;  %v3738_v27 = vrot.slane %v2517_v34, 4  ;;  %v8383_v7 = vpop.f32.mrb[93].mxu0  ;;  %v8385_v23 = vpop.f32.mrb[93].mxu1 }
 0x276   : > { %v3000_v24 = vrot.slane %v2394_v57, 4  ;;  %v3768_v8 = vrot.slane %v2522_v56, 4  ;;  %v2988_v48 = vrot.slane %v2392_v5, 4  ;;  %v3756_v50 = vrot.slane %v2520_v42, 4 }
 0x277   : > { %v3006_v32 = vrot.slane %v2395_v26, 4  ;;  %v3774_v3 = vrot.slane %v2523_v45, 4  ;;  %v2971_v53 = vmax.f32 %v2389_v0, %v2970_v31  ;;  %v3739_v16 = vmax.f32 %v2517_v34, %v3738_v27 }
 0x278   : > { %v3001_v38 = vmax.f32 %v2394_v57, %v3000_v24  ;;  %v3769_v21 = vmax.f32 %v2522_v56, %v3768_v8  ;;  %v2989_v47 = vmax.f32 %v2392_v5, %v2988_v48  ;;  %v3757_v60 = vmax.f32 %v2520_v42, %v3756_v50  ;;  %v8387_v5 = vpop.f32.mrb[94].mxu0  ;;  %v8389_v42 = vpop.f32.mrb[94].mxu1 }
 0x279   : > { %v3007_v58 = vmax.f32 %v2395_v26, %v3006_v32  ;;  %v3775_v30 = vmax.f32 %v2523_v45, %v3774_v3  ;;  %v2972_v46 = vrot.slane %v2971_v53, 2  ;;  %v3740_v22 = vrot.slane %v3739_v16, 2  ;;  %9403 = vst [vmem:[#allocation16_spill] sm:$0xff] %v8389_v42  ;;  %v8391_v24 = vpop.f32.mrb[95].mxu0 }
 0x27a   : > { %v3002_v25 = vrot.slane %v3001_v38, 2  ;;  %v3770_v52 = vrot.slane %v3769_v21, 2  ;;  %v2990_v29 = vrot.slane %v2989_v47, 2  ;;  %v3758_v49 = vrot.slane %v3757_v60, 2  ;;  %9404 = vst [vmem:[#allocation17_spill] sm:$0xff] %v8391_v24 }
 0x27b   : > { %v3008_v19 = vrot.slane %v3007_v58, 2  ;;  %v3776_v37 = vrot.slane %v3775_v30, 2  ;;  %v2973_v0 = vmax.f32 %v2971_v53, %v2972_v46  ;;  %v3741_v34 = vmax.f32 %v3739_v16, %v3740_v22 }
 0x27c   : > { %v3003_v57 = vmax.f32 %v3001_v38, %v3002_v25  ;;  %v3771_v56 = vmax.f32 %v3769_v21, %v3770_v52  ;;  %v2991_v26 = vmax.f32 %v2989_v47, %v2990_v29  ;;  %v3759_v45 = vmax.f32 %v3757_v60, %v3758_v49 }
 0x27d   : > { %v3009_v31 = vmax.f32 %v3007_v58, %v3008_v19  ;;  %v3777_v27 = vmax.f32 %v3775_v30, %v3776_v37  ;;  %v2974_v8 = vrot.slane %v2973_v0, 1  ;;  %v3742_v48 = vrot.slane %v3741_v34, 1 }
 0x27e   : > { %v3004_v50 = vrot.slane %v3003_v57, 1  ;;  %v3772_v32 = vrot.slane %v3771_v56, 1  ;;  %v2992_v3 = vrot.slane %v2991_v26, 1  ;;  %v3760_v4 = vrot.slane %v3759_v45, 1 }
 0x27f   : > { %v3010_v53 = vrot.slane %v3009_v31, 1  ;;  %v3778_v16 = vrot.slane %v3777_v27, 1  ;;  %v2975_v38 = vmax.f32 %v2973_v0, %v2974_v8  ;;  %v3743_v21 = vmax.f32 %v3741_v34, %v3742_v48 }
 0x280   : > { %v8393_v46 = vmax.f32 %v3003_v57, %v3004_v50  ;;  %v8395_v22 = vmax.f32 %v3771_v56, %v3772_v32  ;;  %v2993_v47 = vmax.f32 %v2991_v26, %v2992_v3  ;;  %v3761_v60 = vmax.f32 %v3759_v45, %v3760_v4  ;;  %v9406_v45 = vld [vmem:[#allocation19_spill] sm:$0xff]  ;;  %v9408_v32 = vld [vmem:[#allocation21_spill] sm:$0xff] }
 0x281   : > { %v8397_v58 = vmax.f32 %v3009_v31, %v3010_v53  ;;  %v8399_v30 = vmax.f32 %v3777_v27, %v3778_v16  ;;  %v5204_v25 = vunpack.c.l.b16 %v6248_v28  ;;  %v5332_v52 = vunpack.c.l.b16 %v6376_v44  ;;  %v9407_v27 = vld [vmem:[#allocation20_spill] sm:$0xff]  ;;  %v9409_v53 = vld [vmem:[#allocation22_spill] sm:$0xff] }
 0x282   : > { %v6249_v29 = vpack.c.bf16 %v2975_v38, %v2975_v38  ;;  %v6377_v49 = vpack.c.bf16 %v3743_v21, %v3743_v21  ;;  %v5207_v19 = vunpack.c.l.b16 %v6251_v14  ;;  %v9405_v4 = vpack.c.bf16 %v8326_v43, %v8326_v43 }
 0x283   : > { %v6252_v0 = vpack.c.bf16 %v2993_v47, %v2993_v47  ;;  %v6380_v34 = vpack.c.bf16 %v3761_v60, %v3761_v60  ;;  %v1577_v31 = vadd.f32 %v8357_v33, %v9406_v45  ;;  %v2089_v8 = vadd.f32 %v8357_v33, %v9407_v27 }
 0x284   : > { %v5335_v37 = vunpack.c.l.b16 %v9405_v4  ;;  %v5205_v57 = vunpack.c.l.b16 %v6249_v29  ;;  %v5333_v56 = vunpack.c.l.b16 %v6377_v49  ;;  %v1598_v3 = vadd.f32 %v8357_v33, %v9408_v32  ;;  %v8443_v29 = vpop.f32.mrb[95].mxu1 }
 0x285   : > { %v5208_v28 = vunpack.c.l.b16 %v6252_v0  ;;  %v5336_v44 = vunpack.c.l.b16 %v6380_v34  ;;  %v2110_v16 = vadd.f32 %v8357_v33, %v9409_v53  ;;  %v2393_v47 = vmax.f32 %v1577_v31, 0.0  ;;  %9410 = vst [vmem:[#allocation18_spill] sm:$0xff] %v8443_v29  ;;  %v9411_v0 = vld [vmem:[#allocation23_spill] sm:$0xff] }
 0x286   : > { %v5459_v43 = vsel %vm5396_vm0, %v5205_v57, %v5204_v25  ;;  %v5571_v26 = vsel %vm5396_vm0, %v5333_v56, %v5332_v52  ;;  %v2521_v60 = vmax.f32 %v2089_v8, 0.0  ;;  %v2398_v52 = vmax.f32 %v1598_v3, 0.0 }
 0x287   : > { %v5460_v48 = vsel %vm5398_vm1, %v8340_v55, %v5459_v43  ;;  %v5572_v50 = vsel %vm5398_vm1, %v8342_v10, %v5571_v26  ;;  %v2526_v10 = vmax.f32 %v2110_v16, 0.0  ;;  %v2994_v49 = vrot.slane %v2393_v47, 4  ;;  %v9413_v43 = vld [vmem:[#allocation25_spill] sm:$0xff]  ;;  %v9414_v26 = vld [vmem:[#allocation26_spill] sm:$0xff] }
 0x288   : > { %v5461_v38 = vsel %vm5400_vm2, %v5207_v19, %v5460_v48  ;;  %v5573_v21 = vsel %vm5400_vm2, %v5335_v37, %v5572_v50  ;;  %v3762_v4 = vrot.slane %v2521_v60, 4  ;;  %v1590_v34 = vadd.f32 %v8357_v33, %v9411_v0  ;;  %v9412_v19 = vld [vmem:[#allocation24_spill] sm:$0xff]  ;;  %v8453_v0 = vpop.f32.mrb[96].mxu0 }
 0x289   : > { %v8438_v25 = vsel %vm5402_vm3, %v5208_v28, %v5461_v38  ;;  %v8441_v55 = vsel %vm5402_vm3, %v5336_v44, %v5573_v21  ;;  %v2102_v37 = vadd.f32 %v8357_v33, %v9412_v19  ;;  %v3024_v57 = vrot.slane %v2398_v52, 4  ;;  %9415 = vst [vmem:[#allocation19_spill] sm:$0xff] %v8453_v0  ;;  %v8455_v19 = vpop.f32.mrb[96].mxu1 }
 0x28a   : > { %v3792_v56 = vrot.slane %v2526_v10, 4  ;;  %v1601_v28 = vadd.f32 %v8357_v33, %v9413_v43  ;;  %v2113_v44 = vadd.f32 %v8357_v33, %v9414_v26  ;;  %v2995_v45 = vmax.f32 %v2393_v47, %v2994_v49  ;;  %9416 = vst [vmem:[#allocation20_spill] sm:$0xff] %v8455_v19  ;;  %v8457_v47 = vpop.f32.mrb[97].mxu0 }
 0x28b   : > { %v3763_v31 = vmax.f32 %v2521_v60, %v3762_v4  ;;  %v2396_v27 = vmax.f32 %v1590_v34, 0.0  ;;  %v2524_v8 = vmax.f32 %v2102_v37, 0.0  ;;  %v3025_v48 = vmax.f32 %v2398_v52, %v3024_v57  ;;  %9417 = vst [vmem:[#allocation21_spill] sm:$0xff] %v8457_v47  ;;  %v8459_v60 = vpop.f32.mrb[97].mxu1  ;;  %v8461_v34 = vpop.f32.mrb[98].mxu0 }
 0x28c   : > { %v3793_v50 = vmax.f32 %v2526_v10, %v3792_v56  ;;  %v2399_v32 = vmax.f32 %v1601_v28, 0.0  ;;  %v2527_v3 = vmax.f32 %v2113_v44, 0.0  ;;  %v2996_v53 = vrot.slane %v2995_v45, 2  ;;  %9418 = vst [vmem:[#allocation22_spill] sm:$0xff] %v8459_v60  ;;  %9419 = vst [vmem:[#allocation23_spill] sm:$0xff] %v8461_v34  ;;  %v8463_v37 = vpop.f32.mrb[98].mxu1 }
 0x28d   : > { %v3764_v16 = vrot.slane %v3763_v31, 2  ;;  %v3012_v38 = vrot.slane %v2396_v27, 4  ;;  %v3780_v21 = vrot.slane %v2524_v8, 4  ;;  %v3026_v43 = vrot.slane %v3025_v48, 2  ;;  %9420 = vst [vmem:[#allocation24_spill] sm:$0xff] %v8463_v37  ;;  %v8465_v2 = vpop.f32.mrb[99].mxu0 }
 0x28e   : > { %v3794_v14 = vrot.slane %v3793_v50, 2  ;;  %v3030_v36 = vrot.slane %v2399_v32, 4  ;;  %v3798_v26 = vrot.slane %v2527_v3, 4  ;;  %v2997_v52 = vmax.f32 %v2995_v45, %v2996_v53  ;;  %9421 = vst [vmem:[#allocation25_spill] sm:$0xff] %v8465_v2 }
 0x28f   : > { %v3765_v10 = vmax.f32 %v3763_v31, %v3764_v16  ;;  %v3013_v49 = vmax.f32 %v2396_v27, %v3012_v38  ;;  %v3781_v4 = vmax.f32 %v2524_v8, %v3780_v21  ;;  %v3027_v57 = vmax.f32 %v3025_v48, %v3026_v43 }
 0x290   : > { %v3795_v56 = vmax.f32 %v3793_v50, %v3794_v14  ;;  %v3031_v28 = vmax.f32 %v2399_v32, %v3030_v36  ;;  %v3799_v44 = vmax.f32 %v2527_v3, %v3798_v26  ;;  %v2998_v13 = vrot.slane %v2997_v52, 1 }
 0x291   : > { %v3766_v19 = vrot.slane %v3765_v10, 1  ;;  %v3014_v0 = vrot.slane %v3013_v49, 2  ;;  %v3782_v47 = vrot.slane %v3781_v4, 2  ;;  %v3028_v29 = vrot.slane %v3027_v57, 1 }
 0x292   : > { %v3796_v60 = vrot.slane %v3795_v56, 1  ;;  %v3032_v45 = vrot.slane %v3031_v28, 2  ;;  %v3800_v31 = vrot.slane %v3799_v44, 2  ;;  %v2999_v27 = vmax.f32 %v2997_v52, %v2998_v13 }
 0x293   : > { %v3767_v8 = vmax.f32 %v3765_v10, %v3766_v19  ;;  %v3015_v53 = vmax.f32 %v3013_v49, %v3014_v0  ;;  %v3783_v16 = vmax.f32 %v3781_v4, %v3782_v47  ;;  %v3029_v38 = vmax.f32 %v3027_v57, %v3028_v29 }
 0x294   : > { %v3797_v21 = vmax.f32 %v3795_v56, %v3796_v60  ;;  %v3033_v48 = vmax.f32 %v3031_v28, %v3032_v45  ;;  %v3801_v14 = vmax.f32 %v3799_v44, %v3800_v31  ;;  %v6253_v36 = vpack.c.bf16 %v2999_v27, %v2999_v27  ;;  %v9426_v31 = vld [vmem:[#allocation27_spill] sm:$0xff] }
 0x295   : > { %v6381_v50 = vpack.c.bf16 %v3767_v8, %v3767_v8  ;;  %v3016_v32 = vrot.slane %v3015_v53, 1  ;;  %v3784_v3 = vrot.slane %v3783_v16, 1  ;;  %v6258_v43 = vpack.c.bf16 %v3029_v38, %v3029_v38 }
 0x296   : > { %v6386_v26 = vpack.c.bf16 %v3797_v21, %v3797_v21  ;;  %v3034_v2 = vrot.slane %v3033_v48, 1  ;;  %v3802_v37 = vrot.slane %v3801_v14, 1  ;;  %v5209_v34 = vunpack.c.l.b16 %v6253_v36  ;;  %v9427_v21 = vld [vmem:[#allocation28_spill] sm:$0xff] }
 0x297   : > { %v5337_v24 = vunpack.c.l.b16 %v6381_v50  ;;  %v8467_v42 = vmax.f32 %v3015_v53, %v3016_v32  ;;  %v8469_v13 = vmax.f32 %v3783_v16, %v3784_v3  ;;  %v9422_v29 = vpack.c.bf16 %v8393_v46, %v8393_v46  ;;  %v9429_v50 = vld [vmem:[#allocation2_spill] sm:$0xff] }
 0x298   : > { %v9423_v19 = vpack.c.bf16 %v8395_v22, %v8395_v22  ;;  %v8477_v60 = vmax.f32 %v3033_v48, %v3034_v2  ;;  %v8479_v52 = vmax.f32 %v3801_v14, %v3802_v37  ;;  %v9424_v10 = vpack.c.bf16 %v8397_v58, %v8397_v58  ;;  %v9428_v14 = vld [vmem:[#allocation29_spill] sm:$0xff] }
 0x299   : > { %v5210_v0 = vunpack.c.l.b16 %v9422_v29  ;;  %v9425_v4 = vpack.c.bf16 %v8399_v30, %v8399_v30  ;;  %v5463_v46 = vsel %vm5404_vm4, %v5209_v34, %v8438_v25  ;;  %v5575_v56 = vsel %vm5404_vm4, %v5337_v24, %v8441_v55 }
 0x29a   : > { %v5338_v47 = vunpack.c.l.b16 %v9423_v19  ;;  %v5211_v49 = vunpack.c.l.b16 %v9424_v10  ;;  %v8493_v37 = vunpack.c.l.b16 %v6258_v43  ;;  %v8495_v58 = vunpack.c.l.b16 %v6386_v26  ;;  %v8525_v19 = vpop.f32.mrb[99].mxu1 }
 0x29b   : > { %v5339_v57 = vunpack.c.l.b16 %v9425_v4  ;;  %v5464_v22 = vsel %vm5406_vm5, %v5210_v0, %v5463_v46  ;;  %v6256_v25 = vpack.c.bf16 %v8467_v42, %v8467_v42  ;;  %v1593_v27 = vadd.f32 %v8357_v33, %v9426_v31 }
 0x29c   : > { %v5576_v2 = vsel %vm5406_vm5, %v5338_v47, %v5575_v56  ;;  %v5465_v28 = vsel %vm5408_vm6, %v5211_v49, %v5464_v22  ;;  %v2105_v8 = vadd.f32 %v8357_v33, %v8076_v1  ;;  %v1614_v53 = vadd.f32 %v8357_v33, %v8078_v9 }
 0x29d   : > { %v5577_v30 = vsel %vm5408_vm6, %v5339_v57, %v5576_v2  ;;  %v5635_v55 = vpack.c.b16 %v5465_v28, %v5465_v28  ;;  %v2126_v16 = vadd.f32 %v8357_v33, %v8080_v12  ;;  %v1606_v38 = vadd.f32 %v8357_v33, %v8082_v18 }
 0x29e   : > { %v5651_v34 = vpack.c.b16 %v5577_v30, %v5577_v30  ;;  %v2118_v48 = vadd.f32 %v8357_v33, %v9427_v21  ;;  %v1617_v36 = vadd.f32 %v8357_v33, %v9428_v14  ;;  %v2129_v1 = vadd.f32 %v8357_v33, %v9429_v50  ;;  %v8527_v21 = vpop.f32.mrb[100].mxu0 }
 0x29f   : > { %5699 = vst [vmem:[%s7360_s13 + $0x20] sm:$0xf] %v5635_v55  ;;  %v2397_v32 = vmax.f32 %v1593_v27, 0.0  ;;  %v2525_v3 = vmax.f32 %v2105_v8, 0.0  ;;  %v2402_v9 = vmax.f32 %v1614_v53, 0.0  ;;  %v2530_v43 = vmax.f32 %v2126_v16, 0.0 }
 0x2a0   : > { %5715 = vst [vmem:[%s7360_s13 + $0x60] sm:$0xf] %v5651_v34  ;;  %v2400_v26 = vmax.f32 %v1606_v38, 0.0  ;;  %v2528_v12 = vmax.f32 %v2118_v48, 0.0  ;;  %v2403_v29 = vmax.f32 %v1617_v36, 0.0  ;;  %v2531_v0 = vmax.f32 %v2129_v1, 0.0 }
 0x2a1   : > { %v3018_v18 = vrot.slane %v2397_v32, 4  ;;  %v3786_v47 = vrot.slane %v2525_v3, 4  ;;  %v3048_v10 = vrot.slane %v2402_v9, 4  ;;  %v3816_v49 = vrot.slane %v2530_v43, 4  ;;  %v8529_v48 = vpop.f32.mrb[100].mxu1 }
 0x2a2   : > { %v3036_v4 = vrot.slane %v2400_v26, 4  ;;  %v3804_v57 = vrot.slane %v2528_v12, 4  ;;  %v3054_v46 = vrot.slane %v2403_v29, 4  ;;  %v3822_v56 = vrot.slane %v2531_v0, 4 }
 0x2a3   : > { %v3019_v22 = vmax.f32 %v2397_v32, %v3018_v18  ;;  %v3787_v2 = vmax.f32 %v2525_v3, %v3786_v47  ;;  %v3049_v28 = vmax.f32 %v2402_v9, %v3048_v10  ;;  %v3817_v30 = vmax.f32 %v2530_v43, %v3816_v49  ;;  %v8531_v32 = vpop.f32.mrb[101].mxu0  ;;  %v8533_v3 = vpop.f32.mrb[101].mxu1 }
 0x2a4   : > { %v3037_v55 = vmax.f32 %v2400_v26, %v3036_v4  ;;  %v3805_v34 = vmax.f32 %v2528_v12, %v3804_v57  ;;  %v3055_v31 = vmax.f32 %v2403_v29, %v3054_v46  ;;  %v3823_v27 = vmax.f32 %v2531_v0, %v3822_v56  ;;  %9430 = vst [vmem:[#allocation26_spill] sm:$0xff] %v8533_v3  ;;  %v8535_v29 = vpop.f32.mrb[102].mxu0  ;;  %v8537_v0 = vpop.f32.mrb[102].mxu1 }
 0x2a5   : > { %v3020_v8 = vrot.slane %v3019_v22, 2  ;;  %v3788_v53 = vrot.slane %v3787_v2, 2  ;;  %v3050_v16 = vrot.slane %v3049_v28, 2  ;;  %v3818_v38 = vrot.slane %v3817_v30, 2  ;;  %9431 = vst [vmem:[#allocation27_spill] sm:$0xff] %v8535_v29  ;;  %9432 = vst [vmem:[#allocation28_spill] sm:$0xff] %v8537_v0 }
 0x2a6   : > { %v3038_v14 = vrot.slane %v3037_v55, 2  ;;  %v3806_v36 = vrot.slane %v3805_v34, 2  ;;  %v3056_v50 = vrot.slane %v3055_v31, 2  ;;  %v3824_v1 = vrot.slane %v3823_v27, 2  ;;  %v8539_v4 = vpop.f32.mrb[103].mxu0 }
 0x2a7   : > { %v3021_v9 = vmax.f32 %v3019_v22, %v3020_v8  ;;  %v3789_v43 = vmax.f32 %v3787_v2, %v3788_v53  ;;  %v3051_v26 = vmax.f32 %v3049_v28, %v3050_v16  ;;  %v3819_v12 = vmax.f32 %v3817_v30, %v3818_v38  ;;  %9433 = vst [vmem:[#allocation29_spill] sm:$0xff] %v8539_v4 }
 0x2a8   : > { %v3039_v18 = vmax.f32 %v3037_v55, %v3038_v14  ;;  %v3807_v47 = vmax.f32 %v3805_v34, %v3806_v36  ;;  %v3057_v10 = vmax.f32 %v3055_v31, %v3056_v50  ;;  %v3825_v49 = vmax.f32 %v3823_v27, %v3824_v1 }
 0x2a9   : > { %v3022_v57 = vrot.slane %v3021_v9, 1  ;;  %v3790_v46 = vrot.slane %v3789_v43, 1  ;;  %v3052_v56 = vrot.slane %v3051_v26, 1  ;;  %v3820_v45 = vrot.slane %v3819_v12, 1 }
 0x2aa   : > { %v3040_v44 = vrot.slane %v3039_v18, 1  ;;  %v3808_v24 = vrot.slane %v3807_v47, 1  ;;  %v3058_v22 = vrot.slane %v3057_v10, 1  ;;  %v3826_v2 = vrot.slane %v3825_v49, 1 }
 0x2ab   : > { %v3023_v28 = vmax.f32 %v3021_v9, %v3022_v57  ;;  %v3791_v30 = vmax.f32 %v3789_v43, %v3790_v46  ;;  %v8541_v8 = vmax.f32 %v3051_v26, %v3052_v56  ;;  %v8543_v53 = vmax.f32 %v3819_v12, %v3820_v45  ;;  %v9438_v46 = vld [vmem:[#allocation4_spill] sm:$0xff] }
 0x2ac   : > { %v3041_v55 = vmax.f32 %v3039_v18, %v3040_v44  ;;  %v3809_v34 = vmax.f32 %v3807_v47, %v3808_v24  ;;  %v8545_v31 = vmax.f32 %v3057_v10, %v3058_v22  ;;  %v8547_v27 = vmax.f32 %v3825_v49, %v3826_v2  ;;  %v9437_v49 = vld [vmem:[#allocation3_spill] sm:$0xff]  ;;  %v8601_v47 = vpop.f32.mrb[104].mxu0 }
 0x2ad   : > { %v5212_v16 = vunpack.c.l.b16 %v6256_v25  ;;  %v9434_v38 = vpack.c.bf16 %v8469_v13, %v8469_v13  ;;  %v6257_v36 = vpack.c.bf16 %v3023_v28, %v3023_v28  ;;  %v6385_v50 = vpack.c.bf16 %v3791_v30, %v3791_v30  ;;  %v9439_v28 = vld [vmem:[#allocation5_spill] sm:$0xff]  ;;  %9446 = vst [vmem:[#allocation3_spill] sm:$0xff] %v8601_v47 }
 0x2ae   : > { %v9435_v45 = vpack.c.bf16 %v8477_v60, %v8477_v60  ;;  %v9436_v24 = vpack.c.bf16 %v8479_v52, %v8479_v52  ;;  %v6260_v9 = vpack.c.bf16 %v3041_v55, %v3041_v55  ;;  %v6388_v43 = vpack.c.bf16 %v3809_v34, %v3809_v34  ;;  %v9440_v55 = vld [vmem:[#allocation6_spill] sm:$0xff] }
 0x2af   : > { %v5340_v14 = vunpack.c.l.b16 %v9434_v38  ;;  %v5213_v26 = vunpack.c.l.b16 %v6257_v36  ;;  %v5341_v12 = vunpack.c.l.b16 %v6385_v50  ;;  %v1609_v57 = vadd.f32 %v8357_v33, %v9437_v49  ;;  %v9444_v49 = vld [vmem:[#allocation9_spill] sm:$0xff] }
 0x2b0   : > { %v5215_v1 = vunpack.c.l.b16 %v9435_v45  ;;  %v5343_v44 = vunpack.c.l.b16 %v9436_v24  ;;  %v5216_v25 = vunpack.c.l.b16 %v6260_v9  ;;  %v5344_v18 = vunpack.c.l.b16 %v6388_v43  ;;  %v8591_v24 = vpop.f32.mrb[103].mxu1 }
 0x2b1   : > { %v5466_v52 = vsel %vm5396_vm0, %v5213_v26, %v5212_v16  ;;  %v5578_v10 = vsel %vm5396_vm0, %v5341_v12, %v5340_v14  ;;  %v2121_v56 = vadd.f32 %v8357_v33, %v9438_v46  ;;  %v1630_v30 = vadd.f32 %v8357_v33, %v9439_v28  ;;  %9441 = vst [vmem:[#allocation2_spill] sm:$0xff] %v8591_v24  ;;  %v9442_v26 = vld [vmem:[#allocation7_spill] sm:$0xff]  ;;  %v8603_v60 = vpop.f32.mrb[104].mxu1 }
 0x2b2   : > { %v5467_v22 = vsel %vm5398_vm1, %v8493_v37, %v5466_v52  ;;  %v5579_v2 = vsel %vm5398_vm1, %v8495_v58, %v5578_v10  ;;  %v2142_v34 = vadd.f32 %v8357_v33, %v9440_v55  ;;  %v2401_v14 = vmax.f32 %v1609_v57, 0.0  ;;  %v9445_v57 = vld [vmem:[#allocation10_spill] sm:$0xff]  ;;  %9447 = vst [vmem:[#allocation4_spill] sm:$0xff] %v8603_v60 }
 0x2b3   : > { %v5468_v16 = vsel %vm5400_vm2, %v5215_v1, %v5467_v22  ;;  %v5580_v38 = vsel %vm5400_vm2, %v5343_v44, %v5579_v2  ;;  %v2529_v36 = vmax.f32 %v2121_v56, 0.0  ;;  %v2406_v45 = vmax.f32 %v1630_v30, 0.0  ;;  %v9443_v1 = vld [vmem:[#allocation8_spill] sm:$0xff] }
 0x2b4   : > { %v8586_v50 = vsel %vm5402_vm3, %v5216_v25, %v5468_v16  ;;  %v8589_v37 = vsel %vm5402_vm3, %v5344_v18, %v5580_v38  ;;  %v2534_v58 = vmax.f32 %v2142_v34, 0.0  ;;  %v3042_v9 = vrot.slane %v2401_v14, 4 }
 0x2b5   : > { %v3810_v43 = vrot.slane %v2529_v36, 4  ;;  %v1622_v12 = vadd.f32 %v8357_v33, %v9442_v26  ;;  %v2134_v44 = vadd.f32 %v8357_v33, %v9443_v1  ;;  %v3072_v52 = vrot.slane %v2406_v45, 4 }
 0x2b6   : > { %v3840_v10 = vrot.slane %v2534_v58, 4  ;;  %v1633_v25 = vadd.f32 %v8357_v33, %v9444_v49  ;;  %v2145_v18 = vadd.f32 %v8357_v33, %v9445_v57  ;;  %v3043_v46 = vmax.f32 %v2401_v14, %v3042_v9  ;;  %v8605_v14 = vpop.f32.mrb[105].mxu0 }
 0x2b7   : > { %v3811_v56 = vmax.f32 %v2529_v36, %v3810_v43  ;;  %v2404_v22 = vmax.f32 %v1622_v12, 0.0  ;;  %v2532_v2 = vmax.f32 %v2134_v44, 0.0  ;;  %v3073_v28 = vmax.f32 %v2406_v45, %v3072_v52  ;;  %9448 = vst [vmem:[#allocation5_spill] sm:$0xff] %v8605_v14  ;;  %v8607_v36 = vpop.f32.mrb[105].mxu1  ;;  %v8609_v12 = vpop.f32.mrb[106].mxu0 }
 0x2b8   : > { %v3841_v30 = vmax.f32 %v2534_v58, %v3840_v10  ;;  %v2407_v55 = vmax.f32 %v1633_v25, 0.0  ;;  %v2535_v34 = vmax.f32 %v2145_v18, 0.0  ;;  %v3044_v16 = vrot.slane %v3043_v46, 2  ;;  %9449 = vst [vmem:[#allocation6_spill] sm:$0xff] %v8607_v36  ;;  %9450 = vst [vmem:[#allocation7_spill] sm:$0xff] %v8609_v12  ;;  %v8611_v44 = vpop.f32.mrb[106].mxu1 }
 0x2b9   : > { %v3812_v38 = vrot.slane %v3811_v56, 2  ;;  %v3060_v26 = vrot.slane %v2404_v22, 4  ;;  %v3828_v1 = vrot.slane %v2532_v2, 4  ;;  %v3074_v49 = vrot.slane %v3073_v28, 2  ;;  %9451 = vst [vmem:[#allocation8_spill] sm:$0xff] %v8611_v44  ;;  %v8613_v60 = vpop.f32.mrb[107].mxu0 }
 0x2ba   : > { %v3842_v13 = vrot.slane %v3841_v30, 2  ;;  %v3078_v42 = vrot.slane %v2407_v55, 4  ;;  %v3846_v57 = vrot.slane %v2535_v34, 4  ;;  %v3045_v45 = vmax.f32 %v3043_v46, %v3044_v16  ;;  %9452 = vst [vmem:[#allocation9_spill] sm:$0xff] %v8613_v60 }
 0x2bb   : > { %v3813_v58 = vmax.f32 %v3811_v56, %v3812_v38  ;;  %v3061_v9 = vmax.f32 %v2404_v22, %v3060_v26  ;;  %v3829_v43 = vmax.f32 %v2532_v2, %v3828_v1  ;;  %v3075_v52 = vmax.f32 %v3073_v28, %v3074_v49 }
 0x2bc   : > { %v3843_v10 = vmax.f32 %v3841_v30, %v3842_v13  ;;  %v3079_v25 = vmax.f32 %v2407_v55, %v3078_v42  ;;  %v3847_v18 = vmax.f32 %v2535_v34, %v3846_v57  ;;  %v3046_v47 = vrot.slane %v3045_v45, 1 }
 0x2bd   : > { %v3814_v24 = vrot.slane %v3813_v58, 1  ;;  %v3062_v4 = vrot.slane %v3061_v9, 2  ;;  %v3830_v14 = vrot.slane %v3829_v43, 2  ;;  %v3076_v0 = vrot.slane %v3075_v52, 1 }
 0x2be   : > { %v3844_v36 = vrot.slane %v3843_v10, 1  ;;  %v3080_v46 = vrot.slane %v3079_v25, 2  ;;  %v3848_v56 = vrot.slane %v3847_v18, 2  ;;  %v3047_v22 = vmax.f32 %v3045_v45, %v3046_v47 }
 0x2bf   : > { %v3815_v2 = vmax.f32 %v3813_v58, %v3814_v24  ;;  %v3063_v16 = vmax.f32 %v3061_v9, %v3062_v4  ;;  %v3831_v38 = vmax.f32 %v3829_v43, %v3830_v14  ;;  %v3077_v26 = vmax.f32 %v3075_v52, %v3076_v0 }
 0x2c0   : > { %v3845_v1 = vmax.f32 %v3843_v10, %v3844_v36  ;;  %v3081_v28 = vmax.f32 %v3079_v25, %v3080_v46  ;;  %v3849_v13 = vmax.f32 %v3847_v18, %v3848_v56  ;;  %v6261_v42 = vpack.c.bf16 %v3047_v22, %v3047_v22  ;;  %v9457_v56 = vld [vmem:[#allocation11_spill] sm:$0xff] }
 0x2c1   : > { %v6389_v30 = vpack.c.bf16 %v3815_v2, %v3815_v2  ;;  %v3064_v55 = vrot.slane %v3063_v16, 1  ;;  %v3832_v34 = vrot.slane %v3831_v38, 1  ;;  %v6266_v49 = vpack.c.bf16 %v3077_v26, %v3077_v26 }
 0x2c2   : > { %v6394_v57 = vpack.c.bf16 %v3845_v1, %v3845_v1  ;;  %v3082_v60 = vrot.slane %v3081_v28, 1  ;;  %v3850_v44 = vrot.slane %v3849_v13, 1  ;;  %v5217_v12 = vunpack.c.l.b16 %v6261_v42 }
 0x2c3   : > { %v5345_v29 = vunpack.c.l.b16 %v6389_v30  ;;  %v8615_v3 = vmax.f32 %v3063_v16, %v3064_v55  ;;  %v8617_v47 = vmax.f32 %v3831_v38, %v3832_v34  ;;  %v9453_v0 = vpack.c.bf16 %v8541_v8, %v8541_v8 }
 0x2c4   : > { %v9454_v24 = vpack.c.bf16 %v8543_v53, %v8543_v53  ;;  %v8625_v36 = vmax.f32 %v3081_v28, %v3082_v60  ;;  %v8627_v45 = vmax.f32 %v3849_v13, %v3850_v44  ;;  %v9455_v58 = vpack.c.bf16 %v8545_v31, %v8545_v31 }
 0x2c5   : > { %v5218_v4 = vunpack.c.l.b16 %v9453_v0  ;;  %v9456_v43 = vpack.c.bf16 %v8547_v27, %v8547_v27  ;;  %v5470_v8 = vsel %vm5404_vm4, %v5217_v12, %v8586_v50  ;;  %v5582_v10 = vsel %vm5404_vm4, %v5345_v29, %v8589_v37 }
 0x2c6   : > { %v5346_v14 = vunpack.c.l.b16 %v9454_v24  ;;  %v5219_v9 = vunpack.c.l.b16 %v9455_v58  ;;  %v8641_v44 = vunpack.c.l.b16 %v6266_v49  ;;  %v8643_v31 = vunpack.c.l.b16 %v6394_v57  ;;  %v8673_v57 = vpop.f32.mrb[107].mxu1 }
 0x2c7   : > { %v5347_v52 = vunpack.c.l.b16 %v9456_v43  ;;  %v5471_v53 = vsel %vm5406_vm5, %v5218_v4, %v5470_v8  ;;  %v6264_v50 = vpack.c.bf16 %v8615_v3, %v8615_v3  ;;  %v6392_v29 = vpack.c.bf16 %v8617_v47, %v8617_v47 }
 0x2c8   : > { %v5583_v60 = vsel %vm5406_vm5, %v5346_v14, %v5582_v10  ;;  %v5472_v25 = vsel %vm5408_vm6, %v5219_v9, %v5471_v53  ;;  %v6267_v18 = vpack.c.bf16 %v8625_v36, %v8625_v36  ;;  %v6395_v46 = vpack.c.bf16 %v8627_v45, %v8627_v45 }
 0x2c9   : > { %v5584_v27 = vsel %vm5408_vm6, %v5347_v52, %v5583_v60  ;;  %v5636_v37 = vpack.c.b16 %v5472_v25, %v5472_v25  ;;  %v1625_v22 = vadd.f32 %v8357_v33, %v9457_v56  ;;  %v2137_v2 = vadd.f32 %v8357_v33, %v8224_v59  ;;  %v8675_v56 = vpop.f32.mrb[108].mxu0 }
 0x2ca   : > { %v5652_v12 = vpack.c.b16 %v5584_v27, %v5584_v27  ;;  %v1646_v16 = vadd.f32 %v8357_v33, %v8226_v61  ;;  %v2158_v38 = vadd.f32 %v8357_v33, %v8228_v17  ;;  %v1638_v26 = vadd.f32 %v8357_v33, %v8230_v40 }
 0x2cb   : > { %5700 = vst [vmem:[%s7360_s13 + $0x24] sm:$0xf] %v5636_v37  ;;  %v2150_v1 = vadd.f32 %v8357_v33, %v8232_v11  ;;  %v1649_v28 = vadd.f32 %v8357_v33, %v8234_v39  ;;  %v2161_v59 = vadd.f32 %v8357_v33, %v8236_v35  ;;  %v2405_v13 = vmax.f32 %v1625_v22, 0.0  ;;  %v8677_v22 = vpop.f32.mrb[108].mxu1 }
 0x2cc   : > { %5716 = vst [vmem:[%s7360_s13 + $0x64] sm:$0xf] %v5652_v12  ;;  %v2533_v42 = vmax.f32 %v2137_v2, 0.0  ;;  %v2410_v61 = vmax.f32 %v1646_v16, 0.0  ;;  %v2538_v30 = vmax.f32 %v2158_v38, 0.0  ;;  %v2408_v55 = vmax.f32 %v1638_v26, 0.0 }
 0x2cd   : > { %v2536_v17 = vmax.f32 %v2150_v1, 0.0  ;;  %v2411_v34 = vmax.f32 %v1649_v28, 0.0  ;;  %v2539_v49 = vmax.f32 %v2161_v59, 0.0  ;;  %v3066_v40 = vrot.slane %v2405_v13, 4  ;;  %v8679_v1 = vpop.f32.mrb[109].mxu0  ;;  %v8681_v28 = vpop.f32.mrb[109].mxu1 }
 0x2ce   : > { %v3834_v0 = vrot.slane %v2533_v42, 4  ;;  %v3096_v4 = vrot.slane %v2410_v61, 4  ;;  %v3864_v11 = vrot.slane %v2538_v30, 4  ;;  %v3084_v24 = vrot.slane %v2408_v55, 4 }
 0x2cf   : > { %v3852_v14 = vrot.slane %v2536_v17, 4  ;;  %v3102_v39 = vrot.slane %v2411_v34, 4  ;;  %v3870_v58 = vrot.slane %v2539_v49, 4  ;;  %v3067_v9 = vmax.f32 %v2405_v13, %v3066_v40 }
 0x2d0   : > { %v3835_v35 = vmax.f32 %v2533_v42, %v3834_v0  ;;  %v3097_v43 = vmax.f32 %v2410_v61, %v3096_v4  ;;  %v3865_v52 = vmax.f32 %v2538_v30, %v3864_v11  ;;  %v3085_v8 = vmax.f32 %v2408_v55, %v3084_v24  ;;  %v8683_v30 = vpop.f32.mrb[110].mxu0  ;;  %v8685_v55 = vpop.f32.mrb[110].mxu1 }
 0x2d1   : > { %v3853_v10 = vmax.f32 %v2536_v17, %v3852_v14  ;;  %v3103_v53 = vmax.f32 %v2411_v34, %v3102_v39  ;;  %v3871_v60 = vmax.f32 %v2539_v49, %v3870_v58  ;;  %v3068_v25 = vrot.slane %v3067_v9, 2  ;;  %v8687_v0 = vpop.f32.mrb[111].mxu0 }
 0x2d2   : > { %v3836_v27 = vrot.slane %v3835_v35, 2  ;;  %v3098_v37 = vrot.slane %v3097_v43, 2  ;;  %v3866_v12 = vrot.slane %v3865_v52, 2  ;;  %v3086_v2 = vrot.slane %v3085_v8, 2 }
 0x2d3   : > { %v3854_v16 = vrot.slane %v3853_v10, 2  ;;  %v3104_v38 = vrot.slane %v3103_v53, 2  ;;  %v3872_v26 = vrot.slane %v3871_v60, 2  ;;  %v3069_v59 = vmax.f32 %v3067_v9, %v3068_v25 }
 0x2d4   : > { %v3837_v13 = vmax.f32 %v3835_v35, %v3836_v27  ;;  %v3099_v42 = vmax.f32 %v3097_v43, %v3098_v37  ;;  %v3867_v61 = vmax.f32 %v3865_v52, %v3866_v12  ;;  %v3087_v17 = vmax.f32 %v3085_v8, %v3086_v2 }
 0x2d5   : > { %v3855_v34 = vmax.f32 %v3853_v10, %v3854_v16  ;;  %v3105_v49 = vmax.f32 %v3103_v53, %v3104_v38  ;;  %v3873_v40 = vmax.f32 %v3871_v60, %v3872_v26  ;;  %v3070_v4 = vrot.slane %v3069_v59, 1 }
 0x2d6   : > { %v3838_v11 = vrot.slane %v3837_v13, 1  ;;  %v3100_v24 = vrot.slane %v3099_v42, 1  ;;  %v3868_v14 = vrot.slane %v3867_v61, 1  ;;  %v3088_v39 = vrot.slane %v3087_v17, 1 }
 0x2d7   : > { %v3856_v58 = vrot.slane %v3855_v34, 1  ;;  %v3106_v9 = vrot.slane %v3105_v49, 1  ;;  %v3874_v35 = vrot.slane %v3873_v40, 1  ;;  %v3071_v43 = vmax.f32 %v3069_v59, %v3070_v4 }
 0x2d8   : > { %v3839_v52 = vmax.f32 %v3837_v13, %v3838_v11  ;;  %v8689_v25 = vmax.f32 %v3099_v42, %v3100_v24  ;;  %v8691_v27 = vmax.f32 %v3867_v61, %v3868_v14  ;;  %v3089_v8 = vmax.f32 %v3087_v17, %v3088_v39 }
 0x2d9   : > { %v3857_v10 = vmax.f32 %v3855_v34, %v3856_v58  ;;  %v8693_v53 = vmax.f32 %v3105_v49, %v3106_v9  ;;  %v8695_v60 = vmax.f32 %v3873_v40, %v3874_v35  ;;  %v5220_v37 = vunpack.c.l.b16 %v6264_v50  ;;  %v8739_v9 = vpop.f32.mrb[111].mxu1 }
 0x2da   : > { %v5348_v12 = vunpack.c.l.b16 %v6392_v29  ;;  %v6265_v2 = vpack.c.bf16 %v3071_v43, %v3071_v43  ;;  %v6393_v16 = vpack.c.bf16 %v3839_v52, %v3839_v52  ;;  %v5223_v38 = vunpack.c.l.b16 %v6267_v18  ;;  %v9458_v43 = vld [vmem:[#allocation12_spill] sm:$0xff] }
 0x2db   : > { %v5351_v26 = vunpack.c.l.b16 %v6395_v46  ;;  %v6268_v59 = vpack.c.bf16 %v3089_v8, %v3089_v8  ;;  %v6396_v13 = vpack.c.bf16 %v3857_v10, %v3857_v10  ;;  %v1641_v17 = vadd.f32 %v8357_v33, %v8238_v6 }
 0x2dc   : > { %v5221_v42 = vunpack.c.l.b16 %v6265_v2  ;;  %v5349_v61 = vunpack.c.l.b16 %v6393_v16  ;;  %v2153_v34 = vadd.f32 %v8357_v33, %v8290_v54  ;;  %v1662_v4 = vadd.f32 %v8357_v33, %v8300_v63  ;;  %v9460_v2 = vld [vmem:[#allocation14_spill] sm:$0xff] }
 0x2dd   : > { %v5224_v50 = vunpack.c.l.b16 %v6268_v59  ;;  %v5352_v29 = vunpack.c.l.b16 %v6396_v13  ;;  %v2174_v11 = vadd.f32 %v8357_v33, %v8302_v15  ;;  %v2409_v6 = vmax.f32 %v1641_v17, 0.0 }
 0x2de   : > { %v5473_v45 = vsel %vm5396_vm0, %v5221_v42, %v5220_v37  ;;  %v5585_v46 = vsel %vm5396_vm0, %v5349_v61, %v5348_v12  ;;  %v2537_v39 = vmax.f32 %v2153_v34, 0.0  ;;  %v2414_v58 = vmax.f32 %v1662_v4, 0.0  ;;  %v9459_v37 = vld [vmem:[#allocation13_spill] sm:$0xff]  ;;  %v8749_v34 = vpop.f32.mrb[112].mxu0 }
 0x2df   : > { %v5474_v49 = vsel %vm5398_vm1, %v8641_v44, %v5473_v45  ;;  %v5586_v40 = vsel %vm5398_vm1, %v8643_v31, %v5585_v46  ;;  %v2542_v31 = vmax.f32 %v2174_v11, 0.0  ;;  %v3090_v63 = vrot.slane %v2409_v6, 4 }
 0x2e0   : > { %v5475_v24 = vsel %vm5400_vm2, %v5223_v38, %v5474_v49  ;;  %v5587_v14 = vsel %vm5400_vm2, %v5351_v26, %v5586_v40  ;;  %v3858_v35 = vrot.slane %v2537_v39, 4  ;;  %v1654_v15 = vadd.f32 %v8357_v33, %v8304_v41  ;;  %v8751_v49 = vpop.f32.mrb[112].mxu1 }
 0x2e1   : > { %v8734_v54 = vsel %vm5402_vm3, %v5224_v50, %v5475_v24  ;;  %v8737_v44 = vsel %vm5402_vm3, %v5352_v29, %v5587_v14  ;;  %v2166_v52 = vadd.f32 %v8357_v33, %v9458_v43  ;;  %v3120_v8 = vrot.slane %v2414_v58, 4  ;;  %v8753_v24 = vpop.f32.mrb[113].mxu0  ;;  %v8755_v14 = vpop.f32.mrb[113].mxu1 }
 0x2e2   : > { %v3888_v10 = vrot.slane %v2542_v31, 4  ;;  %v1665_v12 = vadd.f32 %v8357_v33, %v9459_v37  ;;  %v2177_v16 = vadd.f32 %v8357_v33, %v9460_v2  ;;  %v3091_v38 = vmax.f32 %v2409_v6, %v3090_v63  ;;  %v8757_v63 = vpop.f32.mrb[114].mxu0 }
 0x2e3   : > { %v3859_v26 = vmax.f32 %v2537_v39, %v3858_v35  ;;  %v2412_v59 = vmax.f32 %v1654_v15, 0.0  ;;  %v2540_v13 = vmax.f32 %v2166_v52, 0.0  ;;  %v3121_v42 = vmax.f32 %v2414_v58, %v3120_v8  ;;  %9461 = vst [vmem:[#allocation10_spill] sm:$0xff] %v8757_v63  ;;  %v8759_v35 = vpop.f32.mrb[114].mxu1 }
 0x2e4   : > { %v3889_v61 = vmax.f32 %v2542_v31, %v3888_v10  ;;  %v2415_v50 = vmax.f32 %v1665_v12, 0.0  ;;  %v2543_v29 = vmax.f32 %v2177_v16, 0.0  ;;  %v3092_v41 = vrot.slane %v3091_v38, 2  ;;  %9462 = vst [vmem:[#allocation11_spill] sm:$0xff] %v8759_v35  ;;  %v8761_v10 = vpop.f32.mrb[115].mxu0 }
 0x2e5   : > { %v3860_v45 = vrot.slane %v3859_v26, 2  ;;  %v3108_v46 = vrot.slane %v2412_v59, 4  ;;  %v3876_v17 = vrot.slane %v2540_v13, 4  ;;  %v3122_v40 = vrot.slane %v3121_v42, 2  ;;  %9463 = vst [vmem:[#allocation12_spill] sm:$0xff] %v8761_v10 }
 0x2e6   : > { %v3890_v4 = vrot.slane %v3889_v61, 2  ;;  %v3126_v11 = vrot.slane %v2415_v50, 4  ;;  %v3894_v33 = vrot.slane %v2543_v29, 4  ;;  %v3093_v6 = vmax.f32 %v3091_v38, %v3092_v41 }
 0x2e7   : > { %v3861_v39 = vmax.f32 %v3859_v26, %v3860_v45  ;;  %v3109_v58 = vmax.f32 %v2412_v59, %v3108_v46  ;;  %v3877_v31 = vmax.f32 %v2540_v13, %v3876_v17  ;;  %v3123_v15 = vmax.f32 %v3121_v42, %v3122_v40 }
 0x2e8   : > { %v3891_v43 = vmax.f32 %v3889_v61, %v3890_v4  ;;  %v3127_v52 = vmax.f32 %v2415_v50, %v3126_v11  ;;  %v3895_v8 = vmax.f32 %v2543_v29, %v3894_v33  ;;  %v3094_v37 = vrot.slane %v3093_v6, 1 }
 0x2e9   : > { %v3862_v12 = vrot.slane %v3861_v39, 1  ;;  %v3110_v2 = vrot.slane %v3109_v58, 2  ;;  %v3878_v16 = vrot.slane %v3877_v31, 2  ;;  %v3124_v18 = vrot.slane %v3123_v15, 1 }
 0x2ea   : > { %v3892_v36 = vrot.slane %v3891_v43, 1  ;;  %v3128_v38 = vrot.slane %v3127_v52, 2  ;;  %v3896_v26 = vrot.slane %v3895_v8, 2  ;;  %v3095_v59 = vmax.f32 %v3093_v6, %v3094_v37 }
 0x2eb   : > { %v3863_v13 = vmax.f32 %v3861_v39, %v3862_v12  ;;  %v3111_v41 = vmax.f32 %v3109_v58, %v3110_v2  ;;  %v3879_v45 = vmax.f32 %v3877_v31, %v3878_v16  ;;  %v3125_v46 = vmax.f32 %v3123_v15, %v3124_v18 }
 0x2ec   : > { %v3893_v17 = vmax.f32 %v3891_v43, %v3892_v36  ;;  %v3129_v42 = vmax.f32 %v3127_v52, %v3128_v38  ;;  %v3897_v61 = vmax.f32 %v3895_v8, %v3896_v26  ;;  %v6269_v50 = vpack.c.bf16 %v3095_v59, %v3095_v59  ;;  %v8806_v26 = vld [vmem:[%s9260_s2] ss:$0 sm:$0xff]  ;;  %v9468_v59 = vld [vmem:[#allocation15_spill] sm:$0xff] }
 0x2ed   : > { %v6397_v29 = vpack.c.bf16 %v3863_v13, %v3863_v13  ;;  %v3112_v40 = vrot.slane %v3111_v41, 1  ;;  %v3880_v4 = vrot.slane %v3879_v45, 1  ;;  %v6274_v11 = vpack.c.bf16 %v3125_v46, %v3125_v46 }
 0x2ee   : > { %v6402_v33 = vpack.c.bf16 %v3893_v17, %v3893_v17  ;;  %v3130_v47 = vrot.slane %v3129_v42, 1  ;;  %v3898_v3 = vrot.slane %v3897_v61, 1  ;;  %v5225_v10 = vunpack.c.l.b16 %v6269_v50  ;;  %v9469_v50 = vld [vmem:[#allocation16_spill] sm:$0xff] }
 0x2ef   : > { %v5353_v35 = vunpack.c.l.b16 %v6397_v29  ;;  %v8763_v63 = vmax.f32 %v3111_v41, %v3112_v40  ;;  %v8765_v6 = vmax.f32 %v3879_v45, %v3880_v4  ;;  %v9464_v18 = vpack.c.bf16 %v8689_v25, %v8689_v25 }
 0x2f0   : > { %v9465_v39 = vpack.c.bf16 %v8691_v27, %v8691_v27  ;;  %v8773_v31 = vmax.f32 %v3129_v42, %v3130_v47  ;;  %v8775_v15 = vmax.f32 %v3897_v61, %v3898_v3  ;;  %v9466_v43 = vpack.c.bf16 %v8693_v53, %v8693_v53 }
 0x2f1   : > { %v5226_v36 = vunpack.c.l.b16 %v9464_v18  ;;  %v9467_v8 = vpack.c.bf16 %v8695_v60, %v8695_v60  ;;  %v5477_v25 = vsel %vm5404_vm4, %v5225_v10, %v8734_v54  ;;  %v5589_v12 = vsel %vm5404_vm4, %v5353_v35, %v8737_v44 }
 0x2f2   : > { %v5354_v58 = vunpack.c.l.b16 %v9465_v39  ;;  %v5227_v52 = vunpack.c.l.b16 %v9466_v43  ;;  %v8789_v3 = vunpack.c.l.b16 %v6274_v11  ;;  %v8791_v53 = vunpack.c.l.b16 %v6402_v33 }
 0x2f3   : > { %v5355_v37 = vunpack.c.l.b16 %v9467_v8  ;;  %v5478_v27 = vsel %vm5406_vm5, %v5226_v36, %v5477_v25  ;;  %v6272_v54 = vpack.c.bf16 %v8763_v63, %v8763_v63  ;;  %v6400_v44 = vpack.c.bf16 %v8765_v6, %v8765_v6  ;;  %v8826_v36 = vpop.f32.mrb[115].mxu1 }
 0x2f4   : > { %v5590_v47 = vsel %vm5406_vm5, %v5354_v58, %v5589_v12  ;;  %v5479_v2 = vsel %vm5408_vm6, %v5227_v52, %v5478_v27  ;;  %v1657_v13 = vadd.f32 %v8806_v26, %v9468_v59  ;;  %v2169_v41 = vadd.f32 %v8806_v26, %v8377_v62 }
 0x2f5   : > { %v5591_v60 = vsel %vm5408_vm6, %v5355_v37, %v5590_v47  ;;  %v5637_v35 = vpack.c.b16 %v5479_v2, %v5479_v2  ;;  %v1678_v45 = vadd.f32 %v8806_v26, %v8379_v20  ;;  %v2190_v46 = vadd.f32 %v8806_v26, %v8381_v51 }
 0x2f6   : > { %v5653_v10 = vpack.c.b16 %v5591_v60, %v5591_v60  ;;  %v1670_v17 = vadd.f32 %v8806_v26, %v8383_v7  ;;  %v2182_v42 = vadd.f32 %v8806_v26, %v8385_v23  ;;  %v1681_v61 = vadd.f32 %v8806_v26, %v8387_v5 }
 0x2f7   : > { %5701 = vst [vmem:[%s7360_s13 + $0x28] sm:$0xf] %v5637_v35  ;;  %v2193_v62 = vadd.f32 %v8806_v26, %v9469_v50  ;;  %v2413_v29 = vmax.f32 %v1657_v13, 0.0  ;;  %v2541_v40 = vmax.f32 %v2169_v41, 0.0  ;;  %v2418_v20 = vmax.f32 %v1678_v45, 0.0  ;;  %v8828_v45 = vpop.f32.mrb[116].mxu0 }
 0x2f8   : > { %5717 = vst [vmem:[%s7360_s13 + $0x68] sm:$0xf] %v5653_v10  ;;  %v2546_v4 = vmax.f32 %v2190_v46, 0.0  ;;  %v2416_v11 = vmax.f32 %v1670_v17, 0.0  ;;  %v2544_v51 = vmax.f32 %v2182_v42, 0.0  ;;  %v2419_v33 = vmax.f32 %v1681_v61, 0.0 }
 0x2f9   : > { %v2547_v18 = vmax.f32 %v2193_v62, 0.0  ;;  %v3114_v7 = vrot.slane %v2413_v29, 4  ;;  %v3882_v39 = vrot.slane %v2541_v40, 4  ;;  %v3144_v58 = vrot.slane %v2418_v20, 4  ;;  %v8830_v46 = vpop.f32.mrb[116].mxu1  ;;  %v8832_v62 = vpop.f32.mrb[117].mxu0 }
 0x2fa   : > { %v3912_v23 = vrot.slane %v2546_v4, 4  ;;  %v3132_v43 = vrot.slane %v2416_v11, 4  ;;  %v3900_v52 = vrot.slane %v2544_v51, 4  ;;  %v3150_v5 = vrot.slane %v2419_v33, 4 }
 0x2fb   : > { %v3918_v8 = vrot.slane %v2547_v18, 4  ;;  %v3115_v37 = vmax.f32 %v2413_v29, %v3114_v7  ;;  %v3883_v25 = vmax.f32 %v2541_v40, %v3882_v39  ;;  %v3145_v12 = vmax.f32 %v2418_v20, %v3144_v58  ;;  %v8834_v29 = vpop.f32.mrb[117].mxu1 }
 0x2fc   : > { %v3913_v27 = vmax.f32 %v2546_v4, %v3912_v23  ;;  %v3133_v47 = vmax.f32 %v2416_v11, %v3132_v43  ;;  %v3901_v2 = vmax.f32 %v2544_v51, %v3900_v52  ;;  %v3151_v60 = vmax.f32 %v2419_v33, %v3150_v5  ;;  %v8836_v51 = vpop.f32.mrb[118].mxu0  ;;  %v8838_v33 = vpop.f32.mrb[118].mxu1 }
 0x2fd   : > { %v3919_v35 = vmax.f32 %v2547_v18, %v3918_v8  ;;  %v3116_v10 = vrot.slane %v3115_v37, 2  ;;  %v3884_v59 = vrot.slane %v3883_v25, 2  ;;  %v3146_v13 = vrot.slane %v3145_v12, 2  ;;  %9470 = vst [vmem:[#allocation13_spill] sm:$0xff] %v8838_v33  ;;  %v8840_v23 = vpop.f32.mrb[119].mxu0 }
 0x2fe   : > { %v3914_v41 = vrot.slane %v3913_v27, 2  ;;  %v3134_v17 = vrot.slane %v3133_v47, 2  ;;  %v3902_v42 = vrot.slane %v3901_v2, 2  ;;  %v3152_v61 = vrot.slane %v3151_v60, 2  ;;  %9471 = vst [vmem:[#allocation14_spill] sm:$0xff] %v8840_v23 }
 0x2ff   : > { %v3920_v50 = vrot.slane %v3919_v35, 2  ;;  %v3117_v40 = vmax.f32 %v3115_v37, %v3116_v10  ;;  %v3885_v20 = vmax.f32 %v3883_v25, %v3884_v59  ;;  %v3147_v4 = vmax.f32 %v3145_v12, %v3146_v13 }
 0x300   : > { %v3915_v11 = vmax.f32 %v3913_v27, %v3914_v41  ;;  %v3135_v18 = vmax.f32 %v3133_v47, %v3134_v17  ;;  %v3903_v7 = vmax.f32 %v3901_v2, %v3902_v42  ;;  %v3153_v39 = vmax.f32 %v3151_v60, %v3152_v61 }
 0x301   : > { %v3921_v58 = vmax.f32 %v3919_v35, %v3920_v50  ;;  %v3118_v43 = vrot.slane %v3117_v40, 1  ;;  %v3886_v52 = vrot.slane %v3885_v20, 1  ;;  %v3148_v5 = vrot.slane %v3147_v4, 1 }
 0x302   : > { %v3916_v8 = vrot.slane %v3915_v11, 1  ;;  %v3136_v38 = vrot.slane %v3135_v18, 1  ;;  %v3904_v16 = vrot.slane %v3903_v7, 1  ;;  %v3154_v37 = vrot.slane %v3153_v39, 1 }
 0x303   : > { %v3922_v25 = vrot.slane %v3921_v58, 1  ;;  %v3119_v12 = vmax.f32 %v3117_v40, %v3118_v43  ;;  %v3887_v27 = vmax.f32 %v3885_v20, %v3886_v52  ;;  %v8842_v10 = vmax.f32 %v3147_v4, %v3148_v5  ;;  %v9475_v43 = vld [vmem:[#allocation18_spill] sm:$0xff] }
 0x304   : > { %v8844_v59 = vmax.f32 %v3915_v11, %v3916_v8  ;;  %v3137_v47 = vmax.f32 %v3135_v18, %v3136_v38  ;;  %v3905_v2 = vmax.f32 %v3903_v7, %v3904_v16  ;;  %v8846_v60 = vmax.f32 %v3153_v39, %v3154_v37  ;;  %v9474_v39 = vld [vmem:[#allocation17_spill] sm:$0xff]  ;;  %v9476_v37 = vld [vmem:[#allocation19_spill] sm:$0xff] }
 0x305   : > { %v8848_v35 = vmax.f32 %v3921_v58, %v3922_v25  ;;  %v5228_v13 = vunpack.c.l.b16 %v6272_v54  ;;  %v5356_v41 = vunpack.c.l.b16 %v6400_v44  ;;  %v6273_v17 = vpack.c.bf16 %v3119_v12, %v3119_v12  ;;  %v9477_v12 = vld [vmem:[#allocation20_spill] sm:$0xff] }
 0x306   : > { %v6401_v42 = vpack.c.bf16 %v3887_v27, %v3887_v27  ;;  %v9472_v61 = vpack.c.bf16 %v8773_v31, %v8773_v31  ;;  %v9473_v16 = vpack.c.bf16 %v8775_v15, %v8775_v15  ;;  %v6276_v40 = vpack.c.bf16 %v3137_v47, %v3137_v47 }
 0x307   : > { %v6404_v20 = vpack.c.bf16 %v3905_v2, %v3905_v2  ;;  %v5229_v4 = vunpack.c.l.b16 %v6273_v17  ;;  %v1673_v58 = vadd.f32 %v8806_v26, %v9474_v39  ;;  %v2185_v52 = vadd.f32 %v8806_v26, %v9475_v43  ;;  %v9482_v39 = vld [vmem:[#allocation24_spill] sm:$0xff] }
 0x308   : > { %v5231_v50 = vunpack.c.l.b16 %v9472_v61  ;;  %v5359_v38 = vunpack.c.l.b16 %v9473_v16  ;;  %v5357_v11 = vunpack.c.l.b16 %v6401_v42  ;;  %v5232_v54 = vunpack.c.l.b16 %v6276_v40  ;;  %v8892_v61 = vpop.f32.mrb[119].mxu1 }
 0x309   : > { %v5360_v44 = vunpack.c.l.b16 %v6404_v20  ;;  %v5480_v15 = vsel %vm5396_vm0, %v5229_v4, %v5228_v13  ;;  %v1694_v25 = vadd.f32 %v8806_v26, %v9476_v37  ;;  %v2206_v27 = vadd.f32 %v8806_v26, %v9477_v12  ;;  %9478 = vst [vmem:[#allocation15_spill] sm:$0xff] %v8892_v61  ;;  %v9479_v20 = vld [vmem:[#allocation21_spill] sm:$0xff]  ;;  %v8904_v18 = vpop.f32.mrb[120].mxu1 }
 0x30a   : > { %v5592_v7 = vsel %vm5396_vm0, %v5357_v11, %v5356_v41  ;;  %v5481_v5 = vsel %vm5398_vm1, %v8789_v3, %v5480_v15  ;;  %v2417_v13 = vmax.f32 %v1673_v58, 0.0  ;;  %v2545_v41 = vmax.f32 %v2185_v52, 0.0  ;;  %9484 = vst [vmem:[#allocation17_spill] sm:$0xff] %v8904_v18 }
 0x30b   : > { %v5593_v8 = vsel %vm5398_vm1, %v8791_v53, %v5592_v7  ;;  %v5482_v47 = vsel %vm5400_vm2, %v5231_v50, %v5481_v5  ;;  %v2422_v42 = vmax.f32 %v1694_v25, 0.0  ;;  %v2550_v53 = vmax.f32 %v2206_v27, 0.0  ;;  %v9480_v50 = vld [vmem:[#allocation22_spill] sm:$0xff]  ;;  %v9481_v7 = vld [vmem:[#allocation23_spill] sm:$0xff] }
 0x30c   : > { %v5594_v2 = vsel %vm5400_vm2, %v5359_v38, %v5593_v8  ;;  %v8887_v17 = vsel %vm5402_vm3, %v5232_v54, %v5482_v47  ;;  %v3138_v16 = vrot.slane %v2417_v13, 4  ;;  %v3906_v40 = vrot.slane %v2545_v41, 4 }
 0x30d   : > { %v8890_v3 = vsel %vm5402_vm3, %v5360_v44, %v5594_v2  ;;  %v1686_v4 = vadd.f32 %v8806_v26, %v9479_v20  ;;  %v2198_v38 = vadd.f32 %v8806_v26, %v9480_v50  ;;  %v3168_v11 = vrot.slane %v2422_v42, 4  ;;  %v8902_v50 = vpop.f32.mrb[120].mxu0 }
 0x30e   : > { %v3936_v15 = vrot.slane %v2550_v53, 4  ;;  %v1697_v54 = vadd.f32 %v8806_v26, %v9481_v7  ;;  %v2209_v44 = vadd.f32 %v8806_v26, %v9482_v39  ;;  %v3139_v58 = vmax.f32 %v2417_v13, %v3138_v16  ;;  %9483 = vst [vmem:[#allocation16_spill] sm:$0xff] %v8902_v50  ;;  %v8906_v13 = vpop.f32.mrb[121].mxu0 }
 0x30f   : > { %v3907_v43 = vmax.f32 %v2545_v41, %v3906_v40  ;;  %v2420_v52 = vmax.f32 %v1686_v4, 0.0  ;;  %v2548_v5 = vmax.f32 %v2198_v38, 0.0  ;;  %v3169_v8 = vmax.f32 %v2422_v42, %v3168_v11  ;;  %9485 = vst [vmem:[#allocation18_spill] sm:$0xff] %v8906_v13  ;;  %v8908_v41 = vpop.f32.mrb[121].mxu1  ;;  %v8910_v4 = vpop.f32.mrb[122].mxu0 }
 0x310   : > { %v3937_v37 = vmax.f32 %v2550_v53, %v3936_v15  ;;  %v2423_v25 = vmax.f32 %v1697_v54, 0.0  ;;  %v2551_v12 = vmax.f32 %v2209_v44, 0.0  ;;  %v3140_v27 = vrot.slane %v3139_v58, 2  ;;  %9486 = vst [vmem:[#allocation19_spill] sm:$0xff] %v8908_v41  ;;  %9487 = vst [vmem:[#allocation20_spill] sm:$0xff] %v8910_v4  ;;  %v8912_v38 = vpop.f32.mrb[122].mxu1 }
 0x311   : > { %v3908_v47 = vrot.slane %v3907_v43, 2  ;;  %v3156_v2 = vrot.slane %v2420_v52, 4  ;;  %v3924_v20 = vrot.slane %v2548_v5, 4  ;;  %v3170_v7 = vrot.slane %v3169_v8, 2  ;;  %9488 = vst [vmem:[#allocation21_spill] sm:$0xff] %v8912_v38  ;;  %v8914_v63 = vpop.f32.mrb[123].mxu0 }
 0x312   : > { %v3938_v31 = vrot.slane %v3937_v37, 2  ;;  %v3174_v6 = vrot.slane %v2423_v25, 4  ;;  %v3942_v39 = vrot.slane %v2551_v12, 4  ;;  %v3141_v42 = vmax.f32 %v3139_v58, %v3140_v27  ;;  %9489 = vst [vmem:[#allocation22_spill] sm:$0xff] %v8914_v63 }
 0x313   : > { %v3909_v53 = vmax.f32 %v3907_v43, %v3908_v47  ;;  %v3157_v16 = vmax.f32 %v2420_v52, %v3156_v2  ;;  %v3925_v40 = vmax.f32 %v2548_v5, %v3924_v20  ;;  %v3171_v11 = vmax.f32 %v3169_v8, %v3170_v7 }
 0x314   : > { %v3939_v15 = vmax.f32 %v3937_v37, %v3938_v31  ;;  %v3175_v54 = vmax.f32 %v2423_v25, %v3174_v6  ;;  %v3943_v44 = vmax.f32 %v2551_v12, %v3942_v39  ;;  %v3142_v18 = vrot.slane %v3141_v42, 1 }
 0x315   : > { %v3910_v50 = vrot.slane %v3909_v53, 1  ;;  %v3158_v61 = vrot.slane %v3157_v16, 2  ;;  %v3926_v13 = vrot.slane %v3925_v40, 2  ;;  %v3172_v23 = vrot.slane %v3171_v11, 1 }
 0x316   : > { %v3940_v41 = vrot.slane %v3939_v15, 1  ;;  %v3176_v58 = vrot.slane %v3175_v54, 2  ;;  %v3944_v43 = vrot.slane %v3943_v44, 2  ;;  %v3143_v52 = vmax.f32 %v3141_v42, %v3142_v18 }
 0x317   : > { %v3911_v5 = vmax.f32 %v3909_v53, %v3910_v50  ;;  %v3159_v27 = vmax.f32 %v3157_v16, %v3158_v61  ;;  %v3927_v47 = vmax.f32 %v3925_v40, %v3926_v13  ;;  %v3173_v2 = vmax.f32 %v3171_v11, %v3172_v23 }
 0x318   : > { %v3941_v20 = vmax.f32 %v3939_v15, %v3940_v41  ;;  %v3177_v8 = vmax.f32 %v3175_v54, %v3176_v58  ;;  %v3945_v31 = vmax.f32 %v3943_v44, %v3944_v43  ;;  %v6277_v6 = vpack.c.bf16 %v3143_v52, %v3143_v52  ;;  %v9494_v52 = vld [vmem:[#allocation25_spill] sm:$0xff] }
 0x319   : > { %v6405_v37 = vpack.c.bf16 %v3911_v5, %v3911_v5  ;;  %v3160_v25 = vrot.slane %v3159_v27, 1  ;;  %v3928_v12 = vrot.slane %v3927_v47, 1  ;;  %v6282_v7 = vpack.c.bf16 %v3173_v2, %v3173_v2  ;;  %v9495_v2 = vld [vmem:[#allocation26_spill] sm:$0xff] }
 0x31a   : > { %v6410_v39 = vpack.c.bf16 %v3941_v20, %v3941_v20  ;;  %v5233_v63 = vunpack.c.l.b16 %v6277_v6  ;;  %v3178_v4 = vrot.slane %v3177_v8, 1  ;;  %v3946_v33 = vrot.slane %v3945_v31, 1  ;;  %v9497_v6 = vld [vmem:[#allocation28_spill] sm:$0xff] }
 0x31b   : > { %v5361_v38 = vunpack.c.l.b16 %v6405_v37  ;;  %v9490_v18 = vpack.c.bf16 %v8842_v10, %v8842_v10  ;;  %v9491_v23 = vpack.c.bf16 %v8844_v59, %v8844_v59  ;;  %v8922_v13 = vmax.f32 %v3159_v27, %v3160_v25 }
 0x31c   : > { %v8924_v41 = vmax.f32 %v3927_v47, %v3928_v12  ;;  %v9492_v42 = vpack.c.bf16 %v8846_v60, %v8846_v60  ;;  %v9493_v16 = vpack.c.bf16 %v8848_v35, %v8848_v35  ;;  %v5484_v10 = vsel %vm5404_vm4, %v5233_v63, %v8887_v17 }
 0x31d   : > { %v5234_v50 = vunpack.c.l.b16 %v9490_v18  ;;  %v5362_v61 = vunpack.c.l.b16 %v9491_v23  ;;  %v5596_v11 = vsel %vm5404_vm4, %v5361_v38, %v8890_v3  ;;  %v8938_v54 = vunpack.c.l.b16 %v6282_v7 }
 0x31e   : > { %v5235_v53 = vunpack.c.l.b16 %v9492_v42  ;;  %v5363_v40 = vunpack.c.l.b16 %v9493_v16  ;;  %v8940_v60 = vunpack.c.l.b16 %v6410_v39  ;;  %v8944_v58 = vmax.f32 %v3177_v8, %v3178_v4  ;;  %v9496_v8 = vld [vmem:[#allocation27_spill] sm:$0xff] }
 0x31f   : > { %v5485_v59 = vsel %vm5406_vm5, %v5234_v50, %v5484_v10  ;;  %v5597_v15 = vsel %vm5406_vm5, %v5362_v61, %v5596_v11  ;;  %v8946_v63 = vmax.f32 %v3945_v31, %v3946_v33  ;;  %v6280_v38 = vpack.c.bf16 %v8922_v13, %v8922_v13  ;;  %v8970_v50 = vpop.f32.mrb[123].mxu1 }
 0x320   : > { %v5486_v44 = vsel %vm5408_vm6, %v5235_v53, %v5485_v59  ;;  %v5598_v35 = vsel %vm5408_vm6, %v5363_v40, %v5597_v15  ;;  %v6408_v43 = vpack.c.bf16 %v8924_v41, %v8924_v41  ;;  %v1689_v5 = vadd.f32 %v8806_v26, %v9494_v52 }
 0x321   : > { %v5638_v17 = vpack.c.b16 %v5486_v44, %v5486_v44  ;;  %v5654_v3 = vpack.c.b16 %v5598_v35, %v5598_v35  ;;  %v2201_v27 = vadd.f32 %v8806_v26, %v8525_v19  ;;  %v1710_v4 = vadd.f32 %v8806_v26, %v8527_v21 }
 0x322   : > { %v2222_v33 = vadd.f32 %v8806_v26, %v8529_v48  ;;  %v1702_v47 = vadd.f32 %v8806_v26, %v8531_v32  ;;  %v2214_v20 = vadd.f32 %v8806_v26, %v9495_v2  ;;  %v1713_v31 = vadd.f32 %v8806_v26, %v9496_v8  ;;  %v8974_v2 = vpop.f32.mrb[124].mxu1 }
 0x323   : > { %5702 = vst [vmem:[%s7360_s13 + $0x2c] sm:$0xf] %v5638_v17  ;;  %5718 = vst [vmem:[%s7360_s13 + $0x6c] sm:$0xf] %v5654_v3  ;;  %v2225_v19 = vadd.f32 %v8806_v26, %v9497_v6  ;;  %v2421_v37 = vmax.f32 %v1689_v5, 0.0  ;;  %v2549_v25 = vmax.f32 %v2201_v27, 0.0 }
 0x324   : > { %v2426_v21 = vmax.f32 %v1710_v4, 0.0  ;;  %v2554_v12 = vmax.f32 %v2222_v33, 0.0  ;;  %v2424_v7 = vmax.f32 %v1702_v47, 0.0  ;;  %v2552_v48 = vmax.f32 %v2214_v20, 0.0  ;;  %v8972_v47 = vpop.f32.mrb[124].mxu0  ;;  %9499 = vst [vmem:[#allocation24_spill] sm:$0xff] %v8974_v2 }
 0x325   : > { %v2427_v39 = vmax.f32 %v1713_v31, 0.0  ;;  %v2555_v18 = vmax.f32 %v2225_v19, 0.0  ;;  %v3162_v32 = vrot.slane %v2421_v37, 4  ;;  %v3930_v23 = vrot.slane %v2549_v25, 4  ;;  %9498 = vst [vmem:[#allocation23_spill] sm:$0xff] %v8972_v47  ;;  %v8976_v19 = vpop.f32.mrb[125].mxu0 }
 0x326   : > { %v3192_v61 = vrot.slane %v2426_v21, 4  ;;  %v3960_v42 = vrot.slane %v2554_v12, 4  ;;  %v3180_v53 = vrot.slane %v2424_v7, 4  ;;  %v3948_v16 = vrot.slane %v2552_v48, 4 }
 0x327   : > { %v3198_v40 = vrot.slane %v2427_v39, 4  ;;  %v3966_v10 = vrot.slane %v2555_v18, 4  ;;  %v3163_v11 = vmax.f32 %v2421_v37, %v3162_v32  ;;  %v3931_v59 = vmax.f32 %v2549_v25, %v3930_v23  ;;  %v8978_v37 = vpop.f32.mrb[125].mxu1 }
 0x328   : > { %v3193_v15 = vmax.f32 %v2426_v21, %v3192_v61  ;;  %v3961_v44 = vmax.f32 %v2554_v12, %v3960_v42  ;;  %v3181_v35 = vmax.f32 %v2424_v7, %v3180_v53  ;;  %v3949_v17 = vmax.f32 %v2552_v48, %v3948_v16  ;;  %9500 = vst [vmem:[#allocation25_spill] sm:$0xff] %v8978_v37  ;;  %v8980_v48 = vpop.f32.mrb[126].mxu0 }
 0x329   : > { %v3199_v3 = vmax.f32 %v2427_v39, %v3198_v40  ;;  %v3967_v52 = vmax.f32 %v2555_v18, %v3966_v10  ;;  %v3164_v5 = vrot.slane %v3163_v11, 2  ;;  %v3932_v27 = vrot.slane %v3931_v59, 2  ;;  %9501 = vst [vmem:[#allocation26_spill] sm:$0xff] %v8980_v48  ;;  %v8982_v39 = vpop.f32.mrb[126].mxu1  ;;  %v8984_v42 = vpop.f32.mrb[127].mxu0 }
 0x32a   : > { %v3194_v4 = vrot.slane %v3193_v15, 2  ;;  %v3962_v33 = vrot.slane %v3961_v44, 2  ;;  %v3182_v20 = vrot.slane %v3181_v35, 2  ;;  %v3950_v8 = vrot.slane %v3949_v17, 2  ;;  %9502 = vst [vmem:[#allocation27_spill] sm:$0xff] %v8982_v39  ;;  %9503 = vst [vmem:[#allocation28_spill] sm:$0xff] %v8984_v42 }
 0x32b   : > { %v3200_v31 = vrot.slane %v3199_v3, 2  ;;  %v3968_v6 = vrot.slane %v3967_v52, 2  ;;  %v3165_v25 = vmax.f32 %v3163_v11, %v3164_v5  ;;  %v3933_v21 = vmax.f32 %v3931_v59, %v3932_v27 }
 0x32c   : > { %v3195_v12 = vmax.f32 %v3193_v15, %v3194_v4  ;;  %v3963_v7 = vmax.f32 %v3961_v44, %v3962_v33  ;;  %v3183_v18 = vmax.f32 %v3181_v35, %v3182_v20  ;;  %v3951_v32 = vmax.f32 %v3949_v17, %v3950_v8 }
 0x32d   : > { %v3201_v23 = vmax.f32 %v3199_v3, %v3200_v31  ;;  %v3969_v61 = vmax.f32 %v3967_v52, %v3968_v6  ;;  %v3166_v53 = vrot.slane %v3165_v25, 1  ;;  %v3934_v16 = vrot.slane %v3933_v21, 1 }
 0x32e   : > { %v3196_v40 = vrot.slane %v3195_v12, 1  ;;  %v3964_v10 = vrot.slane %v3963_v7, 1  ;;  %v6283_v11 = vpack.c.bf16 %v8944_v58, %v8944_v58  ;;  %v6411_v59 = vpack.c.bf16 %v8946_v63, %v8946_v63 }
 0x32f   : > { %v3184_v15 = vrot.slane %v3183_v18, 1  ;;  %v3952_v44 = vrot.slane %v3951_v32, 1  ;;  %v3167_v5 = vmax.f32 %v3165_v25, %v3166_v53  ;;  %v3935_v27 = vmax.f32 %v3933_v21, %v3934_v16 }
 0x330   : > { %v3202_v35 = vrot.slane %v3201_v23, 1  ;;  %v3970_v17 = vrot.slane %v3969_v61, 1  ;;  %v8990_v3 = vmax.f32 %v3195_v12, %v3196_v40  ;;  %v8992_v52 = vmax.f32 %v3963_v7, %v3964_v10  ;;  %v9504_v40 = vld [vmem:[#allocation29_spill] sm:$0xff] }
 0x331   : > { %v3185_v4 = vmax.f32 %v3183_v18, %v3184_v15  ;;  %v3953_v33 = vmax.f32 %v3951_v32, %v3952_v44  ;;  %v5236_v20 = vunpack.c.l.b16 %v6280_v38  ;;  %v5364_v58 = vunpack.c.l.b16 %v6408_v43  ;;  %v9506_v15 = vld [vmem:[#allocation3_spill] sm:$0xff] }
 0x332   : > { %v6281_v63 = vpack.c.bf16 %v3167_v5, %v3167_v5  ;;  %v6409_v8 = vpack.c.bf16 %v3935_v27, %v3935_v27  ;;  %v5239_v31 = vunpack.c.l.b16 %v6283_v11  ;;  %v5367_v6 = vunpack.c.l.b16 %v6411_v59  ;;  %v9505_v11 = vld [vmem:[#allocation2_spill] sm:$0xff]  ;;  %v9507_v5 = vld [vmem:[#allocation4_spill] sm:$0xff] }
 0x333   : > { %v6284_v25 = vpack.c.bf16 %v3185_v4, %v3185_v4  ;;  %v6412_v21 = vpack.c.bf16 %v3953_v33, %v3953_v33  ;;  %v9000_v7 = vmax.f32 %v3201_v23, %v3202_v35  ;;  %v9002_v18 = vmax.f32 %v3969_v61, %v3970_v17 }
 0x334   : > { %v5237_v12 = vunpack.c.l.b16 %v6281_v63  ;;  %v5365_v53 = vunpack.c.l.b16 %v6409_v8  ;;  %v1705_v10 = vadd.f32 %v8806_v26, %v9504_v40  ;;  %v2217_v23 = vadd.f32 %v8806_v26, %v9505_v11  ;;  %v9030_v63 = vpop.f32.mrb[127].mxu1  ;;  %v9512_v40 = vld [vmem:[#allocation8_spill] sm:$0xff] }
 0x335   : > { %v5240_v41 = vunpack.c.l.b16 %v6284_v25  ;;  %v5368_v43 = vunpack.c.l.b16 %v6412_v21  ;;  %v1726_v44 = vadd.f32 %v8806_v26, %v9506_v15  ;;  %v2238_v27 = vadd.f32 %v8806_v26, %v9507_v5  ;;  %9508 = vst [vmem:[#allocation29_spill] sm:$0xff] %v9030_v63  ;;  %v9509_v21 = vld [vmem:[#allocation5_spill] sm:$0xff] }
 0x336   : > { %v5487_v32 = vsel %vm5396_vm0, %v5237_v12, %v5236_v20  ;;  %v5599_v16 = vsel %vm5396_vm0, %v5365_v53, %v5364_v58  ;;  %v2425_v4 = vmax.f32 %v1705_v10, 0.0  ;;  %v2553_v33 = vmax.f32 %v2217_v23, 0.0 }
 0x337   : > { %v5488_v61 = vsel %vm5398_vm1, %v8938_v54, %v5487_v32  ;;  %v5600_v59 = vsel %vm5398_vm1, %v8940_v60, %v5599_v16  ;;  %v2430_v58 = vmax.f32 %v1726_v44, 0.0  ;;  %v2558_v60 = vmax.f32 %v2238_v27, 0.0  ;;  %v9511_v16 = vld [vmem:[#allocation7_spill] sm:$0xff] }
 0x338   : > { %v5489_v35 = vsel %vm5400_vm2, %v5239_v31, %v5488_v61  ;;  %v5601_v17 = vsel %vm5400_vm2, %v5367_v6, %v5600_v59  ;;  %v3186_v8 = vrot.slane %v2425_v4, 4  ;;  %v3954_v25 = vrot.slane %v2553_v33, 4  ;;  %v9510_v31 = vld [vmem:[#allocation6_spill] sm:$0xff] }
 0x339   : > { %v9025_v20 = vsel %vm5402_vm3, %v5240_v41, %v5489_v35  ;;  %v9028_v54 = vsel %vm5402_vm3, %v5368_v43, %v5601_v17  ;;  %v1718_v12 = vadd.f32 %v8806_v26, %v9509_v21  ;;  %v2230_v6 = vadd.f32 %v8806_v26, %v9510_v31 }
 0x33a   : > { %v3216_v53 = vrot.slane %v2430_v58, 4  ;;  %v3984_v32 = vrot.slane %v2558_v60, 4  ;;  %v1729_v41 = vadd.f32 %v8806_v26, %v9511_v16  ;;  %v2241_v43 = vadd.f32 %v8806_v26, %v9512_v40 }
 0x33b   : > { %v3187_v10 = vmax.f32 %v2425_v4, %v3186_v8  ;;  %v3955_v11 = vmax.f32 %v2553_v33, %v3954_v25  ;;  %v2428_v23 = vmax.f32 %v1718_v12, 0.0  ;;  %v2556_v61 = vmax.f32 %v2230_v6, 0.0 }
 0x33c   : > { %v3217_v59 = vmax.f32 %v2430_v58, %v3216_v53  ;;  %v3985_v15 = vmax.f32 %v2558_v60, %v3984_v32  ;;  %v2431_v44 = vmax.f32 %v1729_v41, 0.0  ;;  %v2559_v5 = vmax.f32 %v2241_v43, 0.0 }
 0x33d   : > { %v3188_v27 = vrot.slane %v3187_v10, 2  ;;  %v3956_v35 = vrot.slane %v3955_v11, 2  ;;  %v3204_v17 = vrot.slane %v2428_v23, 4  ;;  %v3972_v21 = vrot.slane %v2556_v61, 4 }
 0x33e   : > { %v3218_v31 = vrot.slane %v3217_v59, 2  ;;  %v3986_v38 = vrot.slane %v3985_v15, 2  ;;  %v3222_v13 = vrot.slane %v2431_v44, 4  ;;  %v3990_v63 = vrot.slane %v2559_v5, 4 }
 0x33f   : > { %v3189_v16 = vmax.f32 %v3187_v10, %v3188_v27  ;;  %v3957_v42 = vmax.f32 %v3955_v11, %v3956_v35  ;;  %v3205_v39 = vmax.f32 %v2428_v23, %v3204_v17  ;;  %v3973_v40 = vmax.f32 %v2556_v61, %v3972_v21 }
 0x340   : > { %v3219_v4 = vmax.f32 %v3217_v59, %v3218_v31  ;;  %v3987_v33 = vmax.f32 %v3985_v15, %v3986_v38  ;;  %v3223_v8 = vmax.f32 %v2431_v44, %v3222_v13  ;;  %v3991_v25 = vmax.f32 %v2559_v5, %v3990_v63 }
 0x341   : > { %v3190_v58 = vrot.slane %v3189_v16, 1  ;;  %v3958_v60 = vrot.slane %v3957_v42, 1  ;;  %v3206_v12 = vrot.slane %v3205_v39, 2  ;;  %v3974_v6 = vrot.slane %v3973_v40, 2 }
 0x342   : > { %v3220_v53 = vrot.slane %v3219_v4, 1  ;;  %v3988_v32 = vrot.slane %v3987_v33, 1  ;;  %v3224_v41 = vrot.slane %v3223_v8, 2  ;;  %v3992_v43 = vrot.slane %v3991_v25, 2 }
 0x343   : > { %v3191_v48 = vmax.f32 %v3189_v16, %v3190_v58  ;;  %v3959_v2 = vmax.f32 %v3957_v42, %v3958_v60  ;;  %v3207_v47 = vmax.f32 %v3205_v39, %v3206_v12  ;;  %v3975_v37 = vmax.f32 %v3973_v40, %v3974_v6 }
 0x344   : > { %v3221_v10 = vmax.f32 %v3219_v4, %v3220_v53  ;;  %v3989_v11 = vmax.f32 %v3987_v33, %v3988_v32  ;;  %v3225_v23 = vmax.f32 %v3223_v8, %v3224_v41  ;;  %v3993_v61 = vmax.f32 %v3991_v25, %v3992_v43  ;;  %v9515_v53 = vld [vmem:[#allocation9_spill] sm:$0xff] }
 0x345   : > { %v6287_v13 = vpack.c.bf16 %v9000_v7, %v9000_v7  ;;  %v6415_v38 = vpack.c.bf16 %v9002_v18, %v9002_v18  ;;  %v6285_v63 = vpack.c.bf16 %v3191_v48, %v3191_v48  ;;  %v6413_v59 = vpack.c.bf16 %v3959_v2, %v3959_v2 }
 0x346   : > { %v3208_v15 = vrot.slane %v3207_v47, 1  ;;  %v3976_v44 = vrot.slane %v3975_v37, 1  ;;  %v6290_v35 = vpack.c.bf16 %v3221_v10, %v3221_v10  ;;  %v6418_v42 = vpack.c.bf16 %v3989_v11, %v3989_v11 }
 0x347   : > { %v5241_v5 = vunpack.c.l.b16 %v6285_v63  ;;  %v5369_v27 = vunpack.c.l.b16 %v6413_v59  ;;  %v9513_v39 = vpack.c.bf16 %v8990_v3, %v8990_v3  ;;  %v9514_v21 = vpack.c.bf16 %v8992_v52, %v8992_v52 }
 0x348   : > { %v3226_v7 = vrot.slane %v3225_v23, 1  ;;  %v3994_v16 = vrot.slane %v3993_v61, 1  ;;  %v5243_v40 = vunpack.c.l.b16 %v6287_v13  ;;  %v5371_v18 = vunpack.c.l.b16 %v6415_v38 }
 0x349   : > { %v5242_v17 = vunpack.c.l.b16 %v9513_v39  ;;  %v5370_v31 = vunpack.c.l.b16 %v9514_v21  ;;  %v5491_v2 = vsel %vm5404_vm4, %v5241_v5, %v9025_v20  ;;  %v5603_v48 = vsel %vm5404_vm4, %v5369_v27, %v9028_v54 }
 0x34a   : > { %v9056_v33 = vmax.f32 %v3207_v47, %v3208_v15  ;;  %v9058_v52 = vmax.f32 %v3975_v37, %v3976_v44  ;;  %v9062_v58 = vunpack.c.l.b16 %v6290_v35  ;;  %v9064_v20 = vunpack.c.l.b16 %v6418_v42 }
 0x34b   : > { %v5492_v4 = vsel %vm5406_vm5, %v5242_v17, %v5491_v2  ;;  %v5604_v3 = vsel %vm5406_vm5, %v5370_v31, %v5603_v48  ;;  %v9066_v12 = vmax.f32 %v3225_v23, %v3226_v7  ;;  %v9068_v6 = vmax.f32 %v3993_v61, %v3994_v16 }
 0x34c   : > { %v5493_v8 = vsel %vm5408_vm6, %v5243_v40, %v5492_v4  ;;  %v5605_v25 = vsel %vm5408_vm6, %v5371_v18, %v5604_v3  ;;  %v1721_v47 = vadd.f32 %v8806_v26, %v9515_v53  ;;  %v2233_v37 = vadd.f32 %v8806_v26, %v8673_v57 }
 0x34d   : > { %v5639_v60 = vpack.c.b16 %v5493_v8, %v5493_v8  ;;  %v5655_v54 = vpack.c.b16 %v5605_v25, %v5605_v25  ;;  %v1742_v32 = vadd.f32 %v8806_v26, %v8675_v56  ;;  %v2254_v41 = vadd.f32 %v8806_v26, %v8677_v22 }
 0x34e   : > { %v1734_v43 = vadd.f32 %v8806_v26, %v8679_v1  ;;  %v2246_v10 = vadd.f32 %v8806_v26, %v8681_v28  ;;  %v1745_v11 = vadd.f32 %v8806_v26, %v8683_v30  ;;  %v2257_v57 = vadd.f32 %v8806_v26, %v8685_v55 }
 0x34f   : > { %5703 = vst [vmem:[%s7360_s13 + $0x30] sm:$0xf] %v5639_v60  ;;  %5719 = vst [vmem:[%s7360_s13 + $0x70] sm:$0xf] %v5655_v54  ;;  %v2429_v23 = vmax.f32 %v1721_v47, 0.0  ;;  %v2557_v61 = vmax.f32 %v2233_v37, 0.0 }
 0x350   : > { %v2434_v56 = vmax.f32 %v1742_v32, 0.0  ;;  %v2562_v13 = vmax.f32 %v2254_v41, 0.0  ;;  %v2432_v38 = vmax.f32 %v1734_v43, 0.0  ;;  %v2560_v22 = vmax.f32 %v2246_v10, 0.0 }
 0x351   : > { %v2435_v63 = vmax.f32 %v1745_v11, 0.0  ;;  %v2563_v59 = vmax.f32 %v2257_v57, 0.0  ;;  %v3210_v15 = vrot.slane %v2429_v23, 4  ;;  %v3978_v44 = vrot.slane %v2557_v61, 4 }
 0x352   : > { %v3240_v1 = vrot.slane %v2434_v56, 4  ;;  %v4008_v5 = vrot.slane %v2562_v13, 4  ;;  %v3228_v27 = vrot.slane %v2432_v38, 4  ;;  %v3996_v28 = vrot.slane %v2560_v22, 4 }
 0x353   : > { %v3246_v35 = vrot.slane %v2435_v63, 4  ;;  %v4014_v42 = vrot.slane %v2563_v59, 4  ;;  %v3211_v30 = vmax.f32 %v2429_v23, %v3210_v15  ;;  %v3979_v39 = vmax.f32 %v2557_v61, %v3978_v44 }
 0x354   : > { %v3241_v17 = vmax.f32 %v2434_v56, %v3240_v1  ;;  %v4009_v55 = vmax.f32 %v2562_v13, %v4008_v5  ;;  %v3229_v21 = vmax.f32 %v2432_v38, %v3228_v27  ;;  %v3997_v31 = vmax.f32 %v2560_v22, %v3996_v28 }
 0x355   : > { %v3247_v7 = vmax.f32 %v2435_v63, %v3246_v35  ;;  %v4015_v16 = vmax.f32 %v2563_v59, %v4014_v42  ;;  %v3212_v40 = vrot.slane %v3211_v30, 2  ;;  %v3980_v18 = vrot.slane %v3979_v39, 2 }
 0x356   : > { %v3242_v2 = vrot.slane %v3241_v17, 2  ;;  %v4010_v48 = vrot.slane %v4009_v55, 2  ;;  %v3230_v4 = vrot.slane %v3229_v21, 2  ;;  %v3998_v3 = vrot.slane %v3997_v31, 2 }
 0x357   : > { %v3248_v8 = vrot.slane %v3247_v7, 2  ;;  %v4016_v25 = vrot.slane %v4015_v16, 2  ;;  %v3213_v60 = vmax.f32 %v3211_v30, %v3212_v40  ;;  %v3981_v54 = vmax.f32 %v3979_v39, %v3980_v18 }
 0x358   : > { %v3243_v53 = vmax.f32 %v3241_v17, %v3242_v2  ;;  %v4011_v47 = vmax.f32 %v4009_v55, %v4010_v48  ;;  %v3231_v37 = vmax.f32 %v3229_v21, %v3230_v4  ;;  %v3999_v32 = vmax.f32 %v3997_v31, %v3998_v3 }
 0x359   : > { %v3249_v41 = vmax.f32 %v3247_v7, %v3248_v8  ;;  %v4017_v43 = vmax.f32 %v4015_v16, %v4016_v25  ;;  %v6288_v10 = vpack.c.bf16 %v9056_v33, %v9056_v33  ;;  %v6416_v11 = vpack.c.bf16 %v9058_v52, %v9058_v52 }
 0x35a   : > { %v3214_v57 = vrot.slane %v3213_v60, 1  ;;  %v3982_v23 = vrot.slane %v3981_v54, 1  ;;  %v6291_v61 = vpack.c.bf16 %v9066_v12, %v9066_v12  ;;  %v6419_v56 = vpack.c.bf16 %v9068_v6, %v9068_v6 }
 0x35b   : > { %v3232_v13 = vrot.slane %v3231_v37, 1  ;;  %v4000_v38 = vrot.slane %v3999_v32, 1  ;;  %v3244_v59 = vrot.slane %v3243_v53, 1  ;;  %v4012_v15 = vrot.slane %v4011_v47, 1 }
 0x35c   : > { %v3215_v22 = vmax.f32 %v3213_v60, %v3214_v57  ;;  %v3983_v63 = vmax.f32 %v3981_v54, %v3982_v23  ;;  %v3250_v33 = vrot.slane %v3249_v41, 1  ;;  %v4018_v5 = vrot.slane %v4017_v43, 1  ;;  %v9517_v23 = vld [vmem:[#allocation11_spill] sm:$0xff] }
 0x35d   : > { %v3233_v44 = vmax.f32 %v3231_v37, %v3232_v13  ;;  %v4001_v1 = vmax.f32 %v3999_v32, %v4000_v38  ;;  %v5244_v27 = vunpack.c.l.b16 %v6288_v10  ;;  %v5372_v52 = vunpack.c.l.b16 %v6416_v11  ;;  %v9516_v11 = vld [vmem:[#allocation10_spill] sm:$0xff] }
 0x35e   : > { %v6289_v28 = vpack.c.bf16 %v3215_v22, %v3215_v22  ;;  %v6417_v35 = vpack.c.bf16 %v3983_v63, %v3983_v63  ;;  %v5247_v42 = vunpack.c.l.b16 %v6291_v61  ;;  %v5375_v30 = vunpack.c.l.b16 %v6419_v56 }
 0x35f   : > { %v6292_v12 = vpack.c.bf16 %v3233_v44, %v3233_v44  ;;  %v6420_v39 = vpack.c.bf16 %v4001_v1, %v4001_v1  ;;  %v9096_v55 = vmax.f32 %v3243_v53, %v3244_v59  ;;  %v9098_v21 = vmax.f32 %v4011_v47, %v4012_v15 }
 0x360   : > { %v5245_v17 = vunpack.c.l.b16 %v6289_v28  ;;  %v5373_v6 = vunpack.c.l.b16 %v6417_v35  ;;  %v9100_v16 = vmax.f32 %v3249_v41, %v3250_v33  ;;  %v9102_v40 = vmax.f32 %v4017_v43, %v4018_v5 }
 0x361   : > { %v5248_v31 = vunpack.c.l.b16 %v6292_v12  ;;  %v5376_v7 = vunpack.c.l.b16 %v6420_v39  ;;  %v1737_v48 = vadd.f32 %v8806_v26, %v8687_v0  ;;  %v2249_v4 = vadd.f32 %v8806_v26, %v8739_v9 }
 0x362   : > { %v5494_v18 = vsel %vm5396_vm0, %v5245_v17, %v5244_v27  ;;  %v5606_v2 = vsel %vm5396_vm0, %v5373_v6, %v5372_v52  ;;  %v1758_v25 = vadd.f32 %v8806_v26, %v8749_v34  ;;  %v2270_v60 = vadd.f32 %v8806_v26, %v8751_v49 }
 0x363   : > { %v5495_v3 = vsel %vm5398_vm1, %v9062_v58, %v5494_v18  ;;  %v5607_v8 = vsel %vm5398_vm1, %v9064_v20, %v5606_v2  ;;  %v2433_v0 = vmax.f32 %v1737_v48, 0.0  ;;  %v2561_v47 = vmax.f32 %v2249_v4, 0.0 }
 0x364   : > { %v5496_v54 = vsel %vm5400_vm2, %v5247_v42, %v5495_v3  ;;  %v5608_v53 = vsel %vm5400_vm2, %v5375_v30, %v5607_v8  ;;  %v2438_v37 = vmax.f32 %v1758_v25, 0.0  ;;  %v2566_v20 = vmax.f32 %v2270_v60, 0.0 }
 0x365   : > { %v9121_v9 = vsel %vm5402_vm3, %v5248_v31, %v5496_v54  ;;  %v9124_v58 = vsel %vm5402_vm3, %v5376_v7, %v5608_v53  ;;  %v3234_v32 = vrot.slane %v2433_v0, 4  ;;  %v4002_v41 = vrot.slane %v2561_v47, 4 }
 0x366   : > { %v1750_v34 = vadd.f32 %v8806_v26, %v8753_v24  ;;  %v2262_v49 = vadd.f32 %v8806_v26, %v8755_v14  ;;  %v3264_v43 = vrot.slane %v2438_v37, 4  ;;  %v4032_v10 = vrot.slane %v2566_v20, 4 }
 0x367   : > { %v1761_v57 = vadd.f32 %v8806_v26, %v9516_v11  ;;  %v2273_v61 = vadd.f32 %v8806_v26, %v9517_v23  ;;  %v3235_v56 = vmax.f32 %v2433_v0, %v3234_v32  ;;  %v4003_v13 = vmax.f32 %v2561_v47, %v4002_v41 }
 0x368   : > { %v2436_v38 = vmax.f32 %v1750_v34, 0.0  ;;  %v2564_v22 = vmax.f32 %v2262_v49, 0.0  ;;  %v3265_v63 = vmax.f32 %v2438_v37, %v3264_v43  ;;  %v4033_v59 = vmax.f32 %v2566_v20, %v4032_v10 }
 0x369   : > { %v2439_v15 = vmax.f32 %v1761_v57, 0.0  ;;  %v2567_v44 = vmax.f32 %v2273_v61, 0.0  ;;  %v3236_v24 = vrot.slane %v3235_v56, 2  ;;  %v4004_v1 = vrot.slane %v4003_v13, 2 }
 0x36a   : > { %v3252_v33 = vrot.slane %v2436_v38, 4  ;;  %v4020_v14 = vrot.slane %v2564_v22, 4  ;;  %v3266_v5 = vrot.slane %v3265_v63, 2  ;;  %v4034_v27 = vrot.slane %v4033_v59, 2 }
 0x36b   : > { %v3270_v52 = vrot.slane %v2439_v15, 4  ;;  %v4038_v28 = vrot.slane %v2567_v44, 4  ;;  %v3237_v35 = vmax.f32 %v3235_v56, %v3236_v24  ;;  %v4005_v42 = vmax.f32 %v4003_v13, %v4004_v1 }
 0x36c   : > { %v3253_v30 = vmax.f32 %v2436_v38, %v3252_v33  ;;  %v4021_v26 = vmax.f32 %v2564_v22, %v4020_v14  ;;  %v3267_v12 = vmax.f32 %v3265_v63, %v3266_v5  ;;  %v4035_v39 = vmax.f32 %v4033_v59, %v4034_v27  ;;  %v9518_v27 = vld [vmem:[#allocation12_spill] sm:$0xff] }
 0x36d   : > { %v3271_v17 = vmax.f32 %v2439_v15, %v3270_v52  ;;  %v4039_v6 = vmax.f32 %v2567_v44, %v4038_v28  ;;  %v3238_v31 = vrot.slane %v3237_v35, 1  ;;  %v4006_v7 = vrot.slane %v4005_v42, 1 }
 0x36e   : > { %v3254_v18 = vrot.slane %v3253_v30, 2  ;;  %v4022_v2 = vrot.slane %v4021_v26, 2  ;;  %v3268_v48 = vrot.slane %v3267_v12, 1  ;;  %v4036_v4 = vrot.slane %v4035_v39, 1 }
 0x36f   : > { %v3239_v3 = vmax.f32 %v3237_v35, %v3238_v31  ;;  %v4007_v8 = vmax.f32 %v4005_v42, %v4006_v7  ;;  %v3272_v25 = vrot.slane %v3271_v17, 2  ;;  %v4040_v60 = vrot.slane %v4039_v6, 2 }
 0x370   : > { %v6294_v54 = vpack.c.bf16 %v9096_v55, %v9096_v55  ;;  %v6422_v53 = vpack.c.bf16 %v9098_v21, %v9098_v21  ;;  %v3255_v0 = vmax.f32 %v3253_v30, %v3254_v18  ;;  %v4023_v47 = vmax.f32 %v4021_v26, %v4022_v2 }
 0x371   : > { %v6295_v37 = vpack.c.bf16 %v9100_v16, %v9100_v16  ;;  %v6423_v20 = vpack.c.bf16 %v9102_v40, %v9102_v40  ;;  %v6293_v32 = vpack.c.bf16 %v3239_v3, %v3239_v3  ;;  %v6421_v41 = vpack.c.bf16 %v4007_v8, %v4007_v8 }
 0x372   : > { %v3269_v34 = vmax.f32 %v3267_v12, %v3268_v48  ;;  %v4037_v49 = vmax.f32 %v4035_v39, %v4036_v4  ;;  %v3273_v11 = vmax.f32 %v3271_v17, %v3272_v25  ;;  %v4041_v57 = vmax.f32 %v4039_v6, %v4040_v60  ;;  %v9519_v39 = vld [vmem:[#allocation13_spill] sm:$0xff] }
 0x373   : > { %v5249_v43 = vunpack.c.l.b16 %v6293_v32  ;;  %v5377_v10 = vunpack.c.l.b16 %v6421_v41  ;;  %v5250_v55 = vunpack.c.l.b16 %v6294_v54  ;;  %v5378_v23 = vunpack.c.l.b16 %v6422_v53 }
 0x374   : > { %v3256_v61 = vrot.slane %v3255_v0, 1  ;;  %v4024_v21 = vrot.slane %v4023_v47, 1  ;;  %v5251_v56 = vunpack.c.l.b16 %v6295_v37  ;;  %v5379_v13 = vunpack.c.l.b16 %v6423_v20 }
 0x375   : > { %v5498_v16 = vsel %vm5404_vm4, %v5249_v43, %v9121_v9  ;;  %v5610_v40 = vsel %vm5404_vm4, %v5377_v10, %v9124_v58  ;;  %v6298_v63 = vpack.c.bf16 %v3269_v34, %v3269_v34  ;;  %v6426_v59 = vpack.c.bf16 %v4037_v49, %v4037_v49  ;;  %v9157_v58 = vld [vmem:[%s9260_s2] ss:$0 sm:$0xff] }
 0x376   : > { %v5499_v38 = vsel %vm5406_vm5, %v5250_v55, %v5498_v16  ;;  %v5611_v22 = vsel %vm5406_vm5, %v5378_v23, %v5610_v40  ;;  %v3274_v24 = vrot.slane %v3273_v11, 1  ;;  %v4042_v1 = vrot.slane %v4041_v57, 1 }
 0x377   : > { %v5500_v15 = vsel %vm5408_vm6, %v5251_v56, %v5499_v38  ;;  %v5612_v44 = vsel %vm5408_vm6, %v5379_v13, %v5611_v22  ;;  %v9150_v9 = vmax.f32 %v3255_v0, %v3256_v61  ;;  %v9152_v5 = vmax.f32 %v4023_v47, %v4024_v21 }
 0x378   : > { %v5640_v33 = vpack.c.b16 %v5500_v15, %v5500_v15  ;;  %v5656_v14 = vpack.c.b16 %v5612_v44, %v5612_v44  ;;  %v1753_v52 = vadd.f32 %v9157_v58, %v9518_v27  ;;  %v2265_v28 = vadd.f32 %v9157_v58, %v8826_v36 }
 0x379   : > { %v1774_v35 = vadd.f32 %v9157_v58, %v8828_v45  ;;  %v2286_v42 = vadd.f32 %v9157_v58, %v8830_v46  ;;  %v1766_v30 = vadd.f32 %v9157_v58, %v8832_v62  ;;  %v2278_v26 = vadd.f32 %v9157_v58, %v8834_v29 }
 0x37a   : > { %5704 = vst [vmem:[%s7360_s13 + $0x34] sm:$0xf] %v5640_v33  ;;  %5720 = vst [vmem:[%s7360_s13 + $0x74] sm:$0xf] %v5656_v14  ;;  %v1777_v12 = vadd.f32 %v9157_v58, %v8836_v51  ;;  %v2289_v36 = vadd.f32 %v9157_v58, %v9519_v39  ;;  %v2437_v17 = vmax.f32 %v1753_v52, 0.0  ;;  %v2565_v6 = vmax.f32 %v2265_v28, 0.0 }
 0x37b   : > { %v2442_v45 = vmax.f32 %v1774_v35, 0.0  ;;  %v2570_v31 = vmax.f32 %v2286_v42, 0.0  ;;  %v2440_v7 = vmax.f32 %v1766_v30, 0.0  ;;  %v2568_v46 = vmax.f32 %v2278_v26, 0.0 }
 0x37c   : > { %v2443_v18 = vmax.f32 %v1777_v12, 0.0  ;;  %v2571_v2 = vmax.f32 %v2289_v36, 0.0  ;;  %v3258_v48 = vrot.slane %v2437_v17, 4  ;;  %v4026_v4 = vrot.slane %v2565_v6, 4 }
 0x37d   : > { %v3288_v62 = vrot.slane %v2442_v45, 4  ;;  %v4056_v3 = vrot.slane %v2570_v31, 4  ;;  %v3276_v8 = vrot.slane %v2440_v7, 4  ;;  %v4044_v29 = vrot.slane %v2568_v46, 4 }
 0x37e   : > { %v3294_v25 = vrot.slane %v2443_v18, 4  ;;  %v4062_v60 = vrot.slane %v2571_v2, 4  ;;  %v3259_v51 = vmax.f32 %v2437_v17, %v3258_v48  ;;  %v4027_v54 = vmax.f32 %v2565_v6, %v4026_v4 }
 0x37f   : > { %v3289_v53 = vmax.f32 %v2442_v45, %v3288_v62  ;;  %v4057_v0 = vmax.f32 %v2570_v31, %v4056_v3  ;;  %v3277_v47 = vmax.f32 %v2440_v7, %v3276_v8  ;;  %v4045_v37 = vmax.f32 %v2568_v46, %v4044_v29  ;;  %v9520_v29 = vld [vmem:[#allocation14_spill] sm:$0xff] }
 0x380   : > { %v3295_v20 = vmax.f32 %v2443_v18, %v3294_v25  ;;  %v4063_v32 = vmax.f32 %v2571_v2, %v4062_v60  ;;  %v5254_v41 = vunpack.c.l.b16 %v6298_v63  ;;  %v5382_v34 = vunpack.c.l.b16 %v6426_v59  ;;  %v9521_v60 = vld [vmem:[#allocation15_spill] sm:$0xff] }
 0x381   : > { %v3260_v49 = vrot.slane %v3259_v51, 2  ;;  %v4028_v43 = vrot.slane %v4027_v54, 2  ;;  %v3275_v10 = vmax.f32 %v3273_v11, %v3274_v24  ;;  %v4043_v55 = vmax.f32 %v4041_v57, %v4042_v1 }
 0x382   : > { %v3278_v23 = vrot.slane %v3277_v47, 2  ;;  %v4046_v61 = vrot.slane %v4045_v37, 2  ;;  %v3290_v13 = vrot.slane %v3289_v53, 2  ;;  %v4058_v16 = vrot.slane %v4057_v0, 2 }
 0x383   : > { %v3261_v21 = vmax.f32 %v3259_v51, %v3260_v49  ;;  %v4029_v56 = vmax.f32 %v4027_v54, %v4028_v43  ;;  %v3296_v22 = vrot.slane %v3295_v20, 2  ;;  %v4064_v15 = vrot.slane %v4063_v32, 2 }
 0x384   : > { %v3279_v40 = vmax.f32 %v3277_v47, %v3278_v23  ;;  %v4047_v38 = vmax.f32 %v4045_v37, %v4046_v61  ;;  %v6296_v44 = vpack.c.bf16 %v9150_v9, %v9150_v9  ;;  %v6424_v63 = vpack.c.bf16 %v9152_v5, %v9152_v5  ;;  %v9523_v37 = vld [vmem:[#allocation17_spill] sm:$0xff] }
 0x385   : > { %v3262_v59 = vrot.slane %v3261_v21, 1  ;;  %v4030_v33 = vrot.slane %v4029_v56, 1  ;;  %v6299_v11 = vpack.c.bf16 %v3275_v10, %v3275_v10  ;;  %v6427_v57 = vpack.c.bf16 %v4043_v55, %v4043_v55 }
 0x386   : > { %v3280_v24 = vrot.slane %v3279_v40, 1  ;;  %v4048_v1 = vrot.slane %v4047_v38, 1  ;;  %v3291_v52 = vmax.f32 %v3289_v53, %v3290_v13  ;;  %v4059_v28 = vmax.f32 %v4057_v0, %v4058_v16  ;;  %v9522_v0 = vld [vmem:[#allocation16_spill] sm:$0xff]  ;;  %v9525_v16 = vld [vmem:[#allocation19_spill] sm:$0xff] }
 0x387   : > { %v3263_v14 = vmax.f32 %v3261_v21, %v3262_v59  ;;  %v4031_v27 = vmax.f32 %v4029_v56, %v4030_v33  ;;  %v3297_v30 = vmax.f32 %v3295_v20, %v3296_v22  ;;  %v4065_v26 = vmax.f32 %v4063_v32, %v4064_v15  ;;  %v9524_v56 = vld [vmem:[#allocation18_spill] sm:$0xff]  ;;  %v9526_v15 = vld [vmem:[#allocation20_spill] sm:$0xff] }
 0x388   : > { %v3281_v35 = vmax.f32 %v3279_v40, %v3280_v24  ;;  %v4049_v42 = vmax.f32 %v4047_v38, %v4048_v1  ;;  %v5252_v12 = vunpack.c.l.b16 %v6296_v44  ;;  %v5380_v39 = vunpack.c.l.b16 %v6424_v63  ;;  %v9527_v63 = vld [vmem:[#allocation21_spill] sm:$0xff] }
 0x389   : > { %v6297_v9 = vpack.c.bf16 %v3263_v14, %v3263_v14  ;;  %v6425_v36 = vpack.c.bf16 %v4031_v27, %v4031_v27  ;;  %v5255_v17 = vunpack.c.l.b16 %v6299_v11  ;;  %v5383_v5 = vunpack.c.l.b16 %v6427_v57 }
 0x38a   : > { %v6300_v6 = vpack.c.bf16 %v3281_v35, %v3281_v35  ;;  %v6428_v45 = vpack.c.bf16 %v4049_v42, %v4049_v42  ;;  %v3292_v46 = vrot.slane %v3291_v52, 1  ;;  %v4060_v18 = vrot.slane %v4059_v28, 1 }
 0x38b   : > { %v5253_v31 = vunpack.c.l.b16 %v6297_v9  ;;  %v5381_v7 = vunpack.c.l.b16 %v6425_v36  ;;  %v3298_v4 = vrot.slane %v3297_v30, 1  ;;  %v4066_v62 = vrot.slane %v4065_v26, 1 }
 0x38c   : > { %v5256_v2 = vunpack.c.l.b16 %v6300_v6  ;;  %v5384_v48 = vunpack.c.l.b16 %v6428_v45  ;;  %v1769_v25 = vadd.f32 %v9157_v58, %v9520_v29  ;;  %v2281_v51 = vadd.f32 %v9157_v58, %v9521_v60 }
 0x38d   : > { %v5501_v3 = vsel %vm5396_vm0, %v5253_v31, %v5252_v12  ;;  %v5613_v8 = vsel %vm5396_vm0, %v5381_v7, %v5380_v39  ;;  %v1790_v47 = vadd.f32 %v9157_v58, %v9522_v0  ;;  %v2302_v20 = vadd.f32 %v9157_v58, %v9523_v37 }
 0x38e   : > { %v5502_v54 = vsel %vm5398_vm1, %v5254_v41, %v5501_v3  ;;  %v5614_v53 = vsel %vm5398_vm1, %v5382_v34, %v5613_v8  ;;  %v2441_v43 = vmax.f32 %v1769_v25, 0.0  ;;  %v2569_v10 = vmax.f32 %v2281_v51, 0.0 }
 0x38f   : > { %v5503_v32 = vsel %vm5400_vm2, %v5255_v17, %v5502_v54  ;;  %v5615_v49 = vsel %vm5400_vm2, %v5383_v5, %v5614_v53  ;;  %v2446_v41 = vmax.f32 %v1790_v47, 0.0  ;;  %v2574_v34 = vmax.f32 %v2302_v20, 0.0 }
 0x390   : > { %v9196_v55 = vsel %vm5402_vm3, %v5256_v2, %v5503_v32  ;;  %v9199_v23 = vsel %vm5402_vm3, %v5384_v48, %v5615_v49  ;;  %v3282_v61 = vrot.slane %v2441_v43, 4  ;;  %v4050_v21 = vrot.slane %v2569_v10, 4 }
 0x391   : > { %v1782_v13 = vadd.f32 %v9157_v58, %v9524_v56  ;;  %v2294_v40 = vadd.f32 %v9157_v58, %v9525_v16  ;;  %v3312_v38 = vrot.slane %v2446_v41, 4  ;;  %v4080_v22 = vrot.slane %v2574_v34, 4 }
 0x392   : > { %v1793_v44 = vadd.f32 %v9157_v58, %v9526_v15  ;;  %v2305_v59 = vadd.f32 %v9157_v58, %v9527_v63  ;;  %v3283_v33 = vmax.f32 %v2441_v43, %v3282_v61  ;;  %v4051_v11 = vmax.f32 %v2569_v10, %v4050_v21 }
 0x393   : > { %v2444_v57 = vmax.f32 %v1782_v13, 0.0  ;;  %v2572_v24 = vmax.f32 %v2294_v40, 0.0  ;;  %v3313_v1 = vmax.f32 %v2446_v41, %v3312_v38  ;;  %v4081_v14 = vmax.f32 %v2574_v34, %v4080_v22 }
 0x394   : > { %v2447_v27 = vmax.f32 %v1793_v44, 0.0  ;;  %v2575_v35 = vmax.f32 %v2305_v59, 0.0  ;;  %v3284_v42 = vrot.slane %v3283_v33, 2  ;;  %v4052_v12 = vrot.slane %v4051_v11, 2 }
 0x395   : > { %v3300_v39 = vrot.slane %v2444_v57, 4  ;;  %v4068_v9 = vrot.slane %v2572_v24, 4  ;;  %v3314_v36 = vrot.slane %v3313_v1, 2  ;;  %v4082_v17 = vrot.slane %v4081_v14, 2 }
 0x396   : > { %v3293_v5 = vmax.f32 %v3291_v52, %v3292_v46  ;;  %v4061_v6 = vmax.f32 %v4059_v28, %v4060_v18  ;;  %v3285_v45 = vmax.f32 %v3283_v33, %v3284_v42  ;;  %v4053_v31 = vmax.f32 %v4051_v11, %v4052_v12 }
 0x397   : > { %v3299_v7 = vmax.f32 %v3297_v30, %v3298_v4  ;;  %v4067_v2 = vmax.f32 %v4065_v26, %v4066_v62  ;;  %v3318_v48 = vrot.slane %v2447_v27, 4  ;;  %v4086_v3 = vrot.slane %v2575_v35, 4 }
 0x398   : > { %v3286_v8 = vrot.slane %v3285_v45, 1  ;;  %v4054_v29 = vrot.slane %v4053_v31, 1  ;;  %v3301_v25 = vmax.f32 %v2444_v57, %v3300_v39  ;;  %v4069_v60 = vmax.f32 %v2572_v24, %v4068_v9  ;;  %v9529_v9 = vld [vmem:[#allocation25_spill] sm:$0xff] }
 0x399   : > { %v3315_v51 = vmax.f32 %v3313_v1, %v3314_v36  ;;  %v4083_v54 = vmax.f32 %v4081_v14, %v4082_v17  ;;  %v6302_v53 = vpack.c.bf16 %v3293_v5, %v3293_v5  ;;  %v6430_v0 = vpack.c.bf16 %v4061_v6, %v4061_v6  ;;  %v9528_v14 = vld [vmem:[#allocation22_spill] sm:$0xff]  ;;  %v9530_v6 = vld [vmem:[#allocation23_spill] sm:$0xff] }
 0x39a   : > { %v3287_v47 = vmax.f32 %v3285_v45, %v3286_v8  ;;  %v4055_v37 = vmax.f32 %v4053_v31, %v4054_v29  ;;  %v6303_v20 = vpack.c.bf16 %v3299_v7, %v3299_v7  ;;  %v6431_v32 = vpack.c.bf16 %v4067_v2, %v4067_v2  ;;  %v9531_v31 = vld [vmem:[#allocation24_spill] sm:$0xff]  ;;  %v9533_v8 = vld [vmem:[#allocation27_spill] sm:$0xff] }
 0x39b   : > { %v3319_v52 = vmax.f32 %v2447_v27, %v3318_v48  ;;  %v4087_v28 = vmax.f32 %v2575_v35, %v4086_v3  ;;  %v3302_v30 = vrot.slane %v3301_v25, 2  ;;  %v4070_v26 = vrot.slane %v4069_v60, 2  ;;  %v9532_v48 = vld [vmem:[#allocation26_spill] sm:$0xff] }
 0x39c   : > { %v6301_v46 = vpack.c.bf16 %v3287_v47, %v3287_v47  ;;  %v6429_v18 = vpack.c.bf16 %v4055_v37, %v4055_v37  ;;  %v3316_v4 = vrot.slane %v3315_v51, 1  ;;  %v4084_v62 = vrot.slane %v4083_v54, 1 }
 0x39d   : > { %v5258_v49 = vunpack.c.l.b16 %v6302_v53  ;;  %v5386_v43 = vunpack.c.l.b16 %v6430_v0  ;;  %v5259_v34 = vunpack.c.l.b16 %v6303_v20  ;;  %v5387_v61 = vunpack.c.l.b16 %v6431_v32 }
 0x39e   : > { %v5257_v10 = vunpack.c.l.b16 %v6301_v46  ;;  %v5385_v41 = vunpack.c.l.b16 %v6429_v18  ;;  %v3320_v21 = vrot.slane %v3319_v52, 2  ;;  %v4088_v56 = vrot.slane %v4087_v28, 2 }
 0x39f   : > { %v3303_v40 = vmax.f32 %v3301_v25, %v3302_v30  ;;  %v4071_v38 = vmax.f32 %v4069_v60, %v4070_v26  ;;  %v3317_v44 = vmax.f32 %v3315_v51, %v3316_v4  ;;  %v4085_v63 = vmax.f32 %v4083_v54, %v4084_v62 }
 0x3a0   : > { %v5505_v13 = vsel %vm5404_vm4, %v5257_v10, %v9196_v55  ;;  %v5617_v16 = vsel %vm5404_vm4, %v5385_v41, %v9199_v23  ;;  %v3321_v55 = vmax.f32 %v3319_v52, %v3320_v21  ;;  %v4089_v24 = vmax.f32 %v4087_v28, %v4088_v56 }
 0x3a1   : > { %v5506_v22 = vsel %vm5406_vm5, %v5258_v49, %v5505_v13  ;;  %v5618_v15 = vsel %vm5406_vm5, %v5386_v43, %v5617_v16  ;;  %v3304_v1 = vrot.slane %v3303_v40, 1  ;;  %v4072_v23 = vrot.slane %v4071_v38, 1 }
 0x3a2   : > { %v5507_v59 = vsel %vm5408_vm6, %v5259_v34, %v5506_v22  ;;  %v5619_v33 = vsel %vm5408_vm6, %v5387_v61, %v5618_v15  ;;  %v1785_v27 = vadd.f32 %v9157_v58, %v9528_v14  ;;  %v2297_v35 = vadd.f32 %v9157_v58, %v8970_v50 }
 0x3a3   : > { %v5641_v11 = vpack.c.b16 %v5507_v59, %v5507_v59  ;;  %v5657_v57 = vpack.c.b16 %v5619_v33, %v5619_v33  ;;  %v6306_v42 = vpack.c.bf16 %v3317_v44, %v3317_v44  ;;  %v6434_v12 = vpack.c.bf16 %v4085_v63, %v4085_v63 }
 0x3a4   : > { %v1798_v39 = vadd.f32 %v9157_v58, %v8976_v19  ;;  %v2310_v36 = vadd.f32 %v9157_v58, %v9529_v9  ;;  %v2445_v17 = vmax.f32 %v1785_v27, 0.0  ;;  %v2573_v5 = vmax.f32 %v2297_v35, 0.0 }
 0x3a5   : > { %5705 = vst [vmem:[%s7360_s13 + $0x38] sm:$0xf] %v5641_v11  ;;  %5721 = vst [vmem:[%s7360_s13 + $0x78] sm:$0xf] %v5657_v57  ;;  %v1806_v45 = vadd.f32 %v9157_v58, %v9530_v6  ;;  %v2318_v7 = vadd.f32 %v9157_v58, %v9531_v31  ;;  %v1809_v3 = vadd.f32 %v9157_v58, %v9532_v48  ;;  %v3322_v19 = vrot.slane %v3321_v55, 1 }
 0x3a6   : > { %v2448_v2 = vmax.f32 %v1798_v39, 0.0  ;;  %v2576_v50 = vmax.f32 %v2310_v36, 0.0  ;;  %v2321_v29 = vadd.f32 %v9157_v58, %v9533_v8  ;;  %v4090_v25 = vrot.slane %v4089_v24, 1 }
 0x3a7   : > { %v3306_v60 = vrot.slane %v2445_v17, 4  ;;  %v4074_v51 = vrot.slane %v2573_v5, 4  ;;  %v3305_v54 = vmax.f32 %v3303_v40, %v3304_v1  ;;  %v4073_v53 = vmax.f32 %v4071_v38, %v4072_v23 }
 0x3a8   : > { %v3324_v0 = vrot.slane %v2448_v2, 4  ;;  %v4092_v47 = vrot.slane %v2576_v50, 4  ;;  %v2450_v32 = vmax.f32 %v1806_v45, 0.0  ;;  %v2578_v52 = vmax.f32 %v2318_v7, 0.0 }
 0x3a9   : > { %v3307_v37 = vmax.f32 %v2445_v17, %v3306_v60  ;;  %v4075_v20 = vmax.f32 %v2573_v5, %v4074_v51  ;;  %v2451_v18 = vmax.f32 %v1809_v3, 0.0  ;;  %v2579_v30 = vmax.f32 %v2321_v29, 0.0  ;;  %v9534_v51 = vld [vmem:[#allocation28_spill] sm:$0xff] }
 0x3aa   : > { %v3325_v28 = vmax.f32 %v2448_v2, %v3324_v0  ;;  %v4093_v46 = vmax.f32 %v2576_v50, %v4092_v47  ;;  %v5262_v26 = vunpack.c.l.b16 %v6306_v42  ;;  %v5390_v4 = vunpack.c.l.b16 %v6434_v12 }
 0x3ab   : > { %v3308_v62 = vrot.slane %v3307_v37, 2  ;;  %v4076_v49 = vrot.slane %v4075_v20, 2  ;;  %v3323_v43 = vmax.f32 %v3321_v55, %v3322_v19  ;;  %v4091_v10 = vmax.f32 %v4089_v24, %v4090_v25 }
 0x3ac   : > { %v3326_v41 = vrot.slane %v3325_v28, 2  ;;  %v4094_v34 = vrot.slane %v4093_v46, 2  ;;  %v3336_v56 = vrot.slane %v2450_v32, 4  ;;  %v4104_v13 = vrot.slane %v2578_v52, 4 }
 0x3ad   : > { %v3309_v61 = vmax.f32 %v3307_v37, %v3308_v62  ;;  %v4077_v21 = vmax.f32 %v4075_v20, %v4076_v49  ;;  %v3342_v38 = vrot.slane %v2451_v18, 4  ;;  %v4110_v22 = vrot.slane %v2579_v30, 4 }
 0x3ae   : > { %v3327_v16 = vmax.f32 %v3325_v28, %v3326_v41  ;;  %v4095_v40 = vmax.f32 %v4093_v46, %v4094_v34  ;;  %v6304_v15 = vpack.c.bf16 %v3305_v54, %v3305_v54  ;;  %v6432_v44 = vpack.c.bf16 %v4073_v53, %v4073_v53  ;;  %v9535_v53 = vld [vmem:[#allocation29_spill] sm:$0xff] }
 0x3af   : > { %v3310_v63 = vrot.slane %v3309_v61, 1  ;;  %v4078_v59 = vrot.slane %v4077_v21, 1  ;;  %v6307_v33 = vpack.c.bf16 %v3323_v43, %v3323_v43  ;;  %v6435_v11 = vpack.c.bf16 %v4091_v10, %v4091_v10 }
 0x3b0   : > { %v3328_v57 = vrot.slane %v3327_v16, 1  ;;  %v4096_v1 = vrot.slane %v4095_v40, 1  ;;  %v3337_v23 = vmax.f32 %v2450_v32, %v3336_v56  ;;  %v4105_v14 = vmax.f32 %v2578_v52, %v4104_v13 }
 0x3b1   : > { %v3311_v55 = vmax.f32 %v3309_v61, %v3310_v63  ;;  %v4079_v24 = vmax.f32 %v4077_v21, %v4078_v59  ;;  %v3343_v42 = vmax.f32 %v2451_v18, %v3342_v38  ;;  %v4111_v12 = vmax.f32 %v2579_v30, %v4110_v22 }
 0x3b2   : > { %v3329_v27 = vmax.f32 %v3327_v16, %v3328_v57  ;;  %v4097_v35 = vmax.f32 %v4095_v40, %v4096_v1  ;;  %v5260_v39 = vunpack.c.l.b16 %v6304_v15  ;;  %v5388_v9 = vunpack.c.l.b16 %v6432_v44 }
 0x3b3   : > { %v6305_v36 = vpack.c.bf16 %v3311_v55, %v3311_v55  ;;  %v6433_v17 = vpack.c.bf16 %v4079_v24, %v4079_v24  ;;  %v5263_v5 = vunpack.c.l.b16 %v6307_v33  ;;  %v5391_v6 = vunpack.c.l.b16 %v6435_v11 }
 0x3b4   : > { %v6308_v45 = vpack.c.bf16 %v3329_v27, %v3329_v27  ;;  %v6436_v31 = vpack.c.bf16 %v4097_v35, %v4097_v35  ;;  %v3338_v50 = vrot.slane %v3337_v23, 2  ;;  %v4106_v48 = vrot.slane %v4105_v14, 2 }
 0x3b5   : > { %v5261_v7 = vunpack.c.l.b16 %v6305_v36  ;;  %v5389_v2 = vunpack.c.l.b16 %v6433_v17  ;;  %v3344_v29 = vrot.slane %v3343_v42, 2  ;;  %v4112_v19 = vrot.slane %v4111_v12, 2 }
 0x3b6   : > { %v5264_v3 = vunpack.c.l.b16 %v6308_v45  ;;  %v5392_v8 = vunpack.c.l.b16 %v6436_v31  ;;  %v1801_v54 = vadd.f32 %v9157_v58, %v9534_v51  ;;  %v2313_v0 = vadd.f32 %v9157_v58, %v9535_v53 }
 0x3b7   : > { %v5508_v25 = vsel %vm5396_vm0, %v5261_v7, %v5260_v39  ;;  %v5620_v60 = vsel %vm5396_vm0, %v5389_v2, %v5388_v9  ;;  %v3339_v46 = vmax.f32 %v3337_v23, %v3338_v50  ;;  %v4107_v18 = vmax.f32 %v4105_v14, %v4106_v48 }
 0x3b8   : > { %v5509_v47 = vsel %vm5398_vm1, %v5262_v26, %v5508_v25  ;;  %v5621_v37 = vsel %vm5398_vm1, %v5390_v4, %v5620_v60  ;;  %v2449_v52 = vmax.f32 %v1801_v54, 0.0  ;;  %v2577_v28 = vmax.f32 %v2313_v0, 0.0 }
 0x3b9   : > { %v5510_v20 = vsel %vm5400_vm2, %v5263_v5, %v5509_v47  ;;  %v5622_v32 = vsel %vm5400_vm2, %v5391_v6, %v5621_v37  ;;  %v3345_v49 = vmax.f32 %v3343_v42, %v3344_v29  ;;  %v4113_v43 = vmax.f32 %v4111_v12, %v4112_v19 }
 0x3ba   : > { %v5511_v30 = vsel %vm5402_vm3, %v5264_v3, %v5510_v20  ;;  %v5623_v62 = vsel %vm5402_vm3, %v5392_v8, %v5622_v32  ;;  %v3330_v10 = vrot.slane %v2449_v52, 4  ;;  %v4098_v58 = vrot.slane %v2577_v28, 4 }
 0x3bb   : > { %v3340_v34 = vrot.slane %v3339_v46, 1  ;;  %v4108_v4 = vrot.slane %v4107_v18, 1  ;;  %v3346_v61 = vrot.slane %v3345_v49, 1  ;;  %v4114_v21 = vrot.slane %v4113_v43, 1 }
 0x3bc   : > { %v3331_v41 = vmax.f32 %v2449_v52, %v3330_v10  ;;  %v4099_v26 = vmax.f32 %v2577_v28, %v4098_v58 }
 0x3bd   : > { %v3341_v38 = vmax.f32 %v3339_v46, %v3340_v34  ;;  %v4109_v22 = vmax.f32 %v4107_v18, %v4108_v4  ;;  %v3347_v15 = vmax.f32 %v3345_v49, %v3346_v61  ;;  %v4115_v44 = vmax.f32 %v4113_v43, %v4114_v21 }
 0x3be   : > { %v3332_v56 = vrot.slane %v3331_v41, 2  ;;  %v4100_v13 = vrot.slane %v4099_v26, 2 }
 0x3bf   : > { %v6310_v57 = vpack.c.bf16 %v3341_v38, %v3341_v38  ;;  %v6438_v1 = vpack.c.bf16 %v4109_v22, %v4109_v22  ;;  %v6311_v55 = vpack.c.bf16 %v3347_v15, %v3347_v15  ;;  %v6439_v24 = vpack.c.bf16 %v4115_v44, %v4115_v44 }
 0x3c0   : > { %v3333_v16 = vmax.f32 %v3331_v41, %v3332_v56  ;;  %v4101_v40 = vmax.f32 %v4099_v26, %v4100_v13 }
 0x3c1   : > { %v5266_v42 = vunpack.c.l.b16 %v6310_v57  ;;  %v5394_v12 = vunpack.c.l.b16 %v6438_v1  ;;  %v5267_v39 = vunpack.c.l.b16 %v6311_v55  ;;  %v5395_v9 = vunpack.c.l.b16 %v6439_v24 }
 0x3c2   : > { %v3334_v63 = vrot.slane %v3333_v16, 1  ;;  %v4102_v59 = vrot.slane %v4101_v40, 1 }
 0x3c4   : > { %v3335_v33 = vmax.f32 %v3333_v16, %v3334_v63  ;;  %v4103_v11 = vmax.f32 %v4101_v40, %v4102_v59 }
 0x3c6   : > { %v6309_v23 = vpack.c.bf16 %v3335_v33, %v3335_v33  ;;  %v6437_v14 = vpack.c.bf16 %v4103_v11, %v4103_v11 }
 0x3c8   : > { %v5265_v27 = vunpack.c.l.b16 %v6309_v23  ;;  %v5393_v35 = vunpack.c.l.b16 %v6437_v14 }
 0x3ca   : > { %v5512_v36 = vsel %vm5404_vm4, %v5265_v27, %v5511_v30  ;;  %v5624_v17 = vsel %vm5404_vm4, %v5393_v35, %v5623_v62 }
 0x3cb   : > { %v5513_v5 = vsel %vm5406_vm5, %v5266_v42, %v5512_v36  ;;  %v5625_v6 = vsel %vm5406_vm5, %v5394_v12, %v5624_v17 }
 0x3cc   : > { %v5514_v45 = vsel %vm5408_vm6, %v5267_v39, %v5513_v5  ;;  %v5626_v31 = vsel %vm5408_vm6, %v5395_v9, %v5625_v6 }
 0x3cd   : > { %v5642_v7 = vpack.c.b16 %v5514_v45, %v5514_v45  ;;  %v5658_v2 = vpack.c.b16 %v5626_v31, %v5626_v31 }
 0x3cf   : > { %5706 = vst [vmem:[%s7360_s13 + $0x3c] sm:$0xf] %v5642_v7  ;;  %5722 = vst [vmem:[%s7360_s13 + $0x7c] sm:$0xf] %v5658_v2 }
 0x3d0 PF: > { %s13_s12 = sadd.s32 1, %s7019_s12  }
 0x3d1   : > { %p10_p4 = scmp.ge.s32.totalorder %s13_s12, 4  }
 0x3d3   :  { %12 = sbr.rel (!%p10_p4) target bundleno = 1 (0x1), region = 62 }

// kernel: pig_action_3dcnn_forward.4
= control target key start
LH: loop header
LB: loop body
LE: loop exit
PB: predicated region body
PF: predicated region fallthrough
CT: control target
= control target key end

     0   :  { %s3382_s12 = smov 0   ;;  %s4077_s0 = inlined_call_operand.vmem [shape: bf16[2,256,896], index: 0, kind: input, shape index: {}]   ;;  %s4078_s1 = inlined_call_operand.vmem [shape: bf16[896,128], index: 1, kind: input, shape index: {}]   ;;  %s4079_s2 = inlined_call_operand.vmem [shape: f32[1,128], index: 2, kind: input, shape index: {}]   ;;  %s4080_s3 = inlined_call_operand.vmem [shape: bf16[2,32,128], index: 3, kind: output, shape index: {}]  }
   0x1 LB: > { %s2461_s13 = sadd.s32 4294967295, %s3360_s12   ;;  %p2465_p0 = scmp.ge.s32.totalorder %s3360_s12, 1  ;;  %s3360_s12 = sphi %s3382_s12, %s13_s12  }
   0x2   : > { %p137_p1 = scmp.lt.s32.totalorder %s3360_s12, 3 }
   0x4   : > { %p138_p2 = pnand %p2465_p0, %p137_p1 }
   0x5   : > { %v3138_v0 = vld [vmem:[%s4078_s1 + $0x40] sm:$0xff] (!%p138_p2)   ;;  %v3140_v2 = vld [vmem:[%s4078_s1 + $0x48] sm:$0xff] (!%p138_p2)   ;;  %p161_p3 = scmp.lt.s32.totalorder (!%p138_p2), %s2461_s13, 1  ;;  %v3142_v4 = vld [vmem:[%s4078_s1 + $0x50] sm:$0xff] (!%p138_p2)   ;;  %vm2359_vm0 = vcmask (!%p138_p2), 1041409   ;;  %vm2361_vm1 = vcmask (!%p138_p2), 1042434  }
   0x6   : > { %141 = sbr.rel (%p138_p2) target bundleno = 525 (0x20d), region = 32  ;;  %v3139_v1 = vld [vmem:[%s4078_s1] sm:$0xff] (!%p138_p2)   ;;  %2705 = vmatprep.subr.bf16.mxu0 (!%p138_p2), %v3138_v0  ;;  %3113 = vmatprep.subr.bf16.mxu1 (!%p138_p2), %v3138_v0  ;;  %v3141_v3 = vld [vmem:[%s4078_s1 + $0x8] sm:$0xff] (!%p138_p2)   ;;  %v3143_v5 = vld [vmem:[%s4078_s1 + $0x10] sm:$0xff] (!%p138_p2)   ;;  %vm2363_vm2 = vcmask (!%p138_p2), 1043459   ;;  %vm2365_vm3 = vcmask (!%p138_p2), 1044484  }
   0x7   : > { %2706 = vmatpush3.bf16.msra.mxu0 (!%p138_p2), %v3139_v1  ;;  %3121 = vmatpush3.bf16.msra.mxu1 (!%p138_p2), %v3139_v1  ;;  %v3144_v6 = vld [vmem:[%s4078_s1 + $0x58] sm:$0xff] (!%p138_p2)   ;;  %v3146_v8 = vld [vmem:[%s4078_s1 + $0x60] sm:$0xff] (!%p138_p2)   ;;  %v3148_v10 = vld [vmem:[%s4078_s1 + $0x68] sm:$0xff] (!%p138_p2)   ;;  %vm2367_vm4 = vcmask (!%p138_p2), 1045509   ;;  %vm2369_vm5 = vcmask (!%p138_p2), 1046534   ;;  %vm2371_vm6 = vcmask (!%p138_p2), 1047559  }
   0x8   : > { %2707 = vmatprep.subr.bf16.mxu0 (!%p138_p2), %v3140_v2  ;;  %3114 = vmatprep.subr.bf16.mxu1 (!%p138_p2), %v3140_v2  ;;  %v3145_v7 = vld [vmem:[%s4078_s1 + $0x18] sm:$0xff] (!%p138_p2)   ;;  %v3147_v9 = vld [vmem:[%s4078_s1 + $0x20] sm:$0xff] (!%p138_p2)   ;;  %v3149_v13 = vld [vmem:[%s4078_s1 + $0x28] sm:$0xff] (!%p138_p2)  }
   0x9   : > { %v3150_v14 = vld [vmem:[%s4078_s1 + $0x70] sm:$0xff] (!%p138_p2)   ;;  %v3152_v16 = vld [vmem:[%s4078_s1 + $0x78] sm:$0xff] (!%p138_p2)   ;;  %v3160_v18 = vld [vmem:[%s4078_s1 + $0xc0] sm:$0xff] (!%p138_p2)  }
   0xa   : > { %v3151_v15 = vld [vmem:[%s4078_s1 + $0x30] sm:$0xff] (!%p138_p2)   ;;  %v3153_v17 = vld [vmem:[%s4078_s1 + $0x38] sm:$0xff] (!%p138_p2)   ;;  %v3161_v21 = vld [vmem:[%s4078_s1 + $0x140] sm:$0xff] (!%p138_p2)  }
   0xb   : > { %2708 = vmatpush3.bf16.msra.mxu0 (!%p138_p2), %v3141_v3  ;;  %3122 = vmatpush3.bf16.msra.mxu1 (!%p138_p2), %v3141_v3  ;;  %v3162_v22 = vld [vmem:[%s4078_s1 + $0x80] sm:$0xff] (!%p138_p2)   ;;  %v3164_v24 = vld [vmem:[%s4078_s1 + $0xc8] sm:$0xff] (!%p138_p2)   ;;  %v3172_v32 = vld [vmem:[%s4078_s1 + $0xd0] sm:$0xff] (!%p138_p2)  }
   0xc   : > { %2709 = vmatprep.subr.bf16.mxu0 (!%p138_p2), %v3142_v4  ;;  %3115 = vmatprep.subr.bf16.mxu1 (!%p138_p2), %v3142_v4  ;;  %v3163_v23 = vld [vmem:[%s4078_s1 + $0x100] sm:$0xff] (!%p138_p2)   ;;  %v3175_v27 = vld [vmem:[%s4078_s1 + $0x148] sm:$0xff] (!%p138_p2)   ;;  %v3173_v33 = vld [vmem:[%s4078_s1 + $0x90] sm:$0xff] (!%p138_p2)  }
   0xd   : > { %s4082_s13 = smov (!%p161_p3, %s2461_s13), 1  ;;  %v3165_v28 = vld [vmem:[%s4078_s1 + $0x88] sm:$0xff]   ;;  %v3174_v34 = vld [vmem:[%s4078_s1 + $0xd8] sm:$0xff]   ;;  %v3184_v38 = vld [vmem:[%s4078_s1 + $0xe0] sm:$0xff]  }
   0xe   : > { %s3129_s28 = smul.u32 896, %s4082_s13  ;;  %v3177_v29 = vld [vmem:[%s4078_s1 + $0x108] sm:$0xff]   ;;  %v3176_v37 = vld [vmem:[%s4078_s1 + $0x98] sm:$0xff]   ;;  %v3195_v41 = vld [vmem:[%s4078_s1 + $0x150] sm:$0xff]   ;;  %s2672_s7 = sshll.u32 %s4082_s13, 4 }
   0xf   : > { %2710 = vmatpush3.bf16.msra.mxu0 %v3143_v5  ;;  %3123 = vmatpush3.bf16.msra.mxu1 %v3143_v5  ;;  %v3185_v42 = vld [vmem:[%s4078_s1 + $0xa0] sm:$0xff]   ;;  %v3186_v43 = vld [vmem:[%s4078_s1 + $0xe8] sm:$0xff]   ;;  %v3197_v44 = vld [vmem:[%s4078_s1 + $0x110] sm:$0xff]   ;;  %s3936_s10 = scalar_lea.vmem %s4080_s3, %s2672_s7 }
  0x10   : > { %2711 = vmatprep.subr.bf16.mxu0 %v3144_v6  ;;  %3116 = vmatprep.subr.bf16.mxu1 %v3144_v6  ;;  %s3423_s8 = scalar_lea.vmem %s4077_s0, %s3129_s28  ;;  %v3187_v47 = vld [vmem:[%s4078_s1 + $0xa8] sm:$0xff]   ;;  %v3194_v50 = vld [vmem:[%s4078_s1 + $0xf0] sm:$0xff]   ;;  %v3207_v52 = vld [vmem:[%s4078_s1 + $0x158] sm:$0xff]  }
  0x11   : > { %v3156_v11 = vld [vmem:[%s3423_s8 + $0x4] ss:$28 sps:$4 sm:$0xff]   ;;  %v3166_v25 = vld [vmem:[%s3423_s8 + $0x3c] ss:$28 sps:$4 sm:$0xff]   ;;  %v3178_v35 = vld [vmem:[%s3423_s8 + $0x74] ss:$28 sps:$4 sm:$0xff]  }
  0x12   : > { %v3159_v12 = vld [vmem:[%s3423_s8 + $0x2a4] ss:$28 sps:$4 sm:$0xff]   ;;  %1363 = vmatprep.mubr.bf16.mxu0 %v3156_v11  ;;  %v3168_v26 = vld [vmem:[%s3423_s8 + $0x2dc] ss:$28 sps:$4 sm:$0xff]   ;;  %v3180_v36 = vld [vmem:[%s3423_s8 + $0x314] ss:$28 sps:$4 sm:$0xff]  }
  0x13   : > { %2712 = vmatpush3.bf16.msra.mxu0 %v3145_v7  ;;  %3124 = vmatpush3.bf16.msra.mxu1 %v3145_v7  ;;  %v3154_v19 = vld [vmem:[%s3423_s8] ss:$28 sps:$4 sm:$0xff]   ;;  %v3170_v30 = vld [vmem:[%s3423_s8 + $0x38] ss:$28 sps:$4 sm:$0xff]   ;;  %v3182_v39 = vld [vmem:[%s3423_s8 + $0x70] ss:$28 sps:$4 sm:$0xff]  }
  0x14   : > { %2713 = vmatprep.subr.bf16.mxu0 %v3146_v8  ;;  %3117 = vmatprep.subr.bf16.mxu1 %v3146_v8  ;;  %v3157_v20 = vld [vmem:[%s3423_s8 + $0x2a0] ss:$28 sps:$4 sm:$0xff]   ;;  %v3171_v31 = vld [vmem:[%s3423_s8 + $0x2d8] ss:$28 sps:$4 sm:$0xff]   ;;  %v3183_v40 = vld [vmem:[%s3423_s8 + $0x310] ss:$28 sps:$4 sm:$0xff]  }
  0x15   : > { %1459 = vmatprep.mubr.bf16.mxu1 %v3159_v12  ;;  %v3188_v45 = vld [vmem:[%s3423_s8 + $0xac] ss:$28 sps:$4 sm:$0xff]   ;;  %v3196_v51 = vld [vmem:[%s4078_s1 + $0xb0] sm:$0xff]   ;;  %v3208_v53 = vld [vmem:[%s4078_s1 + $0x118] sm:$0xff]  }
  0x16   : > { %v3190_v46 = vld [vmem:[%s3423_s8 + $0x34c] ss:$28 sps:$4 sm:$0xff]   ;;  %v3200_v54 = vld [vmem:[%s3423_s8 + $0xe4] ss:$28 sps:$4 sm:$0xff]   ;;  %v3198_v55 = vld [vmem:[%s4078_s1 + $0xf8] sm:$0xff]  }
  0x17   : > { %2714 = vmatpush3.bf16.msra.mxu0 %v3147_v9  ;;  %3125 = vmatpush3.bf16.msra.mxu1 %v3147_v9  ;;  %v3192_v48 = vld [vmem:[%s3423_s8 + $0xa8] ss:$28 sps:$4 sm:$0xff]   ;;  %v3199_v57 = vld [vmem:[%s4078_s1 + $0xb8] sm:$0xff]   ;;  %v3215_v6 = vld [vmem:[%s3423_s8 + $0x154] ss:$28 sps:$4 sm:$0xff]  }
  0x18   : > { %2715 = vmatprep.subr.bf16.mxu0 %v3148_v10  ;;  %3118 = vmatprep.subr.bf16.mxu1 %v3148_v10  ;;  %v3193_v49 = vld [vmem:[%s3423_s8 + $0x348] ss:$28 sps:$4 sm:$0xff]   ;;  %v3205_v62 = vld [vmem:[%s3423_s8 + $0xe0] ss:$28 sps:$4 sm:$0xff]   ;;  %v3213_v4 = vld [vmem:[%s3423_s8 + $0x118] ss:$28 sps:$4 sm:$0xff]  }
  0x19   : > { %v3204_v56 = vld [vmem:[%s3423_s8 + $0xc] ss:$28 sps:$4 sm:$0xff]   ;;  %v3206_v58 = vld [vmem:[%s4078_s1 + $0x180] sm:$0xff]   ;;  %v3209_v63 = vld [vmem:[%s3423_s8 + $0x11c] ss:$28 sps:$4 sm:$0xff]  }
  0x1a   : > { %v3202_v59 = vld [vmem:[%s3423_s8 + $0x8] ss:$28 sps:$4 sm:$0xff]   ;;  %v3214_v5 = vld [vmem:[%s3423_s8 + $0x40] ss:$28 sps:$4 sm:$0xff]   ;;  %v3238_v7 = vld [vmem:[%s4078_s1 + $0x190] sm:$0xff]  }
  0x1b   : > { %2716 = vmatpush3.bf16.msra.mxu0 %v3149_v13  ;;  %3126 = vmatpush3.bf16.msra.mxu1 %v3149_v13  ;;  %v3221_v60 = vld [vmem:[%s4078_s1 + $0x160] sm:$0xff]   ;;  %v3223_v1 = vld [vmem:[%s4078_s1 + $0x188] sm:$0xff]   ;;  %v3217_v8 = vld [vmem:[%s3423_s8 + $0x7c] ss:$28 sps:$4 sm:$0xff]  }
  0x1c   : > { %2717 = vmatprep.subr.bf16.mxu0 %v3150_v14  ;;  %3119 = vmatprep.subr.bf16.mxu1 %v3150_v14  ;;  %v3222_v61 = vld [vmem:[%s4078_s1 + $0x120] sm:$0xff]   ;;  %v3230_v2 = vld [vmem:[%s4078_s1 + $0x168] sm:$0xff]   ;;  %v3245_v9 = vld [vmem:[%s4078_s1 + $0x170] sm:$0xff]  }
  0x1d   : > { %v3211_v0 = vld [vmem:[%s3423_s8 + $0x44] ss:$28 sps:$4 sm:$0xff]   ;;  %v3231_v3 = vld [vmem:[%s4078_s1 + $0x128] sm:$0xff]   ;;  %v3246_v10 = vld [vmem:[%s4078_s1 + $0x130] sm:$0xff]  }
  0x1e   : > { %v3219_v11 = vld [vmem:[%s3423_s8 + $0x150] ss:$28 sps:$4 sm:$0xff]   ;;  %v3220_v12 = vld [vmem:[%s3423_s8 + $0x78] ss:$28 sps:$4 sm:$0xff]  }
  0x1f   : > { %2718 = vmatpush3.bf16.msra.mxu0 %v3151_v15  ;;  %3127 = vmatpush3.bf16.msra.mxu1 %v3151_v15  ;;  %v3224_v13 = vld [vmem:[%s3423_s8 + $0x18c] ss:$28 sps:$4 sm:$0xff]   ;;  %v3226_v14 = vld [vmem:[%s3423_s8 + $0xb4] ss:$28 sps:$4 sm:$0xff]   ;;  %v3253_v15 = vld [vmem:[%s4078_s1 + $0x198] sm:$0xff]  }
  0x20   : > { %2719 = vmatprep.subr.bf16.mxu0 %v3152_v16  ;;  %3120 = vmatprep.subr.bf16.mxu1 %v3152_v16  ;;  %v3254_v16 = vld [vmem:[%s4078_s1 + $0x178] sm:$0xff]  }
  0x23   : > { %2720 = vmatpush3.bf16.msra.mxu0 %v3153_v17  ;;  %3128 = vmatpush3.bf16.msra.mxu1 %v3153_v17  ;;  %v3255_v17 = vld [vmem:[%s4078_s1 + $0x138] sm:$0xff]  }
  0x24   : > { %2817 = vmatprep.subr.bf16.mxu1 %v3160_v18  ;;  %2929 = vmatprep.subr.bf16.mxu0 %v3161_v21  ;;  %v3228_v18 = vld [vmem:[%s3423_s8 + $0x188] ss:$28 sps:$4 sm:$0xff]  }
  0x25   : > { %v3234_v21 = vld [vmem:[%s3423_s8 + $0xec] ss:$28 sps:$4 sm:$0xff]  }
  0x26   : > { %1364 = vmatmul.mubr.bf16.vlgmr.msra.gmra.mrb[0].mxu0 %v3154_v19  ;;  %1460 = vmatmul.mubr.bf16.vlgmr.msra.gmra.mrb[0].mxu1 %v3157_v20  ;;  %v3229_v19 = vld [vmem:[%s3423_s8 + $0xb0] ss:$28 sps:$4 sm:$0xff]   ;;  %v3232_v20 = vld [vmem:[%s3423_s8 + $0x1c4] ss:$28 sps:$4 sm:$0xff]  }
  0x27   : > { %2818 = vmatpush3.bf16.msra.mxu1 %v3162_v22  ;;  %2930 = vmatpush3.bf16.msra.mxu0 %v3163_v23  ;;  %v3268_v22 = vld [vmem:[%s4078_s1 + $0x1a0] sm:$0xff]  }
  0x28   : > { %2819 = vmatprep.subr.bf16.mxu1 %v3164_v24  ;;  %1371 = vmatprep.mubr.bf16.mxu0 %v3166_v25  ;;  %v3236_v23 = vld [vmem:[%s3423_s8 + $0x1c0] ss:$28 sps:$4 sm:$0xff]   ;;  %v3237_v24 = vld [vmem:[%s3423_s8 + $0xe8] ss:$28 sps:$4 sm:$0xff]  }
  0x29   : > { %1467 = vmatprep.mubr.bf16.mxu1 %v3168_v26  ;;  %2931 = vmatprep.subr.bf16.mxu0 %v3175_v27  ;;  %v3281_v25 = vld [vmem:[%s4078_s1 + $0x1a8] sm:$0xff]   ;;  %v3239_v26 = vld [vmem:[%s3423_s8 + $0x1fc] ss:$28 sps:$4 sm:$0xff]   ;;  %v3241_v27 = vld [vmem:[%s3423_s8 + $0x124] ss:$28 sps:$4 sm:$0xff]  }
  0x2b   : > { %2820 = vmatpush3.bf16.msra.mxu1 %v3165_v28  ;;  %2932 = vmatpush3.bf16.msra.mxu0 %v3177_v29  ;;  %v3294_v28 = vld [vmem:[%s4078_s1 + $0x1b0] sm:$0xff]  }
  0x2c   : > { %2821 = vmatprep.subr.bf16.mxu1 %v3172_v32  ;;  %2933 = vmatprep.subr.bf16.mxu0 %v3195_v41  ;;  %v3243_v29 = vld [vmem:[%s3423_s8 + $0x1f8] ss:$28 sps:$4 sm:$0xff]  }
  0x2d   : > { %v3249_v32 = vld [vmem:[%s3423_s8 + $0x15c] ss:$28 sps:$4 sm:$0xff]   ;;  %v3266_v41 = vld [vmem:[%s3423_s8 + $0x14] ss:$28 sps:$4 sm:$0xff]  }
  0x2e   : > { %1372 = vmatmul.mubr.bf16.gmra.mrb[4].mxu0 %v3170_v30  ;;  %1468 = vmatmul.mubr.bf16.gmra.mrb[4].mxu1 %v3171_v31  ;;  %v3244_v30 = vld [vmem:[%s3423_s8 + $0x120] ss:$28 sps:$4 sm:$0xff]   ;;  %v3247_v31 = vld [vmem:[%s3423_s8 + $0x234] ss:$28 sps:$4 sm:$0xff]  }
  0x2f   : > { %2822 = vmatpush3.bf16.msra.mxu1 %v3173_v33  ;;  %1379 = vmatprep.mubr.bf16.mxu0 %v3178_v35  ;;  %v3307_v33 = vld [vmem:[%s4078_s1 + $0x1b8] sm:$0xff]  }
  0x30   : > { %2823 = vmatprep.subr.bf16.mxu1 %v3174_v34  ;;  %1475 = vmatprep.mubr.bf16.mxu1 %v3180_v36  ;;  %v3251_v34 = vld [vmem:[%s3423_s8 + $0x230] ss:$28 sps:$4 sm:$0xff]   ;;  %v3252_v35 = vld [vmem:[%s3423_s8 + $0x158] ss:$28 sps:$4 sm:$0xff]  }
  0x31   : > { %2934 = vmatpush3.bf16.msra.mxu0 %v3197_v44  ;;  %v3256_v36 = vld [vmem:[%s3423_s8 + $0x26c] ss:$28 sps:$4 sm:$0xff]   ;;  %v3269_v44 = vld [vmem:[%s3423_s8 + $0x204] ss:$28 sps:$4 sm:$0xff]  }
  0x32   : > { %2935 = vmatprep.subr.bf16.mxu0 %v3207_v52  ;;  %v3282_v52 = vld [vmem:[%s3423_s8 + $0x274] ss:$28 sps:$4 sm:$0xff]  }
  0x33   : > { %2824 = vmatpush3.bf16.msra.mxu1 %v3176_v37  ;;  %v3258_v37 = vld [vmem:[%s3423_s8 + $0x194] ss:$28 sps:$4 sm:$0xff]  }
  0x34   : > { %2825 = vmatprep.subr.bf16.mxu1 %v3184_v38  ;;  %v3260_v38 = vld [vmem:[%s3423_s8 + $0x268] ss:$28 sps:$4 sm:$0xff]  }
  0x35   : > { %2936 = vmatpush3.bf16.msra.mxu0 %v3208_v53  ;;  %v3284_v53 = vld [vmem:[%s3423_s8 + $0xbc] ss:$28 sps:$4 sm:$0xff]  }
  0x36   : > { %1380 = vmatmul.mubr.bf16.gmra.mrb[8].mxu0 %v3182_v39  ;;  %1476 = vmatmul.mubr.bf16.gmra.mrb[8].mxu1 %v3183_v40  ;;  %v3261_v39 = vld [vmem:[%s3423_s8 + $0x190] ss:$28 sps:$4 sm:$0xff]  }
  0x37   : > { %2826 = vmatpush3.bf16.msra.mxu1 %v3185_v42  ;;  %1387 = vmatprep.mubr.bf16.mxu0 %v3188_v45  ;;  %v3262_v40 = vld [vmem:[%s3423_s8 + $0x1cc] ss:$28 sps:$4 sm:$0xff]  }
  0x38   : > { %2827 = vmatprep.subr.bf16.mxu1 %v3186_v43  ;;  %1483 = vmatprep.mubr.bf16.mxu1 %v3190_v46  ;;  %v3264_v42 = vld [vmem:[%s3423_s8 + $0x10] ss:$28 sps:$4 sm:$0xff]   ;;  %v3267_v43 = vld [vmem:[%s3423_s8 + $0x1c8] ss:$28 sps:$4 sm:$0xff]   ;;  %v3273_v46 = vld [vmem:[%s3423_s8 + $0x200] ss:$28 sps:$4 sm:$0xff]  }
  0x39   : > { %2937 = vmatprep.subr.bf16.mxu0 %v3221_v60  ;;  %v3271_v45 = vld [vmem:[%s3423_s8 + $0x4c] ss:$28 sps:$4 sm:$0xff]   ;;  %v3295_v60 = vld [vmem:[%s3423_s8 + $0x2e4] ss:$28 sps:$4 sm:$0xff]  }
  0x3a   : > { %2938 = vmatpush3.bf16.msra.mxu0 %v3222_v61  ;;  %v3297_v61 = vld [vmem:[%s3423_s8 + $0x12c] ss:$28 sps:$4 sm:$0xff]  }
  0x3b   : > { %2828 = vmatpush3.bf16.msra.mxu1 %v3187_v47  ;;  %2939 = vmatprep.subr.bf16.mxu0 %v3230_v2  ;;  %v3274_v47 = vld [vmem:[%s3423_s8 + $0x48] ss:$28 sps:$4 sm:$0xff]   ;;  %v3305_v2 = vld [vmem:[%s3423_s8 + $0x318] ss:$28 sps:$4 sm:$0xff]  }
  0x3c   : > { %2829 = vmatprep.subr.bf16.mxu1 %v3194_v50  ;;  %v3279_v50 = vld [vmem:[%s3423_s8 + $0x238] ss:$28 sps:$4 sm:$0xff]  }
  0x3e   : > { %1388 = vmatmul.mubr.bf16.gmra.mrb[12].mxu0 %v3192_v48  ;;  %1484 = vmatmul.mubr.bf16.gmra.mrb[12].mxu1 %v3193_v49  ;;  %v3275_v48 = vld [vmem:[%s3423_s8 + $0x23c] ss:$28 sps:$4 sm:$0xff]   ;;  %v3277_v49 = vld [vmem:[%s3423_s8 + $0x84] ss:$28 sps:$4 sm:$0xff]  }
  0x3f   : > { %2830 = vmatpush3.bf16.msra.mxu1 %v3196_v51  ;;  %1395 = vmatprep.mubr.bf16.mxu0 %v3200_v54  ;;  %v3280_v51 = vld [vmem:[%s3423_s8 + $0x80] ss:$28 sps:$4 sm:$0xff]   ;;  %v3286_v54 = vld [vmem:[%s3423_s8 + $0x270] ss:$28 sps:$4 sm:$0xff]  }
  0x40   : > { %2831 = vmatprep.subr.bf16.mxu1 %v3198_v55  ;;  %1524 = vmatprep.mubr.bf16.mxu1 %v3204_v56  ;;  %v3287_v55 = vld [vmem:[%s3423_s8 + $0xb8] ss:$28 sps:$4 sm:$0xff]   ;;  %v3288_v56 = vld [vmem:[%s3423_s8 + $0x2ac] ss:$28 sps:$4 sm:$0xff]  }
  0x41   : > { %2940 = vmatpush3.bf16.msra.mxu0 %v3231_v3  ;;  %v3306_v3 = vld [vmem:[%s3423_s8 + $0x160] ss:$28 sps:$4 sm:$0xff]  }
  0x42   : > { %2941 = vmatprep.subr.bf16.mxu0 %v3245_v9  ;;  %v3316_v9 = vld [vmem:[%s3423_s8 + $0x18] ss:$28 sps:$4 sm:$0xff]  }
  0x43   : > { %2832 = vmatpush3.bf16.msra.mxu1 %v3199_v57  ;;  %v3290_v57 = vld [vmem:[%s3423_s8 + $0xf4] ss:$28 sps:$4 sm:$0xff]  }
  0x44   : > { %3065 = vmatprep.subr.bf16.mxu1 %v3206_v58 }
  0x45   : > { %2942 = vmatpush3.bf16.msra.mxu0 %v3246_v10  ;;  %v3317_v10 = vld [vmem:[%s3423_s8 + $0x1d0] ss:$28 sps:$4 sm:$0xff]  }
  0x46   : > { %1396 = vmatmul.mubr.bf16.gmra.mrb[16].mxu0 %v3205_v62  ;;  %1525 = vmatmul.mubr.bf16.vlgmr.msra.gmra.mrb[16].mxu1 %v3202_v59  ;;  %v3293_v59 = vld [vmem:[%s3423_s8 + $0xf0] ss:$28 sps:$4 sm:$0xff]   ;;  %v3299_v62 = vld [vmem:[%s3423_s8 + $0x2e0] ss:$28 sps:$4 sm:$0xff]  }
  0x47   : > { %3066 = vmatpush3.bf16.msra.mxu1 %v3206_v58  ;;  %1403 = vmatprep.mubr.bf16.mxu0 %v3209_v63  ;;  %v3292_v58 = vld [vmem:[%s3423_s8 + $0x2a8] ss:$28 sps:$4 sm:$0xff]  }
  0x48   : > { %1532 = vmatprep.mubr.bf16.mxu1 %v3211_v0  ;;  %3067 = vmatprep.subr.bf16.mxu1 %v3223_v1  ;;  %v3300_v63 = vld [vmem:[%s3423_s8 + $0x128] ss:$28 sps:$4 sm:$0xff]   ;;  %v3301_v0 = vld [vmem:[%s3423_s8 + $0x31c] ss:$28 sps:$4 sm:$0xff]  }
  0x49   : > { %2943 = vmatprep.subr.bf16.mxu0 %v3254_v16  ;;  %v3324_v16 = vld [vmem:[%s3423_s8 + $0x244] ss:$28 sps:$4 sm:$0xff]  }
  0x4a   : > { %2944 = vmatpush3.bf16.msra.mxu0 %v3255_v17  ;;  %v3326_v17 = vld [vmem:[%s3423_s8 + $0xf8] ss:$28 sps:$4 sm:$0xff]  }
  0x4b   : > { %3068 = vmatpush3.bf16.msra.mxu1 %v3223_v1  ;;  %v3303_v1 = vld [vmem:[%s3423_s8 + $0x164] ss:$28 sps:$4 sm:$0xff]  }
  0x4c   : > { %3069 = vmatprep.subr.bf16.mxu1 %v3238_v7 }
  0x4e   : > { %1404 = vmatmul.mubr.bf16.gmra.mrb[20].mxu0 %v3213_v4  ;;  %1533 = vmatmul.mubr.bf16.gmra.mrb[20].mxu1 %v3214_v5  ;;  %v3308_v4 = vld [vmem:[%s3423_s8 + $0x354] ss:$28 sps:$4 sm:$0xff]   ;;  %v3310_v5 = vld [vmem:[%s3423_s8 + $0x19c] ss:$28 sps:$4 sm:$0xff]  }
  0x4f   : > { %1411 = vmatprep.mubr.bf16.mxu0 %v3215_v6  ;;  %1540 = vmatprep.mubr.bf16.mxu1 %v3217_v8  ;;  %v3312_v6 = vld [vmem:[%s3423_s8 + $0x350] ss:$28 sps:$4 sm:$0xff]  }
  0x50   : > { %3070 = vmatpush3.bf16.msra.mxu1 %v3238_v7  ;;  %v3313_v7 = vld [vmem:[%s3423_s8 + $0x198] ss:$28 sps:$4 sm:$0xff]  }
  0x51   : > { %3071 = vmatprep.subr.bf16.mxu1 %v3253_v15  ;;  %v3314_v8 = vld [vmem:[%s3423_s8 + $0x1d4] ss:$28 sps:$4 sm:$0xff]  }
  0x54   : > { %3072 = vmatpush3.bf16.msra.mxu1 %v3253_v15  ;;  %v3323_v15 = vld [vmem:[%s3423_s8 + $0xc0] ss:$28 sps:$4 sm:$0xff]  }
  0x55   : > { %3073 = vmatprep.subr.bf16.mxu1 %v3268_v22 }
  0x56   : > { %1412 = vmatmul.mubr.bf16.gmra.mrb[24].mxu0 %v3219_v11  ;;  %1541 = vmatmul.mubr.bf16.gmra.mrb[24].mxu1 %v3220_v12  ;;  %v3318_v11 = vld [vmem:[%s3423_s8 + $0x50] ss:$28 sps:$4 sm:$0xff]  }
  0x57   : > { %1419 = vmatprep.mubr.bf16.mxu0 %v3224_v13  ;;  %1548 = vmatprep.mubr.bf16.mxu1 %v3226_v14  ;;  %v3319_v12 = vld [vmem:[%s3423_s8 + $0x20c] ss:$28 sps:$4 sm:$0xff]  }
  0x58   : > { %3074 = vmatpush3.bf16.msra.mxu1 %v3268_v22  ;;  %v3321_v13 = vld [vmem:[%s3423_s8 + $0x88] ss:$28 sps:$4 sm:$0xff]   ;;  %v3332_v22 = vld [vmem:[%s3423_s8 + $0x278] ss:$28 sps:$4 sm:$0xff]  }
  0x59   : > { %3075 = vmatprep.subr.bf16.mxu1 %v3281_v25  ;;  %v3322_v14 = vld [vmem:[%s3423_s8 + $0x208] ss:$28 sps:$4 sm:$0xff]  }
  0x5c   : > { %3076 = vmatpush3.bf16.msra.mxu1 %v3281_v25  ;;  %v3336_v25 = vld [vmem:[%s3423_s8 + $0x1d8] ss:$28 sps:$4 sm:$0xff]  }
  0x5d   : > { %3077 = vmatprep.subr.bf16.mxu1 %v3294_v28 }
  0x5e   : > { %1420 = vmatmul.mubr.bf16.gmra.mrb[28].mxu0 %v3228_v18  ;;  %1549 = vmatmul.mubr.bf16.gmra.mrb[28].mxu1 %v3229_v19  ;;  %v3327_v18 = vld [vmem:[%s3423_s8 + $0x240] ss:$28 sps:$4 sm:$0xff]   ;;  %v3328_v19 = vld [vmem:[%s3423_s8 + $0x130] ss:$28 sps:$4 sm:$0xff]  }
  0x5f   : > { %1427 = vmatprep.mubr.bf16.mxu0 %v3232_v20  ;;  %1556 = vmatprep.mubr.bf16.mxu1 %v3234_v21  ;;  %v3329_v20 = vld [vmem:[%s3423_s8 + $0x27c] ss:$28 sps:$4 sm:$0xff]   ;;  %v3331_v21 = vld [vmem:[%s3423_s8 + $0x168] ss:$28 sps:$4 sm:$0xff]  }
  0x60   : > { %3078 = vmatpush3.bf16.msra.mxu1 %v3294_v28  ;;  %v3339_v28 = vld [vmem:[%s3423_s8 + $0x2ec] ss:$28 sps:$4 sm:$0xff]  }
  0x61   : > { %3079 = vmatprep.subr.bf16.mxu1 %v3307_v33 }
  0x64   : > { %3080 = vmatpush3.bf16.msra.mxu1 %v3307_v33  ;;  %v3346_v33 = vld [vmem:[%s3423_s8 + $0x2b8] ss:$28 sps:$4 sm:$0xff]  }
  0x66   : > { %1428 = vmatmul.mubr.bf16.gmra.mrb[32].mxu0 %v3236_v23  ;;  %1557 = vmatmul.mubr.bf16.gmra.mrb[32].mxu1 %v3237_v24  ;;  %v3333_v23 = vld [vmem:[%s3423_s8 + $0x1a0] ss:$28 sps:$4 sm:$0xff]   ;;  %v3334_v24 = vld [vmem:[%s3423_s8 + $0x2b4] ss:$28 sps:$4 sm:$0xff]  }
  0x67   : > { %1435 = vmatprep.mubr.bf16.mxu0 %v3239_v26  ;;  %1564 = vmatprep.mubr.bf16.mxu1 %v3241_v27  ;;  %v3337_v26 = vld [vmem:[%s3423_s8 + $0x2b0] ss:$28 sps:$4 sm:$0xff]  }
  0x68   : > { %v3338_v27 = vld [vmem:[%s3423_s8 + $0x210] ss:$28 sps:$4 sm:$0xff]  }
  0x6e   : > { %1436 = vmatmul.mubr.bf16.gmra.mrb[36].mxu0 %v3243_v29  ;;  %1565 = vmatmul.mubr.bf16.gmra.mrb[36].mxu1 %v3244_v30  ;;  %v3341_v29 = vld [vmem:[%s3423_s8 + $0x248] ss:$28 sps:$4 sm:$0xff]  }
  0x6f   : > { %1443 = vmatprep.mubr.bf16.mxu0 %v3247_v31  ;;  %1572 = vmatprep.mubr.bf16.mxu1 %v3249_v32  ;;  %v3342_v30 = vld [vmem:[%s3423_s8 + $0x2e8] ss:$28 sps:$4 sm:$0xff]   ;;  %v3343_v31 = vld [vmem:[%s3423_s8 + $0x280] ss:$28 sps:$4 sm:$0xff]  }
  0x70   : > { %v3344_v32 = vld [vmem:[%s3423_s8 + $0x324] ss:$28 sps:$4 sm:$0xff]  }
  0x76   : > { %1444 = vmatmul.mubr.bf16.gmra.mrb[40].mxu0 %v3251_v34  ;;  %1573 = vmatmul.mubr.bf16.gmra.mrb[40].mxu1 %v3252_v35  ;;  %v3347_v34 = vld [vmem:[%s3423_s8 + $0x320] ss:$28 sps:$4 sm:$0xff]   ;;  %v3348_v35 = vld [vmem:[%s3423_s8 + $0x2f0] ss:$28 sps:$4 sm:$0xff]  }
  0x77   : > { %1451 = vmatprep.mubr.bf16.mxu0 %v3256_v36  ;;  %1580 = vmatprep.mubr.bf16.mxu1 %v3258_v37  ;;  %v3349_v36 = vld [vmem:[%s3423_s8 + $0x35c] ss:$28 sps:$4 sm:$0xff]   ;;  %v3351_v37 = vld [vmem:[%s3423_s8 + $0x328] ss:$28 sps:$4 sm:$0xff]  }
  0x7e   : > { %1452 = vmatmul.mubr.bf16.gmra.mrb[44].mxu0 %v3260_v38  ;;  %1581 = vmatmul.mubr.bf16.gmra.mrb[44].mxu1 %v3261_v39 }
  0x7f   : > { %1588 = vmatprep.mubr.bf16.mxu1 %v3262_v40  ;;  %1685 = vmatprep.mubr.bf16.mxu0 %v3266_v41 }
  0x86   : > { %1589 = vmatmul.mubr.bf16.gmra.mrb[48].mxu1 %v3267_v43  ;;  %1686 = vmatmul.mubr.bf16.vlgmr.msra.gmra.mrb[48].mxu0 %v3264_v42  ;;  %v3352_v42 = vld [vmem:[%s3423_s8 + $0x358] ss:$28 sps:$4 sm:$0xff]   ;;  %v3353_v43 = vld [vmem:[%s3423_s8 + $0x360] ss:$28 sps:$4 sm:$0xff]  }
  0x87   : > { %1596 = vmatprep.mubr.bf16.mxu1 %v3269_v44  ;;  %1693 = vmatprep.mubr.bf16.mxu0 %v3271_v45 }
  0x8e   : > { %1597 = vmatmul.mubr.bf16.gmra.mrb[52].mxu1 %v3273_v46  ;;  %1694 = vmatmul.mubr.bf16.gmra.mrb[52].mxu0 %v3274_v47 }
  0x8f   : > { %1604 = vmatprep.mubr.bf16.mxu1 %v3275_v48  ;;  %1701 = vmatprep.mubr.bf16.mxu0 %v3277_v49 }
  0x96   : > { %1605 = vmatmul.mubr.bf16.gmra.mrb[56].mxu1 %v3279_v50  ;;  %1702 = vmatmul.mubr.bf16.gmra.mrb[56].mxu0 %v3280_v51 }
  0x97   : > { %1612 = vmatprep.mubr.bf16.mxu1 %v3282_v52  ;;  %1709 = vmatprep.mubr.bf16.mxu0 %v3284_v53 }
  0x9e   : > { %1613 = vmatmul.mubr.bf16.gmra.mrb[60].mxu1 %v3286_v54  ;;  %1710 = vmatmul.mubr.bf16.gmra.mrb[60].mxu0 %v3287_v55 }
  0x9f   : > { %1620 = vmatprep.mubr.bf16.mxu1 %v3288_v56  ;;  %1717 = vmatprep.mubr.bf16.mxu0 %v3290_v57 }
  0xa6   : > { %1621 = vmatmul.mubr.bf16.gmra.mrb[64].mxu1 %v3292_v58  ;;  %1718 = vmatmul.mubr.bf16.gmra.mrb[64].mxu0 %v3293_v59 }
  0xa7   : > { %1628 = vmatprep.mubr.bf16.mxu1 %v3295_v60  ;;  %1725 = vmatprep.mubr.bf16.mxu0 %v3297_v61 }
  0xae   : > { %1629 = vmatmul.mubr.bf16.gmra.mrb[68].mxu1 %v3299_v62  ;;  %1726 = vmatmul.mubr.bf16.gmra.mrb[68].mxu0 %v3300_v63 }
  0xaf   : > { %1636 = vmatprep.mubr.bf16.mxu1 %v3301_v0  ;;  %1733 = vmatprep.mubr.bf16.mxu0 %v3303_v1 }
  0xb6   : > { %1637 = vmatmul.mubr.bf16.gmra.mrb[72].mxu1 %v3305_v2  ;;  %1734 = vmatmul.mubr.bf16.gmra.mrb[72].mxu0 %v3306_v3 }
  0xb7   : > { %1644 = vmatprep.mubr.bf16.mxu1 %v3308_v4  ;;  %1741 = vmatprep.mubr.bf16.mxu0 %v3310_v5 }
  0xbe   : > { %1645 = vmatmul.mubr.bf16.gmra.mrb[76].mxu1 %v3312_v6  ;;  %1742 = vmatmul.mubr.bf16.gmra.mrb[76].mxu0 %v3313_v7 }
  0xbf   : > { %1749 = vmatprep.mubr.bf16.mxu0 %v3314_v8  ;;  %3081 = vmatprep.mubr.bf16.mxu1 %v3316_v9 }
  0xc6   : > { %1750 = vmatmul.mubr.bf16.gmra.mrb[80].mxu0 %v3317_v10  ;;  %3082 = vmatmul.mubr.bf16.vlgmr.msra.gmra.mrb[80].mxu1 %v3318_v11 }
  0xc7   : > { %1757 = vmatprep.mubr.bf16.mxu0 %v3319_v12  ;;  %3085 = vmatprep.mubr.bf16.mxu1 %v3321_v13 }
  0xce   : > { %1758 = vmatmul.mubr.bf16.gmra.mrb[84].mxu0 %v3322_v14  ;;  %3086 = vmatmul.mubr.bf16.gmra.mrb[84].mxu1 %v3323_v15 }
  0xcf   : > { %1765 = vmatprep.mubr.bf16.mxu0 %v3324_v16  ;;  %3089 = vmatprep.mubr.bf16.mxu1 %v3326_v17 }
  0xd6   : > { %1766 = vmatmul.mubr.bf16.gmra.mrb[88].mxu0 %v3327_v18  ;;  %3090 = vmatmul.mubr.bf16.gmra.mrb[88].mxu1 %v3328_v19 }
  0xd7   : > { %1773 = vmatprep.mubr.bf16.mxu0 %v3329_v20  ;;  %3093 = vmatprep.mubr.bf16.mxu1 %v3331_v21 }
  0xde   : > { %1774 = vmatmul.mubr.bf16.gmra.mrb[92].mxu0 %v3332_v22  ;;  %3094 = vmatmul.mubr.bf16.gmra.mrb[92].mxu1 %v3333_v23 }
  0xdf   : > { %1781 = vmatprep.mubr.bf16.mxu0 %v3334_v24  ;;  %3097 = vmatprep.mubr.bf16.mxu1 %v3336_v25  ;;  %v3697_v24 = vld [vmem:[%s4079_s2] ss:$0 sm:$0xff] }
  0xe6   : > { %1782 = vmatmul.mubr.bf16.gmra.mrb[96].mxu0 %v3337_v26  ;;  %3098 = vmatmul.mubr.bf16.gmra.mrb[96].mxu1 %v3338_v27 }
  0xe7   : > { %1789 = vmatprep.mubr.bf16.mxu0 %v3339_v28  ;;  %3101 = vmatprep.mubr.bf16.mxu1 %v3341_v29 }
  0xee   : > { %1790 = vmatmul.mubr.bf16.gmra.mrb[100].mxu0 %v3342_v30  ;;  %3102 = vmatmul.mubr.bf16.gmra.mrb[100].mxu1 %v3343_v31 }
  0xef   : > { %1797 = vmatprep.mubr.bf16.mxu0 %v3344_v32  ;;  %3105 = vmatprep.mubr.bf16.mxu1 %v3346_v33 }
  0xf6   : > { %1798 = vmatmul.mubr.bf16.gmra.mrb[104].mxu0 %v3347_v34  ;;  %3106 = vmatmul.mubr.bf16.gmra.mrb[104].mxu1 %v3348_v35 }
  0xf7   : > { %1805 = vmatprep.mubr.bf16.mxu0 %v3349_v36  ;;  %3109 = vmatprep.mubr.bf16.mxu1 %v3351_v37 }
  0xf9   : > { %v2721_v38 = vpop.f32.mrb[0].mxu0  ;;  %v2793_v39 = vpop.f32.mrb[0].mxu1 }
  0xfa   : > { %v2722_v40 = vpop.f32.mrb[1].mxu0  ;;  %v2794_v41 = vpop.f32.mrb[1].mxu1 }
  0xfb   : > { %v2723_v44 = vadd.f32 %v2722_v40, %v2721_v38  ;;  %v3678_v45 = vadd.f32 %v2794_v41, %v2793_v39  ;;  %v2724_v46 = vpop.f32.mrb[2].mxu0  ;;  %v2796_v47 = vpop.f32.mrb[2].mxu1 }
  0xfc   : > { %v2725_v48 = vpop.f32.mrb[3].mxu0  ;;  %v2797_v49 = vpop.f32.mrb[3].mxu1 }
  0xfd   : > { %v2726_v50 = vadd.f32 %v2725_v48, %v2724_v46  ;;  %v3680_v51 = vadd.f32 %v2797_v49, %v2796_v47  ;;  %v1366_v29 = vadd.f32 %v2723_v44, %v3697_v24 }
  0xfe   : > { %1806 = vmatmul.mubr.bf16.gmra.mrb[108].mxu0 %v3352_v42  ;;  %3110 = vmatmul.mubr.bf16.gmra.mrb[108].mxu1 %v3353_v43 }
  0xff   : > { %v1369_v36 = vadd.f32 %v2726_v50, %v3697_v24 }
 0x101   : > { %v2727_v52 = vpop.f32.mrb[4].mxu0  ;;  %v2799_v53 = vpop.f32.mrb[4].mxu1 }
 0x102   : > { %v2728_v54 = vpop.f32.mrb[5].mxu0  ;;  %v2800_v55 = vpop.f32.mrb[5].mxu1 }
 0x103   : > { %v2729_v56 = vadd.f32 %v2728_v54, %v2727_v52  ;;  %v3682_v57 = vadd.f32 %v2800_v55, %v2799_v53  ;;  %v2730_v58 = vpop.f32.mrb[6].mxu0  ;;  %v2802_v59 = vpop.f32.mrb[6].mxu1 }
 0x104   : > { %v2731_v60 = vpop.f32.mrb[7].mxu0  ;;  %v2803_v61 = vpop.f32.mrb[7].mxu1 }
 0x105   : > { %v2732_v62 = vadd.f32 %v2731_v60, %v2730_v58  ;;  %v3684_v63 = vadd.f32 %v2803_v61, %v2802_v59  ;;  %v1374_v44 = vadd.f32 %v2729_v56, %v3697_v24 }
 0x107   : > { %v1377_v50 = vadd.f32 %v2732_v62, %v3697_v24 }
 0x109   : > { %v2733_v0 = vpop.f32.mrb[8].mxu0  ;;  %v2805_v1 = vpop.f32.mrb[8].mxu1 }
 0x10a   : > { %v2734_v2 = vpop.f32.mrb[9].mxu0  ;;  %v2806_v3 = vpop.f32.mrb[9].mxu1 }
 0x10b   : > { %v2735_v4 = vadd.f32 %v2734_v2, %v2733_v0  ;;  %v3686_v5 = vadd.f32 %v2806_v3, %v2805_v1  ;;  %v2736_v6 = vpop.f32.mrb[10].mxu0  ;;  %v2808_v7 = vpop.f32.mrb[10].mxu1 }
 0x10c   : > { %v2737_v8 = vpop.f32.mrb[11].mxu0  ;;  %v2809_v9 = vpop.f32.mrb[11].mxu1 }
 0x10d   : > { %v2738_v10 = vadd.f32 %v2737_v8, %v2736_v6  ;;  %v3688_v11 = vadd.f32 %v2809_v9, %v2808_v7  ;;  %v1382_v56 = vadd.f32 %v2735_v4, %v3697_v24 }
 0x10f   : > { %v1385_v62 = vadd.f32 %v2738_v10, %v3697_v24 }
 0x111   : > { %v2739_v12 = vpop.f32.mrb[12].mxu0  ;;  %v2811_v13 = vpop.f32.mrb[12].mxu1 }
 0x112   : > { %v2740_v14 = vpop.f32.mrb[13].mxu0  ;;  %v2812_v15 = vpop.f32.mrb[13].mxu1 }
 0x113   : > { %v2741_v16 = vadd.f32 %v2740_v14, %v2739_v12  ;;  %v3690_v17 = vadd.f32 %v2812_v15, %v2811_v13  ;;  %v2742_v18 = vpop.f32.mrb[14].mxu0  ;;  %v2814_v19 = vpop.f32.mrb[14].mxu1 }
 0x114   : > { %v2743_v20 = vpop.f32.mrb[15].mxu0  ;;  %v2815_v21 = vpop.f32.mrb[15].mxu1 }
 0x115   : > { %v2744_v22 = vadd.f32 %v2743_v20, %v2742_v18  ;;  %v3692_v23 = vadd.f32 %v2815_v21, %v2814_v19  ;;  %v1390_v4 = vadd.f32 %v2741_v16, %v3697_v24 }
 0x117   : > { %v1393_v10 = vadd.f32 %v2744_v22, %v3697_v24 }
 0x119   : > { %v2745_v25 = vpop.f32.mrb[16].mxu0  ;;  %v2833_v26 = vpop.f32.mrb[16].mxu1 }
 0x11a   : > { %v2746_v27 = vpop.f32.mrb[17].mxu0  ;;  %v2834_v28 = vpop.f32.mrb[17].mxu1 }
 0x11b   : > { %v3700_v30 = vadd.f32 %v2746_v27, %v2745_v25  ;;  %v2835_v31 = vadd.f32 %v2834_v28, %v2833_v26  ;;  %v2748_v32 = vpop.f32.mrb[18].mxu0  ;;  %v2836_v33 = vpop.f32.mrb[18].mxu1 }
 0x11c   : > { %v2749_v34 = vpop.f32.mrb[19].mxu0  ;;  %v2837_v35 = vpop.f32.mrb[19].mxu1 }
 0x11d   : > { %v3703_v37 = vadd.f32 %v2835_v31, %v1366_v29  ;;  %v2750_v38 = vadd.f32 %v2749_v34, %v2748_v32  ;;  %v2838_v39 = vadd.f32 %v2837_v35, %v2836_v33  ;;  %v1398_v16 = vadd.f32 %v3700_v30, %v3697_v24 }
 0x11f   : > { %v3705_v40 = vadd.f32 %v2838_v39, %v1369_v36 }
 0x121   : > { %v2751_v41 = vpop.f32.mrb[20].mxu0  ;;  %v2839_v42 = vpop.f32.mrb[20].mxu1 }
 0x122   : > { %v2752_v43 = vpop.f32.mrb[21].mxu0  ;;  %v2840_v46 = vpop.f32.mrb[21].mxu1 }
 0x123   : > { %v3708_v47 = vadd.f32 %v2752_v43, %v2751_v41  ;;  %v2841_v48 = vadd.f32 %v2840_v46, %v2839_v42  ;;  %v2754_v49 = vpop.f32.mrb[22].mxu0  ;;  %v2842_v52 = vpop.f32.mrb[22].mxu1 }
 0x124   : > { %v2755_v53 = vpop.f32.mrb[23].mxu0  ;;  %v2843_v54 = vpop.f32.mrb[23].mxu1 }
 0x125   : > { %v3711_v55 = vadd.f32 %v2841_v48, %v1374_v44  ;;  %v2756_v58 = vadd.f32 %v2755_v53, %v2754_v49  ;;  %v2844_v59 = vadd.f32 %v2843_v54, %v2842_v52  ;;  %v1401_v53 = vadd.f32 %v2750_v38, %v3697_v24 }
 0x126   : > { %v1406_v30 = vadd.f32 %v3708_v47, %v3697_v24 }
 0x127   : > { %v3713_v60 = vadd.f32 %v2844_v59, %v1377_v50 }
 0x129   : > { %v2757_v61 = vpop.f32.mrb[24].mxu0  ;;  %v2845_v0 = vpop.f32.mrb[24].mxu1 }
 0x12a   : > { %v2758_v1 = vpop.f32.mrb[25].mxu0  ;;  %v2846_v2 = vpop.f32.mrb[25].mxu1 }
 0x12b   : > { %v3716_v3 = vadd.f32 %v2758_v1, %v2757_v61  ;;  %v2847_v6 = vadd.f32 %v2846_v2, %v2845_v0  ;;  %v2760_v7 = vpop.f32.mrb[26].mxu0  ;;  %v2848_v8 = vpop.f32.mrb[26].mxu1 }
 0x12c   : > { %v2761_v9 = vpop.f32.mrb[27].mxu0  ;;  %v2849_v12 = vpop.f32.mrb[27].mxu1 }
 0x12d   : > { %v3719_v13 = vadd.f32 %v2847_v6, %v1382_v56  ;;  %v2762_v14 = vadd.f32 %v2761_v9, %v2760_v7  ;;  %v2850_v15 = vadd.f32 %v2849_v12, %v2848_v8  ;;  %v1414_v47 = vadd.f32 %v3716_v3, %v3697_v24 }
 0x12f   : > { %v3721_v18 = vadd.f32 %v2850_v15, %v1385_v62  ;;  %v1409_v62 = vadd.f32 %v2756_v58, %v3697_v24 }
 0x131   : > { %v2763_v19 = vpop.f32.mrb[28].mxu0  ;;  %v2851_v20 = vpop.f32.mrb[28].mxu1 }
 0x132   : > { %v2764_v21 = vpop.f32.mrb[29].mxu0  ;;  %v2852_v25 = vpop.f32.mrb[29].mxu1 }
 0x133   : > { %v3724_v26 = vadd.f32 %v2764_v21, %v2763_v19  ;;  %v2853_v27 = vadd.f32 %v2852_v25, %v2851_v20  ;;  %v2766_v28 = vpop.f32.mrb[30].mxu0  ;;  %v2854_v29 = vpop.f32.mrb[30].mxu1 }
 0x134   : > { %v2767_v31 = vpop.f32.mrb[31].mxu0  ;;  %v2855_v32 = vpop.f32.mrb[31].mxu1 }
 0x135   : > { %v3727_v33 = vadd.f32 %v2853_v27, %v1390_v4  ;;  %v2768_v34 = vadd.f32 %v2767_v31, %v2766_v28  ;;  %v2856_v35 = vadd.f32 %v2855_v32, %v2854_v29 }
 0x137   : > { %v3729_v36 = vadd.f32 %v2856_v35, %v1393_v10 }
 0x139   : > { %v2769_v39 = vpop.f32.mrb[32].mxu0  ;;  %v2857_v41 = vpop.f32.mrb[32].mxu1 }
 0x13a   : > { %v2770_v42 = vpop.f32.mrb[33].mxu0  ;;  %v2858_v43 = vpop.f32.mrb[33].mxu1 }
 0x13b   : > { %v3733_v46 = vadd.f32 %v2770_v42, %v2769_v39  ;;  %v2859_v44 = vadd.f32 %v2858_v43, %v2857_v41  ;;  %v2772_v48 = vpop.f32.mrb[34].mxu0  ;;  %v2860_v49 = vpop.f32.mrb[34].mxu1  ;;  %v1417_v39 = vadd.f32 %v2762_v14, %v3697_v24 }
 0x13c   : > { %v2773_v52 = vpop.f32.mrb[35].mxu0  ;;  %v2861_v22 = vpop.f32.mrb[35].mxu1 }
 0x13d   : > { %v3736_v54 = vadd.f32 %v2859_v44, %v1398_v16  ;;  %v2774_v50 = vadd.f32 %v2773_v52, %v2772_v48  ;;  %v2862_v59 = vadd.f32 %v2861_v22, %v2860_v49  ;;  %v1422_v52 = vadd.f32 %v3724_v26, %v3697_v24 }
 0x13f   : > { %v3738_v61 = vadd.f32 %v2862_v59, %v1401_v53 }
 0x141   : > { %v2775_v0 = vpop.f32.mrb[36].mxu0  ;;  %v2863_v1 = vpop.f32.mrb[36].mxu1 }
 0x142   : > { %v2776_v2 = vpop.f32.mrb[37].mxu0  ;;  %v2864_v56 = vpop.f32.mrb[37].mxu1 }
 0x143   : > { %v3742_v6 = vadd.f32 %v2776_v2, %v2775_v0  ;;  %v2865_v7 = vadd.f32 %v2864_v56, %v2863_v1  ;;  %v2778_v8 = vpop.f32.mrb[38].mxu0  ;;  %v2866_v9 = vpop.f32.mrb[38].mxu1  ;;  %v1425_v2 = vadd.f32 %v2768_v34, %v3697_v24  ;;  %v1433_v34 = vadd.f32 %v2774_v50, %v3697_v24 }
 0x144   : > { %v2779_v12 = vpop.f32.mrb[39].mxu0  ;;  %v2867_v38 = vpop.f32.mrb[39].mxu1 }
 0x145   : > { %v3745_v15 = vadd.f32 %v2865_v7, %v1406_v30  ;;  %v2780_v19 = vadd.f32 %v2779_v12, %v2778_v8  ;;  %v2868_v20 = vadd.f32 %v2867_v38, %v2866_v9  ;;  %v1438_v50 = vadd.f32 %v3742_v6, %v3697_v24 }
 0x147   : > { %v3747_v21 = vadd.f32 %v2868_v20, %v1409_v62  ;;  %v1430_v62 = vadd.f32 %v3733_v46, %v3697_v24 }
 0x149   : > { %v2781_v25 = vpop.f32.mrb[40].mxu0  ;;  %v2869_v4 = vpop.f32.mrb[40].mxu1 }
 0x14a   : > { %v2782_v27 = vpop.f32.mrb[41].mxu0  ;;  %v2870_v28 = vpop.f32.mrb[41].mxu1 }
 0x14b   : > { %v3751_v29 = vadd.f32 %v2782_v27, %v2781_v25  ;;  %v2871_v31 = vadd.f32 %v2870_v28, %v2869_v4  ;;  %v2784_v32 = vpop.f32.mrb[42].mxu0  ;;  %v2872_v10 = vpop.f32.mrb[42].mxu1 }
 0x14c   : > { %v2785_v35 = vpop.f32.mrb[43].mxu0  ;;  %v2873_v58 = vpop.f32.mrb[43].mxu1 }
 0x14d   : > { %v3754_v41 = vadd.f32 %v2871_v31, %v1414_v47  ;;  %v3756_v42 = vadd.f32 %v2785_v35, %v2784_v32  ;;  %v2874_v43 = vadd.f32 %v2873_v58, %v2872_v10 }
 0x14f   : > { %v3758_v16 = vadd.f32 %v2874_v43, %v1417_v39 }
 0x151   : > { %v2787_v44 = vpop.f32.mrb[44].mxu0  ;;  %v2875_v48 = vpop.f32.mrb[44].mxu1 }
 0x152   : > { %v2788_v49 = vpop.f32.mrb[45].mxu0  ;;  %v2876_v3 = vpop.f32.mrb[45].mxu1 }
 0x153   : > { %v3762_v22 = vadd.f32 %v2788_v49, %v2787_v44  ;;  %v2877_v53 = vadd.f32 %v2876_v3, %v2875_v48  ;;  %v2790_v59 = vpop.f32.mrb[46].mxu0  ;;  %v2878_v0 = vpop.f32.mrb[46].mxu1 }
 0x154   : > { %v2791_v14 = vpop.f32.mrb[47].mxu0  ;;  %v2879_v1 = vpop.f32.mrb[47].mxu1 }
 0x155   : > { %v3765_v56 = vadd.f32 %v2877_v53, %v1422_v52  ;;  %v3767_v30 = vadd.f32 %v2791_v14, %v2790_v59  ;;  %v2880_v7 = vadd.f32 %v2879_v1, %v2878_v0  ;;  %v1441_v59 = vadd.f32 %v2780_v19, %v3697_v24 }
 0x156   : > { %v1446_v19 = vadd.f32 %v3751_v29, %v3697_v24 }
 0x157   : > { %v3769_v8 = vadd.f32 %v2880_v7, %v1425_v2 }
 0x159   : > { %v2881_v9 = vpop.f32.mrb[48].mxu1  ;;  %v2945_v12 = vpop.f32.mrb[48].mxu0 }
 0x15a   : > { %v2882_v38 = vpop.f32.mrb[49].mxu1  ;;  %v2946_v26 = vpop.f32.mrb[49].mxu0 }
 0x15b   : > { %v2883_v20 = vadd.f32 %v2882_v38, %v2881_v9  ;;  %v2947_v25 = vadd.f32 %v2946_v26, %v2945_v12  ;;  %v2884_v4 = vpop.f32.mrb[50].mxu1  ;;  %v2948_v27 = vpop.f32.mrb[50].mxu0 }
 0x15c   : > { %v2885_v28 = vpop.f32.mrb[51].mxu1  ;;  %v2949_v47 = vpop.f32.mrb[51].mxu0 }
 0x15d   : > { %v3774_v31 = vadd.f32 %v2883_v20, %v1430_v62  ;;  %v2886_v32 = vadd.f32 %v2885_v28, %v2884_v4  ;;  %v2950_v10 = vadd.f32 %v2949_v47, %v2948_v27  ;;  %v3777_v35 = vadd.f32 %v2947_v25, %v3703_v37 }
 0x15f   : > { %v3779_v58 = vadd.f32 %v2886_v32, %v1433_v34  ;;  %v3782_v39 = vadd.f32 %v2950_v10, %v3705_v40 }
 0x161   : > { %v2887_v46 = vpop.f32.mrb[52].mxu1  ;;  %v2951_v43 = vpop.f32.mrb[52].mxu0 }
 0x162   : > { %v2888_v44 = vpop.f32.mrb[53].mxu1  ;;  %v2952_v48 = vpop.f32.mrb[53].mxu0 }
 0x163   : > { %v2889_v49 = vadd.f32 %v2888_v44, %v2887_v46  ;;  %v2953_v3 = vadd.f32 %v2952_v48, %v2951_v43  ;;  %v2890_v52 = vpop.f32.mrb[54].mxu1  ;;  %v2954_v53 = vpop.f32.mrb[54].mxu0 }
 0x164   : > { %v2891_v37 = vpop.f32.mrb[55].mxu1  ;;  %v2955_v0 = vpop.f32.mrb[55].mxu0 }
 0x165   : > { %v3787_v14 = vadd.f32 %v2889_v49, %v1438_v50  ;;  %v2892_v1 = vadd.f32 %v2891_v37, %v2890_v52  ;;  %v2956_v40 = vadd.f32 %v2955_v0, %v2954_v53  ;;  %v3790_v2 = vadd.f32 %v2953_v3, %v3711_v55 }
 0x166   : > { %v1449_v55 = vadd.f32 %v3756_v42, %v3697_v24  ;;  %v1454_v42 = vadd.f32 %v3762_v22, %v3697_v24 }
 0x167   : > { %v3792_v7 = vadd.f32 %v2892_v1, %v1441_v59  ;;  %v3795_v9 = vadd.f32 %v2956_v40, %v3713_v60 }
 0x169   : > { %v2893_v6 = vpop.f32.mrb[56].mxu1  ;;  %v2957_v12 = vpop.f32.mrb[56].mxu0 }
 0x16a   : > { %v2894_v38 = vpop.f32.mrb[57].mxu1  ;;  %v2958_v26 = vpop.f32.mrb[57].mxu0 }
 0x16b   : > { %v2895_v62 = vadd.f32 %v2894_v38, %v2893_v6  ;;  %v2959_v20 = vadd.f32 %v2958_v26, %v2957_v12  ;;  %v2896_v25 = vpop.f32.mrb[58].mxu1  ;;  %v2960_v4 = vpop.f32.mrb[58].mxu0 }
 0x16c   : > { %v2897_v27 = vpop.f32.mrb[59].mxu1  ;;  %v2961_v34 = vpop.f32.mrb[59].mxu0 }
 0x16d   : > { %v3801_v28 = vadd.f32 %v2895_v62, %v1446_v19  ;;  %v2898_v60 = vadd.f32 %v2897_v27, %v2896_v25  ;;  %v2962_v47 = vadd.f32 %v2961_v34, %v2960_v4  ;;  %v3804_v32 = vadd.f32 %v2959_v20, %v3719_v13 }
 0x16e   : > { %v1457_v13 = vadd.f32 %v3767_v30, %v3697_v24  ;;  %v1462_v30 = vadd.f32 %v3678_v45, %v3697_v24 }
 0x16f   : > { %v3806_v10 = vadd.f32 %v2898_v60, %v1449_v55  ;;  %v3809_v29 = vadd.f32 %v2962_v47, %v3721_v18 }
 0x171   : > { %v2899_v46 = vpop.f32.mrb[60].mxu1  ;;  %v2963_v43 = vpop.f32.mrb[60].mxu0 }
 0x172   : > { %v2900_v44 = vpop.f32.mrb[61].mxu1  ;;  %v2964_v48 = vpop.f32.mrb[61].mxu0 }
 0x173   : > { %v2901_v50 = vadd.f32 %v2900_v44, %v2899_v46  ;;  %v2965_v49 = vadd.f32 %v2964_v48, %v2963_v43  ;;  %v2902_v3 = vpop.f32.mrb[62].mxu1  ;;  %v2966_v52 = vpop.f32.mrb[62].mxu0 }
 0x174   : > { %v2903_v53 = vpop.f32.mrb[63].mxu1  ;;  %v2967_v59 = vpop.f32.mrb[63].mxu0 }
 0x175   : > { %v3815_v37 = vadd.f32 %v2901_v50, %v1454_v42  ;;  %v2904_v18 = vadd.f32 %v2903_v53, %v2902_v3  ;;  %v2968_v0 = vadd.f32 %v2967_v59, %v2966_v52  ;;  %v3818_v1 = vadd.f32 %v2965_v49, %v3727_v33 }
 0x176   : > { %v1465_v33 = vadd.f32 %v3680_v51, %v3697_v24  ;;  %v1470_v51 = vadd.f32 %v3682_v57, %v3697_v24 }
 0x177   : > { %v3820_v40 = vadd.f32 %v2904_v18, %v1457_v13  ;;  %v3823_v22 = vadd.f32 %v2968_v0, %v3729_v36 }
 0x179   : > { %v2905_v6 = vpop.f32.mrb[64].mxu1  ;;  %v2969_v12 = vpop.f32.mrb[64].mxu0 }
 0x17a   : > { %v2906_v38 = vpop.f32.mrb[65].mxu1  ;;  %v2970_v26 = vpop.f32.mrb[65].mxu0 }
 0x17b   : > { %v2907_v19 = vadd.f32 %v2906_v38, %v2905_v6  ;;  %v2971_v62 = vadd.f32 %v2970_v26, %v2969_v12  ;;  %v2908_v20 = vpop.f32.mrb[66].mxu1  ;;  %v2972_v25 = vpop.f32.mrb[66].mxu0 }
 0x17c   : > { %v2909_v4 = vpop.f32.mrb[67].mxu1  ;;  %v2973_v55 = vpop.f32.mrb[67].mxu0 }
 0x17d   : > { %v3829_v27 = vadd.f32 %v2907_v19, %v1462_v30  ;;  %v2910_v36 = vadd.f32 %v2909_v4, %v2908_v20  ;;  %v2974_v34 = vadd.f32 %v2973_v55, %v2972_v25  ;;  %v3832_v60 = vadd.f32 %v2971_v62, %v3736_v54 }
 0x17e   : > { %v1473_v54 = vadd.f32 %v3684_v63, %v3697_v24  ;;  %v1478_v63 = vadd.f32 %v3686_v5, %v3697_v24 }
 0x17f   : > { %v3834_v47 = vadd.f32 %v2910_v36, %v1465_v33  ;;  %v3837_v45 = vadd.f32 %v2974_v34, %v3738_v61 }
 0x181   : > { %v2911_v46 = vpop.f32.mrb[68].mxu1  ;;  %v2975_v43 = vpop.f32.mrb[68].mxu0 }
 0x182   : > { %v2912_v44 = vpop.f32.mrb[69].mxu1  ;;  %v2976_v48 = vpop.f32.mrb[69].mxu0 }
 0x183   : > { %v2913_v42 = vadd.f32 %v2912_v44, %v2911_v46  ;;  %v2977_v50 = vadd.f32 %v2976_v48, %v2975_v43  ;;  %v2914_v49 = vpop.f32.mrb[70].mxu1  ;;  %v2978_v3 = vpop.f32.mrb[70].mxu0 }
 0x184   : > { %v2915_v52 = vpop.f32.mrb[71].mxu1  ;;  %v2979_v13 = vpop.f32.mrb[71].mxu0 }
 0x185   : > { %v3843_v53 = vadd.f32 %v2913_v42, %v1470_v51  ;;  %v2916_v61 = vadd.f32 %v2915_v52, %v2914_v49  ;;  %v2980_v59 = vadd.f32 %v2979_v13, %v2978_v3  ;;  %v3846_v18 = vadd.f32 %v2977_v50, %v3745_v15 }
 0x186   : > { %v1481_v15 = vadd.f32 %v3688_v11, %v3697_v24  ;;  %v1486_v11 = vadd.f32 %v3690_v17, %v3697_v24 }
 0x187   : > { %v3848_v0 = vadd.f32 %v2916_v61, %v1473_v54  ;;  %v3851_v57 = vadd.f32 %v2980_v59, %v3747_v21 }
 0x189   : > { %v2917_v6 = vpop.f32.mrb[72].mxu1  ;;  %v2981_v12 = vpop.f32.mrb[72].mxu0 }
 0x18a   : > { %v2918_v38 = vpop.f32.mrb[73].mxu1  ;;  %v2982_v26 = vpop.f32.mrb[73].mxu0 }
 0x18b   : > { %v2919_v30 = vadd.f32 %v2918_v38, %v2917_v6  ;;  %v2983_v19 = vadd.f32 %v2982_v26, %v2981_v12  ;;  %v2920_v62 = vpop.f32.mrb[74].mxu1  ;;  %v2984_v20 = vpop.f32.mrb[74].mxu0 }
 0x18c   : > { %v2921_v25 = vpop.f32.mrb[75].mxu1  ;;  %v2985_v33 = vpop.f32.mrb[75].mxu0 }
 0x18d   : > { %v3857_v4 = vadd.f32 %v2919_v30, %v1478_v63  ;;  %v2922_v21 = vadd.f32 %v2921_v25, %v2920_v62  ;;  %v2986_v55 = vadd.f32 %v2985_v33, %v2984_v20  ;;  %v3860_v36 = vadd.f32 %v2983_v19, %v3754_v41 }
 0x18e   : > { %v1489_v41 = vadd.f32 %v3692_v23, %v3697_v24 }
 0x18f   : > { %v3862_v34 = vadd.f32 %v2922_v21, %v1481_v15  ;;  %v3865_v5 = vadd.f32 %v2986_v55, %v3758_v16 }
 0x191   : > { %v2923_v46 = vpop.f32.mrb[76].mxu1  ;;  %v2987_v43 = vpop.f32.mrb[76].mxu0 }
 0x192   : > { %v2924_v44 = vpop.f32.mrb[77].mxu1  ;;  %v2988_v48 = vpop.f32.mrb[77].mxu0 }
 0x193   : > { %v2925_v51 = vadd.f32 %v2924_v44, %v2923_v46  ;;  %v2989_v42 = vadd.f32 %v2988_v48, %v2987_v43  ;;  %v2926_v50 = vpop.f32.mrb[78].mxu1  ;;  %v2990_v49 = vpop.f32.mrb[78].mxu0 }
 0x194   : > { %v2927_v3 = vpop.f32.mrb[79].mxu1  ;;  %v2991_v54 = vpop.f32.mrb[79].mxu0 }
 0x195   : > { %v3871_v52 = vadd.f32 %v2925_v51, %v1486_v11  ;;  %v2928_v16 = vadd.f32 %v2927_v3, %v2926_v50  ;;  %v2992_v13 = vadd.f32 %v2991_v54, %v2990_v49  ;;  %v3874_v61 = vadd.f32 %v2989_v42, %v3765_v56 }
 0x197   : > { %v3876_v59 = vadd.f32 %v2928_v16, %v1489_v41  ;;  %v3879_v17 = vadd.f32 %v2992_v13, %v3769_v8 }
 0x199   : > { %v2993_v6 = vpop.f32.mrb[80].mxu0  ;;  %v3083_v12 = vpop.f32.mrb[80].mxu1 }
 0x19a   : > { %v1857_v38 = vadd.f32 %v3083_v12, %v3790_v2  ;;  %v2994_v26 = vpop.f32.mrb[81].mxu0  ;;  %v1848_v23 = vpop.f32.mrb[81].mxu1 }
 0x19b   : > { %v2995_v24 = vadd.f32 %v2994_v26, %v2993_v6  ;;  %v1849_v63 = vadd.f32 %v1848_v23, %v3777_v35  ;;  %v2996_v30 = vpop.f32.mrb[82].mxu0  ;;  %v3084_v19 = vpop.f32.mrb[82].mxu1 }
 0x19c   : > { %v1977_v62 = vmax.f32 %v1857_v38, 0.0  ;;  %v1860_v56 = vadd.f32 %v3084_v19, %v3795_v9  ;;  %v2997_v20 = vpop.f32.mrb[83].mxu0  ;;  %v1851_v15 = vpop.f32.mrb[83].mxu1 }
 0x19d   : > { %v1975_v25 = vmax.f32 %v1849_v63, 0.0  ;;  %v2998_v33 = vadd.f32 %v2997_v20, %v2996_v30  ;;  %v1852_v8 = vadd.f32 %v1851_v15, %v3782_v39  ;;  %v3886_v21 = vadd.f32 %v2995_v24, %v3774_v31 }
 0x19e   : > { %v2019_v2 = vrot.slane %v1977_v62, 4  ;;  %v1978_v55 = vmax.f32 %v1860_v56, 0.0 }
 0x19f   : > { %v2007_v46 = vrot.slane %v1975_v25, 4  ;;  %v1976_v43 = vmax.f32 %v1852_v8, 0.0  ;;  %v3889_v35 = vadd.f32 %v2998_v33, %v3779_v58 }
 0x1a0   : > { %v2020_v44 = vmax.f32 %v1977_v62, %v2019_v2  ;;  %v2025_v48 = vrot.slane %v1978_v55, 4 }
 0x1a1   : > { %v2008_v11 = vmax.f32 %v1975_v25, %v2007_v46  ;;  %v2013_v9 = vrot.slane %v1976_v43, 4  ;;  %v2999_v51 = vpop.f32.mrb[84].mxu0  ;;  %v3087_v42 = vpop.f32.mrb[84].mxu1 }
 0x1a2   : > { %v2021_v50 = vrot.slane %v2020_v44, 2  ;;  %v2026_v49 = vmax.f32 %v1978_v55, %v2025_v48  ;;  %v1873_v39 = vadd.f32 %v3087_v42, %v3818_v1  ;;  %v3000_v41 = vpop.f32.mrb[85].mxu0  ;;  %v1864_v31 = vpop.f32.mrb[85].mxu1 }
 0x1a3   : > { %v2009_v3 = vrot.slane %v2008_v11, 2  ;;  %v2014_v54 = vmax.f32 %v1976_v43, %v2013_v9  ;;  %v3892_v16 = vadd.f32 %v3000_v41, %v2999_v51  ;;  %v1865_v13 = vadd.f32 %v1864_v31, %v3804_v32  ;;  %v3002_v58 = vpop.f32.mrb[86].mxu0  ;;  %v3088_v6 = vpop.f32.mrb[86].mxu1 }
 0x1a4   : > { %v2022_v12 = vmax.f32 %v2020_v44, %v2021_v50  ;;  %v2027_v38 = vrot.slane %v2026_v49, 2  ;;  %v1981_v26 = vmax.f32 %v1873_v39, 0.0  ;;  %v1876_v23 = vadd.f32 %v3088_v6, %v3823_v22  ;;  %v3003_v24 = vpop.f32.mrb[87].mxu0  ;;  %v1867_v63 = vpop.f32.mrb[87].mxu1 }
 0x1a5   : > { %v2010_v30 = vmax.f32 %v2008_v11, %v2009_v3  ;;  %v2015_v19 = vrot.slane %v2014_v54, 2  ;;  %v1979_v1 = vmax.f32 %v1865_v13, 0.0  ;;  %v3896_v62 = vadd.f32 %v3003_v24, %v3002_v58 }
 0x1a6   : > { %v2023_v56 = vrot.slane %v2022_v12, 1  ;;  %v2028_v20 = vmax.f32 %v2026_v49, %v2027_v38  ;;  %v2043_v15 = vrot.slane %v1981_v26, 4  ;;  %v1982_v25 = vmax.f32 %v1876_v23, 0.0 }
 0x1a7   : > { %v2011_v32 = vrot.slane %v2010_v30, 1  ;;  %v2016_v33 = vmax.f32 %v2014_v54, %v2015_v19  ;;  %v2031_v8 = vrot.slane %v1979_v1, 4  ;;  %v1868_v2 = vadd.f32 %v1867_v63, %v3809_v29 }
 0x1a8   : > { %v2024_v55 = vmax.f32 %v2022_v12, %v2023_v56  ;;  %v2029_v22 = vrot.slane %v2028_v20, 1  ;;  %v2044_v46 = vmax.f32 %v1981_v26, %v2043_v15  ;;  %v2049_v43 = vrot.slane %v1982_v25, 4 }
 0x1a9   : > { %v2012_v44 = vmax.f32 %v2010_v30, %v2011_v32  ;;  %v2017_v48 = vrot.slane %v2016_v33, 1  ;;  %v2032_v11 = vmax.f32 %v1979_v1, %v2031_v8  ;;  %v1980_v9 = vmax.f32 %v1868_v2, 0.0  ;;  %v3005_v51 = vpop.f32.mrb[88].mxu0  ;;  %v3091_v42 = vpop.f32.mrb[88].mxu1 }
 0x1aa   : > { %v2675_v50 = vpack.c.bf16 %v2024_v55, %v2024_v55  ;;  %v2030_v49 = vmax.f32 %v2028_v20, %v2029_v22  ;;  %v2045_v39 = vrot.slane %v2044_v46, 2  ;;  %v2050_v41 = vmax.f32 %v1982_v25, %v2049_v43  ;;  %v3006_v31 = vpop.f32.mrb[89].mxu0  ;;  %v1880_v3 = vpop.f32.mrb[89].mxu1 }
 0x1ab   : > { %v2673_v54 = vpack.c.bf16 %v2012_v44, %v2012_v44  ;;  %v2018_v13 = vmax.f32 %v2016_v33, %v2017_v48  ;;  %v2033_v29 = vrot.slane %v2032_v11, 2  ;;  %v2037_v58 = vrot.slane %v1980_v9, 4  ;;  %v3008_v6 = vpop.f32.mrb[90].mxu0  ;;  %v3092_v12 = vpop.f32.mrb[90].mxu1 }
 0x1ac   : > { %v2329_v38 = vunpack.c.l.b16 %v2675_v50  ;;  %v2676_v26 = vpack.c.bf16 %v2030_v49, %v2030_v49  ;;  %v2046_v23 = vmax.f32 %v2044_v46, %v2045_v39  ;;  %v2051_v24 = vrot.slane %v2050_v41, 2  ;;  %v3009_v63 = vpop.f32.mrb[91].mxu0  ;;  %v1883_v30 = vpop.f32.mrb[91].mxu1 }
 0x1ad   : > { %v2327_v19 = vunpack.c.l.b16 %v2673_v54  ;;  %v2674_v1 = vpack.c.bf16 %v2018_v13, %v2018_v13  ;;  %v2034_v56 = vmax.f32 %v2032_v11, %v2033_v29  ;;  %v2038_v20 = vmax.f32 %v1980_v9, %v2037_v58 }
 0x1ae   : > { %v2330_v15 = vunpack.c.l.b16 %v2676_v26  ;;  %v2047_v25 = vrot.slane %v2046_v23, 1  ;;  %v2052_v32 = vmax.f32 %v2050_v41, %v2051_v24  ;;  %v1889_v33 = vadd.f32 %v3091_v42, %v3846_v18 }
 0x1af   : > { %v2328_v8 = vunpack.c.l.b16 %v2674_v1  ;;  %v2035_v2 = vrot.slane %v2034_v56, 1  ;;  %v2039_v55 = vrot.slane %v2038_v20, 2  ;;  %v3900_v22 = vadd.f32 %v3006_v31, %v3005_v51 }
 0x1b0   : > { %v2048_v43 = vmax.f32 %v2046_v23, %v2047_v25  ;;  %v2053_v46 = vrot.slane %v2052_v32, 1  ;;  %v1985_v44 = vmax.f32 %v1889_v33, 0.0  ;;  %v1881_v48 = vadd.f32 %v1880_v3, %v3832_v60 }
 0x1b1   : > { %v2360_v50 = vsel %vm2359_vm0, %v2328_v8, %v2327_v19  ;;  %v2036_v11 = vmax.f32 %v2034_v56, %v2035_v2  ;;  %v2040_v9 = vmax.f32 %v2038_v20, %v2039_v55  ;;  %v1892_v49 = vadd.f32 %v3092_v12, %v3851_v57  ;;  %v3011_v39 = vpop.f32.mrb[92].mxu0  ;;  %v3095_v18 = vpop.f32.mrb[92].mxu1 }
 0x1b2   : > { %v2362_v42 = vsel %vm2361_vm1, %v2329_v38, %v2360_v50  ;;  %v2679_v41 = vpack.c.bf16 %v2048_v43, %v2048_v43  ;;  %v2054_v51 = vmax.f32 %v2052_v32, %v2053_v46  ;;  %v2067_v31 = vrot.slane %v1985_v44, 4  ;;  %v3012_v54 = vpop.f32.mrb[93].mxu0  ;;  %v1896_v13 = vpop.f32.mrb[93].mxu1 }
 0x1b3   : > { %v2677_v29 = vpack.c.bf16 %v2036_v11, %v2036_v11  ;;  %v2364_v60 = vsel %vm2363_vm2, %v2330_v15, %v2362_v42  ;;  %v2041_v3 = vrot.slane %v2040_v9, 1  ;;  %v1983_v58 = vmax.f32 %v1881_v48, 0.0  ;;  %v3907_v26 = vpop.f32.mrb[94].mxu0  ;;  %v3096_v23 = vpop.f32.mrb[94].mxu1 }
 0x1b4   : > { %v2333_v24 = vunpack.c.l.b16 %v2679_v41  ;;  %v2680_v57 = vpack.c.bf16 %v2054_v51, %v2054_v51  ;;  %v2068_v12 = vmax.f32 %v1985_v44, %v2067_v31  ;;  %v1986_v19 = vmax.f32 %v1892_v49, 0.0  ;;  %v3015_v1 = vpop.f32.mrb[95].mxu0  ;;  %v3909_v38 = vpop.f32.mrb[95].mxu1 }
 0x1b5   : > { %v2331_v56 = vunpack.c.l.b16 %v2677_v29  ;;  %v2042_v20 = vmax.f32 %v2040_v9, %v2041_v3  ;;  %v2055_v25 = vrot.slane %v1983_v58, 4  ;;  %v3911_v32 = vadd.f32 %v3009_v63, %v3008_v6 }
 0x1b6   : > { %v2334_v33 = vunpack.c.l.b16 %v2680_v57  ;;  %v2069_v8 = vrot.slane %v2068_v12, 2  ;;  %v2073_v15 = vrot.slane %v1986_v19, 4  ;;  %v1884_v2 = vadd.f32 %v1883_v30, %v3837_v45 }
 0x1b7   : > { %v2366_v55 = vsel %vm2365_vm3, %v2331_v56, %v2364_v60  ;;  %v2678_v43 = vpack.c.bf16 %v2042_v20, %v2042_v20  ;;  %v2056_v46 = vmax.f32 %v1983_v58, %v2055_v25  ;;  %v1905_v44 = vadd.f32 %v3095_v18, %v3874_v61 }
 0x1b8   : > { %v2070_v48 = vmax.f32 %v2068_v12, %v2069_v8  ;;  %v2074_v50 = vmax.f32 %v1986_v19, %v2073_v15  ;;  %v1984_v11 = vmax.f32 %v1884_v2, 0.0  ;;  %v3916_v49 = vadd.f32 %v3012_v54, %v3011_v39 }
 0x1b9   : > { %v2332_v9 = vunpack.c.l.b16 %v2678_v43  ;;  %v2057_v6 = vrot.slane %v2056_v46, 2  ;;  %v1989_v63 = vmax.f32 %v1905_v44, 0.0  ;;  %v1897_v42 = vadd.f32 %v1896_v13, %v3860_v36  ;;  %v3919_v41 = vpop.f32.mrb[96].mxu0  ;;  %v3099_v51 = vpop.f32.mrb[96].mxu1 }
 0x1ba   : > { %v2071_v45 = vrot.slane %v2070_v48, 1  ;;  %v2075_v30 = vrot.slane %v2074_v50, 2  ;;  %v2061_v31 = vrot.slane %v1984_v11, 4  ;;  %v1908_v29 = vadd.f32 %v3096_v23, %v3879_v17  ;;  %v3018_v61 = vpop.f32.mrb[97].mxu0  ;;  %v1912_v18 = vpop.f32.mrb[97].mxu1 }
 0x1bb   : > { %v2368_v60 = vsel %vm2367_vm4, %v2332_v9, %v2366_v55  ;;  %v2058_v39 = vmax.f32 %v2056_v46, %v2057_v6  ;;  %v2091_v54 = vrot.slane %v1989_v63, 4  ;;  %v1987_v3 = vmax.f32 %v1897_v42, 0.0  ;;  %v3924_v58 = vpop.f32.mrb[98].mxu0  ;;  %v3926_v57 = vpop.f32.mrb[98].mxu1 }
 0x1bc   : > { %v2370_v36 = vsel %vm2369_vm5, %v2333_v24, %v2368_v60  ;;  %v2072_v13 = vmax.f32 %v2070_v48, %v2071_v45  ;;  %v2076_v12 = vmax.f32 %v2074_v50, %v2075_v30  ;;  %v2062_v19 = vmax.f32 %v1984_v11, %v2061_v31  ;;  %v3929_v56 = vpop.f32.mrb[99].mxu0  ;;  %v3931_v20 = vpop.f32.mrb[99].mxu1 }
 0x1bd   : > { %v2372_v17 = vsel %vm2371_vm6, %v2334_v33, %v2370_v36  ;;  %v2059_v23 = vrot.slane %v2058_v39, 1  ;;  %v2092_v25 = vmax.f32 %v1989_v63, %v2091_v54  ;;  %v2079_v8 = vrot.slane %v1987_v3, 4 }
 0x1be   : > { %v2394_v15 = vpack.c.b16 %v2372_v17, %v2372_v17  ;;  %v2683_v24 = vpack.c.bf16 %v2072_v13, %v2072_v13  ;;  %v2077_v2 = vrot.slane %v2076_v12, 1  ;;  %v2063_v55 = vrot.slane %v2062_v19, 2 }
 0x1bf   : > { %v2060_v43 = vmax.f32 %v2058_v39, %v2059_v23  ;;  %v2093_v46 = vrot.slane %v2092_v25, 2  ;;  %v2080_v44 = vmax.f32 %v1987_v3, %v2079_v8  ;;  %v1990_v48 = vmax.f32 %v1908_v29, 0.0 }
 0x1c0   : > { %2402 = vst [vmem:[%s3936_s10] sm:$0xf] %v2394_v15  ;;  %v2078_v50 = vmax.f32 %v2076_v12, %v2077_v2  ;;  %v2064_v11 = vmax.f32 %v2062_v19, %v2063_v55  ;;  %v3941_v9 = vadd.f32 %v3015_v1, %v3907_v26  ;;  %v1900_v60 = vadd.f32 %v3909_v38, %v3865_v5 }
 0x1c1   : > { %v2681_v6 = vpack.c.bf16 %v2060_v43, %v2060_v43  ;;  %v2094_v42 = vmax.f32 %v2092_v25, %v2093_v46  ;;  %v2081_v33 = vrot.slane %v2080_v44, 2  ;;  %v2097_v45 = vrot.slane %v1990_v48, 4  ;;  %v3943_v63 = vpop.f32.mrb[100].mxu0  ;;  %v3945_v30 = vpop.f32.mrb[100].mxu1 }
 0x1c2   : > { %v2065_v31 = vrot.slane %v2064_v11, 1  ;;  %v1760_v29 = vadd.f32 %v3892_v16, %v3787_v14  ;;  %v3951_v39 = vpop.f32.mrb[101].mxu0  ;;  %v3953_v54 = vpop.f32.mrb[101].mxu1  ;;  %v2337_v26 = vunpack.c.l.b16 %v2683_v24  ;;  %v2684_v1 = vpack.c.bf16 %v2078_v50, %v2078_v50 }
 0x1c3   : > { %v2082_v3 = vmax.f32 %v2080_v44, %v2081_v33  ;;  %v2098_v36 = vmax.f32 %v1990_v48, %v2097_v45  ;;  %v3955_v13 = vpop.f32.mrb[102].mxu0  ;;  %v3957_v12 = vpop.f32.mrb[102].mxu1  ;;  %v2335_v19 = vunpack.c.l.b16 %v2681_v6  ;;  %v1988_v23 = vmax.f32 %v1900_v60, 0.0 }
 0x1c4   : > { %v2066_v17 = vmax.f32 %v2064_v11, %v2065_v31  ;;  %v1921_v25 = vadd.f32 %v3099_v51, %v1760_v29  ;;  %v3959_v5 = vpop.f32.mrb[103].mxu0  ;;  %v3961_v38 = vpop.f32.mrb[103].mxu1  ;;  %v2095_v14 = vrot.slane %v2094_v42, 1  ;;  %v3964_v15 = vadd.f32 %v3018_v61, %v3919_v41 }
 0x1c5   : > { %v2083_v16 = vrot.slane %v2082_v3, 1  ;;  %v2099_v8 = vrot.slane %v2098_v36, 2  ;;  %v2085_v2 = vrot.slane %v1988_v23, 4  ;;  %v1913_v43 = vadd.f32 %v1912_v18, %v3886_v21 }
 0x1c6   : > { %v2682_v24 = vpack.c.bf16 %v2066_v17, %v2066_v17  ;;  %v1993_v55 = vmax.f32 %v1921_v25, 0.0  ;;  %v2338_v46 = vunpack.c.l.b16 %v2684_v1  ;;  %v1763_v51 = vadd.f32 %v3896_v62, %v3792_v7 }
 0x1c7   : > { %v2084_v44 = vmax.f32 %v2082_v3, %v2083_v16  ;;  %v2100_v48 = vmax.f32 %v2098_v36, %v2099_v8  ;;  %v2086_v11 = vmax.f32 %v1988_v23, %v2085_v2  ;;  %v1991_v33 = vmax.f32 %v1913_v43, 0.0 }
 0x1c8   : > { %v2336_v50 = vunpack.c.l.b16 %v2682_v24  ;;  %v2115_v6 = vrot.slane %v1993_v55, 4  ;;  %v2096_v45 = vmax.f32 %v2094_v42, %v2095_v14  ;;  %v1924_v41 = vadd.f32 %v3926_v57, %v1763_v51 }
 0x1c9   : > { %v2685_v31 = vpack.c.bf16 %v2084_v44, %v2084_v44  ;;  %v2101_v60 = vrot.slane %v2100_v48, 1  ;;  %v3970_v61 = vpop.f32.mrb[104].mxu0  ;;  %v3972_v29 = vpop.f32.mrb[104].mxu1  ;;  %v2087_v18 = vrot.slane %v2086_v11, 2  ;;  %v2103_v3 = vrot.slane %v1991_v33, 4 }
 0x1ca   : > { %v2373_v21 = vsel %vm2359_vm0, %v2336_v50, %v2335_v19  ;;  %v2116_v1 = vmax.f32 %v1993_v55, %v2115_v6  ;;  %v3975_v36 = vpop.f32.mrb[105].mxu0  ;;  %v3977_v7 = vpop.f32.mrb[105].mxu1  ;;  %v1994_v23 = vmax.f32 %v1924_v41, 0.0  ;;  %v2687_v55 = vpack.c.bf16 %v2096_v45, %v2096_v45 }
 0x1cb   : > { %v2374_v62 = vsel %vm2361_vm1, %v2337_v26, %v2373_v21  ;;  %v2339_v42 = vunpack.c.l.b16 %v2685_v31  ;;  %v2102_v17 = vmax.f32 %v2100_v48, %v2101_v60  ;;  %v3980_v25 = vpop.f32.mrb[106].mxu0  ;;  %v3982_v57 = vpop.f32.mrb[106].mxu1  ;;  %v2088_v16 = vmax.f32 %v2086_v11, %v2087_v18 }
 0x1cc   : > { %v2375_v14 = vsel %vm2363_vm2, %v2338_v46, %v2374_v62  ;;  %v2117_v19 = vrot.slane %v2116_v1, 2  ;;  %v2104_v8 = vmax.f32 %v1991_v33, %v2103_v3  ;;  %v3985_v24 = vpop.f32.mrb[107].mxu0  ;;  %v3987_v2 = vpop.f32.mrb[107].mxu1  ;;  %v2121_v26 = vrot.slane %v1994_v23, 4 }
 0x1cd   : > { %v2376_v43 = vsel %vm2365_vm3, %v2339_v42, %v2375_v14  ;;  %v3992_v44 = vadd.f32 %v3929_v56, %v3924_v58  ;;  %v2089_v48 = vrot.slane %v2088_v16, 1  ;;  %v1916_v46 = vadd.f32 %v3931_v20, %v3889_v35 }
 0x1ce   : > { %v2118_v51 = vmax.f32 %v2116_v1, %v2117_v19  ;;  %v2105_v50 = vrot.slane %v2104_v8, 2  ;;  %v2688_v11 = vpack.c.bf16 %v2102_v17, %v2102_v17  ;;  %v2122_v6 = vmax.f32 %v1994_v23, %v2121_v26 }
 0x1cf   : > { %v1776_v33 = vadd.f32 %v3916_v49, %v3815_v37  ;;  %v3025_v45 = vadd.f32 %v3951_v39, %v3943_v63  ;;  %v2090_v31 = vmax.f32 %v2088_v16, %v2089_v48  ;;  %v1992_v21 = vmax.f32 %v1916_v46, 0.0 }
 0x1d0   : > { %v2119_v60 = vrot.slane %v2118_v51, 1  ;;  %v2106_v41 = vmax.f32 %v2104_v8, %v2105_v50  ;;  %v2123_v58 = vrot.slane %v2122_v6, 2  ;;  %v1768_v18 = vadd.f32 %v3900_v22, %v3801_v28 }
 0x1d1   : > { %v1937_v56 = vadd.f32 %v3945_v30, %v1776_v33  ;;  %v1779_v35 = vadd.f32 %v3941_v9, %v3820_v40  ;;  %v4005_v20 = vpop.f32.mrb[108].mxu0  ;;  %v4007_v1 = vpop.f32.mrb[108].mxu1  ;;  %v2686_v37 = vpack.c.bf16 %v2090_v31, %v2090_v31  ;;  %v2109_v39 = vrot.slane %v1992_v21, 4 }
 0x1d2   : > { %v2120_v49 = vmax.f32 %v2118_v51, %v2119_v60  ;;  %v2107_v63 = vrot.slane %v2106_v41, 1  ;;  %v4009_v3 = vpop.f32.mrb[109].mxu0  ;;  %v4011_v62 = vpop.f32.mrb[109].mxu1  ;;  %v2124_v42 = vmax.f32 %v2122_v6, %v2123_v58  ;;  %v1929_v17 = vadd.f32 %v3953_v54, %v1768_v18 }
 0x1d3   : > { %v1997_v30 = vmax.f32 %v1937_v56, 0.0  ;;  %v1940_v28 = vadd.f32 %v3957_v12, %v1779_v35  ;;  %v4015_v22 = vpop.f32.mrb[110].mxu0  ;;  %v4017_v40 = vpop.f32.mrb[110].mxu1  ;;  %v2341_v9 = vunpack.c.l.b16 %v2687_v55  ;;  %v2340_v23 = vunpack.c.l.b16 %v2686_v37 }
 0x1d4   : > { %v2110_v14 = vmax.f32 %v1992_v21, %v2109_v39  ;;  %v4019_v16 = vpop.f32.mrb[111].mxu0  ;;  %v4021_v19 = vpop.f32.mrb[111].mxu1  ;;  %v2125_v8 = vrot.slane %v2124_v42, 1  ;;  %v1995_v48 = vmax.f32 %v1929_v17, 0.0  ;;  %v2342_v50 = vunpack.c.l.b16 %v2688_v11 }
 0x1d5   : > { %v2139_v26 = vrot.slane %v1997_v30, 4  ;;  %v1998_v51 = vmax.f32 %v1940_v28, 0.0  ;;  %v2377_v54 = vsel %vm2367_vm4, %v2340_v23, %v2376_v43  ;;  %v2691_v46 = vpack.c.bf16 %v2120_v49, %v2120_v49 }
 0x1d6   : > { %v2111_v12 = vrot.slane %v2110_v14, 2  ;;  %v2378_v6 = vsel %vm2369_vm5, %v2341_v9, %v2377_v54  ;;  %v2108_v33 = vmax.f32 %v2106_v41, %v2107_v63  ;;  %v2127_v31 = vrot.slane %v1995_v48, 4 }
 0x1d7   : > { %v2140_v55 = vmax.f32 %v1997_v30, %v2139_v26  ;;  %v2379_v60 = vsel %vm2371_vm6, %v2342_v50, %v2378_v6  ;;  %v2145_v58 = vrot.slane %v1998_v51, 4  ;;  %v2126_v18 = vmax.f32 %v2124_v42, %v2125_v8 }
 0x1d8   : > { %v2112_v21 = vmax.f32 %v2110_v14, %v2111_v12  ;;  %v2395_v56 = vpack.c.b16 %v2379_v60, %v2379_v60  ;;  %v2128_v37 = vmax.f32 %v1995_v48, %v2127_v31  ;;  %v3028_v43 = vadd.f32 %v3959_v5, %v3955_v13 }
 0x1d9   : > { %v2141_v35 = vrot.slane %v2140_v55, 2  ;;  %v2146_v11 = vmax.f32 %v1998_v51, %v2145_v58  ;;  %v1771_v49 = vadd.f32 %v3911_v32, %v3806_v10  ;;  %v2345_v41 = vunpack.c.l.b16 %v2691_v46 }
 0x1da   : > { %v2113_v39 = vrot.slane %v2112_v21, 1  ;;  %2403 = vst [vmem:[%s3936_s10 + $0x4] sm:$0xf] %v2395_v56  ;;  %v2689_v63 = vpack.c.bf16 %v2108_v33, %v2108_v33  ;;  %v2129_v30 = vrot.slane %v2128_v37, 2  ;;  %v1792_v17 = vadd.f32 %v3025_v45, %v3843_v53 }
 0x1db   : > { %v2147_v9 = vrot.slane %v2146_v11, 2  ;;  %v1932_v42 = vadd.f32 %v3961_v38, %v1771_v49  ;;  %v3031_v23 = vadd.f32 %v3975_v36, %v3970_v61  ;;  %v2692_v14 = vpack.c.bf16 %v2126_v18, %v2126_v18 }
 0x1dc   : > { %v2114_v28 = vmax.f32 %v2112_v21, %v2113_v39  ;;  %v2130_v8 = vmax.f32 %v2128_v37, %v2129_v30  ;;  %v1953_v13 = vadd.f32 %v3972_v29, %v1792_v17  ;;  %v1784_v10 = vadd.f32 %v3964_v15, %v3829_v27 }
 0x1dd   : > { %v2142_v5 = vmax.f32 %v2140_v55, %v2141_v35  ;;  %v1996_v26 = vmax.f32 %v1932_v42, 0.0  ;;  %v1795_v48 = vadd.f32 %v3028_v43, %v3848_v0  ;;  %v2148_v45 = vmax.f32 %v2146_v11, %v2147_v9 }
 0x1de   : > { %v2690_v32 = vpack.c.bf16 %v2114_v28, %v2114_v28  ;;  %v2131_v53 = vrot.slane %v2130_v8, 1  ;;  %v2001_v51 = vmax.f32 %v1953_v13, 0.0  ;;  %v1945_v38 = vadd.f32 %v3977_v7, %v1784_v10 }
 0x1df   : > { %v2343_v50 = vunpack.c.l.b16 %v2689_v63  ;;  %v2133_v61 = vrot.slane %v1996_v26, 4  ;;  %v1956_v36 = vadd.f32 %v3982_v57, %v1795_v48  ;;  %v2346_v46 = vunpack.c.l.b16 %v2692_v14 }
 0x1e0   : > { %v2344_v54 = vunpack.c.l.b16 %v2690_v32  ;;  %v2132_v29 = vmax.f32 %v2130_v8, %v2131_v53  ;;  %v2163_v12 = vrot.slane %v2001_v51, 4  ;;  %v1999_v6 = vmax.f32 %v1945_v38, 0.0 }
 0x1e1   : > { %v2143_v15 = vrot.slane %v2142_v5, 1  ;;  %v2134_v33 = vmax.f32 %v1996_v26, %v2133_v61  ;;  %v2002_v55 = vmax.f32 %v1956_v36, 0.0  ;;  %v2149_v60 = vrot.slane %v2148_v45, 1 }
 0x1e2   : > { %v2380_v27 = vsel %vm2359_vm0, %v2344_v54, %v2343_v50  ;;  %v2693_v31 = vpack.c.bf16 %v2132_v29, %v2132_v29  ;;  %v2164_v21 = vmax.f32 %v2001_v51, %v2163_v12  ;;  %v2151_v56 = vrot.slane %v1999_v6, 4 }
 0x1e3   : > { %v2381_v0 = vsel %vm2361_vm1, %v2345_v41, %v2380_v27  ;;  %v2135_v58 = vrot.slane %v2134_v33, 2  ;;  %v2169_v35 = vrot.slane %v2002_v55, 4  ;;  %v3034_v37 = vadd.f32 %v3985_v24, %v3980_v25 }
 0x1e4   : > { %v2382_v7 = vsel %vm2363_vm2, %v2346_v46, %v2381_v0  ;;  %v2347_v18 = vunpack.c.l.b16 %v2693_v31  ;;  %v2165_v57 = vrot.slane %v2164_v21, 2  ;;  %v2144_v39 = vmax.f32 %v2142_v5, %v2143_v15 }
 0x1e5   : > { %v2136_v11 = vmax.f32 %v2134_v33, %v2135_v58  ;;  %v2152_v43 = vmax.f32 %v1999_v6, %v2151_v56  ;;  %v1787_v49 = vadd.f32 %v3992_v44, %v3834_v47  ;;  %v2150_v63 = vmax.f32 %v2148_v45, %v2149_v60 }
 0x1e6   : > { %v2383_v41 = vsel %vm2365_vm3, %v2347_v18, %v2382_v7  ;;  %v2170_v30 = vmax.f32 %v2002_v55, %v2169_v35  ;;  %v3037_v17 = vadd.f32 %v4009_v3, %v4005_v20  ;;  %v1800_v14 = vadd.f32 %v3031_v23, %v3857_v4 }
 0x1e7   : > { %v2137_v28 = vrot.slane %v2136_v11, 1  ;;  %v2153_v9 = vrot.slane %v2152_v43, 2  ;;  %v1948_v42 = vadd.f32 %v3987_v2, %v1787_v49  ;;  %v2166_v25 = vmax.f32 %v2164_v21, %v2165_v57 }
 0x1e8   : > { %v2171_v24 = vrot.slane %v2170_v30, 2  ;;  %v1808_v8 = vadd.f32 %v3037_v17, %v3871_v52  ;;  %v3040_v47 = vadd.f32 %v4019_v16, %v4015_v22  ;;  %v1961_v32 = vadd.f32 %v4011_v62, %v1800_v14 }
 0x1e9   : > { %v2138_v44 = vmax.f32 %v2136_v11, %v2137_v28  ;;  %v2154_v13 = vmax.f32 %v2152_v43, %v2153_v9  ;;  %v2000_v10 = vmax.f32 %v1948_v42, 0.0  ;;  %v2695_v5 = vpack.c.bf16 %v2144_v39, %v2144_v39 }
 0x1ea   : > { %v2172_v20 = vmax.f32 %v2170_v30, %v2171_v24  ;;  %v1969_v3 = vadd.f32 %v4007_v1, %v1808_v8  ;;  %v1811_v2 = vadd.f32 %v3040_v47, %v3876_v59  ;;  %v2696_v26 = vpack.c.bf16 %v2150_v63, %v2150_v63 }
 0x1eb   : > { %v2694_v4 = vpack.c.bf16 %v2138_v44, %v2138_v44  ;;  %v2157_v23 = vrot.slane %v2000_v10, 4  ;;  %v2003_v48 = vmax.f32 %v1961_v32, 0.0  ;;  %v2167_v53 = vrot.slane %v2166_v25, 1 }
 0x1ec   : > { %v2005_v52 = vmax.f32 %v1969_v3, 0.0  ;;  %v1972_v45 = vadd.f32 %v4017_v40, %v1811_v2  ;;  %v2155_v16 = vrot.slane %v2154_v13, 1  ;;  %v2349_v50 = vunpack.c.l.b16 %v2695_v5 }
 0x1ed   : > { %v2348_v22 = vunpack.c.l.b16 %v2694_v4  ;;  %v2158_v51 = vmax.f32 %v2000_v10, %v2157_v23  ;;  %v2175_v38 = vrot.slane %v2003_v48, 4  ;;  %v2173_v62 = vrot.slane %v2172_v20, 1 }
 0x1ee   : > { %v2187_v54 = vrot.slane %v2005_v52, 4  ;;  %v2006_v61 = vmax.f32 %v1972_v45, 0.0  ;;  %v2350_v36 = vunpack.c.l.b16 %v2696_v26  ;;  %v2168_v12 = vmax.f32 %v2166_v25, %v2167_v53 }
 0x1ef   : > { %v2384_v1 = vsel %vm2367_vm4, %v2348_v22, %v2383_v41  ;;  %v2159_v59 = vrot.slane %v2158_v51, 2  ;;  %v2176_v46 = vmax.f32 %v2003_v48, %v2175_v38  ;;  %v2156_v15 = vmax.f32 %v2154_v13, %v2155_v16 }
 0x1f0   : > { %v2385_v29 = vsel %vm2369_vm5, %v2349_v50, %v2384_v1  ;;  %v2188_v6 = vmax.f32 %v2005_v52, %v2187_v54  ;;  %v2193_v27 = vrot.slane %v2006_v61, 4  ;;  %v2174_v31 = vmax.f32 %v2172_v20, %v2173_v62 }
 0x1f1   : > { %v2386_v40 = vsel %vm2371_vm6, %v2350_v36, %v2385_v29  ;;  %v2160_v33 = vmax.f32 %v2158_v51, %v2159_v59  ;;  %v2177_v55 = vrot.slane %v2176_v46, 2  ;;  %v1803_v56 = vadd.f32 %v3034_v37, %v3862_v34 }
 0x1f2   : > { %v2396_v0 = vpack.c.b16 %v2386_v40, %v2386_v40  ;;  %v2189_v60 = vrot.slane %v2188_v6, 2  ;;  %v2194_v21 = vmax.f32 %v2006_v61, %v2193_v27  ;;  %v2697_v57 = vpack.c.bf16 %v2156_v15, %v2156_v15 }
 0x1f3   : > { %v2161_v7 = vrot.slane %v2160_v33, 1  ;;  %v2178_v58 = vmax.f32 %v2176_v46, %v2177_v55  ;;  %v1964_v11 = vadd.f32 %v4021_v19, %v1803_v56  ;;  %v2699_v43 = vpack.c.bf16 %v2168_v12, %v2168_v12 }
 0x1f4   : > { %2404 = vst [vmem:[%s3936_s10 + $0x8] sm:$0xf] %v2396_v0  ;;  %v2195_v18 = vrot.slane %v2194_v21, 2  ;;  %v2700_v49 = vpack.c.bf16 %v2174_v31, %v2174_v31  ;;  %v2190_v41 = vmax.f32 %v2188_v6, %v2189_v60  ;;  %v2351_v9 = vunpack.c.l.b16 %v2697_v57 }
 0x1f5   : > { %v2162_v35 = vmax.f32 %v2160_v33, %v2161_v7  ;;  %v2179_v39 = vrot.slane %v2178_v58, 1  ;;  %v2004_v28 = vmax.f32 %v1964_v11, 0.0  ;;  %v2353_v24 = vunpack.c.l.b16 %v2699_v43 }
 0x1f6   : > { %v2196_v17 = vmax.f32 %v2194_v21, %v2195_v18  ;;  %v2354_v34 = vunpack.c.l.b16 %v2700_v49  ;;  %v2191_v37 = vrot.slane %v2190_v41, 1 }
 0x1f7   : > { %v2698_v63 = vpack.c.bf16 %v2162_v35, %v2162_v35  ;;  %v2180_v30 = vmax.f32 %v2178_v58, %v2179_v39  ;;  %v2181_v25 = vrot.slane %v2004_v28, 4 }
 0x1f8   : > { %v2197_v44 = vrot.slane %v2196_v17, 1  ;;  %v2192_v5 = vmax.f32 %v2190_v41, %v2191_v37 }
 0x1f9   : > { %v2352_v42 = vunpack.c.l.b16 %v2698_v63  ;;  %v2701_v14 = vpack.c.bf16 %v2180_v30, %v2180_v30  ;;  %v2182_v13 = vmax.f32 %v2004_v28, %v2181_v25 }
 0x1fa   : > { %v2198_v3 = vmax.f32 %v2196_v17, %v2197_v44  ;;  %v2703_v4 = vpack.c.bf16 %v2192_v5, %v2192_v5 }
 0x1fb   : > { %v2387_v8 = vsel %vm2359_vm0, %v2352_v42, %v2351_v9  ;;  %v2355_v47 = vunpack.c.l.b16 %v2701_v14  ;;  %v2183_v32 = vrot.slane %v2182_v13, 2 }
 0x1fc   : > { %v2388_v19 = vsel %vm2361_vm1, %v2353_v24, %v2387_v8  ;;  %v2704_v23 = vpack.c.bf16 %v2198_v3, %v2198_v3  ;;  %v2357_v52 = vunpack.c.l.b16 %v2703_v4 }
 0x1fd   : > { %v2389_v10 = vsel %vm2363_vm2, %v2354_v34, %v2388_v19  ;;  %v2184_v2 = vmax.f32 %v2182_v13, %v2183_v32 }
 0x1fe   : > { %v2390_v20 = vsel %vm2365_vm3, %v2355_v47, %v2389_v10  ;;  %v2358_v45 = vunpack.c.l.b16 %v2704_v23 }
 0x1ff   : > { %v2185_v26 = vrot.slane %v2184_v2, 1 }
 0x201   : > { %v2186_v48 = vmax.f32 %v2184_v2, %v2185_v26 }
 0x203   : > { %v2702_v53 = vpack.c.bf16 %v2186_v48, %v2186_v48 }
 0x205   : > { %v2356_v22 = vunpack.c.l.b16 %v2702_v53 }
 0x207   : > { %v2391_v16 = vsel %vm2367_vm4, %v2356_v22, %v2390_v20 }
 0x208   : > { %v2392_v51 = vsel %vm2369_vm5, %v2357_v52, %v2391_v16 }
 0x209   : > { %v2393_v38 = vsel %vm2371_vm6, %v2358_v45, %v2392_v51 }
 0x20a   : > { %v2397_v50 = vpack.c.b16 %v2393_v38, %v2393_v38 }
 0x20c   : > { %2405 = vst [vmem:[%s3936_s10 + $0xc] sm:$0xf] %v2397_v50 }
 0x20d PF: > { %s13_s12 = sadd.s32 1, %s3360_s12  }
 0x20e   : > { %p10_p4 = scmp.ge.s32.totalorder %s13_s12, 4  }
 0x210   :  { %12 = sbr.rel (!%p10_p4) target bundleno = 1 (0x1), region = 62 }

// kernel: pig_action_3dcnn_forward.5
= control target key start
LH: loop header
LB: loop body
LE: loop exit
PB: predicated region body
PF: predicated region fallthrough
CT: control target
= control target key end

     0   :  { %vm2095_vm0 = vmmov 0   ;;  %s2594_s1 = inlined_call_operand.vmem [shape: bf16[2048,128], index: 1, kind: input, shape index: {}]   ;;  %s2595_s0 = inlined_call_operand.vmem [shape: bf16[16,2048], index: 0, kind: input, shape index: {}]   ;;  %s2596_s3 = inlined_call_operand.vmem [shape: bf16[128,128], index: 3, kind: input, shape index: {}]   ;;  %s2597_s2 = inlined_call_operand.vmem [shape: f32[1,128], index: 2, kind: input, shape index: {}]   ;;  %s2598_s4 = inlined_call_operand.vmem [shape: f32[1,128], index: 4, kind: input, shape index: {}]   ;;  %s2599_s5 = inlined_call_operand.vmem [shape: f32[16,128], index: 5, kind: output, shape index: {}]  }
   0x1   :  { %v1958_v0 = vld [vmem:[%s2594_s1 + $0x40] sm:$0xff]   ;;  %v1962_v4 = vld [vmem:[%s2594_s1 + $0x48] sm:$0xff]   ;;  %v1966_v8 = vld [vmem:[%s2594_s1 + $0x50] sm:$0xff]  }
   0x2   :  { %v1959_v1 = vld [vmem:[%s2594_s1 + $0xc0] sm:$0xff]   ;;  %1751 = vmatprep.subr.bf16.mxu0 %v1958_v0  ;;  %v1963_v5 = vld [vmem:[%s2594_s1 + $0xc8] sm:$0xff]   ;;  %v1967_v9 = vld [vmem:[%s2594_s1 + $0xd0] sm:$0xff]  }
   0x3   :  { %v1960_v2 = vld [vmem:[%s2594_s1] sm:$0xff]   ;;  %1773 = vmatprep.subr.bf16.mxu1 %v1959_v1  ;;  %v1964_v6 = vld [vmem:[%s2594_s1 + $0x8] sm:$0xff]   ;;  %v1968_v10 = vld [vmem:[%s2594_s1 + $0x10] sm:$0xff]  }
   0x4   :  { %v1961_v3 = vld [vmem:[%s2594_s1 + $0x80] sm:$0xff]   ;;  %1752 = vmatpush3.bf16.msra.mxu0 %v1960_v2  ;;  %v1965_v7 = vld [vmem:[%s2594_s1 + $0x88] sm:$0xff]   ;;  %v1969_v11 = vld [vmem:[%s2594_s1 + $0x90] sm:$0xff]  }
   0x5   :  { %1774 = vmatpush3.bf16.msra.mxu1 %v1961_v3  ;;  %1753 = vmatprep.subr.bf16.mxu0 %v1962_v4  ;;  %v1970_v12 = vld [vmem:[%s2594_s1 + $0x58] sm:$0xff]   ;;  %v1974_v16 = vld [vmem:[%s2594_s1 + $0x60] sm:$0xff]   ;;  %v1978_v20 = vld [vmem:[%s2594_s1 + $0x68] sm:$0xff]  }
   0x6   :  { %1775 = vmatprep.subr.bf16.mxu1 %v1963_v5  ;;  %v1971_v13 = vld [vmem:[%s2594_s1 + $0xd8] sm:$0xff]   ;;  %v1975_v17 = vld [vmem:[%s2594_s1 + $0xe0] sm:$0xff]   ;;  %v1979_v21 = vld [vmem:[%s2594_s1 + $0xe8] sm:$0xff]  }
   0x7   :  { %v1972_v14 = vld [vmem:[%s2594_s1 + $0x18] sm:$0xff]   ;;  %v1976_v18 = vld [vmem:[%s2594_s1 + $0x20] sm:$0xff]   ;;  %v1980_v22 = vld [vmem:[%s2594_s1 + $0x28] sm:$0xff]  }
   0x8   :  { %1754 = vmatpush3.bf16.msra.mxu0 %v1964_v6  ;;  %v1973_v15 = vld [vmem:[%s2594_s1 + $0x98] sm:$0xff]   ;;  %v1977_v19 = vld [vmem:[%s2594_s1 + $0xa0] sm:$0xff]   ;;  %v1981_v23 = vld [vmem:[%s2594_s1 + $0xa8] sm:$0xff]  }
   0x9   :  { %1776 = vmatpush3.bf16.msra.mxu1 %v1965_v7  ;;  %1755 = vmatprep.subr.bf16.mxu0 %v1966_v8  ;;  %v1982_v24 = vld [vmem:[%s2594_s1 + $0x70] sm:$0xff]   ;;  %v1986_v28 = vld [vmem:[%s2594_s1 + $0x78] sm:$0xff]   ;;  %v21_v32 = vld [vmem:[%s2595_s0] sm:$0xff] }
   0xa   :  { %1777 = vmatprep.subr.bf16.mxu1 %v1967_v9  ;;  %v1983_v25 = vld [vmem:[%s2594_s1 + $0xf0] sm:$0xff]   ;;  %v1987_v29 = vld [vmem:[%s2594_s1 + $0xf8] sm:$0xff]   ;;  %v29_v33 = vld [vmem:[%s2595_s0 + $0x40] sm:$0xff] }
   0xb   :  { %v1984_v26 = vld [vmem:[%s2594_s1 + $0x30] sm:$0xff]   ;;  %v1988_v30 = vld [vmem:[%s2594_s1 + $0x38] sm:$0xff]   ;;  %v22_v34 = vld [vmem:[%s2595_s0 + $0x8] sm:$0xff]  ;;  %v1598_v35 = vcombine.low %v21_v32, %v29_v33  ;;  %v1599_v36 = vcombine.high %v21_v32, %v29_v33 }
   0xc   :  { %1756 = vmatpush3.bf16.msra.mxu0 %v1968_v10  ;;  %v1985_v27 = vld [vmem:[%s2594_s1 + $0xb0] sm:$0xff]   ;;  %v1989_v31 = vld [vmem:[%s2594_s1 + $0xb8] sm:$0xff]   ;;  %v30_v37 = vld [vmem:[%s2595_s0 + $0x48] sm:$0xff] }
   0xd   :  { %1778 = vmatpush3.bf16.msra.mxu1 %v1969_v11  ;;  %1757 = vmatprep.subr.bf16.mxu0 %v1970_v12  ;;  %v1600_v38 = vcombine.low %v22_v34, %v30_v37  ;;  %v1601_v39 = vcombine.high %v22_v34, %v30_v37  ;;  %v1990_v40 = vld [vmem:[%s2594_s1 + $0x140] sm:$0xff]   ;;  %v1994_v44 = vld [vmem:[%s2594_s1 + $0x148] sm:$0xff]   ;;  %v1998_v48 = vld [vmem:[%s2594_s1 + $0x150] sm:$0xff]  }
   0xe   :  { %1779 = vmatprep.subr.bf16.mxu1 %v1971_v13  ;;  %1180 = vmatprep.mubr.bf16.mxu0 %v1599_v36  ;;  %v1991_v41 = vld [vmem:[%s2594_s1 + $0x1c0] sm:$0xff]   ;;  %v1995_v45 = vld [vmem:[%s2594_s1 + $0x1c8] sm:$0xff]   ;;  %v1999_v49 = vld [vmem:[%s2594_s1 + $0x1d0] sm:$0xff]  }
   0xf   :  { %1221 = vmatprep.mubr.bf16.mxu1 %v1601_v39  ;;  %v1992_v42 = vld [vmem:[%s2594_s1 + $0x100] sm:$0xff]   ;;  %v1996_v46 = vld [vmem:[%s2594_s1 + $0x108] sm:$0xff]   ;;  %v2000_v50 = vld [vmem:[%s2594_s1 + $0x110] sm:$0xff]  }
  0x10   :  { %1758 = vmatpush3.bf16.msra.mxu0 %v1972_v14  ;;  %v1993_v43 = vld [vmem:[%s2594_s1 + $0x180] sm:$0xff]   ;;  %v1997_v47 = vld [vmem:[%s2594_s1 + $0x188] sm:$0xff]   ;;  %v2001_v51 = vld [vmem:[%s2594_s1 + $0x190] sm:$0xff]  }
  0x11   :  { %1780 = vmatpush3.bf16.msra.mxu1 %v1973_v15  ;;  %1759 = vmatprep.subr.bf16.mxu0 %v1974_v16  ;;  %v2002_v52 = vld [vmem:[%s2594_s1 + $0x158] sm:$0xff]   ;;  %v2006_v56 = vld [vmem:[%s2594_s1 + $0x160] sm:$0xff]   ;;  %v2010_v60 = vld [vmem:[%s2594_s1 + $0x168] sm:$0xff]  }
  0x12   :  { %1781 = vmatprep.subr.bf16.mxu1 %v1975_v17  ;;  %v2003_v53 = vld [vmem:[%s2594_s1 + $0x1d8] sm:$0xff]   ;;  %v2007_v57 = vld [vmem:[%s2594_s1 + $0x1e0] sm:$0xff]   ;;  %v2011_v61 = vld [vmem:[%s2594_s1 + $0x1e8] sm:$0xff]  }
  0x13   :  { %v2004_v54 = vld [vmem:[%s2594_s1 + $0x118] sm:$0xff]   ;;  %v2008_v58 = vld [vmem:[%s2594_s1 + $0x120] sm:$0xff]   ;;  %v2012_v62 = vld [vmem:[%s2594_s1 + $0x128] sm:$0xff]  }
  0x14   :  { %1760 = vmatpush3.bf16.msra.mxu0 %v1976_v18  ;;  %v2005_v55 = vld [vmem:[%s2594_s1 + $0x198] sm:$0xff]   ;;  %v2009_v59 = vld [vmem:[%s2594_s1 + $0x1a0] sm:$0xff]   ;;  %v2013_v63 = vld [vmem:[%s2594_s1 + $0x1a8] sm:$0xff]  }
  0x15   :  { %1782 = vmatpush3.bf16.msra.mxu1 %v1977_v19  ;;  %1761 = vmatprep.subr.bf16.mxu0 %v1978_v20  ;;  %v2014_v0 = vld [vmem:[%s2594_s1 + $0x170] sm:$0xff]   ;;  %v2018_v4 = vld [vmem:[%s2594_s1 + $0x178] sm:$0xff]   ;;  %v2022_v16 = vld [vmem:[%s2594_s1 + $0x240] sm:$0xff]  }
  0x16   :  { %1783 = vmatprep.subr.bf16.mxu1 %v1979_v21  ;;  %v2015_v1 = vld [vmem:[%s2594_s1 + $0x1f0] sm:$0xff]   ;;  %v2019_v5 = vld [vmem:[%s2594_s1 + $0x1f8] sm:$0xff]   ;;  %v2023_v17 = vld [vmem:[%s2594_s1 + $0x2c0] sm:$0xff]  }
  0x17   :  { %v2016_v2 = vld [vmem:[%s2594_s1 + $0x130] sm:$0xff]   ;;  %v2020_v6 = vld [vmem:[%s2594_s1 + $0x138] sm:$0xff]   ;;  %v2024_v18 = vld [vmem:[%s2594_s1 + $0x200] sm:$0xff]  }
  0x18   :  { %1762 = vmatpush3.bf16.msra.mxu0 %v1980_v22  ;;  %v2017_v3 = vld [vmem:[%s2594_s1 + $0x1b0] sm:$0xff]   ;;  %v2021_v7 = vld [vmem:[%s2594_s1 + $0x1b8] sm:$0xff]   ;;  %v2025_v19 = vld [vmem:[%s2594_s1 + $0x280] sm:$0xff]  }
  0x19   :  { %1784 = vmatpush3.bf16.msra.mxu1 %v1981_v23  ;;  %1763 = vmatprep.subr.bf16.mxu0 %v1982_v24  ;;  %v23_v8 = vld [vmem:[%s2595_s0 + $0x10] sm:$0xff]  ;;  %v24_v12 = vld [vmem:[%s2595_s0 + $0x18] sm:$0xff]  ;;  %v2026_v20 = vld [vmem:[%s2594_s1 + $0x248] sm:$0xff]  }
  0x1a   :  { %1785 = vmatprep.subr.bf16.mxu1 %v1983_v25  ;;  %v31_v9 = vld [vmem:[%s2595_s0 + $0x50] sm:$0xff]  ;;  %v32_v13 = vld [vmem:[%s2595_s0 + $0x58] sm:$0xff]  ;;  %v2027_v21 = vld [vmem:[%s2594_s1 + $0x2c8] sm:$0xff]  }
  0x1b   :  { %v1602_v10 = vcombine.low %v23_v8, %v31_v9  ;;  %v1603_v11 = vcombine.high %v23_v8, %v31_v9  ;;  %v1604_v14 = vcombine.low %v24_v12, %v32_v13  ;;  %v1605_v15 = vcombine.high %v24_v12, %v32_v13  ;;  %v2028_v22 = vld [vmem:[%s2594_s1 + $0x208] sm:$0xff]   ;;  %v2030_v24 = vld [vmem:[%s2594_s1 + $0x250] sm:$0xff]   ;;  %v2038_v32 = vld [vmem:[%s2594_s1 + $0x260] sm:$0xff]  }
  0x1c   :  { %1764 = vmatpush3.bf16.msra.mxu0 %v1984_v26  ;;  %v2029_v23 = vld [vmem:[%s2594_s1 + $0x288] sm:$0xff]   ;;  %v2031_v25 = vld [vmem:[%s2594_s1 + $0x2d0] sm:$0xff]   ;;  %v2039_v33 = vld [vmem:[%s2594_s1 + $0x2e0] sm:$0xff]  }
  0x1d   :  { %1786 = vmatpush3.bf16.msra.mxu1 %v1985_v27  ;;  %1765 = vmatprep.subr.bf16.mxu0 %v1986_v28  ;;  %v2032_v26 = vld [vmem:[%s2594_s1 + $0x210] sm:$0xff]   ;;  %v2034_v28 = vld [vmem:[%s2594_s1 + $0x258] sm:$0xff]   ;;  %v2040_v34 = vld [vmem:[%s2594_s1 + $0x220] sm:$0xff]  }
  0x1e   :  { %1787 = vmatprep.subr.bf16.mxu1 %v1987_v29  ;;  %v2033_v27 = vld [vmem:[%s2594_s1 + $0x290] sm:$0xff]   ;;  %v2035_v29 = vld [vmem:[%s2594_s1 + $0x2d8] sm:$0xff]   ;;  %v2042_v36 = vld [vmem:[%s2594_s1 + $0x268] sm:$0xff]  }
  0x1f   :  { %v2043_v37 = vld [vmem:[%s2594_s1 + $0x2e8] sm:$0xff]   ;;  %v2070_v8 = vld [vmem:[%s2594_s1 + $0x360] sm:$0xff]  }
  0x20   :  { %1766 = vmatpush3.bf16.msra.mxu0 %v1988_v30  ;;  %v2036_v30 = vld [vmem:[%s2594_s1 + $0x218] sm:$0xff]   ;;  %v2045_v39 = vld [vmem:[%s2594_s1 + $0x2a8] sm:$0xff]   ;;  %v2071_v9 = vld [vmem:[%s2594_s1 + $0x3e0] sm:$0xff]  }
  0x21   :  { %1788 = vmatpush3.bf16.msra.mxu1 %v1989_v31  ;;  %1795 = vmatprep.subr.bf16.mxu0 %v1990_v40  ;;  %v2037_v31 = vld [vmem:[%s2594_s1 + $0x298] sm:$0xff]   ;;  %v2046_v40 = vld [vmem:[%s2594_s1 + $0x270] sm:$0xff]   ;;  %v2074_v12 = vld [vmem:[%s2594_s1 + $0x368] sm:$0xff]  }
  0x22   :  { %1817 = vmatprep.subr.bf16.mxu1 %v1991_v41  ;;  %v2047_v41 = vld [vmem:[%s2594_s1 + $0x2f0] sm:$0xff]   ;;  %v2075_v13 = vld [vmem:[%s2594_s1 + $0x3e8] sm:$0xff]  }
  0x23   :  { %1181 = vmatmul.mubr.bf16.vlgmr.msra.gmra.mrb[0].mxu0 %v1598_v35  ;;  %v2041_v35 = vld [vmem:[%s2594_s1 + $0x2a0] sm:$0xff]  }
  0x24   :  { %1222 = vmatmul.mubr.bf16.vlgmr.msra.gmra.mrb[0].mxu1 %v1600_v38  ;;  %1796 = vmatpush3.bf16.msra.mxu0 %v1992_v42  ;;  %v2044_v38 = vld [vmem:[%s2594_s1 + $0x228] sm:$0xff]   ;;  %v2048_v42 = vld [vmem:[%s2594_s1 + $0x230] sm:$0xff]  }
  0x25   :  { %1818 = vmatpush3.bf16.msra.mxu1 %v1993_v43  ;;  %1797 = vmatprep.subr.bf16.mxu0 %v1994_v44  ;;  %v2049_v43 = vld [vmem:[%s2594_s1 + $0x2b0] sm:$0xff]   ;;  %v2050_v44 = vld [vmem:[%s2594_s1 + $0x278] sm:$0xff]  }
  0x26   :  { %1819 = vmatprep.subr.bf16.mxu1 %v1995_v45  ;;  %1262 = vmatprep.mubr.bf16.mxu0 %v1603_v11  ;;  %v2051_v45 = vld [vmem:[%s2594_s1 + $0x2f8] sm:$0xff]   ;;  %v2073_v11 = vld [vmem:[%s2594_s1 + $0x3a0] sm:$0xff]  }
  0x27   :  { %1303 = vmatprep.mubr.bf16.mxu1 %v1605_v15  ;;  %v2077_v15 = vld [vmem:[%s2594_s1 + $0x3a8] sm:$0xff]  }
  0x28   :  { %1798 = vmatpush3.bf16.msra.mxu0 %v1996_v46  ;;  %v2052_v46 = vld [vmem:[%s2594_s1 + $0x238] sm:$0xff]  }
  0x29   :  { %1820 = vmatpush3.bf16.msra.mxu1 %v1997_v47  ;;  %1799 = vmatprep.subr.bf16.mxu0 %v1998_v48  ;;  %v2053_v47 = vld [vmem:[%s2594_s1 + $0x2b8] sm:$0xff]   ;;  %v25_v48 = vld [vmem:[%s2595_s0 + $0x20] sm:$0xff] }
  0x2a   :  { %1821 = vmatprep.subr.bf16.mxu1 %v1999_v49  ;;  %v33_v49 = vld [vmem:[%s2595_s0 + $0x60] sm:$0xff] }
  0x2c   :  { %1800 = vmatpush3.bf16.msra.mxu0 %v2000_v50  ;;  %v26_v50 = vld [vmem:[%s2595_s0 + $0x28] sm:$0xff] }
  0x2d   :  { %1822 = vmatpush3.bf16.msra.mxu1 %v2001_v51  ;;  %1801 = vmatprep.subr.bf16.mxu0 %v2002_v52  ;;  %v34_v51 = vld [vmem:[%s2595_s0 + $0x68] sm:$0xff]  ;;  %v1606_v52 = vcombine.low %v25_v48, %v33_v49 }
  0x2e   :  { %1823 = vmatprep.subr.bf16.mxu1 %v2003_v53  ;;  %v1607_v53 = vcombine.high %v25_v48, %v33_v49 }
  0x30   :  { %1802 = vmatpush3.bf16.msra.mxu0 %v2004_v54  ;;  %v1608_v54 = vcombine.low %v26_v50, %v34_v51 }
  0x31   :  { %1824 = vmatpush3.bf16.msra.mxu1 %v2005_v55  ;;  %1803 = vmatprep.subr.bf16.mxu0 %v2006_v56  ;;  %v1609_v55 = vcombine.high %v26_v50, %v34_v51  ;;  %v2054_v56 = vld [vmem:[%s2594_s1 + $0x340] sm:$0xff]  }
  0x32   :  { %1825 = vmatprep.subr.bf16.mxu1 %v2007_v57  ;;  %v2055_v57 = vld [vmem:[%s2594_s1 + $0x3c0] sm:$0xff]  }
  0x34   :  { %1804 = vmatpush3.bf16.msra.mxu0 %v2008_v58  ;;  %v2056_v58 = vld [vmem:[%s2594_s1 + $0x300] sm:$0xff]  }
  0x35   :  { %1826 = vmatpush3.bf16.msra.mxu1 %v2009_v59  ;;  %1805 = vmatprep.subr.bf16.mxu0 %v2010_v60  ;;  %v2057_v59 = vld [vmem:[%s2594_s1 + $0x380] sm:$0xff]   ;;  %v2058_v60 = vld [vmem:[%s2594_s1 + $0x348] sm:$0xff]  }
  0x36   :  { %1827 = vmatprep.subr.bf16.mxu1 %v2011_v61  ;;  %v2059_v61 = vld [vmem:[%s2594_s1 + $0x3c8] sm:$0xff]  }
  0x38   :  { %1806 = vmatpush3.bf16.msra.mxu0 %v2012_v62  ;;  %v2060_v62 = vld [vmem:[%s2594_s1 + $0x308] sm:$0xff]  }
  0x39   :  { %1828 = vmatpush3.bf16.msra.mxu1 %v2013_v63  ;;  %1807 = vmatprep.subr.bf16.mxu0 %v2014_v0  ;;  %v2061_v63 = vld [vmem:[%s2594_s1 + $0x388] sm:$0xff]   ;;  %v2062_v0 = vld [vmem:[%s2594_s1 + $0x350] sm:$0xff]  }
  0x3a   :  { %1829 = vmatprep.subr.bf16.mxu1 %v2015_v1  ;;  %v2063_v1 = vld [vmem:[%s2594_s1 + $0x3d0] sm:$0xff]  }
  0x3c   :  { %1808 = vmatpush3.bf16.msra.mxu0 %v2016_v2  ;;  %v2064_v2 = vld [vmem:[%s2594_s1 + $0x310] sm:$0xff]  }
  0x3d   :  { %1830 = vmatpush3.bf16.msra.mxu1 %v2017_v3  ;;  %1809 = vmatprep.subr.bf16.mxu0 %v2018_v4  ;;  %v2065_v3 = vld [vmem:[%s2594_s1 + $0x390] sm:$0xff]   ;;  %v2066_v4 = vld [vmem:[%s2594_s1 + $0x358] sm:$0xff]  }
  0x3e   :  { %1831 = vmatprep.subr.bf16.mxu1 %v2019_v5  ;;  %v2067_v5 = vld [vmem:[%s2594_s1 + $0x3d8] sm:$0xff]  }
  0x40   :  { %1810 = vmatpush3.bf16.msra.mxu0 %v2020_v6  ;;  %v2068_v6 = vld [vmem:[%s2594_s1 + $0x318] sm:$0xff]  }
  0x41   :  { %1832 = vmatpush3.bf16.msra.mxu1 %v2021_v7  ;;  %1839 = vmatprep.subr.bf16.mxu0 %v2022_v16  ;;  %v2069_v7 = vld [vmem:[%s2594_s1 + $0x398] sm:$0xff]   ;;  %v2078_v16 = vld [vmem:[%s2594_s1 + $0x370] sm:$0xff]  }
  0x42   :  { %1861 = vmatprep.subr.bf16.mxu1 %v2023_v17  ;;  %v2079_v17 = vld [vmem:[%s2594_s1 + $0x3f0] sm:$0xff]  }
  0x43   :  { %1263 = vmatmul.mubr.bf16.vlgmr.msra.gmra.mrb[4].mxu0 %v1602_v10  ;;  %v2072_v10 = vld [vmem:[%s2594_s1 + $0x320] sm:$0xff]  }
  0x44   :  { %1304 = vmatmul.mubr.bf16.vlgmr.msra.gmra.mrb[4].mxu1 %v1604_v14  ;;  %1840 = vmatpush3.bf16.msra.mxu0 %v2024_v18  ;;  %v2076_v14 = vld [vmem:[%s2594_s1 + $0x328] sm:$0xff]   ;;  %v2080_v18 = vld [vmem:[%s2594_s1 + $0x330] sm:$0xff]  }
  0x45   :  { %1862 = vmatpush3.bf16.msra.mxu1 %v2025_v19  ;;  %1841 = vmatprep.subr.bf16.mxu0 %v2026_v20  ;;  %v2081_v19 = vld [vmem:[%s2594_s1 + $0x3b0] sm:$0xff]   ;;  %v2082_v20 = vld [vmem:[%s2594_s1 + $0x378] sm:$0xff]  }
  0x46   :  { %1863 = vmatprep.subr.bf16.mxu1 %v2027_v21  ;;  %1344 = vmatprep.mubr.bf16.mxu0 %v1607_v53  ;;  %v2083_v21 = vld [vmem:[%s2594_s1 + $0x3f8] sm:$0xff]  }
  0x47   :  { %1385 = vmatprep.mubr.bf16.mxu1 %v1609_v55 }
  0x48   :  { %1842 = vmatpush3.bf16.msra.mxu0 %v2028_v22  ;;  %v2084_v22 = vld [vmem:[%s2594_s1 + $0x338] sm:$0xff]  }
  0x49   :  { %1864 = vmatpush3.bf16.msra.mxu1 %v2029_v23  ;;  %1843 = vmatprep.subr.bf16.mxu0 %v2030_v24  ;;  %v2085_v23 = vld [vmem:[%s2594_s1 + $0x3b8] sm:$0xff]   ;;  %v27_v24 = vld [vmem:[%s2595_s0 + $0x30] sm:$0xff] }
  0x4a   :  { %1865 = vmatprep.subr.bf16.mxu1 %v2031_v25  ;;  %v35_v25 = vld [vmem:[%s2595_s0 + $0x70] sm:$0xff] }
  0x4c   :  { %1844 = vmatpush3.bf16.msra.mxu0 %v2032_v26  ;;  %v28_v26 = vld [vmem:[%s2595_s0 + $0x38] sm:$0xff] }
  0x4d   :  { %1866 = vmatpush3.bf16.msra.mxu1 %v2033_v27  ;;  %1845 = vmatprep.subr.bf16.mxu0 %v2034_v28  ;;  %v1610_v27 = vcombine.low %v27_v24, %v35_v25  ;;  %v1611_v28 = vcombine.high %v27_v24, %v35_v25 }
  0x4e   :  { %1867 = vmatprep.subr.bf16.mxu1 %v2035_v29  ;;  %v36_v29 = vld [vmem:[%s2595_s0 + $0x78] sm:$0xff] }
  0x50   :  { %1846 = vmatpush3.bf16.msra.mxu0 %v2036_v30  ;;  %v1612_v30 = vcombine.low %v28_v26, %v36_v29 }
  0x51   :  { %1868 = vmatpush3.bf16.msra.mxu1 %v2037_v31  ;;  %1847 = vmatprep.subr.bf16.mxu0 %v2038_v32  ;;  %v1613_v31 = vcombine.high %v28_v26, %v36_v29  ;;  %v2094_v32 = vmov 0.0  }
  0x52   :  { %1869 = vmatprep.subr.bf16.mxu1 %v2039_v33  ;;  %v2086_v33 = vld [vmem:[%s2596_s3] sm:$0xff]  }
  0x54   :  { %1848 = vmatpush3.bf16.msra.mxu0 %v2040_v34  ;;  %v2087_v34 = vld [vmem:[%s2596_s3 + $0x8] sm:$0xff]  }
  0x55   :  { %1870 = vmatpush3.bf16.msra.mxu1 %v2041_v35  ;;  %1849 = vmatprep.subr.bf16.mxu0 %v2042_v36  ;;  %v2088_v35 = vld [vmem:[%s2596_s3 + $0x10] sm:$0xff]   ;;  %v2089_v36 = vld [vmem:[%s2596_s3 + $0x18] sm:$0xff]  }
  0x56   :  { %1871 = vmatprep.subr.bf16.mxu1 %v2043_v37  ;;  %v2090_v37 = vld [vmem:[%s2596_s3 + $0x20] sm:$0xff]  }
  0x58   :  { %1850 = vmatpush3.bf16.msra.mxu0 %v2044_v38  ;;  %v2091_v38 = vld [vmem:[%s2596_s3 + $0x28] sm:$0xff]  }
  0x59   :  { %1872 = vmatpush3.bf16.msra.mxu1 %v2045_v39  ;;  %1851 = vmatprep.subr.bf16.mxu0 %v2046_v40  ;;  %v2092_v39 = vld [vmem:[%s2596_s3 + $0x30] sm:$0xff]   ;;  %v2093_v40 = vld [vmem:[%s2596_s3 + $0x38] sm:$0xff]  }
  0x5a   :  { %1873 = vmatprep.subr.bf16.mxu1 %v2047_v41 }
  0x5c   :  { %1852 = vmatpush3.bf16.msra.mxu0 %v2048_v42 }
  0x5d   :  { %1874 = vmatpush3.bf16.msra.mxu1 %v2049_v43  ;;  %1853 = vmatprep.subr.bf16.mxu0 %v2050_v44  ;;  %v1597_v43 = vld [vmem:[%s2597_s2] ss:$0 sm:$0xff] }
  0x5e   :  { %1875 = vmatprep.subr.bf16.mxu1 %v2051_v45 }
  0x60   :  { %1854 = vmatpush3.bf16.msra.mxu0 %v2052_v46 }
  0x61   :  { %1876 = vmatpush3.bf16.msra.mxu1 %v2053_v47  ;;  %1883 = vmatprep.subr.bf16.mxu0 %v2054_v56 }
  0x62   :  { %1905 = vmatprep.subr.bf16.mxu1 %v2055_v57 }
  0x63   :  { %1345 = vmatmul.mubr.bf16.vlgmr.msra.gmra.mrb[8].mxu0 %v1606_v52 }
  0x64   :  { %1386 = vmatmul.mubr.bf16.vlgmr.msra.gmra.mrb[8].mxu1 %v1608_v54  ;;  %1884 = vmatpush3.bf16.msra.mxu0 %v2056_v58 }
  0x65   :  { %1906 = vmatpush3.bf16.msra.mxu1 %v2057_v59  ;;  %1885 = vmatprep.subr.bf16.mxu0 %v2058_v60 }
  0x66   :  { %1907 = vmatprep.subr.bf16.mxu1 %v2059_v61  ;;  %1426 = vmatprep.mubr.bf16.mxu0 %v1611_v28 }
  0x67   :  { %1467 = vmatprep.mubr.bf16.mxu1 %v1613_v31 }
  0x68   :  { %1886 = vmatpush3.bf16.msra.mxu0 %v2060_v62 }
  0x69   :  { %1908 = vmatpush3.bf16.msra.mxu1 %v2061_v63  ;;  %1887 = vmatprep.subr.bf16.mxu0 %v2062_v0 }
  0x6a   :  { %1909 = vmatprep.subr.bf16.mxu1 %v2063_v1 }
  0x6c   :  { %1888 = vmatpush3.bf16.msra.mxu0 %v2064_v2 }
  0x6d   :  { %1910 = vmatpush3.bf16.msra.mxu1 %v2065_v3  ;;  %1889 = vmatprep.subr.bf16.mxu0 %v2066_v4 }
  0x6e   :  { %1911 = vmatprep.subr.bf16.mxu1 %v2067_v5 }
  0x70   :  { %1890 = vmatpush3.bf16.msra.mxu0 %v2068_v6 }
  0x71   :  { %1912 = vmatpush3.bf16.msra.mxu1 %v2069_v7  ;;  %1891 = vmatprep.subr.bf16.mxu0 %v2070_v8 }
  0x72   :  { %1913 = vmatprep.subr.bf16.mxu1 %v2071_v9 }
  0x74   :  { %1892 = vmatpush3.bf16.msra.mxu0 %v2072_v10 }
  0x75   :  { %1914 = vmatpush3.bf16.msra.mxu1 %v2073_v11  ;;  %1893 = vmatprep.subr.bf16.mxu0 %v2074_v12 }
  0x76   :  { %1915 = vmatprep.subr.bf16.mxu1 %v2075_v13 }
  0x78   :  { %1894 = vmatpush3.bf16.msra.mxu0 %v2076_v14 }
  0x79   :  { %1916 = vmatpush3.bf16.msra.mxu1 %v2077_v15  ;;  %1895 = vmatprep.subr.bf16.mxu0 %v2078_v16 }
  0x7a   :  { %1917 = vmatprep.subr.bf16.mxu1 %v2079_v17 }
  0x7c   :  { %1896 = vmatpush3.bf16.msra.mxu0 %v2080_v18 }
  0x7d   :  { %1918 = vmatpush3.bf16.msra.mxu1 %v2081_v19  ;;  %1897 = vmatprep.subr.bf16.mxu0 %v2082_v20 }
  0x7e   :  { %1919 = vmatprep.subr.bf16.mxu1 %v2083_v21 }
  0x80   :  { %1898 = vmatpush3.bf16.msra.mxu0 %v2084_v22 }
  0x81   :  { %1920 = vmatpush3.bf16.msra.mxu1 %v2085_v23  ;;  %1936 = vmatprep.subr.bf16.mxu0 %v2094_v32 }
  0x83   :  { %1427 = vmatmul.mubr.bf16.vlgmr.msra.gmra.mrb[12].mxu0 %v1610_v27 }
  0x84   :  { %1468 = vmatmul.mubr.bf16.vlgmr.msra.gmra.mrb[12].mxu1 %v1612_v30  ;;  %1937 = vmatpush3.bf16.msra.mxu0 %v2086_v33 }
  0x85   :  { %1938 = vmatprep.subr.bf16.mxu0 %v2094_v32  ;;  %1952 = vmatprep.mubr.msk.bf16.mxu0 %vm2095_vm0, %v2094_v32 }
  0x88   :  { %1939 = vmatpush3.bf16.msra.mxu0 %v2087_v34 }
  0x89   :  { %1940 = vmatprep.subr.bf16.mxu0 %v2094_v32 }
  0x8c   :  { %1941 = vmatpush3.bf16.msra.mxu0 %v2088_v35 }
  0x8d   :  { %1942 = vmatprep.subr.bf16.mxu0 %v2094_v32 }
  0x90   :  { %1943 = vmatpush3.bf16.msra.mxu0 %v2089_v36 }
  0x91   :  { %1944 = vmatprep.subr.bf16.mxu0 %v2094_v32 }
  0x94   :  { %1945 = vmatpush3.bf16.msra.mxu0 %v2090_v37 }
  0x95   :  { %1946 = vmatprep.subr.bf16.mxu0 %v2094_v32 }
  0x98   :  { %1947 = vmatpush3.bf16.msra.mxu0 %v2091_v38 }
  0x99   :  { %1948 = vmatprep.subr.bf16.mxu0 %v2094_v32 }
  0x9c   :  { %1949 = vmatpush3.bf16.msra.mxu0 %v2092_v39 }
  0x9d   :  { %1950 = vmatprep.subr.bf16.mxu0 %v2094_v32 }
  0xa0   :  { %1951 = vmatpush3.bf16.msra.mxu0 %v2093_v40 }
  0xf6   :  { %v1767_v41 = vpop.f32.mrb[0].mxu0 }
  0xf7   :  { %v1789_v42 = vpop.f32.mrb[0].mxu1  ;;  %v1768_v44 = vpop.f32.mrb[1].mxu0 }
  0xf8   :  { %v1769_v45 = vadd.f32 %v1768_v44, %v1767_v41  ;;  %v1790_v46 = vpop.f32.mrb[1].mxu1  ;;  %v1770_v47 = vpop.f32.mrb[2].mxu0 }
  0xf9   :  { %v1791_v48 = vadd.f32 %v1790_v46, %v1789_v42  ;;  %v1792_v49 = vpop.f32.mrb[2].mxu1  ;;  %v1771_v50 = vpop.f32.mrb[3].mxu0 }
  0xfa   :  { %v1183_v51 = vadd.f32 %v1769_v45, %v1597_v43  ;;  %v1772_v52 = vadd.f32 %v1771_v50, %v1770_v47  ;;  %v1793_v53 = vpop.f32.mrb[3].mxu1  ;;  %v1742_v45 = vld [vmem:[%s2598_s4] ss:$0 sm:$0xff] }
  0xfb   :  { %v1794_v54 = vadd.f32 %v1793_v53, %v1792_v49 }
  0xfc   :  { %v1224_v55 = vadd.f32 %v1791_v48, %v1183_v51  ;;  %v1186_v56 = vadd.f32 %v1772_v52, %v1597_v43 }
  0xfe   :  { %v1227_v57 = vadd.f32 %v1794_v54, %v1186_v56 }
 0x116   :  { %v1811_v58 = vpop.f32.mrb[4].mxu0 }
 0x117   :  { %v1833_v59 = vpop.f32.mrb[4].mxu1  ;;  %v1812_v60 = vpop.f32.mrb[5].mxu0 }
 0x118   :  { %v1813_v61 = vadd.f32 %v1812_v60, %v1811_v58  ;;  %v1834_v62 = vpop.f32.mrb[5].mxu1  ;;  %v1814_v63 = vpop.f32.mrb[6].mxu0 }
 0x119   :  { %v1835_v0 = vadd.f32 %v1834_v62, %v1833_v59  ;;  %v1836_v1 = vpop.f32.mrb[6].mxu1  ;;  %v1815_v2 = vpop.f32.mrb[7].mxu0 }
 0x11a   :  { %v1265_v3 = vadd.f32 %v1813_v61, %v1224_v55  ;;  %v1816_v4 = vadd.f32 %v1815_v2, %v1814_v63  ;;  %v1837_v5 = vpop.f32.mrb[7].mxu1 }
 0x11b   :  { %v1838_v6 = vadd.f32 %v1837_v5, %v1836_v1 }
 0x11c   :  { %v1306_v7 = vadd.f32 %v1835_v0, %v1265_v3  ;;  %v1268_v8 = vadd.f32 %v1816_v4, %v1227_v57 }
 0x11e   :  { %v1309_v9 = vadd.f32 %v1838_v6, %v1268_v8 }
 0x136   :  { %v1855_v10 = vpop.f32.mrb[8].mxu0 }
 0x137   :  { %v1877_v11 = vpop.f32.mrb[8].mxu1  ;;  %v1856_v12 = vpop.f32.mrb[9].mxu0 }
 0x138   :  { %v1878_v13 = vpop.f32.mrb[9].mxu1  ;;  %v1857_v14 = vadd.f32 %v1856_v12, %v1855_v10  ;;  %v1858_v16 = vpop.f32.mrb[10].mxu0 }
 0x139   :  { %v1879_v15 = vadd.f32 %v1878_v13, %v1877_v11  ;;  %v1880_v17 = vpop.f32.mrb[10].mxu1  ;;  %v1859_v18 = vpop.f32.mrb[11].mxu0 }
 0x13a   :  { %v1881_v19 = vpop.f32.mrb[11].mxu1  ;;  %v1347_v20 = vadd.f32 %v1857_v14, %v1306_v7  ;;  %v1860_v21 = vadd.f32 %v1859_v18, %v1858_v16 }
 0x13b   :  { %v1882_v22 = vadd.f32 %v1881_v19, %v1880_v17 }
 0x13c   :  { %v1388_v23 = vadd.f32 %v1879_v15, %v1347_v20  ;;  %v1350_v24 = vadd.f32 %v1860_v21, %v1309_v9 }
 0x13e   :  { %v1391_v25 = vadd.f32 %v1882_v22, %v1350_v24 }
 0x156   :  { %v1899_v26 = vpop.f32.mrb[12].mxu0 }
 0x157   :  { %v1921_v27 = vpop.f32.mrb[12].mxu1  ;;  %v1900_v28 = vpop.f32.mrb[13].mxu0 }
 0x158   :  { %v1901_v29 = vadd.f32 %v1900_v28, %v1899_v26  ;;  %v1922_v30 = vpop.f32.mrb[13].mxu1  ;;  %v1902_v31 = vpop.f32.mrb[14].mxu0 }
 0x159   :  { %v1923_v32 = vadd.f32 %v1922_v30, %v1921_v27  ;;  %v1924_v33 = vpop.f32.mrb[14].mxu1  ;;  %v1903_v34 = vpop.f32.mrb[15].mxu0 }
 0x15a   :  { %v1429_v35 = vadd.f32 %v1901_v29, %v1388_v23  ;;  %v1904_v36 = vadd.f32 %v1903_v34, %v1902_v31  ;;  %v1925_v37 = vpop.f32.mrb[15].mxu1 }
 0x15b   :  { %v1926_v38 = vadd.f32 %v1925_v37, %v1924_v33 }
 0x15c   :  { %v1470_v39 = vadd.f32 %v1923_v32, %v1429_v35  ;;  %v1432_v40 = vadd.f32 %v1904_v36, %v1391_v25 }
 0x15e   :  { %v1473_v41 = vadd.f32 %v1926_v38, %v1432_v40  ;;  %v1476_v42 = vmax.f32 %v1470_v39, 0.0 }
 0x160   :  { %v1477_v43 = vmax.f32 %v1473_v41, 0.0 }
 0x162   :  { %v1478_v44 = vpack.c.bf16 %v1477_v43, %v1476_v42 }
 0x164   :  { %1953 = vmatmul.mubr.bf16.vlgmr.msra.gmra.mrb[16].mxu0 %v1478_v44 }
 0x237   :  { %v1584_v46 = vpop.f32.mrb[16].mxu0 }
 0x238   :  { %v1585_v47 = vadd.f32 %v1742_v45, %v1584_v46  ;;  %v1954_v48 = vpop.f32.mrb[17].mxu0 }
 0x239   :  { %v1587_v49 = vpop.f32.mrb[18].mxu0 }
 0x23a   :  { %1591 = vst [vmem:[%s2599_s5] sm:$0xff] %v1585_v47  ;;  %v1588_v50 = vadd.f32 %v1742_v45, %v1587_v49  ;;  %v1955_v51 = vpop.f32.mrb[19].mxu0 }
 0x23c   :  { %1592 = vst [vmem:[%s2599_s5 + $0x8] sm:$0xff] %v1588_v50 }

</bundles_post_ra>
